<compile_context>
chip_gen: v6e
topology: v6e:2x2x1
jax: 0.10.0
libtpu: 0.0.40
codegen_flags: <defaults>
</compile_context>

<pallas_src>
import jax
import jax.numpy as jnp
from jax import lax
from jax.experimental import pallas as pl
from jax.experimental.pallas import tpu as pltpu

B = 8                      # args.batch_size (hard-coded in the PyTorch view)
CIN, COUT = 1, 28
HIN = WIN = 28
K = 3
HC = HIN - K + 1           # 26  conv output spatial
HP = WP = HC // 2          # 13  pooled spatial
S = HP * WP                # 169
NTAP = K * K               # 9 conv taps
HIDDEN = 128
NCLASS = 10
FEAT = COUT * S            # 4732
Z = 4 * B                  # 32: z = pool_offset*8 + batch
GC = 2                     # channel-block grid steps (pipelines the w1 stream)
CB = COUT // GC            # 14 channels per step


# ---------------------------------------------------------------- kernel ----

def fused_kernel(p_ref, wc_ref, bc_ref, w1_ref, b1_ref, w2_ref, b2_ref,
                 o_ref, acc_ref):
    ci = pl.program_id(0)

    @pl.when(ci == 0)
    def _init():
        acc_ref[...] = jnp.zeros_like(acc_ref)

    # ---- Conv2d(1, 28, 3) for this channel block (VPU, 9 unrolled taps) ----
    # p_ref : (9, 32, 169) f32  im2col taps, z = d*8 + b, s = pi*13 + pj
    # wc_ref: (CB, 1, 9)  f32  conv weight rows for this channel block
    pz = p_ref[...]
    wv = wc_ref[...]
    conv = wv[:, :, 0:1] * pz[0][None, :, :]                 # (CB, 32, 169)
    for t in range(1, NTAP):
        conv = conv + wv[:, :, t:t + 1] * pz[t][None, :, :]
    conv = jnp.maximum(conv + bc_ref[...], 0.0)              # bias + ReLU

    # ---- AvgPool2d(2): mean over the 4 pool offsets (aligned sublane slices)
    pooled = 0.25 * (conv[:, 0 * B:1 * B, :] + conv[:, 1 * B:2 * B, :] +
                     conv[:, 2 * B:3 * B, :] + conv[:, 3 * B:4 * B, :])
    # pooled: (CB, 8, 169) == (c, b, s)

    # ---- hidden Linear partial: batched-over-c MXU matmul, f32 accumulation
    hp = lax.dot_general(pooled.astype(jnp.bfloat16), w1_ref[...],
                         dimension_numbers=(((2,), (1,)), ((0,), (0,))),
                         preferred_element_type=jnp.float32)  # (CB, 8, 128)
    acc_ref[...] += jnp.sum(hp, axis=0)

    # ---- epilogue on the last channel block: bias + ReLU + output Linear ---
    @pl.when(ci == GC - 1)
    def _epilogue():
        h = jnp.maximum(acc_ref[...] + b1_ref[...], 0.0)
        logits = jnp.dot(h.astype(jnp.bfloat16), w2_ref[...],
                         preferred_element_type=jnp.float32) + b2_ref[...]
        o_ref[...] = logits


# --------------------------------------------------------------- wrapper ----

def fused_forward_call(p, wc3, bc3, w1p, b1r, w2t, b2r):
    return pl.pallas_call(
        fused_kernel,
        out_shape=jax.ShapeDtypeStruct((B, NCLASS), jnp.float32),
        grid=(GC,),
        in_specs=[
            pl.BlockSpec((NTAP, Z, S), lambda i: (0, 0, 0)),      # p (resident)
            pl.BlockSpec((CB, 1, NTAP), lambda i: (i, 0, 0)),     # conv weight
            pl.BlockSpec((CB, 1, 1), lambda i: (i, 0, 0)),        # conv bias
            pl.BlockSpec((CB, S, HIDDEN), lambda i: (i, 0, 0)),   # w1 block bf16
            pl.BlockSpec((1, HIDDEN), lambda i: (0, 0)),          # b1
            pl.BlockSpec((HIDDEN, NCLASS), lambda i: (0, 0)),     # w2 bf16
            pl.BlockSpec((1, NCLASS), lambda i: (0, 0)),          # b2
        ],
        out_specs=pl.BlockSpec((B, NCLASS), lambda i: (0, 0)),
        scratch_shapes=[pltpu.VMEM((B, HIDDEN), jnp.float32)],
        compiler_params=pltpu.CompilerParams(
            dimension_semantics=("arbitrary",)),
    )(p, wc3, bc3, w1p, b1r, w2t, b2r)


# ---------------------------------------------------------------- params ----

def init_params(key):
    ks = jax.random.split(key, 6)
    lim_c = 1.0 / (CIN * K * K) ** 0.5
    lim_1 = 1.0 / float(FEAT) ** 0.5
    lim_2 = 1.0 / float(HIDDEN) ** 0.5
    wc = jax.random.uniform(ks[0], (COUT, CIN, K, K), jnp.float32, -lim_c, lim_c)
    bc = jax.random.uniform(ks[1], (COUT,), jnp.float32, -lim_c, lim_c)
    w1 = jax.random.uniform(ks[2], (HIDDEN, FEAT), jnp.float32, -lim_1, lim_1)
    b1 = jax.random.uniform(ks[3], (HIDDEN,), jnp.float32, -lim_1, lim_1)
    w2 = jax.random.uniform(ks[4], (NCLASS, HIDDEN), jnp.float32, -lim_2, lim_2)
    b2 = jax.random.uniform(ks[5], (NCLASS,), jnp.float32, -lim_2, lim_2)
    return wc, bc, w1, b1, w2, b2


def prep_params(params):
    """One-time weight preprocessing (hoisted out of forward())."""
    wc, bc, w1, b1, w2, b2 = params
    wc3 = wc.reshape(COUT, 1, K * K).astype(jnp.float32)          # (28, 1, 9)
    bc3 = bc.reshape(COUT, 1, 1).astype(jnp.float32)              # (28, 1, 1)
    # PyTorch flatten order is (c, pi, pj): rows of w1.T are f = c*169 + s.
    w1p = w1.T.reshape(COUT, S, HIDDEN).astype(jnp.bfloat16)      # (28, 169, 128)
    b1r = b1.reshape(1, HIDDEN).astype(jnp.float32)
    w2t = w2.T.astype(jnp.bfloat16)                               # (128, 10)
    b2r = b2.reshape(1, NCLASS).astype(jnp.float32)
    # TODO(synk): on v5e/v6e an int8 w1 (per-channel scale folded post-dot)
    # would halve the dominant HBM stream; on v7x use fp8 or skip (HBM fast).
    return wc3, bc3, w1p, b1r, w2t, b2r


# --------------------------------------------------------------- forward ----

@jax.jit
def forward(x, prepped):
    wc3, bc3, w1p, b1r, w2t, b2r = prepped
    xs = x[:, 0]                                             # (8, 28, 28)
    # im2col with taps leading and the 2x2 pool offsets folded into z = d*8+b,
    # so the kernel's AvgPool is 3 adds of aligned sublane slices.
    taps = [xs[:, kh:kh + HC, kw:kw + HC].reshape(B, HP, 2, WP, 2)
            for kh in range(K) for kw in range(K)]           # (b, pi, di, pj, dj)
    t6 = jnp.stack(taps, axis=0)                             # (9, b, pi, di, pj, dj)
    p = jnp.transpose(t6, (0, 3, 5, 1, 2, 4))                # (t, di, dj, b, pi, pj)
    p = p.reshape(NTAP, Z, S)                                # (9, 32, 169)
    # TODO(synk): im2col could move in-kernel (pass raw x) to trim XLA glue;
    # the stride-2 pool de-interleave is the only awkward in-kernel piece.
    return fused_forward_call(p, wc3, bc3, w1p, b1r, w2t, b2r)


def reference(x, params):
    wc, bc, w1, b1, w2, b2 = params
    y = jax.lax.conv_general_dilated(
        x, wc, (1, 1), 'VALID', dimension_numbers=('NCHW', 'OIHW', 'NCHW'))
    y = jnp.maximum(y + bc[None, :, None, None], 0.0)
    y = y.reshape(B, COUT, HP, 2, WP, 2).mean(axis=(3, 5))
    y = y.reshape(B, -1)
    h = jnp.maximum(y @ w1.T + b1, 0.0)
    return h @ w2.T + b2


# ------------------------------------------------------------------ main ----

if __name__ == "__main__":
    key = jax.random.PRNGKey(0)
    kx, kp = jax.random.split(key)
    x = jax.random.normal(kx, (B, CIN, HIN, WIN), jnp.float32)
    params = init_params(kp)
    prepped = prep_params(params)

    out = forward(x, prepped)
    out = jax.block_until_ready(out)

    ref = reference(x, params)
    assert out.shape == (B, NCLASS), out.shape
    # bf16 hidden weights / activations (f32 accumulation) -> ~1e-3 level error.
    assert jnp.allclose(out, ref, rtol=2e-2, atol=2e-2), (
        float(jnp.max(jnp.abs(out - ref))))
    print("KERNEL_OK")
</pallas_src>

<mosaic_0001>
module attributes {stable_mosaic.version = 11 : i64} {
  func.func @fused_kernel(%arg0: i32, %arg1: memref<9x32x169xf32, #tpu.memory_space<vmem>>, %arg2: memref<14x1x9xf32, #tpu.memory_space<vmem>>, %arg3: memref<14x1x1xf32, #tpu.memory_space<vmem>>, %arg4: memref<14x169x128xbf16, #tpu.memory_space<vmem>>, %arg5: memref<1x128xf32, #tpu.memory_space<vmem>>, %arg6: memref<128x10xbf16, #tpu.memory_space<vmem>>, %arg7: memref<1x10xf32, #tpu.memory_space<vmem>>, %arg8: memref<8x10xf32, #tpu.memory_space<vmem>>, %arg9: memref<8x128xf32, #tpu.memory_space<vmem>>) attributes {dimension_semantics = [#tpu.dimension_semantics<arbitrary>], iteration_bounds = array<i64: 2>, scalar_prefetch = 0 : i64, scratch_operands = 1 : i64, tpu.core_type = #tpu.core_type<tc>, window_params = [{pipeline_mode = #tpu.pipeline_mode<synchronous>, transform_indices = @transform_0, window_bounds = array<i64: 9, 32, 169>}, {transform_indices = @transform_1, window_bounds = array<i64: 14, 1, 9>}, {transform_indices = @transform_2, window_bounds = array<i64: 14, 1, 1>}, {transform_indices = @transform_3, window_bounds = array<i64: 14, 169, 128>}, {pipeline_mode = #tpu.pipeline_mode<synchronous>, transform_indices = @transform_4, window_bounds = array<i64: 1, 128>}, {pipeline_mode = #tpu.pipeline_mode<synchronous>, transform_indices = @transform_5, window_bounds = array<i64: 128, 10>}, {pipeline_mode = #tpu.pipeline_mode<synchronous>, transform_indices = @transform_6, window_bounds = array<i64: 1, 10>}, {pipeline_mode = #tpu.pipeline_mode<synchronous>, transform_indices = @transform_7, window_bounds = array<i64: 8, 10>}]} {
    %c0_i32 = arith.constant 0 : i32
    %0 = arith.cmpi eq, %arg0, %c0_i32 : i32
    %1 = arith.extui %0 : i1 to i32
    %c0_i32_0 = arith.constant 0 : i32
    %2 = arith.cmpi ne, %1, %c0_i32_0 : i32
    scf.if %2 {
      %cst_20 = arith.constant 0.000000e+00 : f32
      %100 = vector.broadcast %cst_20 : f32 to vector<8x128xf32>
      %c0_21 = arith.constant 0 : index
      %c0_22 = arith.constant 0 : index
      %101 = vector.load %arg9[%c0_21, %c0_22] : memref<8x128xf32, #tpu.memory_space<vmem>>, vector<8x128xf32>
      tpu.vector_store %arg9[%c0_21, %c0_22], %100 {strides = array<i32>} : memref<8x128xf32, #tpu.memory_space<vmem>>, vector<8x128xf32>,
    } else {
    }
    %c0 = arith.constant 0 : index
    %c0_1 = arith.constant 0 : index
    %c0_2 = arith.constant 0 : index
    %3 = vector.load %arg1[%c0, %c0_1, %c0_2] : memref<9x32x169xf32, #tpu.memory_space<vmem>>, vector<9x32x169xf32>
    %c0_3 = arith.constant 0 : index
    %c0_4 = arith.constant 0 : index
    %c0_5 = arith.constant 0 : index
    %4 = vector.load %arg2[%c0_3, %c0_4, %c0_5] : memref<14x1x9xf32, #tpu.memory_space<vmem>>, vector<14x1x9xf32>
    %5 = vector.extract_strided_slice %4 {offsets = [0, 0, 0], sizes = [14, 1, 1], strides = [1, 1, 1]} : vector<14x1x9xf32> to vector<14x1x1xf32>
    %6 = vector.extract_strided_slice %3 {offsets = [0, 0, 0], sizes = [1, 32, 169], strides = [1, 1, 1]} : vector<9x32x169xf32> to vector<1x32x169xf32>
    %7 = vector.shape_cast %6 : vector<1x32x169xf32> to vector<32x169xf32>
    %8 = vector.shape_cast %7 : vector<32x169xf32> to vector<1x32x169xf32>
    %9 = vector.broadcast %5 : vector<14x1x1xf32> to vector<14x32x169xf32>
    %10 = vector.broadcast %8 : vector<1x32x169xf32> to vector<14x32x169xf32>
    %11 = arith.mulf %9, %10 : vector<14x32x169xf32>
    %12 = vector.extract_strided_slice %4 {offsets = [0, 0, 1], sizes = [14, 1, 1], strides = [1, 1, 1]} : vector<14x1x9xf32> to vector<14x1x1xf32>
    %13 = vector.extract_strided_slice %3 {offsets = [1, 0, 0], sizes = [1, 32, 169], strides = [1, 1, 1]} : vector<9x32x169xf32> to vector<1x32x169xf32>
    %14 = vector.shape_cast %13 : vector<1x32x169xf32> to vector<32x169xf32>
    %15 = vector.shape_cast %14 : vector<32x169xf32> to vector<1x32x169xf32>
    %16 = vector.broadcast %12 : vector<14x1x1xf32> to vector<14x32x169xf32>
    %17 = vector.broadcast %15 : vector<1x32x169xf32> to vector<14x32x169xf32>
    %18 = arith.mulf %16, %17 : vector<14x32x169xf32>
    %19 = arith.addf %11, %18 : vector<14x32x169xf32>
    %20 = vector.extract_strided_slice %4 {offsets = [0, 0, 2], sizes = [14, 1, 1], strides = [1, 1, 1]} : vector<14x1x9xf32> to vector<14x1x1xf32>
    %21 = vector.extract_strided_slice %3 {offsets = [2, 0, 0], sizes = [1, 32, 169], strides = [1, 1, 1]} : vector<9x32x169xf32> to vector<1x32x169xf32>
    %22 = vector.shape_cast %21 : vector<1x32x169xf32> to vector<32x169xf32>
    %23 = vector.shape_cast %22 : vector<32x169xf32> to vector<1x32x169xf32>
    %24 = vector.broadcast %20 : vector<14x1x1xf32> to vector<14x32x169xf32>
    %25 = vector.broadcast %23 : vector<1x32x169xf32> to vector<14x32x169xf32>
    %26 = arith.mulf %24, %25 : vector<14x32x169xf32>
    %27 = arith.addf %19, %26 : vector<14x32x169xf32>
    %28 = vector.extract_strided_slice %4 {offsets = [0, 0, 3], sizes = [14, 1, 1], strides = [1, 1, 1]} : vector<14x1x9xf32> to vector<14x1x1xf32>
    %29 = vector.extract_strided_slice %3 {offsets = [3, 0, 0], sizes = [1, 32, 169], strides = [1, 1, 1]} : vector<9x32x169xf32> to vector<1x32x169xf32>
    %30 = vector.shape_cast %29 : vector<1x32x169xf32> to vector<32x169xf32>
    %31 = vector.shape_cast %30 : vector<32x169xf32> to vector<1x32x169xf32>
    %32 = vector.broadcast %28 : vector<14x1x1xf32> to vector<14x32x169xf32>
    %33 = vector.broadcast %31 : vector<1x32x169xf32> to vector<14x32x169xf32>
    %34 = arith.mulf %32, %33 : vector<14x32x169xf32>
    %35 = arith.addf %27, %34 : vector<14x32x169xf32>
    %36 = vector.extract_strided_slice %4 {offsets = [0, 0, 4], sizes = [14, 1, 1], strides = [1, 1, 1]} : vector<14x1x9xf32> to vector<14x1x1xf32>
    %37 = vector.extract_strided_slice %3 {offsets = [4, 0, 0], sizes = [1, 32, 169], strides = [1, 1, 1]} : vector<9x32x169xf32> to vector<1x32x169xf32>
    %38 = vector.shape_cast %37 : vector<1x32x169xf32> to vector<32x169xf32>
    %39 = vector.shape_cast %38 : vector<32x169xf32> to vector<1x32x169xf32>
    %40 = vector.broadcast %36 : vector<14x1x1xf32> to vector<14x32x169xf32>
    %41 = vector.broadcast %39 : vector<1x32x169xf32> to vector<14x32x169xf32>
    %42 = arith.mulf %40, %41 : vector<14x32x169xf32>
    %43 = arith.addf %35, %42 : vector<14x32x169xf32>
    %44 = vector.extract_strided_slice %4 {offsets = [0, 0, 5], sizes = [14, 1, 1], strides = [1, 1, 1]} : vector<14x1x9xf32> to vector<14x1x1xf32>
    %45 = vector.extract_strided_slice %3 {offsets = [5, 0, 0], sizes = [1, 32, 169], strides = [1, 1, 1]} : vector<9x32x169xf32> to vector<1x32x169xf32>
    %46 = vector.shape_cast %45 : vector<1x32x169xf32> to vector<32x169xf32>
    %47 = vector.shape_cast %46 : vector<32x169xf32> to vector<1x32x169xf32>
    %48 = vector.broadcast %44 : vector<14x1x1xf32> to vector<14x32x169xf32>
    %49 = vector.broadcast %47 : vector<1x32x169xf32> to vector<14x32x169xf32>
    %50 = arith.mulf %48, %49 : vector<14x32x169xf32>
    %51 = arith.addf %43, %50 : vector<14x32x169xf32>
    %52 = vector.extract_strided_slice %4 {offsets = [0, 0, 6], sizes = [14, 1, 1], strides = [1, 1, 1]} : vector<14x1x9xf32> to vector<14x1x1xf32>
    %53 = vector.extract_strided_slice %3 {offsets = [6, 0, 0], sizes = [1, 32, 169], strides = [1, 1, 1]} : vector<9x32x169xf32> to vector<1x32x169xf32>
    %54 = vector.shape_cast %53 : vector<1x32x169xf32> to vector<32x169xf32>
    %55 = vector.shape_cast %54 : vector<32x169xf32> to vector<1x32x169xf32>
    %56 = vector.broadcast %52 : vector<14x1x1xf32> to vector<14x32x169xf32>
    %57 = vector.broadcast %55 : vector<1x32x169xf32> to vector<14x32x169xf32>
    %58 = arith.mulf %56, %57 : vector<14x32x169xf32>
    %59 = arith.addf %51, %58 : vector<14x32x169xf32>
    %60 = vector.extract_strided_slice %4 {offsets = [0, 0, 7], sizes = [14, 1, 1], strides = [1, 1, 1]} : vector<14x1x9xf32> to vector<14x1x1xf32>
    %61 = vector.extract_strided_slice %3 {offsets = [7, 0, 0], sizes = [1, 32, 169], strides = [1, 1, 1]} : vector<9x32x169xf32> to vector<1x32x169xf32>
    %62 = vector.shape_cast %61 : vector<1x32x169xf32> to vector<32x169xf32>
    %63 = vector.shape_cast %62 : vector<32x169xf32> to vector<1x32x169xf32>
    %64 = vector.broadcast %60 : vector<14x1x1xf32> to vector<14x32x169xf32>
    %65 = vector.broadcast %63 : vector<1x32x169xf32> to vector<14x32x169xf32>
    %66 = arith.mulf %64, %65 : vector<14x32x169xf32>
    %67 = arith.addf %59, %66 : vector<14x32x169xf32>
    %68 = vector.extract_strided_slice %4 {offsets = [0, 0, 8], sizes = [14, 1, 1], strides = [1, 1, 1]} : vector<14x1x9xf32> to vector<14x1x1xf32>
    %69 = vector.extract_strided_slice %3 {offsets = [8, 0, 0], sizes = [1, 32, 169], strides = [1, 1, 1]} : vector<9x32x169xf32> to vector<1x32x169xf32>
    %70 = vector.shape_cast %69 : vector<1x32x169xf32> to vector<32x169xf32>
    %71 = vector.shape_cast %70 : vector<32x169xf32> to vector<1x32x169xf32>
    %72 = vector.broadcast %68 : vector<14x1x1xf32> to vector<14x32x169xf32>
    %73 = vector.broadcast %71 : vector<1x32x169xf32> to vector<14x32x169xf32>
    %74 = arith.mulf %72, %73 : vector<14x32x169xf32>
    %75 = arith.addf %67, %74 : vector<14x32x169xf32>
    %c0_6 = arith.constant 0 : index
    %c0_7 = arith.constant 0 : index
    %c0_8 = arith.constant 0 : index
    %76 = vector.load %arg3[%c0_6, %c0_7, %c0_8] : memref<14x1x1xf32, #tpu.memory_space<vmem>>, vector<14x1x1xf32>
    %77 = vector.broadcast %76 : vector<14x1x1xf32> to vector<14x32x169xf32>
    %78 = arith.addf %75, %77 : vector<14x32x169xf32>
    %cst = arith.constant 0.000000e+00 : f32
    %79 = vector.broadcast %cst : f32 to vector<14x32x169xf32>
    %80 = arith.maximumf %78, %79 : vector<14x32x169xf32>
    %81 = vector.extract_strided_slice %80 {offsets = [0, 0, 0], sizes = [14, 8, 169], strides = [1, 1, 1]} : vector<14x32x169xf32> to vector<14x8x169xf32>
    %82 = vector.extract_strided_slice %80 {offsets = [0, 8, 0], sizes = [14, 8, 169], strides = [1, 1, 1]} : vector<14x32x169xf32> to vector<14x8x169xf32>
    %83 = arith.addf %81, %82 : vector<14x8x169xf32>
    %84 = vector.extract_strided_slice %80 {offsets = [0, 16, 0], sizes = [14, 8, 169], strides = [1, 1, 1]} : vector<14x32x169xf32> to vector<14x8x169xf32>
    %85 = arith.addf %83, %84 : vector<14x8x169xf32>
    %86 = vector.extract_strided_slice %80 {offsets = [0, 24, 0], sizes = [14, 8, 169], strides = [1, 1, 1]} : vector<14x32x169xf32> to vector<14x8x169xf32>
    %87 = arith.addf %85, %86 : vector<14x8x169xf32>
    %cst_9 = arith.constant 2.500000e-01 : f32
    %88 = vector.broadcast %cst_9 : f32 to vector<14x8x169xf32>
    %89 = arith.mulf %88, %87 : vector<14x8x169xf32>
    %90 = arith.truncf %89 : vector<14x8x169xf32> to vector<14x8x169xbf16>
    %c0_10 = arith.constant 0 : index
    %c0_11 = arith.constant 0 : index
    %c0_12 = arith.constant 0 : index
    %91 = vector.load %arg4[%c0_10, %c0_11, %c0_12] : memref<14x169x128xbf16, #tpu.memory_space<vmem>>, vector<14x169x128xbf16>
    %cst_13 = arith.constant dense<0.000000e+00> : vector<14x8x128xf32>
    %92 = tpu.matmul %90, %91, %cst_13 {dimension_numbers = #tpu.dot_dimension_numbers<[2], [1], [1], [2], [0, 0, 0, 1, 1, 2], [0], [0]>} : vector<14x8x169xbf16>, vector<14x169x128xbf16>, vector<14x8x128xf32> -> vector<14x8x128xf32>
    %c0_14 = arith.constant 0 : index
    %c0_15 = arith.constant 0 : index
    %93 = vector.load %arg9[%c0_14, %c0_15] : memref<8x128xf32, #tpu.memory_space<vmem>>, vector<8x128xf32>
    %cst_16 = arith.constant dense<0.000000e+00> : vector<8x128xf32>
    %94 = vector.multi_reduction <add>, %92, %cst_16 [0] : vector<14x8x128xf32> to vector<8x128xf32>
    %95 = arith.addf %93, %94 : vector<8x128xf32>
    %c0_17 = arith.constant 0 : index
    %c0_18 = arith.constant 0 : index
    %96 = vector.load %arg9[%c0_17, %c0_18] : memref<8x128xf32, #tpu.memory_space<vmem>>, vector<8x128xf32>
    tpu.vector_store %arg9[%c0_17, %c0_18], %95 {strides = array<i32>} : memref<8x128xf32, #tpu.memory_space<vmem>>, vector<8x128xf32>,
    %c1_i32 = arith.constant 1 : i32
    %97 = arith.cmpi eq, %arg0, %c1_i32 : i32
    %98 = arith.extui %97 : i1 to i32
    %c0_i32_19 = arith.constant 0 : i32
    %99 = arith.cmpi ne, %98, %c0_i32_19 : i32
    scf.if %99 {
      %c0_20 = arith.constant 0 : index
      %c0_21 = arith.constant 0 : index
      %100 = vector.load %arg9[%c0_20, %c0_21] : memref<8x128xf32, #tpu.memory_space<vmem>>, vector<8x128xf32>
      %c0_22 = arith.constant 0 : index
      %c0_23 = arith.constant 0 : index
      %101 = vector.load %arg5[%c0_22, %c0_23] : memref<1x128xf32, #tpu.memory_space<vmem>>, vector<1x128xf32>
      %102 = vector.broadcast %101 : vector<1x128xf32> to vector<8x128xf32>
      %103 = arith.addf %100, %102 : vector<8x128xf32>
      %cst_24 = arith.constant 0.000000e+00 : f32
      %104 = vector.broadcast %cst_24 : f32 to vector<8x128xf32>
      %105 = arith.maximumf %103, %104 : vector<8x128xf32>
      %106 = arith.truncf %105 : vector<8x128xf32> to vector<8x128xbf16>
      %c0_25 = arith.constant 0 : index
      %c0_26 = arith.constant 0 : index
      %107 = vector.load %arg6[%c0_25, %c0_26] : memref<128x10xbf16, #tpu.memory_space<vmem>>, vector<128x10xbf16>
      %cst_27 = arith.constant dense<0.000000e+00> : vector<8x10xf32>
      %108 = tpu.matmul %106, %107, %cst_27 {dimension_numbers = #tpu.dot_dimension_numbers<[1], [0], [0], [1], [0, 0, 1, 1], [], []>} : vector<8x128xbf16>, vector<128x10xbf16>, vector<8x10xf32> -> vector<8x10xf32>
      %c0_28 = arith.constant 0 : index
      %c0_29 = arith.constant 0 : index
      %109 = vector.load %arg7[%c0_28, %c0_29] : memref<1x10xf32, #tpu.memory_space<vmem>>, vector<1x10xf32>
      %110 = vector.broadcast %109 : vector<1x10xf32> to vector<8x10xf32>
      %111 = arith.addf %108, %110 : vector<8x10xf32>
      %c0_30 = arith.constant 0 : index
      %c0_31 = arith.constant 0 : index
      %112 = vector.load %arg8[%c0_30, %c0_31] : memref<8x10xf32, #tpu.memory_space<vmem>>, vector<8x10xf32>
      tpu.vector_store %arg8[%c0_30, %c0_31], %111 {strides = array<i32>} : memref<8x10xf32, #tpu.memory_space<vmem>>, vector<8x10xf32>,
    } else {
    }
    return
  }
  func.func @transform_0(%arg0: i32) -> (i32, i32, i32) {
    %c0_i32 = arith.constant 0 : i32
    %c0_i32_0 = arith.constant 0 : i32
    %c0_i32_1 = arith.constant 0 : i32
    %c0_i32_2 = arith.constant 0 : i32
    return %c0_i32, %c0_i32_0, %c0_i32_1 : i32, i32, i32
  }
  func.func @transform_1(%arg0: i32) -> (i32, i32, i32) {
    %c0_i32 = arith.constant 0 : i32
    %c0_i32_0 = arith.constant 0 : i32
    %c0_i32_1 = arith.constant 0 : i32
    return %arg0, %c0_i32, %c0_i32_0 : i32, i32, i32
  }
  func.func @transform_2(%arg0: i32) -> (i32, i32, i32) {
    %c0_i32 = arith.constant 0 : i32
    %c0_i32_0 = arith.constant 0 : i32
    %c0_i32_1 = arith.constant 0 : i32
    return %arg0, %c0_i32, %c0_i32_0 : i32, i32, i32
  }
  func.func @transform_3(%arg0: i32) -> (i32, i32, i32) {
    %c0_i32 = arith.constant 0 : i32
    %c0_i32_0 = arith.constant 0 : i32
    %c0_i32_1 = arith.constant 0 : i32
    return %arg0, %c0_i32, %c0_i32_0 : i32, i32, i32
  }
  func.func @transform_4(%arg0: i32) -> (i32, i32) {
    %c0_i32 = arith.constant 0 : i32
    %c0_i32_0 = arith.constant 0 : i32
    %c0_i32_1 = arith.constant 0 : i32
    return %c0_i32, %c0_i32_0 : i32, i32
  }
  func.func @transform_5(%arg0: i32) -> (i32, i32) {
    %c0_i32 = arith.constant 0 : i32
    %c0_i32_0 = arith.constant 0 : i32
    %c0_i32_1 = arith.constant 0 : i32
    return %c0_i32, %c0_i32_0 : i32, i32
  }
  func.func @transform_6(%arg0: i32) -> (i32, i32) {
    %c0_i32 = arith.constant 0 : i32
    %c0_i32_0 = arith.constant 0 : i32
    %c0_i32_1 = arith.constant 0 : i32
    return %c0_i32, %c0_i32_0 : i32, i32
  }
  func.func @transform_7(%arg0: i32) -> (i32, i32) {
    %c0_i32 = arith.constant 0 : i32
    %c0_i32_0 = arith.constant 0 : i32
    %c0_i32_1 = arith.constant 0 : i32
    return %c0_i32, %c0_i32_0 : i32, i32
  }
}

</mosaic_0001>

<bundles_post_ra>
// kernel: forward.1
= control target key start
LH: loop header
LB: loop body
LE: loop exit
PB: predicated region body
PF: predicated region fallthrough
CT: control target
= control target key end

     0   :  { %12 = vsyncpa [#allocation4], 0  ;;  %s6348_s24 = smov 0   ;;  %s12266_s0 = inlined_call_operand.vmem [shape: f32[9,32,169], index: 0, kind: input, shape index: {}]   ;;  %s12267_s1 = inlined_call_operand.vmem [shape: f32[28,1,9], index: 1, kind: input, shape index: {}]   ;;  %s12268_s2 = inlined_call_operand.vmem [shape: f32[28,1,1], index: 2, kind: input, shape index: {}]   ;;  %s12269_s3 = inlined_call_operand.vmem [shape: bf16[28,169,128], index: 3, kind: input, shape index: {}]   ;;  %s12270_s4 = inlined_call_operand.vmem [shape: f32[1,128], index: 4, kind: input, shape index: {}]   ;;  %s12271_s5 = inlined_call_operand.vmem [shape: bf16[128,10], index: 5, kind: input, shape index: {}]   ;;  %s12272_s6 = inlined_call_operand.vmem [shape: f32[1,10], index: 6, kind: input, shape index: {}]   ;;  %s12273_s7 = inlined_call_operand.hbm [shape: f32[8,10], index: 7, kind: output, shape index: {}]  }
   0x1 LB: > { %s6354_s25 = sadd.s32 4294967295, %s6292_s24   ;;  %p5460_p0 = scmp.ge.s32.totalorder %s6292_s24, 1  ;;  %s6292_s24 = sphi %s6348_s24, %s18_s24  }
   0x2   : > { %p255_p1 = scmp.lt.s32.totalorder %s6292_s24, 3 }
   0x4   : > { %p256_p2 = pnand %p5460_p0, %p255_p1 }
   0x6   : > { %259 = sbr.rel (%p256_p2) target bundleno = 1261 (0x4ed), region = 48 }
   0xb   : > { %s291_s26 = smul.u32 14, %s6354_s25  ;;  %p5462_p4 = scmp.ne.s32.totalorder %s6354_s25, 0 }
   0xd   : > { %p292_p3 = scmp.lt.s32.totalorder %s291_s26, 27 }
   0xf   : > { %s13963_s26 = smov (!%p292_p3, %s291_s26), 27  ;;  %312 = sbr.rel (%p5462_p4) target bundleno = 22 (0x16), region = 52 }
  0x10   : > { %s6362_s29 = scalar_lea.vmem %s12267_s1, %s13963_s26  ;;  %s6367_s9 = scalar_lea.vmem %s12268_s2, %s13963_s26 }
  0x11   : > { %s5703_s10 = smul.u32 88, %s13963_s26 }
  0x13   : > { %s6372_s13 = scalar_lea.vmem %s12269_s3, %s5703_s10 }
  0x14   : > { %v6294_v0 = vmov 0.0  }
  0x15   : > { %313 = vst [vmem:[#allocation2] sm:$0xff] %v6294_v0 }
  0x16 PF: > { %v6376_v1 = vld [vmem:[%s6362_s29 + $0x1] ss:$0 sm:$0xff]  ;;  %v6379_v2 = vld [vmem:[%s6362_s29] ss:$0 sm:$0xff]  ;;  %v12288_v3 = vmov 1   ;;  %v12276_v4 = vmov 0  }
  0x17   : > { %5732 = vset.pattern.permute.xlu0 %v12288_v3  ;;  %5733 = vset.pattern.permute.xlu1 %v12276_v4  ;;  %v12290_v5 = vmov 2   ;;  %v12284_v6 = vmov 5   ;;  %v12286_v7 = vmov 3   ;;  %v12274_v8 = vmov 7   ;;  %v5834_v10 = vld [vmem:[%s6372_s13 + $0x38] sm:$0xff]   ;;  %v5835_v13 = vld [vmem:[%s6372_s13 + $0x30] sm:$0xff]  }
  0x18   : > { %475 = vperm.xlu1 %5733, %v6376_v1   ;;  %639 = vperm.xlu0 %5732, %v6379_v2   ;;  %v12278_v9 = vmov 8   ;;  %v12282_v11 = vmov 4   ;;  %v6408_v12 = vld [vmem:[%s6362_s29 + $0x2] ss:$0 sm:$0xff]  ;;  %v5836_v14 = vld [vmem:[%s6372_s13 + $0x90] sm:$0xff]   ;;  %v5837_v15 = vld [vmem:[%s6372_s13 + $0x28] sm:$0xff]  }
  0x19   : > { %3766 = vmatprep.subr.bf16.mxu0 %v12276_v4  ;;  %3877 = vmatprep.subr.bf16.mxu1 %v12276_v4  ;;  %v5838_v16 = vld [vmem:[%s6372_s13 + $0x88] sm:$0xff]   ;;  %v5839_v17 = vld [vmem:[%s6372_s13 + $0x20] sm:$0xff]   ;;  %v12280_v19 = vmov 6   ;;  %v5841_v20 = vld [vmem:[%s6372_s13 + $0x18] sm:$0xff]   ;;  %vm3759_vm0 = vcmask 1043456   ;;  %vm3760_vm1 = vcmask 1044480  }
  0x1a   : > { %3767 = vmatpush1.bf16.msra.mxu0 %v5834_v10  ;;  %3878 = vmatpush1.bf16.msra.mxu1 %v5836_v14  ;;  %v5840_v18 = vld [vmem:[%s6372_s13 + $0x80] sm:$0xff]   ;;  %v5842_v21 = vld [vmem:[%s6372_s13 + $0x78] sm:$0xff]   ;;  %v5843_v23 = vld [vmem:[%s6372_s13 + $0x10] sm:$0xff]   ;;  %v6304_v31 = vmov 65535   ;;  %vm3755_vm2 = vcmask 334848   ;;  %p5659_p5 = scmp.ne.s32.totalorder %s6354_s25, 1 }
  0x1b   : > { %3768 = vmatprep.subr.bf16.mxu0 %v12276_v4  ;;  %3879 = vmatprep.subr.bf16.mxu1 %v12276_v4  ;;  %v6436_v22 = vld [vmem:[%s6362_s29 + $0x3] ss:$0 sm:$0xff]  ;;  %v5844_v24 = vld [vmem:[%s6372_s13 + $0x70] sm:$0xff]   ;;  %v5845_v25 = vld [vmem:[%s6372_s13 + $0x8] sm:$0xff]   ;;  %v3761_v32 = vsel %vm3759_vm0, 4294967295, %v6304_v31 }
  0x1c   : > { %5734 = vset.pattern.permute.xlu1 %v12288_v3  ;;  %5736 = vset.pattern.permute.xlu0 %v12290_v5  ;;  %v5846_v26 = vld [vmem:[%s6372_s13 + $0x68] sm:$0xff]   ;;  %v5477_v27 = vld [vmem:[%s6367_s9] ss:$0 sm:$0xff]  ;;  %v5849_v30 = vld [vmem:[%s6372_s13 + $0x50] sm:$0x1f]   ;;  %v6462_v34 = vsel %vm3760_vm1, %v3761_v32, 0 }
  0x1d   : > { %643 = vperm.xlu1 %5734, %v6376_v1   ;;  %923 = vperm.xlu0 %5736, %v6376_v1   ;;  %v5847_v28 = vld [vmem:[%s6372_s13] sm:$0xff]   ;;  %12739 = vst [vmem:[#allocation6_spill] sm:$0xff] %v6462_v34  ;;  %v5850_v35 = vld [vmem:[%s6372_s13 + $0x58] sm:$0xff]   ;;  %v3764_v36 = vand.u32 %v5849_v30, %v6462_v34  ;;  %v5852_v37 = vld [vmem:[%s6372_s13 + $0xa8] sm:$0x1f]  }
  0x1e   : > { %3769 = vmatpush1.bf16.msra.mxu0 %v5835_v13  ;;  %3880 = vmatpush1.bf16.msra.mxu1 %v5838_v16  ;;  %v5848_v29 = vld [vmem:[%s6372_s13 + $0x60] sm:$0xff]   ;;  %v5851_v39 = vld [vmem:[%s6372_s13 + $0x48] sm:$0xff]   ;;  %v3875_v40 = vand.u32 %v5852_v37, %v6462_v34  ;;  %v5855_v46 = vld [vmem:[%s6372_s13 + $0x98] sm:$0xff]  }
  0x1f   : > { %3770 = vmatprep.subr.bf16.mxu0 %v12276_v4  ;;  %3881 = vmatprep.subr.bf16.mxu1 %v12276_v4  ;;  %v5478_v33 = vld [vmem:[%s6367_s9 + $0x1] ss:$0 sm:$0xff]  ;;  %v6472_v38 = vld [vmem:[%s6362_s29 + $0x4] ss:$0 sm:$0xff]  ;;  %v5479_v43 = vld [vmem:[%s6367_s9 + $0x2] ss:$0 sm:$0xff] }
  0x20   : > { %v5853_v41 = vld [vmem:[%s6372_s13 + $0x40] sm:$0xff]   ;;  %v6540_v52 = vld [vmem:[%s12266_s0 + $0x8] sm:$0xff]  ;;  %v6545_v53 = vld [vmem:[%s12266_s0 + $0x10] sm:$0xff] }
  0x21   : > { %5735 = vset.pattern.permute.xlu1 %v12290_v5  ;;  %5740 = vset.pattern.permute.xlu0 %v12284_v6  ;;  %v5854_v42 = vld [vmem:[%s6372_s13 + $0xa0] sm:$0xff]   ;;  %12741 = vst [vmem:[#allocation8_spill] sm:$0xff] %v6540_v52  ;;  %12742 = vst [vmem:[#allocation9_spill] sm:$0xff] %v6545_v53  ;;  %v6550_v54 = vld [vmem:[%s12266_s0 + $0x18] sm:$0xff] }
  0x22   : > { %919 = vperm.xlu1 %5735, %v6379_v2   ;;  %1763 = vperm.xlu0 %5740, %v6376_v1   ;;  %v5482_v44 = vld [vmem:[%s6367_s9 + $0x5] ss:$0 sm:$0xff]  ;;  %v5470_v47 = vld [vmem:[%s6362_s29 + $0x7] ss:$0 sm:$0xff]  ;;  %v5469_v48 = vld [vmem:[%s6362_s29 + $0x6] ss:$0 sm:$0xff] }
  0x23   : > { %3771 = vmatpush1.bf16.msra.mxu0 %v5837_v15  ;;  %3882 = vmatpush1.bf16.msra.mxu1 %v5840_v18  ;;  %v6503_v45 = vld [vmem:[%s6362_s29 + $0x5] ss:$0 sm:$0xff]  ;;  %v5480_v49 = vld [vmem:[%s6367_s9 + $0x3] ss:$0 sm:$0xff]  ;;  %v5484_v50 = vld [vmem:[%s6367_s9 + $0x7] ss:$0 sm:$0xff] }
  0x24   : > { %3772 = vmatprep.subr.bf16.mxu0 %v12276_v4  ;;  %3883 = vmatprep.subr.bf16.mxu1 %v12276_v4  ;;  %v6535_v51 = vld [vmem:[%s12266_s0] sm:$0xff]  ;;  %12743 = vst [vmem:[#allocation10_spill] sm:$0xff] %v6550_v54  ;;  %v6560_v56 = vld [vmem:[%s12266_s0 + $0x28] sm:$0xff]  ;;  %v6565_v57 = vld [vmem:[%s12266_s0 + $0x30] sm:$0xff] }
  0x25   : > { %12740 = vst [vmem:[#allocation7_spill] sm:$0xff] %v6535_v51  ;;  %v6555_v55 = vld [vmem:[%s12266_s0 + $0x20] sm:$0xff]  ;;  %12745 = vst [vmem:[#allocation12_spill] sm:$0xff] %v6560_v56  ;;  %v6576_v61 = vld [vmem:[%s12266_s0 + $0x48] sm:$0xff] }
  0x26   : > { %5737 = vset.pattern.permute.xlu1 %v12286_v7  ;;  %5742 = vset.pattern.permute.xlu0 %v12274_v8  ;;  %12744 = vst [vmem:[#allocation11_spill] sm:$0xff] %v6555_v55  ;;  %12746 = vst [vmem:[#allocation13_spill] sm:$0xff] %v6565_v57  ;;  %v6571_v60 = vld [vmem:[%s12266_s0 + $0x40] sm:$0xff]  ;;  %v6582_v63 = vld [vmem:[%s12266_s0 + $0x50] sm:$0xff] }
  0x27   : > { %1199 = vperm.xlu1 %5737, %v6379_v2   ;;  %2319 = vperm.xlu0 %5742, %v6379_v2   ;;  %12747 = vst [vmem:[#allocation14_spill] sm:$0xff] %v6571_v60  ;;  %12748 = vst [vmem:[#allocation15_spill] sm:$0xff] %v6576_v61  ;;  %v6587_v0 = vld [vmem:[%s12266_s0 + $0x58] sm:$0xff]  ;;  %v6601_v14 = vld [vmem:[%s12266_s0 + $0x68] sm:$0xff] }
  0x28   : > { %3773 = vmatpush1.bf16.msra.mxu0 %v5839_v17  ;;  %3884 = vmatpush1.bf16.msra.mxu1 %v5842_v21  ;;  %12749 = vst [vmem:[#allocation16_spill] sm:$0xff] %v6582_v63  ;;  %12750 = vst [vmem:[#allocation17_spill] sm:$0xff] %v6587_v0  ;;  %v6606_v15 = vld [vmem:[%s12266_s0 + $0x70] sm:$0xff]  ;;  %v6611_v16 = vld [vmem:[%s12266_s0 + $0x78] sm:$0xff] }
  0x29   : > { %3774 = vmatprep.subr.bf16.mxu0 %v12276_v4  ;;  %3885 = vmatprep.subr.bf16.mxu1 %v12276_v4  ;;  %12752 = vst [vmem:[#allocation19_spill] sm:$0xff] %v6601_v14  ;;  %12753 = vst [vmem:[#allocation20_spill] sm:$0xff] %v6606_v15  ;;  %v6616_v17 = vld [vmem:[%s12266_s0 + $0x38] sm:$0xff]  ;;  %v6680_v37 = vld [vmem:[%s12266_s0 + $0xa8] sm:$0xff] }
  0x2a   : > { %12754 = vst [vmem:[#allocation21_spill] sm:$0xff] %v6611_v16  ;;  %12755 = vst [vmem:[#allocation22_spill] sm:$0xff] %v6616_v17 }
  0x2b   : > { %1203 = vperm.xlu1 %5737, %v6376_v1   ;;  %5745 = vset.pattern.permute.xlu0 %v12278_v9  ;;  %12761 = vst [vmem:[#allocation28_spill] sm:$0xff] %v6680_v37 }
  0x2c   : > { %2603 = vperm.xlu0 %5745, %v6376_v1   ;;  %3775 = vmatpush1.bf16.msra.mxu0 %v5841_v20 }
  0x2d   : > { %3776 = vmatprep.subr.bf16.mxu0 %v12276_v4  ;;  %3886 = vmatpush1.bf16.msra.mxu1 %v5844_v24 }
  0x2e   : > { %3887 = vmatprep.subr.bf16.mxu1 %v12276_v4 }
  0x2f   : > { %5738 = vset.pattern.permute.xlu1 %v12282_v11 }
  0x30   : > { %1483 = vperm.xlu1 %5738, %v6376_v1   ;;  %5746 = vset.pattern.permute.xlu0 %v12276_v4 }
  0x31   : > { %471 = vperm.xlu0 %5746, %v6379_v2   ;;  %3777 = vmatpush1.bf16.msra.mxu0 %v5843_v23  ;;  %v6633_v23 = vld [vmem:[%s12266_s0 + $0x80] sm:$0xff] }
  0x32   : > { %3778 = vmatprep.subr.bf16.mxu0 %v12276_v4  ;;  %3888 = vmatpush1.bf16.msra.mxu1 %v5846_v26  ;;  %12756 = vst [vmem:[#allocation23_spill] sm:$0xff] %v6633_v23 }
  0x33   : > { %3889 = vmatprep.subr.bf16.mxu1 %v12276_v4 }
  0x34   : > { %5739 = vset.pattern.permute.xlu1 %v12284_v6 }
  0x35   : > { %1759 = vperm.xlu1 %5739, %v6379_v2   ;;  %479 = vperm.xlu0 %5746, %v6408_v12  }
  0x36   : > { %3779 = vmatpush1.bf16.msra.mxu0 %v5845_v25  ;;  %3890 = vmatpush1.bf16.msra.mxu1 %v5848_v29  ;;  %v6659_v29 = vld [vmem:[%s12266_s0 + $0x98] sm:$0xff] }
  0x37   : > { %3780 = vmatprep.subr.bf16.mxu0 %v12276_v4  ;;  %3891 = vmatprep.subr.bf16.mxu1 %v12276_v4  ;;  %12759 = vst [vmem:[#allocation26_spill] sm:$0xff] %v6659_v29 }
  0x39   : > { %5741 = vset.pattern.permute.xlu1 %v12280_v19  ;;  %5751 = vset.pattern.permute.xlu0 %v12286_v7 }
  0x3a   : > { %2039 = vperm.xlu1 %5741, %v6379_v2   ;;  %1207 = vperm.xlu0 %5751, %v6408_v12  }
  0x3b   : > { %3781 = vmatpush1.bf16.msra.mxu0 %v5847_v28  ;;  %3892 = vmatpush1.bf16.msra.mxu1 %v5850_v35  ;;  %v6654_v28 = vld [vmem:[%s12266_s0 + $0x90] sm:$0xff] }
  0x3c   : > { %3792 = vmatprep.subr.bf16.mxu0 %v12276_v4  ;;  %3903 = vmatprep.subr.bf16.mxu1 %v12276_v4  ;;  %12758 = vst [vmem:[#allocation25_spill] sm:$0xff] %v6654_v28 }
  0x3e   : > { %2043 = vperm.xlu1 %5741, %v6376_v1   ;;  %5752 = vset.pattern.permute.xlu0 %v12282_v11 }
  0x3f   : > { %1479 = vperm.xlu0 %5752, %v6379_v2   ;;  %3793 = vmatpush2.bf16.msra.mxu0 %v3764_v36  ;;  %v6675_v36 = vld [vmem:[%s12266_s0 + $0xa0] sm:$0xff] }
  0x40   : > { %3794 = vmatprep.subr.bf16.mxu0 %v12276_v4  ;;  %3904 = vmatpush2.bf16.msra.mxu1 %v3875_v40  ;;  %12760 = vst [vmem:[#allocation27_spill] sm:$0xff] %v6675_v36 }
  0x41   : > { %3905 = vmatprep.subr.bf16.mxu1 %v12276_v4 }
  0x42   : > { %5743 = vset.pattern.permute.xlu1 %v12274_v8 }
  0x43   : > { %2323 = vperm.xlu1 %5743, %v6376_v1   ;;  %1491 = vperm.xlu0 %5752, %v6436_v22   ;;  %v6592_v1 = vld [vmem:[%s12266_s0 + $0x60] sm:$0xff] }
  0x44   : > { %3795 = vmatpush2.bf16.msra.mxu0 %v5851_v39  ;;  %3906 = vmatpush2.bf16.msra.mxu1 %v5854_v42  ;;  %12751 = vst [vmem:[#allocation18_spill] sm:$0xff] %v6592_v1 }
  0x45   : > { %3796 = vmatprep.subr.bf16.mxu0 %v12276_v4  ;;  %3907 = vmatprep.subr.bf16.mxu1 %v12276_v4 }
  0x47   : > { %5744 = vset.pattern.permute.xlu1 %v12278_v9  ;;  %5756 = vset.pattern.permute.xlu0 %v12280_v19 }
  0x48   : > { %2599 = vperm.xlu1 %5744, %v6379_v2   ;;  %2047 = vperm.xlu0 %5756, %v6408_v12  }
  0x49   : > { %3797 = vmatpush2.bf16.msra.mxu0 %v5853_v41  ;;  %3908 = vmatpush2.bf16.msra.mxu1 %v5855_v46  ;;  %v6701_v46 = vld [vmem:[%s12266_s0 + $0xb8] sm:$0xff] }
  0x4a   : > { %3988 = vmatprep.subr.bf16.mxu0 %v12276_v4  ;;  %4099 = vmatprep.subr.bf16.mxu1 %v12276_v4  ;;  %12763 = vst [vmem:[#allocation30_spill] sm:$0xff] %v6701_v46 }
  0x4c   : > { %5747 = vset.pattern.permute.xlu1 %v12276_v4  ;;  %5759 = vset.pattern.permute.xlu0 %v12274_v8 }
  0x4d   : > { %2963 = vperm.xlu1 %5747, %v5477_v27   ;;  %2331 = vperm.xlu0 %5759, %v6436_v22   ;;  %v6649_v27 = vld [vmem:[%s12266_s0 + $0x88] sm:$0xff] }
  0x4e   : > { %12757 = vst [vmem:[#allocation24_spill] sm:$0xff] %v6649_v27 }
  0x51   : > { %2967 = vperm.xlu1 %5747, %v5478_v33   ;;  %5760 = vset.pattern.permute.xlu0 %v12288_v3 }
  0x52   : > { %651 = vperm.xlu0 %5760, %v6436_v22  }
  0x55   : > { %5748 = vset.pattern.permute.xlu1 %v12288_v3 }
  0x56   : > { %647 = vperm.xlu1 %5748, %v6408_v12   ;;  %655 = vperm.xlu0 %5760, %v6472_v38  }
  0x5a   : > { %5749 = vset.pattern.permute.xlu1 %v12276_v4  ;;  %5764 = vset.pattern.permute.xlu0 %v12290_v5 }
  0x5b   : > { %483 = vperm.xlu1 %5749, %v6436_v22   ;;  %935 = vperm.xlu0 %5764, %v6472_v38  }
  0x5f   : > { %5750 = vset.pattern.permute.xlu1 %v12290_v5  ;;  %5771 = vset.pattern.permute.xlu0 %v12278_v9 }
  0x60   : > { %927 = vperm.xlu1 %5750, %v6408_v12   ;;  %2615 = vperm.xlu0 %5771, %v6472_v38  }
  0x64   : > { %931 = vperm.xlu1 %5750, %v6436_v22   ;;  %5772 = vset.pattern.permute.xlu0 %v12276_v4 }
  0x65   : > { %2971 = vperm.xlu0 %5772, %v5479_v43  }
  0x68   : > { %5753 = vset.pattern.permute.xlu1 %v12286_v7 }
  0x69   : > { %1211 = vperm.xlu1 %5753, %v6436_v22   ;;  %2983 = vperm.xlu0 %5772, %v5482_v44   ;;  %v6696_v44 = vld [vmem:[%s12266_s0 + $0xb0] sm:$0xff] }
  0x6a   : > { %12762 = vst [vmem:[#allocation29_spill] sm:$0xff] %v6696_v44 }
  0x6d   : > { %5754 = vset.pattern.permute.xlu1 %v12282_v11  ;;  %5775 = vset.pattern.permute.xlu0 %v12286_v7  ;;  %v6724_v11 = vld [vmem:[%s12266_s0 + $0x150] sm:$0xff] }
  0x6e   : > { %1487 = vperm.xlu1 %5754, %v6408_v12   ;;  %1219 = vperm.xlu0 %5775, %v6503_v45   ;;  %12765 = vst [vmem:[#allocation32_spill] sm:$0xff] %v6724_v11 }
  0x72   : > { %5755 = vset.pattern.permute.xlu1 %v12284_v6  ;;  %1227 = vperm.xlu0 %5775, %v5470_v47  }
  0x73   : > { %1767 = vperm.xlu1 %5755, %v6408_v12  }
  0x76   : > { %5779 = vset.pattern.permute.xlu0 %v12284_v6 }
  0x77   : > { %1771 = vperm.xlu1 %5755, %v6436_v22   ;;  %1775 = vperm.xlu0 %5779, %v6472_v38  }
  0x7b   : > { %5757 = vset.pattern.permute.xlu1 %v12280_v19  ;;  %1783 = vperm.xlu0 %5779, %v5469_v48  }
  0x7c   : > { %2051 = vperm.xlu1 %5757, %v6436_v22  }
  0x7f   : > { %5781 = vset.pattern.permute.xlu0 %v12280_v19  ;;  %v6719_v19 = vld [vmem:[%s12266_s0 + $0x140] sm:$0xff] }
  0x80   : > { %5758 = vset.pattern.permute.xlu1 %v12274_v8  ;;  %2059 = vperm.xlu0 %5781, %v6503_v45   ;;  %12764 = vst [vmem:[#allocation31_spill] sm:$0xff] %v6719_v19 }
  0x81   : > { %2327 = vperm.xlu1 %5758, %v6408_v12  }
  0x84   : > { %2067 = vperm.xlu0 %5781, %v5470_v47  }
  0x85   : > { %5761 = vset.pattern.permute.xlu1 %v12278_v9 }
  0x86   : > { %2607 = vperm.xlu1 %5761, %v6408_v12  }
  0x88   : > { %5785 = vset.pattern.permute.xlu0 %v12278_v9 }
  0x89   : > { %2623 = vperm.xlu0 %5785, %v5469_v48  }
  0x8a   : > { %2611 = vperm.xlu1 %5761, %v6436_v22  }
  0x8d   : > { %5786 = vset.pattern.permute.xlu0 %v12276_v4 }
  0x8e   : > { %5762 = vset.pattern.permute.xlu1 %v12276_v4  ;;  %499 = vperm.xlu0 %5786, %v5470_v47  }
  0x8f   : > { %2975 = vperm.xlu1 %5762, %v5480_v49  }
  0x92   : > { %2991 = vperm.xlu0 %5786, %v5484_v50  }
  0x93   : > { %v476_v58 = vpop.permute.xlu1 %475  ;;  %487 = vperm.xlu1 %5762, %v6472_v38   ;;  %v640_v59 = vpop.permute.xlu0 %639 }
  0x94   : > { %v534_v62 = vmul.f32 %v476_v58, %v6535_v51  ;;  %v535_v2 = vmul.f32 %v476_v58, %v6540_v52  ;;  %v536_v10 = vmul.f32 %v476_v58, %v6545_v53  ;;  %v537_v12 = vmul.f32 %v476_v58, %v6550_v54 }
  0x95   : > { %v538_v13 = vmul.f32 %v476_v58, %v6555_v55  ;;  %v6619_v18 = vmul.f32 %v476_v58, %v6560_v56  ;;  %v6622_v20 = vmul.f32 %v476_v58, %v6565_v57  ;;  %v6625_v21 = vmul.f32 %v640_v59, %v6571_v60 }
  0x96   : > { %v6628_v22 = vmul.f32 %v640_v59, %v6576_v61  ;;  %5789 = vset.pattern.permute.xlu0 %v12290_v5  ;;  %v6637_v24 = vmul.f32 %v640_v59, %v6582_v63  ;;  %v6640_v25 = vmul.f32 %v640_v59, %v6587_v0  ;;  %v6643_v26 = vmul.f32 %v640_v59, %v6592_v1 }
  0x97   : > { %491 = vperm.xlu1 %5762, %v6503_v45   ;;  %943 = vperm.xlu0 %5789, %v5469_v48   ;;  %v6662_v30 = vmul.f32 %v640_v59, %v6601_v14  ;;  %v6665_v31 = vmul.f32 %v640_v59, %v6606_v15  ;;  %v6668_v32 = vmul.f32 %v640_v59, %v6611_v16 }
  0x98   : > { %v6670_v33 = vpop.permute.xlu1 %643  ;;  %v924_v35 = vpop.permute.xlu0 %923  ;;  %v6683_v39 = vmul.f32 %v476_v58, %v6616_v17  ;;  %v6713_v58 = vld [vmem:[%s6362_s29 + $0x8] ss:$0 sm:$0xff] }
  0x99   : > { %v702_v40 = vmul.f32 %v6670_v33, %v6571_v60  ;;  %v703_v41 = vmul.f32 %v6670_v33, %v6576_v61  ;;  %v704_v42 = vmul.f32 %v6670_v33, %v6582_v63  ;;  %v705_v43 = vmul.f32 %v6670_v33, %v6587_v0  ;;  %v6860_v61 = vld [vmem:[%s12266_s0 + $0x1e8] sm:$0xff] }
  0x9a   : > { %v706_v47 = vmul.f32 %v6670_v33, %v6592_v1  ;;  %v707_v48 = vmul.f32 %v6670_v33, %v6601_v14  ;;  %v6709_v49 = vmul.f32 %v6670_v33, %v6606_v15  ;;  %v982_v50 = vmul.f32 %v924_v35, %v6633_v23  ;;  %v6769_v15 = vld [vmem:[%s12266_s0 + $0xc0] sm:$0xff]  ;;  %v6774_v14 = vld [vmem:[%s12266_s0 + $0xd0] sm:$0xff]  ;;  %12782 = vst [vmem:[#allocation48_spill] sm:$0xff] %v6860_v61 }
  0x9b   : > { %v814_v59 = vadd.f32 %v702_v40, %v534_v62  ;;  %v815_v8 = vadd.f32 %v703_v41, %v535_v2  ;;  %v816_v4 = vadd.f32 %v704_v42, %v536_v10  ;;  %v817_v9 = vadd.f32 %v705_v43, %v537_v12  ;;  %5763 = vset.pattern.permute.xlu1 %v12288_v3  ;;  %v6745_v43 = vld [vmem:[%s12266_s0 + $0x148] sm:$0xff] }
  0x9c   : > { %v818_v6 = vadd.f32 %v706_v47, %v538_v13  ;;  %v983_v7 = vmul.f32 %v924_v35, %v6649_v27  ;;  %v984_v62 = vmul.f32 %v924_v35, %v6654_v28  ;;  %v985_v2 = vmul.f32 %v924_v35, %v6659_v29  ;;  %659 = vperm.xlu1 %5763, %v6503_v45   ;;  %v6750_v47 = vld [vmem:[%s12266_s0 + $0x158] sm:$0xff]  ;;  %v6755_v3 = vld [vmem:[%s12266_s0 + $0x168] sm:$0xff] }
  0x9d   : > { %v986_v10 = vmul.f32 %v924_v35, %v6675_v36  ;;  %v6732_v12 = vmul.f32 %v924_v35, %v6680_v37  ;;  %v6735_v40 = vmul.f32 %v924_v35, %v6696_v44  ;;  %v6738_v41 = vmul.f32 %v924_v35, %v6701_v46  ;;  %v920_v13 = vpop.permute.xlu1 %919  ;;  %v6740_v42 = vpop.permute.xlu0 %1763  ;;  %12768 = vst [vmem:[#allocation35_spill] sm:$0xff] %v6750_v47 }
  0x9e   : > { %12767 = vst [vmem:[#allocation34_spill] sm:$0xff] %v6740_v42  ;;  %12769 = vst [vmem:[#allocation36_spill] sm:$0xff] %v6755_v3  ;;  %951 = vperm.xlu0 %5789, %v6713_v58   ;;  %v6758_v35 = vadd.f32 %v982_v50, %v814_v59  ;;  %v6760_v5 = vadd.f32 %v983_v7, %v815_v8  ;;  %v6762_v34 = vadd.f32 %v984_v62, %v816_v4  ;;  %v6779_v50 = vld [vmem:[%s12266_s0 + $0xc8] sm:$0xff]  ;;  %v6784_v4 = vld [vmem:[%s12266_s0 + $0xd8] sm:$0xff] }
  0x9f   : > { %12766 = vst [vmem:[#allocation33_spill] sm:$0xff] %v6735_v40  ;;  %v6764_v40 = vadd.f32 %v985_v2, %v817_v9  ;;  %v6787_v7 = vld [vmem:[%s6362_s29 + $0x9] ss:$0 sm:$0xff]  ;;  %v6789_v8 = vadd.f32 %v986_v10, %v818_v6  ;;  %v6792_v9 = vmul.f32 %v920_v13, %v6633_v23  ;;  %v6795_v59 = vmul.f32 %v920_v13, %v6649_v27  ;;  %v6828_v27 = vld [vmem:[%s12266_s0 + $0xe0] sm:$0xff] }
  0xa0   : > { %12770 = vst [vmem:[#allocation37_spill] sm:$0xff] %v6758_v35  ;;  %12771 = vst [vmem:[#allocation38_spill] sm:$0xff] %v6762_v34  ;;  %v6798_v62 = vmul.f32 %v920_v13, %v6654_v28  ;;  %v6803_v2 = vld [vmem:[%s12266_s0 + $0xe8] sm:$0xff]  ;;  %v6808_v34 = vld [vmem:[%s12266_s0 + $0xf8] sm:$0xff]  ;;  %v6811_v6 = vmul.f32 %v920_v13, %v6659_v29  ;;  %v6814_v10 = vmul.f32 %v920_v13, %v6675_v36 }
  0xa1   : > { %12772 = vst [vmem:[#allocation39_spill] sm:$0xff] %v6789_v8  ;;  %12773 = vst [vmem:[#allocation40_spill] sm:$0xff] %v6808_v34  ;;  %v12775_v8 = vmov 2   ;;  %v6819_v35 = vmul.f32 %v6740_v42, %v6719_v19  ;;  %v6823_v28 = vmul.f32 %v6740_v42, %v6724_v11  ;;  %v6833_v36 = vld [vmem:[%s12266_s0 + $0xf0] sm:$0xff]  ;;  %v6847_v29 = vmul.f32 %v920_v13, %v6680_v37  ;;  %v6865_v37 = vld [vmem:[%s12266_s0 + $0x1f8] sm:$0xff] }
  0xa2   : > { %12774 = vst [vmem:[#allocation41_spill] sm:$0xff] %v6814_v10  ;;  %5765 = vset.pattern.permute.xlu1 %v12775_v8  ;;  %12778 = vst [vmem:[#allocation44_spill] sm:$0xff] %v6833_v36  ;;  %v6850_v8 = vmul.f32 %v920_v13, %v6701_v46  ;;  %v6853_v23 = vmul.f32 %v920_v13, %v6696_v44  ;;  %v709_v1 = vmul.f32 %v6670_v33, %v6611_v16  ;;  %v1200_v0 = vpop.permute.xlu1 %1199  ;;  %v2320_v63 = vpop.permute.xlu0 %2319  ;;  %v12787_v16 = vmov 3   ;;  %v6912_v19 = vld [vmem:[%s12266_s0 + $0x178] sm:$0xff] }
  0xa3   : > { %12776 = vst [vmem:[#allocation42_spill] sm:$0xff] %v6819_v35  ;;  %12777 = vst [vmem:[#allocation43_spill] sm:$0xff] %v6823_v28  ;;  %939 = vperm.xlu1 %5765, %v6503_v45   ;;  %v6839_v35 = vld [vmem:[%s12266_s0 + $0x1c8] sm:$0xff]  ;;  %v6844_v28 = vld [vmem:[%s12266_s0 + $0x1d8] sm:$0xff]  ;;  %v819_v46 = vadd.f32 %v707_v48, %v6619_v18  ;;  %v6870_v13 = vmul.f32 %v6740_v42, %v6745_v43  ;;  %v6874_v33 = vmul.f32 %v6740_v42, %v6750_v47 }
  0xa4   : > { %12779 = vst [vmem:[#allocation45_spill] sm:$0xff] %v6839_v35  ;;  %12780 = vst [vmem:[#allocation46_spill] sm:$0xff] %v6844_v28  ;;  %v6878_v44 = vmul.f32 %v6740_v42, %v6755_v3  ;;  %5793 = vset.pattern.permute.xlu0 %v12787_v16  ;;  %v6882_v60 = vmul.f32 %v1200_v0, %v6769_v15  ;;  %v6885_v11 = vmul.f32 %v1200_v0, %v6774_v14  ;;  %v6890_v18 = vld [vmem:[%s12266_s0 + $0x1c0] sm:$0xff]  ;;  %v6895_v48 = vld [vmem:[%s12266_s0 + $0x1d0] sm:$0xff] }
  0xa5   : > { %12781 = vst [vmem:[#allocation47_spill] sm:$0xff] %v6853_v23  ;;  %12783 = vst [vmem:[#allocation49_spill] sm:$0xff] %v6865_v37  ;;  %1235 = vperm.xlu0 %5793, %v6787_v7   ;;  %v6925_v23 = vmul.f32 %v1200_v0, %v6803_v2  ;;  %v6928_v10 = vmul.f32 %v1200_v0, %v6808_v34  ;;  %v6931_v3 = vmul.f32 %v2320_v63, %v6839_v35  ;;  %v6951_v35 = vld [vmem:[%s12266_s0 + $0x1f0] sm:$0xff] }
  0xa6   : > { %12784 = vst [vmem:[#allocation50_spill] sm:$0xff] %v6870_v13  ;;  %12785 = vst [vmem:[#allocation51_spill] sm:$0xff] %v6874_v33  ;;  %v6901_v33 = vmul.f32 %v1200_v0, %v6784_v4  ;;  %v6906_v13 = vld [vmem:[%s12266_s0 + $0x1e0] sm:$0xff]  ;;  %v6943_v47 = vmul.f32 %v2320_v63, %v6860_v61  ;;  %v6968_v61 = vmul.f32 %v2320_v63, %v6890_v18 }
  0xa7   : > { %12786 = vst [vmem:[#allocation52_spill] sm:$0xff] %v6878_v44  ;;  %12788 = vst [vmem:[#allocation53_spill] sm:$0xff] %v6882_v60  ;;  %v6898_v44 = vmul.f32 %v1200_v0, %v6779_v50  ;;  %v6922_v60 = vld [vmem:[%s12266_s0 + $0x218] sm:$0xff]  ;;  %5766 = vset.pattern.permute.xlu1 %v12787_v16  ;;  %v6957_v16 = vmul.f32 %v1200_v0, %v6833_v36 }
  0xa8   : > { %12789 = vst [vmem:[#allocation54_spill] sm:$0xff] %v6885_v11  ;;  %12790 = vst [vmem:[#allocation55_spill] sm:$0xff] %v6890_v18  ;;  %v6917_v11 = vld [vmem:[%s12266_s0 + $0x208] sm:$0xff]  ;;  %1215 = vperm.xlu1 %5766, %v6472_v38  }
  0xa9   : > { %12791 = vst [vmem:[#allocation56_spill] sm:$0xff] %v6895_v48  ;;  %12792 = vst [vmem:[#allocation57_spill] sm:$0xff] %v6898_v44  ;;  %v6940_v44 = vld [vmem:[%s12266_s0 + $0x228] sm:$0xff] }
  0xaa   : > { %12793 = vst [vmem:[#allocation58_spill] sm:$0xff] %v6901_v33  ;;  %12794 = vst [vmem:[#allocation59_spill] sm:$0xff] %v6906_v13  ;;  %v6934_v33 = vmul.f32 %v2320_v63, %v6844_v28  ;;  %v6954_v28 = vmul.f32 %v1200_v0, %v6828_v27  ;;  %v6977_v0 = vmul.f32 %v2320_v63, %v6951_v35 }
  0xab   : > { %12795 = vst [vmem:[#allocation60_spill] sm:$0xff] %v6925_v23  ;;  %12796 = vst [vmem:[#allocation61_spill] sm:$0xff] %v6928_v10  ;;  %v6946_v23 = vmul.f32 %v2320_v63, %v6865_v37  ;;  %v6965_v37 = vld [vmem:[%s12266_s0 + $0x238] sm:$0xff]  ;;  %v12819_v10 = vmov 4  }
  0xac   : > { %12797 = vst [vmem:[#allocation62_spill] sm:$0xff] %v6931_v3  ;;  %12798 = vst [vmem:[#allocation63_spill] sm:$0xff] %v6934_v33  ;;  %v6960_v33 = vpop.permute.xlu1 %1203  ;;  %5767 = vset.pattern.permute.xlu1 %v12819_v10 }
  0xad   : > { %12799 = vst [vmem:[#allocation64_spill] sm:$0xff] %v6943_v47  ;;  %12800 = vst [vmem:[#allocation65_spill] sm:$0xff] %v6946_v23  ;;  %v6971_v23 = vmul.f32 %v2320_v63, %v6895_v48  ;;  %v6974_v47 = vmul.f32 %v2320_v63, %v6906_v13  ;;  %v6981_v3 = vmul.f32 %v6960_v33, %v6769_v15  ;;  %v6997_v63 = vld [vmem:[%s12266_s0 + $0x118] sm:$0xff]  ;;  %1495 = vperm.xlu1 %5767, %v6472_v38  }
  0xae   : > { %12801 = vst [vmem:[#allocation66_spill] sm:$0xff] %v6951_v35  ;;  %12802 = vst [vmem:[#allocation67_spill] sm:$0xff] %v6954_v28  ;;  %v6987_v28 = vpop.permute.xlu0 %2603  ;;  %v7002_v35 = vld [vmem:[%s12266_s0 + $0x128] sm:$0xff]  ;;  %v821_v13 = vadd.f32 %v709_v1, %v6683_v39  ;;  %v1269_v48 = vmul.f32 %v6960_v33, %v6808_v34  ;;  %v7019_v1 = vld [vmem:[%s12266_s0 + $0x138] sm:$0xff] }
  0xaf   : > { %12803 = vst [vmem:[#allocation68_spill] sm:$0xff] %v6957_v16  ;;  %12804 = vst [vmem:[#allocation69_spill] sm:$0xff] %v6960_v33  ;;  %v6985_v16 = vmul.f32 %v6960_v33, %v6774_v14  ;;  %v7032_v18 = vmul.f32 %v6987_v28, %v6922_v60 }
  0xb0   : > { %12805 = vst [vmem:[#allocation70_spill] sm:$0xff] %v6968_v61  ;;  %12806 = vst [vmem:[#allocation71_spill] sm:$0xff] %v6971_v23  ;;  %v6992_v23 = vld [vmem:[%s12266_s0 + $0x108] sm:$0xff]  ;;  %v1267_v61 = vmul.f32 %v6960_v33, %v6803_v2  ;;  %v1101_v39 = vadd.f32 %v6738_v41, %v821_v13  ;;  %v7045_v13 = vmul.f32 %v6987_v28, %v6940_v44 }
  0xb1   : > { %12807 = vst [vmem:[#allocation72_spill] sm:$0xff] %v6974_v47  ;;  %12808 = vst [vmem:[#allocation73_spill] sm:$0xff] %v6977_v0  ;;  %v1263_v0 = vmul.f32 %v6960_v33, %v6779_v50  ;;  %v1265_v47 = vmul.f32 %v6960_v33, %v6784_v4  ;;  %1499 = vperm.xlu1 %5767, %v6503_v45  }
  0xb2   : > { %12809 = vst [vmem:[#allocation74_spill] sm:$0xff] %v6981_v3  ;;  %12810 = vst [vmem:[#allocation75_spill] sm:$0xff] %v6985_v16  ;;  %v1099_v16 = vadd.f32 %v6732_v12, %v819_v46  ;;  %v12815_v3 = vmov 5   ;;  %v7024_v46 = vmul.f32 %v6740_v42, %v6912_v19  ;;  %v7028_v12 = vmul.f32 %v6987_v28, %v6917_v11  ;;  %v7048_v42 = vpop.permute.xlu1 %1483 }
  0xb3   : > { %12811 = vst [vmem:[#allocation76_spill] sm:$0xff] %v6987_v28  ;;  %12812 = vst [vmem:[#allocation77_spill] sm:$0xff] %v6992_v23  ;;  %5795 = vset.pattern.permute.xlu0 %v12815_v3  ;;  %v7036_v34 = vadd.f32 %v1263_v0, %v6760_v5  ;;  %v7039_v36 = vadd.f32 %v1265_v47, %v6764_v40  ;;  %v7058_v5 = vadd.f32 %v6709_v49, %v6622_v20  ;;  %v12833_v49 = vmov 6  }
  0xb4   : > { %12813 = vst [vmem:[#allocation78_spill] sm:$0xff] %v6997_v63  ;;  %12814 = vst [vmem:[#allocation79_spill] sm:$0xff] %v7002_v35  ;;  %1791 = vperm.xlu0 %5795, %v6713_v58   ;;  %v7041_v41 = vadd.f32 %v1267_v61, %v1099_v16  ;;  %v7062_v61 = vmul.f32 %v6960_v33, %v6828_v27  ;;  %v472_v16 = vpop.permute.xlu0 %471  ;;  %v7066_v38 = vmul.f32 %v7048_v42, %v6992_v23 }
  0xb5   : > { %12816 = vst [vmem:[#allocation80_spill] sm:$0xff] %v7024_v46  ;;  %12817 = vst [vmem:[#allocation81_spill] sm:$0xff] %v7028_v12  ;;  %v7050_v12 = vadd.f32 %v1269_v48, %v1101_v39  ;;  %v7070_v40 = vmul.f32 %v7048_v42, %v6997_v63  ;;  %v7074_v47 = vmul.f32 %v7048_v42, %v7002_v35  ;;  %5768 = vset.pattern.permute.xlu1 %v12815_v3 }
  0xb6   : > { %12818 = vst [vmem:[#allocation82_spill] sm:$0xff] %v7032_v18  ;;  %12820 = vst [vmem:[#allocation83_spill] sm:$0xff] %v7036_v34  ;;  %v7054_v18 = vmul.f32 %v6987_v28, %v6965_v37  ;;  %v7078_v20 = vmul.f32 %v7048_v42, %v7019_v1  ;;  %v526_v48 = vmul.f32 %v472_v16, %v6535_v51  ;;  %1779 = vperm.xlu1 %5768, %v6503_v45   ;;  %v12866_v34 = vld [vmem:[#allocation67_spill] sm:$0xff] }
  0xb7   : > { %12821 = vst [vmem:[#allocation84_spill] sm:$0xff] %v7039_v36  ;;  %12822 = vst [vmem:[#allocation85_spill] sm:$0xff] %v7041_v41  ;;  %v527_v0 = vmul.f32 %v472_v16, %v6540_v52  ;;  %v528_v39 = vmul.f32 %v472_v16, %v6545_v53  ;;  %v529_v28 = vmul.f32 %v472_v16, %v6550_v54  ;;  %v7098_v41 = vpop.permute.xlu1 %1759 }
  0xb8   : > { %12823 = vst [vmem:[#allocation86_spill] sm:$0xff] %v7045_v13  ;;  %12824 = vst [vmem:[#allocation87_spill] sm:$0xff] %v7048_v42  ;;  %5798 = vset.pattern.permute.xlu0 %v12833_v49  ;;  %v532_v13 = vmul.f32 %v472_v16, %v6565_v57  ;;  %v533_v42 = vmul.f32 %v472_v16, %v6616_v17  ;;  %v806_v33 = vadd.f32 %v6625_v21, %v526_v48 }
  0xb9   : > { %12825 = vst [vmem:[#allocation88_spill] sm:$0xff] %v7050_v12  ;;  %12826 = vst [vmem:[#allocation89_spill] sm:$0xff] %v7054_v18  ;;  %2075 = vperm.xlu0 %5798, %v6787_v7   ;;  %v530_v18 = vmul.f32 %v472_v16, %v6555_v55  ;;  %v808_v10 = vadd.f32 %v6637_v24, %v528_v39  ;;  %v809_v46 = vadd.f32 %v6640_v25, %v529_v28 }
  0xba   : > { %12827 = vst [vmem:[#allocation90_spill] sm:$0xff] %v7058_v5  ;;  %12828 = vst [vmem:[#allocation91_spill] sm:$0xff] %v7062_v61  ;;  %v531_v61 = vmul.f32 %v472_v16, %v6560_v56  ;;  %v807_v5 = vadd.f32 %v6628_v22, %v527_v0  ;;  %v813_v16 = vadd.f32 %v6668_v32, %v533_v42  ;;  %5769 = vset.pattern.permute.xlu1 %v12833_v49  ;;  %v12862_v49 = vld [vmem:[#allocation53_spill] sm:$0xff] }
  0xbb   : > { %12829 = vst [vmem:[#allocation92_spill] sm:$0xff] %v7066_v38  ;;  %12830 = vst [vmem:[#allocation93_spill] sm:$0xff] %v7070_v40  ;;  %v480_v40 = vpop.permute.xlu0 %479  ;;  %v1086_v21 = vadd.f32 %v6792_v9, %v806_v33  ;;  %v1088_v22 = vadd.f32 %v6798_v62, %v808_v10  ;;  %v1089_v10 = vadd.f32 %v6811_v6, %v809_v46  ;;  %v12843_v6 = vld [vmem:[#allocation58_spill] sm:$0xff] }
  0xbc   : > { %12831 = vst [vmem:[#allocation94_spill] sm:$0xff] %v7074_v47  ;;  %12832 = vst [vmem:[#allocation95_spill] sm:$0xff] %v7078_v20  ;;  %v810_v20 = vadd.f32 %v6643_v26, %v530_v18  ;;  %v811_v12 = vadd.f32 %v6662_v30, %v531_v61  ;;  %v812_v47 = vadd.f32 %v6665_v31, %v532_v13  ;;  %v12834_v26 = vmov 8   ;;  %v12841_v13 = vld [vmem:[#allocation35_spill] sm:$0xff] }
  0xbd   : > { %v7104_v24 = vmul.f32 %v480_v40, %v6535_v51  ;;  %v7107_v25 = vmul.f32 %v480_v40, %v6540_v52  ;;  %5800 = vset.pattern.permute.xlu0 %v12834_v26  ;;  %v7111_v28 = vmul.f32 %v480_v40, %v6545_v53  ;;  %v7114_v30 = vmul.f32 %v480_v40, %v6550_v54  ;;  %v12868_v54 = vld [vmem:[#allocation68_spill] sm:$0xff] }
  0xbe   : > { %v7117_v31 = vmul.f32 %v480_v40, %v6555_v55  ;;  %v7120_v32 = vmul.f32 %v480_v40, %v6560_v56  ;;  %2631 = vperm.xlu0 %5800, %v6713_v58   ;;  %v7124_v42 = vmul.f32 %v480_v40, %v6565_v57  ;;  %v7127_v9 = vmul.f32 %v480_v40, %v6616_v17  ;;  %v7143_v40 = vpop.permute.xlu1 %2039 }
  0xbf   : > { %12835 = vst [vmem:[#allocation96_spill] sm:$0xff] %v7111_v28  ;;  %12836 = vst [vmem:[#allocation97_spill] sm:$0xff] %v7114_v30  ;;  %v1087_v62 = vadd.f32 %v6795_v59, %v807_v5  ;;  %v1091_v33 = vadd.f32 %v6847_v29, %v811_v12  ;;  %v1093_v18 = vadd.f32 %v6850_v8, %v813_v16  ;;  %v1208_v48 = vpop.permute.xlu0 %1207  ;;  %v7148_v59 = vld [vmem:[%s12266_s0 + $0x188] sm:$0xff]  ;;  %v7153_v29 = vld [vmem:[%s12266_s0 + $0x198] sm:$0xff]  ;;  %v12867_v57 = vmov 7  }
  0xc0   : > { %12837 = vst [vmem:[#allocation98_spill] sm:$0xff] %v7117_v31  ;;  %12838 = vst [vmem:[#allocation99_spill] sm:$0xff] %v7120_v32  ;;  %v7137_v58 = vmul.f32 %v7098_v41, %v6745_v43  ;;  %v7141_v61 = vmul.f32 %v7098_v41, %v12841_v13  ;;  %v12842_v8 = vld [vmem:[#allocation57_spill] sm:$0xff]  ;;  %v1369_v46 = vadd.f32 %v12843_v6, %v1089_v10  ;;  %v12844_v12 = vld [vmem:[#allocation36_spill] sm:$0xff] }
  0xc1   : > { %12839 = vst [vmem:[#allocation100_spill] sm:$0xff] %v7124_v42  ;;  %12840 = vst [vmem:[#allocation101_spill] sm:$0xff] %v7127_v9  ;;  %v1367_v43 = vadd.f32 %v12842_v8, %v1087_v62  ;;  %v7159_v5 = vmul.f32 %v7098_v41, %v12844_v12  ;;  %v7163_v0 = vmul.f32 %v7098_v41, %v6912_v19  ;;  %v7180_v10 = vld [vmem:[%s12266_s0 + $0x1a8] sm:$0xff]  ;;  %v7185_v19 = vld [vmem:[%s12266_s0 + $0x1b8] sm:$0xff] }
  0xc2   : > { %v7166_v39 = vmul.f32 %v1208_v48, %v6769_v15  ;;  %v7169_v16 = vmul.f32 %v1208_v48, %v6779_v50  ;;  %v7172_v13 = vmul.f32 %v1208_v48, %v6774_v14  ;;  %v7175_v62 = vmul.f32 %v1208_v48, %v6784_v4  ;;  %12849 = vst [vmem:[#allocation102_spill] sm:$0xff] %v7185_v19  ;;  %v12853_v4 = vld [vmem:[#allocation44_spill] sm:$0xff] }
  0xc3   : > { %v12850_v15 = vmov 0   ;;  %v7189_v50 = vmul.f32 %v1208_v48, %v6828_v27  ;;  %v7192_v14 = vmul.f32 %v1208_v48, %v6803_v2  ;;  %v7195_v8 = vmul.f32 %v1208_v48, %v12853_v4  ;;  %v12855_v6 = vld [vmem:[#allocation40_spill] sm:$0xff]  ;;  %v12863_v4 = vld [vmem:[#allocation54_spill] sm:$0xff] }
  0xc4   : > { %12845 = vst [vmem:[#allocation35_spill] sm:$0xff] %v7166_v39  ;;  %12846 = vst [vmem:[#allocation57_spill] sm:$0xff] %v7169_v16  ;;  %5801 = vset.pattern.permute.xlu0 %v12850_v15  ;;  %v7198_v12 = vmul.f32 %v1208_v48, %v12855_v6  ;;  %v2095_v27 = vmul.f32 %v7143_v40, %v7148_v59  ;;  %v2097_v2 = vmul.f32 %v7143_v40, %v7153_v29  ;;  %v12860_v6 = vld [vmem:[#allocation41_spill] sm:$0xff] }
  0xc5   : > { %12847 = vst [vmem:[#allocation58_spill] sm:$0xff] %v7172_v13  ;;  %12848 = vst [vmem:[#allocation36_spill] sm:$0xff] %v7175_v62  ;;  %507 = vperm.xlu0 %5801, %v6787_v7   ;;  %v12857_v13 = vld [vmem:[#allocation60_spill] sm:$0xff]  ;;  %v12858_v62 = vld [vmem:[#allocation61_spill] sm:$0xff]  ;;  %v2099_v48 = vmul.f32 %v7143_v40, %v7180_v10  ;;  %v2101_v7 = vmul.f32 %v7143_v40, %v7185_v19  ;;  %v1366_v3 = vadd.f32 %v12862_v49, %v1086_v21 }
  0xc6   : > { %12851 = vst [vmem:[#allocation103_spill] sm:$0xff] %v7189_v50  ;;  %12852 = vst [vmem:[#allocation104_spill] sm:$0xff] %v7192_v14  ;;  %v1371_v39 = vadd.f32 %v12857_v13, %v1091_v33  ;;  %v1373_v16 = vadd.f32 %v12858_v62, %v1093_v18  ;;  %v5988_v50 = vld [vmem:[%s6362_s29 + $0x4] ss:$0 sm:$0xff]  ;;  %v1090_v33 = vadd.f32 %v12860_v6, %v810_v20  ;;  %v12861_v13 = vld [vmem:[#allocation47_spill] sm:$0xff]  ;;  %v1480_v62 = vpop.permute.xlu0 %1479 }
  0xc7   : > { %12854 = vst [vmem:[#allocation105_spill] sm:$0xff] %v7195_v8  ;;  %12856 = vst [vmem:[#allocation40_spill] sm:$0xff] %v7198_v12  ;;  %2055 = vperm.xlu1 %5769, %v5988_v50   ;;  %v7209_v8 = vpop.permute.xlu1 %2043  ;;  %v1092_v18 = vadd.f32 %v12861_v13, %v812_v47  ;;  %v7220_v12 = vld [vmem:[%s12266_s0 + $0x100] sm:$0xff]  ;;  %v7225_v14 = vld [vmem:[%s12266_s0 + $0x110] sm:$0xff]  ;;  %v1535_v38 = vmul.f32 %v1480_v62, %v6992_v23  ;;  %v1537_v21 = vmul.f32 %v1480_v62, %v6997_v63 }
  0xc8   : > { %12859 = vst [vmem:[#allocation60_spill] sm:$0xff] %v7209_v8  ;;  %v1368_v8 = vadd.f32 %v12863_v4, %v1088_v22  ;;  %v12864_v19 = vld [vmem:[#allocation31_spill] sm:$0xff]  ;;  %v12865_v47 = vld [vmem:[#allocation32_spill] sm:$0xff]  ;;  %v1534_v36 = vmul.f32 %v1480_v62, %v7220_v12  ;;  %v1536_v49 = vmul.f32 %v1480_v62, %v7225_v14  ;;  %v1539_v4 = vmul.f32 %v1480_v62, %v7002_v35 }
  0xc9   : > { %v7231_v20 = vmul.f32 %v7098_v41, %v12864_v19  ;;  %v7235_v6 = vmul.f32 %v7098_v41, %v12865_v47  ;;  %v7240_v13 = vld [vmem:[%s12266_s0 + $0x120] sm:$0xff]  ;;  %v7250_v19 = vld [vmem:[%s12266_s0 + $0x130] sm:$0xff]  ;;  %v1541_v47 = vmul.f32 %v1480_v62, %v7019_v1  ;;  %v1370_v17 = vadd.f32 %v12866_v34, %v1090_v33 }
  0xca   : > { %v1538_v22 = vmul.f32 %v1480_v62, %v7240_v13  ;;  %v1647_v56 = vadd.f32 %v1535_v38, %v1367_v43  ;;  %v1649_v55 = vadd.f32 %v1537_v21, %v1369_v46  ;;  %v1372_v53 = vadd.f32 %v12868_v54, %v1092_v18  ;;  %v1492_v9 = vpop.permute.xlu0 %1491  ;;  %v7291_v33 = vld [vmem:[%s12266_s0 + $0x160] sm:$0xff]  ;;  %v7296_v18 = vld [vmem:[%s12266_s0 + $0x170] sm:$0xff]  ;;  %v12885_v21 = vld [vmem:[#allocation63_spill] sm:$0xff] }
  0xcb   : > { %5770 = vset.pattern.permute.xlu1 %v12867_v57  ;;  %v1540_v52 = vmul.f32 %v1480_v62, %v7250_v19  ;;  %v7258_v51 = vpop.permute.xlu1 %2323  ;;  %v1651_v42 = vadd.f32 %v1539_v4, %v1371_v39  ;;  %v1653_v32 = vadd.f32 %v1541_v47, %v1373_v16  ;;  %v1646_v31 = vadd.f32 %v1534_v36, %v1366_v3  ;;  %v12884_v62 = vld [vmem:[#allocation62_spill] sm:$0xff]  ;;  %v12886_v4 = vld [vmem:[#allocation64_spill] sm:$0xff] }
  0xcc   : > { %2335 = vperm.xlu1 %5770, %v5988_v50   ;;  %v1648_v30 = vadd.f32 %v1536_v49, %v1368_v8  ;;  %v7261_v28 = vmul.f32 %v1492_v9, %v7220_v12  ;;  %v7264_v34 = vmul.f32 %v1492_v9, %v6992_v23  ;;  %v7267_v38 = vmul.f32 %v1492_v9, %v7225_v14 }
  0xcd   : > { %v7270_v54 = vmul.f32 %v1492_v9, %v6997_v63  ;;  %v7273_v43 = vmul.f32 %v1492_v9, %v7240_v13  ;;  %v7276_v46 = vmul.f32 %v1492_v9, %v7002_v35  ;;  %v7279_v3 = vmul.f32 %v1492_v9, %v7250_v19  ;;  %v12910_v35 = vld [vmem:[#allocation73_spill] sm:$0xff] }
  0xce   : > { %12869 = vst [vmem:[#allocation61_spill] sm:$0xff] %v7261_v28  ;;  %12870 = vst [vmem:[#allocation41_spill] sm:$0xff] %v7264_v34  ;;  %v7282_v36 = vmul.f32 %v1492_v9, %v7019_v1  ;;  %v1927_v39 = vadd.f32 %v7137_v58, %v1647_v56  ;;  %v1929_v16 = vadd.f32 %v7141_v61, %v1649_v55  ;;  %v7305_v9 = vpop.permute.xlu0 %2047  ;;  %v7310_v58 = vld [vmem:[%s12266_s0 + $0x180] sm:$0xff]  ;;  %v12901_v34 = vld [vmem:[#allocation17_spill] sm:$0xff] }
  0xcf   : > { %12871 = vst [vmem:[#allocation47_spill] sm:$0xff] %v7267_v38  ;;  %12872 = vst [vmem:[#allocation53_spill] sm:$0xff] %v7270_v54  ;;  %v1931_v50 = vadd.f32 %v7159_v5, %v1651_v42  ;;  %v1933_v8 = vadd.f32 %v7163_v0, %v1653_v32  ;;  %v1650_v1 = vadd.f32 %v1538_v22, %v1370_v17  ;;  %v7303_v42 = vpop.permute.xlu1 %2599 }
  0xd0   : > { %12873 = vst [vmem:[#allocation54_spill] sm:$0xff] %v7273_v43  ;;  %12874 = vst [vmem:[#allocation31_spill] sm:$0xff] %v7276_v46  ;;  %2339 = vperm.xlu1 %5770, %v6503_v45   ;;  %v1652_v56 = vadd.f32 %v1540_v52, %v1372_v53  ;;  %v1818_v55 = vmul.f32 %v7098_v41, %v7291_v33  ;;  %v1820_v32 = vmul.f32 %v7098_v41, %v7296_v18  ;;  %v7315_v45 = vld [vmem:[%s12266_s0 + $0x190] sm:$0xff]  ;;  %v7320_v41 = vld [vmem:[%s12266_s0 + $0x1a0] sm:$0xff] }
  0xd1   : > { %12875 = vst [vmem:[#allocation32_spill] sm:$0xff] %v7279_v3  ;;  %12876 = vst [vmem:[#allocation67_spill] sm:$0xff] %v7282_v36  ;;  %v2207_v52 = vadd.f32 %v2095_v27, %v1927_v39  ;;  %v2209_v53 = vadd.f32 %v2097_v2, %v1929_v16  ;;  %v2211_v17 = vadd.f32 %v2099_v48, %v1931_v50  ;;  %v12887_v39 = vld [vmem:[#allocation65_spill] sm:$0xff]  ;;  %v5989_v3 = vld [vmem:[%s6362_s29 + $0x5] ss:$0 sm:$0xff] }
  0xd2   : > { %12877 = vst [vmem:[#allocation68_spill] sm:$0xff] %v7305_v9  ;;  %v2213_v61 = vadd.f32 %v2101_v7, %v1933_v8  ;;  %v7324_v5 = vmul.f32 %v7305_v9, %v7310_v58  ;;  %v7328_v0 = vmul.f32 %v7305_v9, %v7148_v59  ;;  %v7332_v27 = vmul.f32 %v7305_v9, %v7315_v45  ;;  %v12890_v43 = vld [vmem:[#allocation55_spill] sm:$0xff] }
  0xd3   : > { %v7336_v2 = vmul.f32 %v7305_v9, %v7153_v29  ;;  %v7340_v48 = vmul.f32 %v7305_v9, %v7320_v41  ;;  %v7344_v7 = vmul.f32 %v7305_v9, %v7180_v10  ;;  %v2487_v49 = vadd.f32 %v12884_v62, %v2207_v52  ;;  %v12899_v46 = vld [vmem:[#allocation15_spill] sm:$0xff] }
  0xd4   : > { %12878 = vst [vmem:[#allocation106_spill] sm:$0xff] %v7324_v5  ;;  %12879 = vst [vmem:[#allocation107_spill] sm:$0xff] %v7328_v0  ;;  %v2489_v22 = vadd.f32 %v12885_v21, %v2209_v53  ;;  %5773 = vset.pattern.permute.xlu1 %v12834_v26  ;;  %v2491_v47 = vadd.f32 %v12886_v4, %v2211_v17  ;;  %v2493_v16 = vadd.f32 %v12887_v39, %v2213_v61  ;;  %v7362_v61 = vpop.permute.xlu1 %2963  ;;  %v7364_v21 = vpop.permute.xlu0 %2331  ;;  %v5481_v39 = vld [vmem:[%s6367_s9 + $0x4] ss:$0 sm:$0xff]  ;;  %v12908_v0 = vld [vmem:[#allocation71_spill] sm:$0xff] }
  0xd5   : > { %12880 = vst [vmem:[#allocation108_spill] sm:$0xff] %v7332_v27  ;;  %12881 = vst [vmem:[#allocation109_spill] sm:$0xff] %v7336_v2  ;;  %v2655_v50 = vmul.f32 %v7303_v42, %v6917_v11  ;;  %v2657_v8 = vmul.f32 %v7303_v42, %v6922_v60  ;;  %2619 = vperm.xlu1 %5773, %v5989_v3   ;;  %v2659_v52 = vmul.f32 %v7303_v42, %v6940_v44  ;;  %v7369_v60 = vld [vmem:[%s12266_s0 + $0x1b0] sm:$0xff]  ;;  %v12909_v26 = vld [vmem:[#allocation72_spill] sm:$0xff] }
  0xd6   : > { %12882 = vst [vmem:[#allocation110_spill] sm:$0xff] %v7340_v48  ;;  %12883 = vst [vmem:[#allocation111_spill] sm:$0xff] %v7344_v7  ;;  %v2661_v53 = vmul.f32 %v7303_v42, %v6965_v37  ;;  %v1926_v62 = vadd.f32 %v7231_v20, %v1646_v31  ;;  %v1928_v17 = vadd.f32 %v7235_v6, %v1648_v30  ;;  %v12892_v31 = vld [vmem:[#allocation45_spill] sm:$0xff]  ;;  %v12894_v20 = vld [vmem:[#allocation56_spill] sm:$0xff] }
  0xd7   : > { %12888 = vst [vmem:[#allocation62_spill] sm:$0xff] %v7364_v21  ;;  %v2767_v11 = vadd.f32 %v2655_v50, %v2487_v49  ;;  %v2769_v4 = vadd.f32 %v2657_v8, %v2489_v22  ;;  %12889 = vst [vmem:[#allocation63_spill] sm:$0xff] %v7369_v60  ;;  %v1930_v3 = vadd.f32 %v1818_v55, %v1650_v1  ;;  %v12896_v49 = vld [vmem:[#allocation46_spill] sm:$0xff]  ;;  %v12904_v7 = vld [vmem:[#allocation20_spill] sm:$0xff] }
  0xd8   : > { %v1932_v44 = vadd.f32 %v1820_v32, %v1652_v56  ;;  %v7374_v37 = vmul.f32 %v7364_v21, %v12890_v43  ;;  %v7378_v30 = vmul.f32 %v7364_v21, %v12892_v31  ;;  %v7382_v6 = vmul.f32 %v7364_v21, %v12894_v20  ;;  %v12930_v20 = vld [vmem:[#allocation22_spill] sm:$0xff] }
  0xd9   : > { %v7386_v22 = vmul.f32 %v7364_v21, %v12896_v49  ;;  %v2771_v50 = vadd.f32 %v2659_v52, %v2491_v47  ;;  %v2773_v1 = vadd.f32 %v2661_v53, %v2493_v16  ;;  %v3019_v56 = vadd.f32 %v7362_v61, %v2767_v11  ;;  %5774 = vset.pattern.permute.xlu1 %v12850_v15  ;;  %v7399_v47 = vpop.permute.xlu1 %2967  ;;  %v12898_v21 = vld [vmem:[#allocation14_spill] sm:$0xff] }
  0xda   : > { %12891 = vst [vmem:[#allocation64_spill] sm:$0xff] %v7374_v37  ;;  %12893 = vst [vmem:[#allocation65_spill] sm:$0xff] %v7378_v30  ;;  %v3021_v55 = vadd.f32 %v7362_v61, %v2769_v4  ;;  %v2094_v32 = vmul.f32 %v7143_v40, %v7310_v58  ;;  %v2096_v8 = vmul.f32 %v7143_v40, %v7315_v45  ;;  %2979 = vperm.xlu1 %5774, %v5481_v39   ;;  %v652_v4 = vpop.permute.xlu0 %651  ;;  %v12900_v39 = vld [vmem:[#allocation16_spill] sm:$0xff] }
  0xdb   : > { %12895 = vst [vmem:[#allocation45_spill] sm:$0xff] %v7382_v6  ;;  %12897 = vst [vmem:[#allocation46_spill] sm:$0xff] %v7386_v22  ;;  %v2098_v6 = vmul.f32 %v7143_v40, %v7320_v41  ;;  %v2100_v37 = vmul.f32 %v7143_v40, %v7369_v60  ;;  %v3023_v16 = vadd.f32 %v7362_v61, %v2771_v50  ;;  %v3131_v53 = vmax.f32 %v3019_v56, 0.0  ;;  %v12902_v50 = vld [vmem:[#allocation18_spill] sm:$0xff] }
  0xdc   : > { %v7403_v52 = vadd.f32 %v7362_v61, %v2773_v1  ;;  %v3133_v11 = vmax.f32 %v3021_v55, 0.0  ;;  %v2206_v38 = vadd.f32 %v2094_v32, %v1926_v62  ;;  %v2208_v28 = vadd.f32 %v2096_v8, %v1928_v17  ;;  %v12903_v1 = vld [vmem:[#allocation19_spill] sm:$0xff]  ;;  %v12905_v55 = vld [vmem:[#allocation21_spill] sm:$0xff]  ;;  %v7414_v62 = vld [vmem:[%s6362_s29 + $0x6] ss:$0 sm:$0xff] }
  0xdd   : > { %v2210_v22 = vadd.f32 %v2098_v6, %v1930_v3  ;;  %v2212_v30 = vadd.f32 %v2100_v37, %v1932_v44  ;;  %v718_v36 = vmul.f32 %v652_v4, %v12898_v21  ;;  %v719_v40 = vmul.f32 %v652_v4, %v12899_v46  ;;  %v7421_v37 = vld [vmem:[%s12266_s0 + $0x200] sm:$0xff]  ;;  %v12907_v6 = vld [vmem:[#allocation70_spill] sm:$0xff]  ;;  %v648_v8 = vpop.permute.xlu1 %647 }
  0xde   : > { %v720_v54 = vmul.f32 %v652_v4, %v12900_v39  ;;  %v721_v48 = vmul.f32 %v652_v4, %v12901_v34  ;;  %v722_v27 = vmul.f32 %v652_v4, %v12902_v50  ;;  %v723_v5 = vmul.f32 %v652_v4, %v12903_v1  ;;  %495 = vperm.xlu1 %5774, %v7414_v62  }
  0xdf   : > { %v724_v56 = vmul.f32 %v652_v4, %v12904_v7  ;;  %v725_v2 = vmul.f32 %v652_v4, %v12905_v55  ;;  %v3135_v17 = vmax.f32 %v3023_v16, 0.0  ;;  %v3137_v3 = vmax.f32 %v7403_v52, 0.0  ;;  %12906 = vst [vmem:[#allocation14_spill] sm:$0xff] %v7421_v37 }
  0xe0   : > { %v3243_v44 = vadd.f32 %v3133_v11, %v3131_v53  ;;  %v2486_v32 = vadd.f32 %v12907_v6, %v2206_v38  ;;  %v2488_v9 = vadd.f32 %v12908_v0, %v2208_v28  ;;  %v2490_v4 = vadd.f32 %v12909_v26, %v2210_v22 }
  0xe1   : > { %v2492_v63 = vadd.f32 %v12910_v35, %v2212_v30  ;;  %v2654_v16 = vmul.f32 %v7303_v42, %v7421_v37  ;;  %v710_v52 = vmul.f32 %v648_v8, %v12898_v21  ;;  %v711_v53 = vmul.f32 %v648_v8, %v12899_v46  ;;  %v12911_v21 = vld [vmem:[#allocation96_spill] sm:$0xff]  ;;  %v12912_v30 = vld [vmem:[#allocation97_spill] sm:$0xff] }
  0xe2   : > { %v712_v11 = vmul.f32 %v648_v8, %v12900_v39  ;;  %v713_v23 = vmul.f32 %v648_v8, %v12901_v34  ;;  %v714_v38 = vmul.f32 %v648_v8, %v12902_v50  ;;  %v715_v6 = vmul.f32 %v648_v8, %v12903_v1  ;;  %v12914_v39 = vld [vmem:[#allocation98_spill] sm:$0xff]  ;;  %v12929_v37 = vld [vmem:[#allocation13_spill] sm:$0xff] }
  0xe3   : > { %v716_v28 = vmul.f32 %v648_v8, %v12904_v7  ;;  %v717_v26 = vmul.f32 %v648_v8, %v12905_v55  ;;  %v7438_v35 = vadd.f32 %v710_v52, %v7104_v24  ;;  %v7441_v0 = vadd.f32 %v711_v53, %v7107_v25  ;;  %v12915_v7 = vld [vmem:[#allocation99_spill] sm:$0xff]  ;;  %v12916_v55 = vld [vmem:[#allocation100_spill] sm:$0xff]  ;;  %v12918_v8 = vld [vmem:[#allocation101_spill] sm:$0xff] }
  0xe4   : > { %v7444_v46 = vadd.f32 %v712_v11, %v12911_v21  ;;  %v7447_v22 = vadd.f32 %v713_v23, %v12912_v30  ;;  %v12913_v34 = vmov 1   ;;  %v7451_v50 = vadd.f32 %v714_v38, %v12914_v39  ;;  %v7466_v23 = vld [vmem:[%s12266_s0 + $0x210] sm:$0xff]  ;;  %v7471_v52 = vld [vmem:[%s12266_s0 + $0x220] sm:$0xff]  ;;  %v484_v11 = vpop.permute.xlu1 %483  ;;  %v12923_v21 = vld [vmem:[#allocation7_spill] sm:$0xff] }
  0xe5   : > { %5776 = vset.pattern.permute.xlu1 %v12913_v34  ;;  %v7454_v1 = vadd.f32 %v715_v6, %v12915_v7  ;;  %v7457_v24 = vadd.f32 %v716_v28, %v12916_v55  ;;  %v7460_v25 = vadd.f32 %v717_v26, %v12918_v8  ;;  %12920 = vst [vmem:[#allocation17_spill] sm:$0xff] %v7466_v23  ;;  %12921 = vst [vmem:[#allocation18_spill] sm:$0xff] %v7471_v52  ;;  %v7476_v53 = vld [vmem:[%s12266_s0 + $0x230] sm:$0xff]  ;;  %v12924_v39 = vld [vmem:[#allocation8_spill] sm:$0xff] }
  0xe6   : > { %663 = vperm.xlu1 %5776, %v7414_v62   ;;  %12922 = vst [vmem:[#allocation19_spill] sm:$0xff] %v7476_v53  ;;  %v3271_v38 = vadd.f32 %v3243_v44, %v3135_v17  ;;  %v2656_v6 = vmul.f32 %v7303_v42, %v7466_v23  ;;  %v2658_v28 = vmul.f32 %v7303_v42, %v7471_v52  ;;  %v12925_v55 = vld [vmem:[#allocation9_spill] sm:$0xff]  ;;  %v12927_v17 = vld [vmem:[#allocation11_spill] sm:$0xff] }
  0xe7   : > { %12917 = vst [vmem:[#allocation15_spill] sm:$0xff] %v7457_v24  ;;  %12919 = vst [vmem:[#allocation16_spill] sm:$0xff] %v7460_v25  ;;  %v2660_v26 = vmul.f32 %v7303_v42, %v7476_v53  ;;  %v550_v30 = vmul.f32 %v484_v11, %v12923_v21  ;;  %v551_v7 = vmul.f32 %v484_v11, %v12924_v39  ;;  %v12926_v24 = vld [vmem:[#allocation10_spill] sm:$0xff]  ;;  %v12928_v25 = vld [vmem:[#allocation12_spill] sm:$0xff] }
  0xe8   : > { %v552_v8 = vmul.f32 %v484_v11, %v12925_v55  ;;  %v553_v34 = vmul.f32 %v484_v11, %v12926_v24  ;;  %v554_v44 = vmul.f32 %v484_v11, %v12927_v17  ;;  %v555_v57 = vmul.f32 %v484_v11, %v12928_v25  ;;  %v7501_v39 = vld [vmem:[%s6362_s29 + $0x7] ss:$0 sm:$0xff]  ;;  %v12936_v17 = vld [vmem:[#allocation25_spill] sm:$0xff] }
  0xe9   : > { %v556_v23 = vmul.f32 %v484_v11, %v12929_v37  ;;  %v557_v43 = vmul.f32 %v484_v11, %v12930_v20  ;;  %v7492_v52 = vadd.f32 %v718_v36, %v550_v30  ;;  %v7494_v60 = vadd.f32 %v719_v40, %v551_v7  ;;  %v12935_v7 = vld [vmem:[#allocation24_spill] sm:$0xff] }
  0xea   : > { %v7496_v42 = vadd.f32 %v720_v54, %v552_v8  ;;  %v7498_v21 = vadd.f32 %v721_v48, %v553_v34  ;;  %667 = vperm.xlu1 %5776, %v7501_v39   ;;  %v7504_v24 = vadd.f32 %v722_v27, %v554_v44  ;;  %v7506_v55 = vadd.f32 %v723_v5, %v555_v57  ;;  %v928_v54 = vpop.permute.xlu1 %927  ;;  %v12934_v48 = vld [vmem:[#allocation23_spill] sm:$0xff] }
  0xeb   : > { %v7508_v25 = vadd.f32 %v724_v56, %v556_v23  ;;  %v7510_v37 = vadd.f32 %v725_v2, %v557_v43  ;;  %v3299_v36 = vadd.f32 %v3271_v38, %v3137_v3  ;;  %v2766_v20 = vadd.f32 %v2654_v16, %v2486_v32  ;;  %v12938_v56 = vld [vmem:[#allocation26_spill] sm:$0xff] }
  0xec   : > { %12931 = vst [vmem:[#allocation20_spill] sm:$0xff] %v7498_v21  ;;  %v2768_v40 = vadd.f32 %v2656_v6, %v2488_v9  ;;  %v2770_v11 = vadd.f32 %v2658_v28, %v2490_v4  ;;  %v2772_v30 = vadd.f32 %v2660_v26, %v2492_v63  ;;  %v990_v34 = vmul.f32 %v928_v54, %v12934_v48  ;;  %v12939_v63 = vld [vmem:[#allocation27_spill] sm:$0xff]  ;;  %v12940_v4 = vld [vmem:[#allocation28_spill] sm:$0xff] }
  0xed   : > { %12932 = vst [vmem:[#allocation21_spill] sm:$0xff] %v7508_v25  ;;  %12933 = vst [vmem:[#allocation70_spill] sm:$0xff] %v7510_v37  ;;  %v991_v8 = vmul.f32 %v928_v54, %v12935_v7  ;;  %v992_v21 = vmul.f32 %v928_v54, %v12936_v17  ;;  %v3327_v27 = vmul.f32 0.25, %v3299_v36  ;;  %v3018_v57 = vadd.f32 %v7362_v61, %v2766_v20  ;;  %v12941_v36 = vld [vmem:[#allocation29_spill] sm:$0xff]  ;;  %v5865_v37 = vld [vmem:[%s6372_s13 + $0xc0] sm:$0xff]  }
  0xee   : > { %v3020_v5 = vadd.f32 %v7362_v61, %v2768_v40  ;;  %v3022_v43 = vadd.f32 %v7362_v61, %v2770_v11  ;;  %v12937_v2 = vmov 2   ;;  %v3024_v9 = vadd.f32 %v7362_v61, %v2772_v30  ;;  %v7524_v26 = vpop.permute.xlu1 %931  ;;  %v12942_v40 = vld [vmem:[#allocation30_spill] sm:$0xff]  ;;  %v5486_v25 = vld [vmem:[%s6367_s9 + $0x9] ss:$0 sm:$0xff] }
  0xef   : > { %5777 = vset.pattern.permute.xlu1 %v12937_v2  ;;  %v993_v3 = vmul.f32 %v928_v54, %v12938_v56  ;;  %v994_v32 = vmul.f32 %v928_v54, %v12939_v63  ;;  %v995_v16 = vmul.f32 %v928_v54, %v12940_v4  ;;  %v3355_v23 = vpack.c.bf16 %v3327_v27, %v3327_v27 }
  0xf0   : > { %947 = vperm.xlu1 %5777, %v7501_v39   ;;  %v3130_v38 = vmax.f32 %v3018_v57, 0.0  ;;  %v3132_v6 = vmax.f32 %v3020_v5, 0.0  ;;  %v3134_v28 = vmax.f32 %v3022_v43, 0.0  ;;  %v3136_v44 = vmax.f32 %v3024_v9, 0.0  ;;  %v12945_v5 = vld [vmem:[#allocation84_spill] sm:$0xff]  ;;  %v12946_v43 = vld [vmem:[#allocation93_spill] sm:$0xff]  ;;  %2999 = vperm.xlu0 %5801, %v5486_v25  }
  0xf1   : > { %v7527_v20 = vmul.f32 %v928_v54, %v12941_v36  ;;  %v7530_v61 = vmul.f32 %v928_v54, %v12942_v40  ;;  %v7533_v11 = vadd.f32 %v990_v34, %v7438_v35  ;;  %5502 = vmatprep.mubr.msk.bf16.mxu0 %vm3755_vm2, %v3355_v23  ;;  %v7537_v48 = vadd.f32 %v991_v8, %v7441_v0  ;;  %v12943_v35 = vld [vmem:[#allocation83_spill] sm:$0xff]  ;;  %v12944_v34 = vld [vmem:[#allocation92_spill] sm:$0xff] }
  0xf2   : > { %v3242_v30 = vadd.f32 %v3132_v6, %v3130_v38  ;;  %v7540_v7 = vadd.f32 %v992_v21, %v7444_v46  ;;  %v7543_v17 = vadd.f32 %v993_v3, %v7447_v22  ;;  %v7546_v27 = vadd.f32 %v994_v32, %v7451_v50  ;;  %v12948_v46 = vld [vmem:[#allocation85_spill] sm:$0xff]  ;;  %v12949_v21 = vld [vmem:[#allocation94_spill] sm:$0xff]  ;;  %v12950_v22 = vld [vmem:[#allocation88_spill] sm:$0xff] }
  0xf3   : > { %v7549_v54 = vadd.f32 %v995_v16, %v7454_v1  ;;  %v1655_v57 = vadd.f32 %v12944_v34, %v12943_v35  ;;  %v1657_v9 = vadd.f32 %v12946_v43, %v12945_v5  ;;  %v12947_v0 = vmov 3   ;;  %v12951_v3 = vld [vmem:[#allocation95_spill] sm:$0xff]  ;;  %v12952_v50 = vld [vmem:[#allocation60_spill] sm:$0xff]  ;;  %v12953_v1 = vld [vmem:[#allocation50_spill] sm:$0xff] }
  0xf4   : > { %5778 = vset.pattern.permute.xlu1 %v12947_v0  ;;  %v3270_v8 = vadd.f32 %v3242_v30, %v3134_v28  ;;  %v1659_v56 = vadd.f32 %v12949_v21, %v12948_v46  ;;  %v1661_v63 = vadd.f32 %v12951_v3, %v12950_v22  ;;  %v2103_v32 = vmul.f32 %v12952_v50, %v7148_v59  ;;  %v12954_v16 = vld [vmem:[#allocation51_spill] sm:$0xff]  ;;  %v7569_v28 = vpop.permute.xlu1 %1211  ;;  %v12955_v40 = vld [vmem:[#allocation52_spill] sm:$0xff]  ;;  %v12957_v59 = vld [vmem:[#allocation102_spill] sm:$0xff] }
  0xf5   : > { %1223 = vperm.xlu1 %5778, %v7414_v62   ;;  %v1935_v4 = vadd.f32 %v12953_v1, %v1655_v57  ;;  %v1937_v23 = vadd.f32 %v12954_v16, %v1657_v9  ;;  %v2105_v38 = vmul.f32 %v12952_v50, %v7153_v29  ;;  %v2107_v6 = vmul.f32 %v12952_v50, %v7180_v10  ;;  %v12956_v35 = vld [vmem:[#allocation80_spill] sm:$0xff]  ;;  %v12960_v22 = vld [vmem:[#allocation49_spill] sm:$0xff]  ;;  %v12961_v1 = vld [vmem:[#allocation90_spill] sm:$0xff] }
  0xf6   : > { %v3298_v36 = vadd.f32 %v3270_v8, %v3136_v44  ;;  %v1939_v30 = vadd.f32 %v12955_v40, %v1659_v56  ;;  %v1941_v34 = vadd.f32 %v12956_v35, %v1661_v63  ;;  %v2109_v5 = vmul.f32 %v12952_v50, %v12957_v59  ;;  %v12958_v44 = vld [vmem:[#allocation48_spill] sm:$0xff]  ;;  %v12965_v40 = vld [vmem:[#allocation37_spill] sm:$0xff] }
  0xf7   : > { %v2215_v57 = vadd.f32 %v2103_v32, %v1935_v4  ;;  %v2217_v43 = vadd.f32 %v2105_v38, %v1937_v23  ;;  %v2383_v9 = vmul.f32 %v7258_v51, %v12892_v31  ;;  %v2385_v29 = vmul.f32 %v7258_v51, %v12896_v49  ;;  %v12962_v4 = vld [vmem:[#allocation33_spill] sm:$0xff]  ;;  %v12963_v38 = vld [vmem:[#allocation44_spill] sm:$0xff] }
  0xf8   : > { %v3326_v10 = vmul.f32 0.25, %v3298_v36  ;;  %v2219_v46 = vadd.f32 %v2107_v6, %v1939_v30  ;;  %v2221_v21 = vadd.f32 %v2109_v5, %v1941_v34  ;;  %v2387_v8 = vmul.f32 %v7258_v51, %v12958_v44  ;;  %v5856_v31 = vld [vmem:[%s6372_s13 + $0xe8] sm:$0xff]   ;;  %v12966_v30 = vld [vmem:[#allocation74_spill] sm:$0xff]  ;;  %v7592_v34 = vpop.permute.xlu1 %1487 }
  0xf9   : > { %v12959_v56 = vmov 4   ;;  %v2389_v3 = vmul.f32 %v7258_v51, %v12960_v22  ;;  %v2495_v63 = vadd.f32 %v2383_v9, %v2215_v57  ;;  %v2497_v32 = vadd.f32 %v2385_v29, %v2217_v43  ;;  %v12964_v6 = vld [vmem:[#allocation69_spill] sm:$0xff]  ;;  %v12968_v9 = vld [vmem:[#allocation82_spill] sm:$0xff]  ;;  %v12970_v22 = vld [vmem:[#allocation75_spill] sm:$0xff] }
  0xfa   : > { %5780 = vset.pattern.permute.xlu1 %v12959_v56  ;;  %v1100_v16 = vadd.f32 %v12962_v4, %v12961_v1  ;;  %v3354_v49 = vpack.c.bf16 %v3326_v10, %v3326_v10  ;;  %v2499_v23 = vadd.f32 %v2387_v8, %v2219_v46  ;;  %v1268_v36 = vmul.f32 %v12964_v6, %v12963_v38  ;;  %v12967_v57 = vld [vmem:[#allocation81_spill] sm:$0xff]  ;;  %v12969_v44 = vld [vmem:[#allocation38_spill] sm:$0xff]  ;;  %v12972_v8 = vld [vmem:[#allocation39_spill] sm:$0xff] }
  0xfb   : > { %1503 = vperm.xlu1 %5780, %v7414_v62   ;;  %v1374_v35 = vadd.f32 %v12966_v30, %v12965_v40  ;;  %v2501_v5 = vadd.f32 %v2389_v3, %v2221_v21  ;;  %v2775_v43 = vadd.f32 %v12967_v57, %v2495_v63  ;;  %v2777_v29 = vadd.f32 %v12968_v9, %v2497_v32  ;;  %v12971_v10 = vld [vmem:[#allocation86_spill] sm:$0xff]  ;;  %v12973_v4 = vld [vmem:[#allocation91_spill] sm:$0xff]  ;;  %v12975_v56 = vld [vmem:[#allocation89_spill] sm:$0xff] }
  0xfc   : > { %v1376_v1 = vadd.f32 %v12970_v22, %v12969_v44  ;;  %3799 = vmatmul.mubr.bf16.vlgmr.msra.gmra.mxu0 %v3354_v49  ;;  %v2779_v46 = vadd.f32 %v12971_v10, %v2499_v23  ;;  %v1378_v38 = vadd.f32 %v12973_v4, %v12972_v8  ;;  %v1380_v6 = vadd.f32 %v1268_v36, %v1100_v16  ;;  %v12974_v40 = vld [vmem:[#allocation87_spill] sm:$0xff]  ;;  %v5857_v49 = vld [vmem:[%s6372_s13 + $0xe0] sm:$0xff]   ;;  %v12976_v10 = vld [vmem:[#allocation34_spill] sm:$0xff] }
  0xfd   : > { %v1542_v30 = vmul.f32 %v12974_v40, %v7220_v12  ;;  %v2781_v21 = vadd.f32 %v12975_v56, %v2501_v5  ;;  %v3027_v3 = vadd.f32 %v7399_v47, %v2775_v43  ;;  %v3029_v63 = vadd.f32 %v7399_v47, %v2777_v29  ;;  %3989 = vmatpush1.bf16.msra.mxu0 %v5856_v31  ;;  %v7618_v31 = vpop.permute.xlu1 %1767  ;;  %v12977_v4 = vld [vmem:[#allocation42_spill] sm:$0xff] }
  0xfe   : > { %v1544_v32 = vmul.f32 %v12974_v40, %v7225_v14  ;;  %v3031_v23 = vadd.f32 %v7399_v47, %v2779_v46  ;;  %v1546_v16 = vmul.f32 %v12974_v40, %v7240_v13  ;;  %v1548_v36 = vmul.f32 %v12974_v40, %v7250_v19  ;;  %3990 = vmatprep.subr.bf16.mxu0 %v12850_v15 }
  0xff   : > { %v1654_v57 = vadd.f32 %v1542_v30, %v1374_v35  ;;  %1507 = vperm.xlu1 %5780, %v7501_v39   ;;  %v3033_v56 = vadd.f32 %v7399_v47, %v2781_v21  ;;  %v3139_v5 = vmax.f32 %v3027_v3, 0.0  ;;  %v3141_v43 = vmax.f32 %v3029_v63, 0.0  ;;  %v12978_v30 = vld [vmem:[#allocation43_spill] sm:$0xff] }
 0x100   : > { %v1656_v9 = vadd.f32 %v1544_v32, %v1376_v1  ;;  %v3143_v29 = vmax.f32 %v3031_v23, 0.0  ;;  %v1658_v44 = vadd.f32 %v1546_v16, %v1378_v38  ;;  %v1660_v22 = vadd.f32 %v1548_v36, %v1380_v6  ;;  %v5859_v1 = vld [vmem:[%s6372_s13 + $0xd8] sm:$0xff]  }
 0x101   : > { %v1826_v19 = vmul.f32 %v12976_v10, %v7291_v33  ;;  %v3145_v35 = vmax.f32 %v3033_v56, 0.0  ;;  %v3245_v46 = vadd.f32 %v3141_v43, %v3139_v5  ;;  %v1828_v8 = vmul.f32 %v12976_v10, %v7296_v18  ;;  %3991 = vmatpush1.bf16.msra.mxu0 %v5857_v49  ;;  %v12980_v49 = vld [vmem:[#allocation63_spill] sm:$0xff]  ;;  %v7637_v36 = vpop.permute.xlu1 %1771  ;;  %v12983_v5 = vld [vmem:[#allocation56_spill] sm:$0xff]  ;;  %v5861_v10 = vld [vmem:[%s6372_s13 + $0xd0] sm:$0xff]  }
 0x102   : > { %v1934_v40 = vadd.f32 %v12977_v4, %v1654_v57  ;;  %v1936_v21 = vadd.f32 %v12978_v30, %v1656_v9  ;;  %v2102_v25 = vmul.f32 %v12952_v50, %v7310_v58  ;;  %v2104_v38 = vmul.f32 %v12952_v50, %v7315_v45  ;;  %12981 = vst [vmem:[#allocation71_spill] sm:$0xff] %v7637_v36  ;;  %v12982_v56 = vld [vmem:[#allocation55_spill] sm:$0xff]  ;;  %v7645_v9 = vld [vmem:[%s6362_s29 + $0xb] ss:$0 sm:$0xff]  ;;  %v12988_v30 = vld [vmem:[#allocation76_spill] sm:$0xff] }
 0x103   : > { %v1938_v3 = vadd.f32 %v1826_v19, %v1658_v44  ;;  %v12979_v6 = vmov 5   ;;  %v3273_v63 = vadd.f32 %v3245_v46, %v3143_v29  ;;  %v1940_v32 = vadd.f32 %v1828_v8, %v1660_v22  ;;  %3992 = vmatprep.subr.bf16.mxu0 %v12850_v15  ;;  %12984 = vst [vmem:[#allocation72_spill] sm:$0xff] %v7645_v9  ;;  %v12986_v19 = vld [vmem:[#allocation66_spill] sm:$0xff] }
 0x104   : > { %5782 = vset.pattern.permute.xlu1 %v12979_v6  ;;  %v2106_v23 = vmul.f32 %v12952_v50, %v7320_v41  ;;  %v2108_v16 = vmul.f32 %v12952_v50, %v12980_v49  ;;  %v2214_v57 = vadd.f32 %v2102_v25, %v1934_v40  ;;  %v2216_v58 = vadd.f32 %v2104_v38, %v1936_v21  ;;  %v12985_v50 = vld [vmem:[#allocation59_spill] sm:$0xff]  ;;  %v12987_v40 = vld [vmem:[#allocation14_spill] sm:$0xff] }
 0x105   : > { %1787 = vperm.xlu1 %5782, %v7501_v39   ;;  %v2382_v45 = vmul.f32 %v7258_v51, %v12982_v56  ;;  %v2384_v43 = vmul.f32 %v7258_v51, %v12983_v5  ;;  %v3301_v41 = vadd.f32 %v3273_v63, %v3145_v35  ;;  %v2386_v22 = vmul.f32 %v7258_v51, %v12985_v50  ;;  %v12989_v35 = vld [vmem:[#allocation17_spill] sm:$0xff]  ;;  %v12990_v63 = vld [vmem:[#allocation18_spill] sm:$0xff]  ;;  %v7671_v56 = vpop.permute.xlu1 %2051 }
 0x106   : > { %v2218_v29 = vadd.f32 %v2106_v23, %v1938_v3  ;;  %v2220_v44 = vadd.f32 %v2108_v16, %v1940_v32  ;;  %3993 = vmatpush1.bf16.msra.mxu0 %v5859_v1  ;;  %v2388_v46 = vmul.f32 %v7258_v51, %v12986_v19  ;;  %v2662_v21 = vmul.f32 %v12988_v30, %v12987_v40  ;;  %v7685_v19 = vld [vmem:[%s12266_s0 + $0x90] sm:$0xff] }
 0x107   : > { %v2494_v8 = vadd.f32 %v2382_v45, %v2214_v57  ;;  %v2496_v4 = vadd.f32 %v2384_v43, %v2216_v58  ;;  %3994 = vmatprep.subr.bf16.mxu0 %v12850_v15  ;;  %v3329_v25 = vmul.f32 0.25, %v3301_v41  ;;  %v2664_v3 = vmul.f32 %v12988_v30, %v12989_v35  ;;  %515 = vperm.xlu0 %5801, %v7645_v9   ;;  %v7666_v57 = vld [vmem:[%s12266_s0 + $0x80] sm:$0xff]  ;;  %v7676_v41 = vld [vmem:[%s12266_s0 + $0x88] sm:$0xff] }
 0x108   : > { %v2498_v38 = vadd.f32 %v2386_v22, %v2218_v29  ;;  %v2666_v32 = vmul.f32 %v12988_v30, %v12990_v63  ;;  %v12991_v1 = vmov 6   ;;  %v2500_v51 = vadd.f32 %v2388_v46, %v2220_v44  ;;  %12992 = vst [vmem:[#allocation73_spill] sm:$0xff] %v7666_v57  ;;  %12993 = vst [vmem:[#allocation96_spill] sm:$0xff] %v7671_v56  ;;  %v5863_v44 = vld [vmem:[%s6372_s13 + $0xc8] sm:$0xff]  }
 0x109   : > { %5783 = vset.pattern.permute.xlu1 %v12991_v1  ;;  %v2668_v23 = vmul.f32 %v12988_v30, %v7476_v53  ;;  %v2774_v16 = vadd.f32 %v2662_v21, %v2494_v8  ;;  %v998_v58 = vmul.f32 %v7666_v57, %v7524_v26  ;;  %v3357_v45 = vpack.c.bf16 %v3329_v25, %v3329_v25  ;;  %v7692_v8 = vld [vmem:[%s12266_s0 + $0x98] sm:$0xff]  ;;  %v7703_v21 = vld [vmem:[%s12266_s0 + $0xa0] sm:$0xff]  ;;  %v7742_v53 = vld [vmem:[%s6362_s29 + $0xa] ss:$0 sm:$0xff] }
 0x10a   : > { %2063 = vperm.xlu1 %5783, %v7414_v62   ;;  %v2776_v5 = vadd.f32 %v2664_v3, %v2496_v4  ;;  %v2778_v43 = vadd.f32 %v2666_v32, %v2498_v38  ;;  %12994 = vst [vmem:[#allocation97_spill] sm:$0xff] %v7676_v41  ;;  %v999_v29 = vmul.f32 %v7676_v41, %v7524_v26  ;;  %12995 = vst [vmem:[#allocation98_spill] sm:$0xff] %v7685_v19  ;;  %v7710_v38 = vld [vmem:[%s12266_s0 + $0xa8] sm:$0xff] }
 0x10b   : > { %3995 = vmatpush1.bf16.msra.mxu0 %v5861_v10  ;;  %v2780_v50 = vadd.f32 %v2668_v23, %v2500_v51  ;;  %v3026_v22 = vadd.f32 %v7399_v47, %v2774_v16  ;;  %v1000_v46 = vmul.f32 %v7685_v19, %v7524_v26  ;;  %12996 = vst [vmem:[#allocation99_spill] sm:$0xff] %v7692_v8  ;;  %12997 = vst [vmem:[#allocation100_spill] sm:$0xff] %v7703_v21  ;;  %v7718_v23 = vld [vmem:[%s12266_s0 + $0xb0] sm:$0xff] }
 0x10c   : > { %v1001_v10 = vmul.f32 %v7692_v8, %v7524_v26  ;;  %3996 = vmatprep.subr.bf16.mxu0 %v12850_v15  ;;  %5514 = vmatprep.mubr.msk.bf16.mxu1 %vm3755_vm2, %v3357_v45  ;;  %v3028_v4 = vadd.f32 %v7399_v47, %v2776_v5  ;;  %v3030_v30 = vadd.f32 %v7399_v47, %v2778_v43  ;;  %v7727_v45 = vld [vmem:[%s12266_s0 + $0xb8] sm:$0xff] }
 0x10d   : > { %v1002_v25 = vmul.f32 %v7703_v21, %v7524_v26  ;;  %12998 = vst [vmem:[#allocation101_spill] sm:$0xff] %v7710_v38  ;;  %v1003_v3 = vmul.f32 %v7710_v38, %v7524_v26  ;;  %v3032_v32 = vadd.f32 %v7399_v47, %v2780_v50  ;;  %v3138_v51 = vmax.f32 %v3026_v22, 0.0  ;;  %12999 = vst [vmem:[#allocation7_spill] sm:$0xff] %v7718_v23 }
 0x10e   : > { %v7722_v16 = vmul.f32 %v7718_v23, %v7524_v26  ;;  %13001 = vst [vmem:[#allocation9_spill] sm:$0xff] %v7727_v45  ;;  %v7731_v5 = vmul.f32 %v7727_v45, %v7524_v26  ;;  %v13003_v47 = vmov 7   ;;  %5805 = vset.pattern.permute.xlu0 %v12937_v2  ;;  %v3140_v43 = vmax.f32 %v3028_v4, 0.0 }
 0x10f   : > { %5784 = vset.pattern.permute.xlu1 %v13003_v47  ;;  %v3142_v50 = vmax.f32 %v3030_v30, 0.0  ;;  %v1110_v22 = vadd.f32 %v998_v58, %v7492_v52  ;;  %v1111_v56 = vadd.f32 %v999_v29, %v7494_v60  ;;  %3997 = vmatpush1.bf16.msra.mxu0 %v5863_v44  ;;  %v3144_v26 = vmax.f32 %v3032_v32, 0.0  ;;  %v13004_v47 = vld [vmem:[#allocation20_spill] sm:$0xff]  ;;  %v7778_v44 = vld [vmem:[%s12266_s0 + $0xd8] sm:$0xff] }
 0x110   : > { %13000 = vst [vmem:[#allocation8_spill] sm:$0xff] %v7722_v16  ;;  %13002 = vst [vmem:[#allocation10_spill] sm:$0xff] %v7731_v5  ;;  %2343 = vperm.xlu1 %5784, %v7414_v62   ;;  %v7738_v16 = vpop.permute.xlu1 %2327  ;;  %v1112_v5 = vadd.f32 %v1000_v46, %v7496_v42  ;;  %v1113_v63 = vadd.f32 %v1001_v10, %v13004_v47  ;;  %v7747_v4 = vadd.f32 %v1002_v25, %v7504_v24  ;;  %v7757_v52 = vld [vmem:[%s12266_s0 + $0xc0] sm:$0xff]  ;;  %v7764_v24 = vld [vmem:[%s12266_s0 + $0xc8] sm:$0xff] }
 0x111   : > { %3998 = vmatprep.subr.bf16.mxu0 %v12850_v15  ;;  %959 = vperm.xlu0 %5805, %v7742_v53   ;;  %v3244_v60 = vadd.f32 %v3140_v43, %v3138_v51  ;;  %v7752_v62 = vadd.f32 %v1003_v3, %v7506_v55  ;;  %13007 = vst [vmem:[#allocation13_spill] sm:$0xff] %v7757_v52  ;;  %13008 = vst [vmem:[#allocation22_spill] sm:$0xff] %v7764_v24  ;;  %v7771_v55 = vld [vmem:[%s12266_s0 + $0xd0] sm:$0xff]  ;;  %v7785_v10 = vld [vmem:[%s12266_s0 + $0xe0] sm:$0xff] }
 0x112   : > { %13005 = vst [vmem:[#allocation11_spill] sm:$0xff] %v7747_v4  ;;  %v1278_v42 = vmul.f32 %v7757_v52, %v7569_v28  ;;  %v1279_v58 = vmul.f32 %v7764_v24, %v7569_v28  ;;  %13009 = vst [vmem:[#allocation23_spill] sm:$0xff] %v7771_v55  ;;  %v1280_v29 = vmul.f32 %v7771_v55, %v7569_v28  ;;  %v7794_v25 = vld [vmem:[%s12266_s0 + $0xe8] sm:$0xff]  ;;  %v7803_v51 = vld [vmem:[%s12266_s0 + $0xf0] sm:$0xff]  ;;  %v656_v24 = vpop.permute.xlu0 %655 }
 0x113   : > { %13006 = vst [vmem:[#allocation12_spill] sm:$0xff] %v7752_v62  ;;  %13010 = vst [vmem:[#allocation24_spill] sm:$0xff] %v7778_v44  ;;  %v1281_v46 = vmul.f32 %v7778_v44, %v7569_v28  ;;  %v7789_v30 = vmul.f32 %v7785_v10, %v7569_v28  ;;  %v7798_v3 = vmul.f32 %v7794_v25, %v7569_v28  ;;  %v7812_v43 = vld [vmem:[%s12266_s0 + $0xf8] sm:$0xff]  ;;  %3999 = vmatpush1.bf16.msra.mxu0 %v5865_v37 }
 0x114   : > { %13011 = vst [vmem:[#allocation25_spill] sm:$0xff] %v7785_v10  ;;  %13013 = vst [vmem:[#allocation27_spill] sm:$0xff] %v7794_v25  ;;  %v3272_v32 = vadd.f32 %v3244_v60, %v3142_v50  ;;  %v7807_v47 = vmul.f32 %v7803_v51, %v7569_v28  ;;  %v7816_v10 = vmul.f32 %v7812_v43, %v7569_v28  ;;  %v5867_v50 = vld [vmem:[%s6372_s13 + $0xb8] sm:$0xff]   ;;  %2347 = vperm.xlu1 %5784, %v7501_v39   ;;  %v7832_v52 = vpop.permute.xlu1 %2607 }
 0x115   : > { %13012 = vst [vmem:[#allocation26_spill] sm:$0xff] %v7789_v30  ;;  %13014 = vst [vmem:[#allocation28_spill] sm:$0xff] %v7798_v3  ;;  %v7818_v25 = vadd.f32 %v1278_v42, %v1110_v22  ;;  %v7821_v60 = vadd.f32 %v1279_v58, %v1111_v56  ;;  %v7823_v44 = vadd.f32 %v1280_v29, %v1112_v5  ;;  %v13023_v22 = vld [vmem:[#allocation77_spill] sm:$0xff]  ;;  %4000 = vmatprep.subr.bf16.mxu0 %v12850_v15  ;;  %v7978_v62 = vld [vmem:[%s12266_s0 + $0x78] sm:$0xff] }
 0x116   : > { %13015 = vst [vmem:[#allocation29_spill] sm:$0xff] %v7803_v51  ;;  %13016 = vst [vmem:[#allocation30_spill] sm:$0xff] %v7807_v47  ;;  %v7825_v55 = vadd.f32 %v1281_v46, %v1113_v63  ;;  %v7829_v51 = vmul.f32 %v7592_v34, %v7220_v12  ;;  %v3300_v28 = vadd.f32 %v3272_v32, %v3144_v26  ;;  %v13024_v63 = vld [vmem:[#allocation78_spill] sm:$0xff]  ;;  %v13025_v26 = vld [vmem:[#allocation79_spill] sm:$0xff]  ;;  %5808 = vset.pattern.permute.xlu0 %v12947_v0 }
 0x117   : > { %13017 = vst [vmem:[#allocation83_spill] sm:$0xff] %v7812_v43  ;;  %13018 = vst [vmem:[#allocation92_spill] sm:$0xff] %v7816_v10  ;;  %v7836_v37 = vmul.f32 %v7592_v34, %v13023_v22  ;;  %v7840_v56 = vmul.f32 %v7592_v34, %v7225_v14  ;;  %v7844_v5 = vmul.f32 %v7592_v34, %v13024_v63  ;;  %v7858_v14 = vld [vmem:[%s12266_s0 + $0x140] sm:$0xff]  ;;  %v7867_v29 = vld [vmem:[%s12266_s0 + $0x148] sm:$0xff]  ;;  %4001 = vmatpush1.bf16.msra.mxu0 %v5867_v50 }
 0x118   : > { %13019 = vst [vmem:[#allocation84_spill] sm:$0xff] %v7818_v25  ;;  %13020 = vst [vmem:[#allocation93_spill] sm:$0xff] %v7821_v60  ;;  %v7849_v12 = vmul.f32 %v7592_v34, %v7240_v13  ;;  %v7853_v42 = vmul.f32 %v7592_v34, %v13025_v26  ;;  %v7862_v58 = vmul.f32 %v7858_v14, %v7618_v31  ;;  %v3328_v46 = vmul.f32 0.25, %v3300_v28  ;;  %v7877_v32 = vld [vmem:[%s12266_s0 + $0x150] sm:$0xff]  ;;  %v7886_v63 = vld [vmem:[%s12266_s0 + $0x158] sm:$0xff] }
 0x119   : > { %13021 = vst [vmem:[#allocation85_spill] sm:$0xff] %v7823_v44  ;;  %13022 = vst [vmem:[#allocation94_spill] sm:$0xff] %v7825_v55  ;;  %v7871_v13 = vmul.f32 %v7867_v29, %v7618_v31  ;;  %v7881_v22 = vmul.f32 %v7877_v32, %v7618_v31  ;;  %v7890_v26 = vmul.f32 %v7886_v63, %v7618_v31  ;;  %1243 = vperm.xlu0 %5808, %v7645_v9   ;;  %v5858_v43 = vld [vmem:[%s6372_s13 + $0x140] sm:$0xff]   ;;  %v7962_v55 = vld [vmem:[%s12266_s0 + $0x68] sm:$0xff] }
 0x11a   : > { %13026 = vst [vmem:[#allocation88_spill] sm:$0xff] %v7858_v14  ;;  %13027 = vst [vmem:[#allocation95_spill] sm:$0xff] %v7867_v29  ;;  %v7894_v28 = vmul.f32 %v7858_v14, %v7637_v36  ;;  %v7900_v44 = vmul.f32 %v7867_v29, %v7637_v36  ;;  %v7904_v47 = vmul.f32 %v7877_v32, %v7637_v36  ;;  %v7913_v50 = vld [vmem:[%s12266_s0 + $0x40] sm:$0xff]  ;;  %v13035_v29 = vmov 8   ;;  %v7970_v60 = vld [vmem:[%s12266_s0 + $0x70] sm:$0xff]  ;;  %4002 = vmatprep.subr.bf16.mxu0 %v12850_v15 }
 0x11b   : > { %13028 = vst [vmem:[#allocation60_spill] sm:$0xff] %v7877_v32  ;;  %13029 = vst [vmem:[#allocation50_spill] sm:$0xff] %v7886_v63  ;;  %v7908_v25 = vmul.f32 %v7886_v63, %v7637_v36  ;;  %v7916_v14 = vmul.f32 %v7913_v50, %v656_v24  ;;  %5787 = vset.pattern.permute.xlu1 %v13035_v29  ;;  %v3356_v30 = vpack.c.bf16 %v3328_v46, %v3328_v46  ;;  %v7924_v32 = vld [vmem:[%s12266_s0 + $0x48] sm:$0xff]  ;;  %v7940_v46 = vld [vmem:[%s12266_s0 + $0x58] sm:$0xff] }
 0x11c   : > { %13030 = vst [vmem:[#allocation51_spill] sm:$0xff] %v7894_v28  ;;  %13031 = vst [vmem:[#allocation52_spill] sm:$0xff] %v7900_v44  ;;  %v7919_v28 = vpop.permute.xlu1 %2611  ;;  %v7927_v63 = vmul.f32 %v7924_v32, %v656_v24  ;;  %2627 = vperm.xlu1 %5787, %v7501_v39   ;;  %v5869_v29 = vld [vmem:[%s6372_s13 + $0xb0] sm:$0xff]   ;;  %v7949_v44 = vld [vmem:[%s6372_s13 + $0x158] sm:$0x1f]   ;;  %v7965_v39 = vmul.f32 %v7962_v55, %v656_v24  ;;  %v7973_v3 = vmul.f32 %v7970_v60, %v656_v24 }
 0x11d   : > { %13032 = vst [vmem:[#allocation80_spill] sm:$0xff] %v7904_v47  ;;  %13033 = vst [vmem:[#allocation102_spill] sm:$0xff] %v7908_v25  ;;  %v7932_v47 = vld [vmem:[%s12266_s0 + $0x50] sm:$0xff]  ;;  %v5871_v25 = vld [vmem:[%s6372_s13 + $0x100] sm:$0x1f]   ;;  %3910 = vmatmul.mubr.bf16.vlgmr.msra.gmra.mxu1 %v3356_v30  ;;  %4003 = vmatpush1.bf16.msra.mxu0 %v5869_v29 }
 0x11e   : > { %13034 = vst [vmem:[#allocation48_spill] sm:$0xff] %v7913_v50  ;;  %13036 = vst [vmem:[#allocation49_spill] sm:$0xff] %v7919_v28  ;;  %v7935_v4 = vmul.f32 %v7932_v47, %v656_v24  ;;  %v7943_v28 = vmul.f32 %v7940_v46, %v656_v24  ;;  %v7954_v10 = vld [vmem:[%s12266_s0 + $0x60] sm:$0xff]  ;;  %4100 = vmatpush1.bf16.msra.mxu1 %v5858_v43  ;;  %v13054_v43 = vld [vmem:[#allocation6_spill] sm:$0xff]  ;;  %4014 = vmatprep.subr.bf16.mxu0 %v12850_v15 }
 0x11f   : > { %13037 = vst [vmem:[#allocation90_spill] sm:$0xff] %v7924_v32  ;;  %13038 = vst [vmem:[#allocation33_spill] sm:$0xff] %v7932_v47  ;;  %v7957_v36 = vmul.f32 %v7954_v10, %v656_v24  ;;  %v5860_v32 = vld [vmem:[%s6372_s13 + $0x138] sm:$0xff]   ;;  %4101 = vmatprep.subr.bf16.mxu1 %v12850_v15  ;;  %v13057_v29 = vld [vmem:[#allocation36_spill] sm:$0xff]  ;;  %5810 = vset.pattern.permute.xlu0 %v12979_v6 }
 0x120   : > { %13039 = vst [vmem:[#allocation44_spill] sm:$0xff] %v7940_v46  ;;  %13040 = vst [vmem:[#allocation69_spill] sm:$0xff] %v7949_v44  ;;  %v936_v46 = vpop.permute.xlu0 %935  ;;  %5788 = vset.pattern.permute.xlu1 %v12850_v15  ;;  %v8121_v44 = vld [vmem:[%s12266_s0 + $0x38] sm:$0xff]  ;;  %v5864_v0 = vld [vmem:[%s6372_s13 + $0x128] sm:$0xff]   ;;  %1799 = vperm.xlu0 %5810, %v7742_v53  }
 0x121   : > { %13041 = vst [vmem:[#allocation37_spill] sm:$0xff] %v7954_v10  ;;  %13042 = vst [vmem:[#allocation74_spill] sm:$0xff] %v7962_v55  ;;  %v7981_v10 = vmul.f32 %v7978_v62, %v656_v24  ;;  %v7985_v55 = vmul.f32 %v7666_v57, %v936_v46  ;;  %v7988_v9 = vmul.f32 %v7676_v41, %v936_v46  ;;  %v8103_v41 = vld [vmem:[%s12266_s0 + $0x20] sm:$0xff] }
 0x122   : > { %13043 = vst [vmem:[#allocation81_spill] sm:$0xff] %v7970_v60  ;;  %13044 = vst [vmem:[#allocation82_spill] sm:$0xff] %v7978_v62  ;;  %v7991_v60 = vmul.f32 %v7685_v19, %v936_v46  ;;  %v7994_v47 = vmul.f32 %v7692_v8, %v936_v46  ;;  %v7998_v24 = vmul.f32 %v7703_v21, %v936_v46  ;;  %v13055_v21 = vld [vmem:[#allocation16_spill] sm:$0xff]  ;;  %4102 = vmatpush1.bf16.msra.mxu1 %v5860_v32  ;;  %v6023_v32 = vld [vmem:[%s12266_s0 + $0x1c8] sm:$0xff] }
 0x123   : > { %13045 = vst [vmem:[#allocation38_spill] sm:$0xff] %v7985_v55  ;;  %13046 = vst [vmem:[#allocation75_spill] sm:$0xff] %v7988_v9  ;;  %v8001_v62 = vmul.f32 %v7710_v38, %v936_v46  ;;  %v8004_v30 = vmul.f32 %v7718_v23, %v936_v46  ;;  %v8007_v55 = vmul.f32 %v7727_v45, %v936_v46  ;;  %v5483_v9 = vld [vmem:[%s6367_s9 + $0x6] ss:$0 sm:$0xff]  ;;  %v13056_v46 = vld [vmem:[#allocation57_spill] sm:$0xff]  ;;  %4103 = vmatprep.subr.bf16.mxu1 %v12850_v15 }
 0x124   : > { %13047 = vst [vmem:[#allocation86_spill] sm:$0xff] %v7991_v60  ;;  %13048 = vst [vmem:[#allocation39_spill] sm:$0xff] %v7994_v47  ;;  %v8011_v60 = vpop.permute.xlu1 %2975  ;;  %v3986_v47 = vand.u32 %v5871_v25, %v13054_v43  ;;  %v13058_v45 = vld [vmem:[#allocation104_spill] sm:$0xff]  ;;  %2987 = vperm.xlu1 %5788, %v5483_v9   ;;  %v8034_v38 = vld [vmem:[%s12266_s0 + $0x168] sm:$0xff] }
 0x125   : > { %13049 = vst [vmem:[#allocation91_spill] sm:$0xff] %v7998_v24  ;;  %13050 = vst [vmem:[#allocation87_spill] sm:$0xff] %v8001_v62  ;;  %v1109_v62 = vadd.f32 %v7530_v61, %v13055_v21  ;;  %v1387_v25 = vadd.f32 %v13058_v45, %v7549_v54  ;;  %v13059_v23 = vld [vmem:[#allocation40_spill] sm:$0xff]  ;;  %v6020_v61 = vld [vmem:[%s12266_s0 + $0x138] sm:$0xff] }
 0x126   : > { %13051 = vst [vmem:[#allocation89_spill] sm:$0xff] %v8004_v30  ;;  %13052 = vst [vmem:[#allocation34_spill] sm:$0xff] %v8007_v55  ;;  %v1383_v30 = vadd.f32 %v13056_v46, %v7537_v48  ;;  %v1385_v55 = vadd.f32 %v13057_v29, %v7543_v17  ;;  %v1557_v21 = vmul.f32 %v6020_v61, %v7592_v34  ;;  %v8043_v17 = vld [vmem:[%s12266_s0 + $0x178] sm:$0xff]  ;;  %v5862_v9 = vld [vmem:[%s6372_s13 + $0x130] sm:$0xff]   ;;  %4015 = vmatpush2.bf16.msra.mxu0 %v3986_v47 }
 0x127   : > { %13053 = vst [vmem:[#allocation42_spill] sm:$0xff] %v8011_v60  ;;  %v1389_v24 = vadd.f32 %v13059_v23, %v1109_v62  ;;  %13060 = vst [vmem:[#allocation43_spill] sm:$0xff] %v8034_v38  ;;  %v8038_v48 = vmul.f32 %v8034_v38, %v7618_v31  ;;  %v8047_v54 = vmul.f32 %v8043_v17, %v7618_v31  ;;  %v13062_v46 = vld [vmem:[#allocation68_spill] sm:$0xff]  ;;  %4016 = vmatprep.subr.bf16.mxu0 %v12850_v15  ;;  %v8097_v19 = vld [vmem:[%s6362_s29 + $0x8] ss:$0 sm:$0xff] }
 0x128   : > { %13061 = vst [vmem:[#allocation55_spill] sm:$0xff] %v8043_v17  ;;  %v1663_v23 = vadd.f32 %v7836_v37, %v1383_v30  ;;  %v1665_v45 = vadd.f32 %v7844_v5, %v1385_v55  ;;  %v1667_v62 = vadd.f32 %v7853_v42, %v1387_v25  ;;  %v8055_v29 = vmul.f32 %v13062_v46, %v12957_v59  ;;  %v488_v61 = vpop.permute.xlu1 %487  ;;  %v6024_v55 = vld [vmem:[%s12266_s0 + $0x1d8] sm:$0xff]  ;;  %v8074_v47 = vld [vmem:[%s12266_s0] sm:$0xff]  ;;  %v8080_v42 = vld [vmem:[%s12266_s0 + $0x8] sm:$0xff] }
 0x129   : > { %v1669_v8 = vadd.f32 %v1557_v21, %v1389_v24  ;;  %v8062_v37 = vmul.f32 %v6023_v32, %v7738_v16  ;;  %v8068_v59 = vmul.f32 %v6024_v55, %v7738_v16  ;;  %13063 = vst [vmem:[#allocation56_spill] sm:$0xff] %v8074_v47  ;;  %v558_v5 = vmul.f32 %v8074_v47, %v488_v61  ;;  %v8086_v30 = vld [vmem:[%s12266_s0 + $0x10] sm:$0xff]  ;;  %v8092_v21 = vld [vmem:[%s12266_s0 + $0x18] sm:$0xff]  ;;  %v8109_v60 = vld [vmem:[%s12266_s0 + $0x28] sm:$0xff] }
 0x12a   : > { %13064 = vst [vmem:[#allocation59_spill] sm:$0xff] %v8080_v42  ;;  %v559_v24 = vmul.f32 %v8080_v42, %v488_v61  ;;  %13065 = vst [vmem:[#allocation66_spill] sm:$0xff] %v8086_v30  ;;  %v560_v25 = vmul.f32 %v8086_v30, %v488_v61  ;;  %v561_v32 = vmul.f32 %v8092_v21, %v488_v61  ;;  %v5873_v55 = vld [vmem:[%s6372_s13 + $0xf8] sm:$0xff]   ;;  %503 = vperm.xlu1 %5788, %v8097_v19   ;;  %v8115_v38 = vld [vmem:[%s12266_s0 + $0x30] sm:$0xff] }
 0x12b   : > { %13066 = vst [vmem:[#allocation76_spill] sm:$0xff] %v8092_v21  ;;  %13067 = vst [vmem:[#allocation20_spill] sm:$0xff] %v8103_v41  ;;  %v562_v57 = vmul.f32 %v8103_v41, %v488_v61  ;;  %v563_v17 = vmul.f32 %v8109_v60, %v488_v61  ;;  %v564_v43 = vmul.f32 %v8115_v38, %v488_v61  ;;  %4104 = vmatpush1.bf16.msra.mxu1 %v5862_v9 }
 0x12c   : > { %13068 = vst [vmem:[#allocation77_spill] sm:$0xff] %v8109_v60  ;;  %13069 = vst [vmem:[#allocation78_spill] sm:$0xff] %v8115_v38  ;;  %v565_v50 = vmul.f32 %v8121_v44, %v488_v61  ;;  %v8126_v35 = vadd.f32 %v7916_v14, %v558_v5  ;;  %v8129_v1 = vadd.f32 %v7927_v63, %v559_v24  ;;  %4105 = vmatprep.subr.bf16.mxu1 %v12850_v15  ;;  %v5866_v5 = vld [vmem:[%s6372_s13 + $0x120] sm:$0xff]  }
 0x12d   : > { %13070 = vst [vmem:[#allocation79_spill] sm:$0xff] %v8121_v44  ;;  %v8132_v40 = vadd.f32 %v7935_v4, %v560_v25  ;;  %v8135_v46 = vadd.f32 %v7943_v28, %v561_v32  ;;  %v8139_v49 = vadd.f32 %v7957_v36, %v562_v57  ;;  %v8142_v9 = vadd.f32 %v7965_v39, %v563_v17  ;;  %v492_v4 = vpop.permute.xlu1 %491  ;;  %v8163_v39 = vpop.permute.xlu0 %2615 }
 0x12e   : > { %v8145_v14 = vadd.f32 %v7973_v3, %v564_v43  ;;  %v8148_v63 = vadd.f32 %v7981_v10, %v565_v50  ;;  %4017 = vmatpush2.bf16.msra.mxu0 %v5873_v55  ;;  %v8151_v28 = vmul.f32 %v8074_v47, %v492_v4  ;;  %v8154_v61 = vmul.f32 %v8080_v42, %v492_v4  ;;  %v5875_v3 = vld [vmem:[%s6372_s13 + $0xf0] sm:$0xff]   ;;  %v13083_v47 = vld [vmem:[#allocation103_spill] sm:$0xff] }
 0x12f   : > { %13071 = vst [vmem:[#allocation16_spill] sm:$0xff] %v8139_v49  ;;  %13072 = vst [vmem:[#allocation57_spill] sm:$0xff] %v8142_v9  ;;  %v8157_v36 = vmul.f32 %v8086_v30, %v492_v4  ;;  %v8160_v57 = vmul.f32 %v8092_v21, %v492_v4  ;;  %v13076_v43 = vmov 1   ;;  %4018 = vmatprep.subr.bf16.mxu0 %v12850_v15  ;;  %v8168_v10 = vmul.f32 %v8103_v41, %v492_v4 }
 0x130   : > { %13073 = vst [vmem:[#allocation36_spill] sm:$0xff] %v8145_v14  ;;  %13074 = vst [vmem:[#allocation104_spill] sm:$0xff] %v8148_v63  ;;  %5790 = vset.pattern.permute.xlu1 %v13076_v43  ;;  %v8171_v50 = vmul.f32 %v8109_v60, %v492_v4  ;;  %v8174_v17 = vmul.f32 %v8115_v38, %v492_v4  ;;  %4106 = vmatpush1.bf16.msra.mxu1 %v5864_v0  ;;  %v8189_v0 = vld [vmem:[%s12266_s0 + $0x1e8] sm:$0xff]  ;;  %v8228_v63 = vld [vmem:[%s12266_s0 + $0x238] sm:$0xff] }
 0x131   : > { %13075 = vst [vmem:[#allocation40_spill] sm:$0xff] %v8163_v39  ;;  %671 = vperm.xlu1 %5790, %v8097_v19   ;;  %v8179_v24 = vmul.f32 %v8121_v44, %v492_v4  ;;  %v1943_v25 = vadd.f32 %v7871_v13, %v1663_v23  ;;  %v1945_v32 = vadd.f32 %v7890_v26, %v1665_v45  ;;  %v8196_v13 = vld [vmem:[%s12266_s0 + $0x1f8] sm:$0xff]  ;;  %v8205_v45 = vld [vmem:[%s12266_s0 + $0x208] sm:$0xff]  ;;  %v8241_v41 = vpop.permute.xlu0 %2971 }
 0x132   : > { %4107 = vmatprep.subr.bf16.mxu1 %v12850_v15  ;;  %v1947_v55 = vadd.f32 %v8038_v48, %v1667_v62  ;;  %v1949_v14 = vadd.f32 %v8047_v54, %v1669_v8  ;;  %v2395_v49 = vmul.f32 %v8189_v0, %v7738_v16  ;;  %v2397_v26 = vmul.f32 %v8196_v13, %v7738_v16  ;;  %v13077_v48 = vld [vmem:[#allocation107_spill] sm:$0xff]  ;;  %v13078_v54 = vld [vmem:[#allocation109_spill] sm:$0xff] }
 0x133   : > { %4019 = vmatpush2.bf16.msra.mxu0 %v5875_v3  ;;  %v2223_v8 = vadd.f32 %v13077_v48, %v1943_v25  ;;  %v2225_v23 = vadd.f32 %v13078_v54, %v1945_v32  ;;  %v2671_v62 = vmul.f32 %v8205_v45, %v7832_v52  ;;  %v8212_v4 = vld [vmem:[%s12266_s0 + $0x218] sm:$0xff]  ;;  %v8221_v48 = vld [vmem:[%s12266_s0 + $0x228] sm:$0xff]  ;;  %v2677_v9 = vmul.f32 %v8228_v63, %v7832_v52 }
 0x134   : > { %v2673_v3 = vmul.f32 %v8212_v4, %v7832_v52  ;;  %v13079_v39 = vld [vmem:[#allocation111_spill] sm:$0xff]  ;;  %v2229_v32 = vadd.f32 %v8055_v29, %v1949_v14  ;;  %v2675_v54 = vmul.f32 %v8221_v48, %v7832_v52  ;;  %4210 = vmatprep.subr.bf16.mxu0 %v12850_v15  ;;  %4108 = vmatpush1.bf16.msra.mxu1 %v5866_v5  ;;  %v13082_v5 = vld [vmem:[#allocation58_spill] sm:$0xff] }
 0x135   : > { %v2227_v25 = vadd.f32 %v13079_v39, %v1947_v55  ;;  %v5868_v29 = vld [vmem:[%s6372_s13 + $0x118] sm:$0xff]   ;;  %v2503_v14 = vadd.f32 %v8062_v37, %v2223_v8  ;;  %v2505_v39 = vadd.f32 %v8068_v59, %v2225_v23  ;;  %4109 = vmatprep.subr.bf16.mxu1 %v12850_v15  ;;  %v1384_v42 = vadd.f32 %v13082_v5, %v7540_v7  ;;  %v13084_v23 = vld [vmem:[#allocation105_spill] sm:$0xff] }
 0x136   : > { %v13080_v55 = vld [vmem:[#allocation15_spill] sm:$0xff]  ;;  %v2509_v30 = vadd.f32 %v2397_v26, %v2229_v32  ;;  %v1386_v37 = vadd.f32 %v13083_v47, %v7546_v27 }
 0x137   : > { %v1108_v44 = vadd.f32 %v7527_v20, %v13080_v55  ;;  %v13081_v38 = vld [vmem:[#allocation35_spill] sm:$0xff]  ;;  %v2507_v21 = vadd.f32 %v2395_v49, %v2227_v25  ;;  %v2783_v59 = vadd.f32 %v2671_v62, %v2503_v14  ;;  %v2785_v8 = vadd.f32 %v2673_v3, %v2505_v39  ;;  %v8253_v55 = vld [vmem:[%s6362_s29 + $0x9] ss:$0 sm:$0xff]  ;;  %v8256_v49 = vpop.permute.xlu1 %659 }
 0x138   : > { %v1382_v60 = vadd.f32 %v13081_v38, %v7533_v11  ;;  %v6040_v11 = vld [vmem:[%s12266_s0 + $0x130] sm:$0xff]  ;;  %675 = vperm.xlu1 %5790, %v8253_v55   ;;  %v2789_v26 = vadd.f32 %v2677_v9, %v2509_v30  ;;  %v1664_v47 = vadd.f32 %v7840_v56, %v1384_v42  ;;  %4110 = vmatpush1.bf16.msra.mxu1 %v5868_v29 }
 0x139   : > { %v1388_v20 = vadd.f32 %v13084_v23, %v1108_v44  ;;  %v1556_v38 = vmul.f32 %v6040_v11, %v7592_v34  ;;  %v2787_v7 = vadd.f32 %v2675_v54, %v2507_v21  ;;  %v5870_v44 = vld [vmem:[%s6372_s13 + $0x110] sm:$0xff]   ;;  %v3035_v62 = vadd.f32 %v8241_v41, %v2783_v59  ;;  %4111 = vmatprep.subr.bf16.mxu1 %v12850_v15  ;;  %v13088_v59 = vld [vmem:[#allocation108_spill] sm:$0xff] }
 0x13a   : > { %v1662_v27 = vadd.f32 %v7829_v51, %v1382_v60  ;;  %v3037_v34 = vadd.f32 %v8241_v41, %v2785_v8  ;;  %v1666_v3 = vadd.f32 %v7849_v12, %v1386_v37  ;;  %v3041_v51 = vadd.f32 %v8241_v41, %v2789_v26  ;;  %v13087_v37 = vld [vmem:[#allocation106_spill] sm:$0xff]  ;;  %v6042_v11 = vld [vmem:[%s12266_s0 + $0x1c0] sm:$0xff] }
 0x13b   : > { %v1668_v25 = vadd.f32 %v1556_v38, %v1388_v20  ;;  %v3039_v21 = vadd.f32 %v8241_v41, %v2787_v7  ;;  %v1834_v60 = vmul.f32 %v7618_v31, %v7291_v33  ;;  %v1836_v56 = vmul.f32 %v7618_v31, %v7296_v18  ;;  %v5872_v33 = vld [vmem:[%s6372_s13 + $0x108] sm:$0xff]   ;;  %v13085_v18 = vld [vmem:[#allocation63_spill] sm:$0xff]  ;;  %v13086_v31 = vld [vmem:[#allocation68_spill] sm:$0xff]  ;;  %v8282_v8 = vpop.permute.xlu1 %939 }
 0x13c   : > { %v3147_v42 = vmax.f32 %v3035_v62, 0.0  ;;  %v3149_v30 = vmax.f32 %v3037_v34, 0.0  ;;  %v1942_v9 = vadd.f32 %v7862_v58, %v1662_v27  ;;  %v1944_v12 = vadd.f32 %v7881_v22, %v1664_v47  ;;  %5791 = vset.pattern.permute.xlu1 %v12937_v2  ;;  %4112 = vmatpush1.bf16.msra.mxu1 %v5870_v44  ;;  %v13089_v23 = vld [vmem:[#allocation110_spill] sm:$0xff]  ;;  %v8297_v27 = vld [vmem:[%s12266_s0 + $0x1e0] sm:$0xff] }
 0x13d   : > { %v3151_v32 = vmax.f32 %v3039_v21, 0.0  ;;  %v3153_v54 = vmax.f32 %v3041_v51, 0.0  ;;  %v1946_v29 = vadd.f32 %v1834_v60, %v1666_v3  ;;  %v1948_v14 = vadd.f32 %v1836_v56, %v1668_v25  ;;  %955 = vperm.xlu1 %5791, %v8253_v55   ;;  %4113 = vmatprep.subr.bf16.mxu1 %v12850_v15  ;;  %v6043_v7 = vld [vmem:[%s12266_s0 + $0x1d0] sm:$0xff] }
 0x13e   : > { %v3247_v39 = vadd.f32 %v3149_v30, %v3147_v42  ;;  %v2116_v5 = vmul.f32 %v13086_v31, %v13085_v18  ;;  %v2222_v58 = vadd.f32 %v13087_v37, %v1942_v9  ;;  %v2224_v22 = vadd.f32 %v13088_v59, %v1944_v12  ;;  %v8304_v34 = vld [vmem:[%s12266_s0 + $0x1f0] sm:$0xff]  ;;  %v13092_v30 = vld [vmem:[#allocation17_spill] sm:$0xff]  ;;  %v13096_v37 = vld [vmem:[#allocation48_spill] sm:$0xff] }
 0x13f   : > { %v2226_v20 = vadd.f32 %v13089_v23, %v1946_v29  ;;  %v2390_v38 = vmul.f32 %v6042_v11, %v7738_v16  ;;  %v2392_v26 = vmul.f32 %v6043_v7, %v7738_v16  ;;  %v2394_v47 = vmul.f32 %v8297_v27, %v7738_v16  ;;  %v13090_v25 = vld [vmem:[#allocation14_spill] sm:$0xff] }
 0x140   : > { %v3275_v44 = vadd.f32 %v3247_v39, %v3151_v32  ;;  %v2228_v62 = vadd.f32 %v2116_v5, %v1948_v14  ;;  %v2396_v3 = vmul.f32 %v8304_v34, %v7738_v16  ;;  %v2670_v21 = vmul.f32 %v7832_v52, %v13090_v25  ;;  %4114 = vmatpush1.bf16.msra.mxu1 %v5872_v33  ;;  %v13094_v14 = vld [vmem:[#allocation18_spill] sm:$0xff]  ;;  %v13095_v16 = vld [vmem:[#allocation19_spill] sm:$0xff]  ;;  %v13102_v25 = vld [vmem:[#allocation69_spill] sm:$0xff] }
 0x141   : > { %v13091_v51 = vmov 6   ;;  %v2502_v60 = vadd.f32 %v2390_v38, %v2222_v58  ;;  %v2504_v56 = vadd.f32 %v2392_v26, %v2224_v22  ;;  %v2506_v42 = vadd.f32 %v2394_v47, %v2226_v20  ;;  %4125 = vmatprep.subr.bf16.mxu1 %v12850_v15  ;;  %v13097_v59 = vld [vmem:[#allocation90_spill] sm:$0xff]  ;;  %v13098_v20 = vld [vmem:[#allocation33_spill] sm:$0xff]  ;;  %v13099_v38 = vld [vmem:[#allocation72_spill] sm:$0xff] }
 0x142   : > { %5813 = vset.pattern.permute.xlu0 %v13091_v51  ;;  %v2672_v9 = vmul.f32 %v7832_v52, %v13092_v30  ;;  %v13093_v12 = vmov 3   ;;  %v3303_v32 = vadd.f32 %v3275_v44, %v3153_v54  ;;  %v2508_v29 = vadd.f32 %v2396_v3, %v2228_v62  ;;  %v13100_v47 = vld [vmem:[#allocation44_spill] sm:$0xff]  ;;  %v13101_v62 = vld [vmem:[#allocation37_spill] sm:$0xff] }
 0x143   : > { %5792 = vset.pattern.permute.xlu1 %v13093_v12  ;;  %v2674_v39 = vmul.f32 %v7832_v52, %v13094_v14  ;;  %v2676_v18 = vmul.f32 %v7832_v52, %v13095_v16  ;;  %v2782_v31 = vadd.f32 %v2670_v21, %v2502_v60  ;;  %v8321_v58 = vmul.f32 %v13096_v37, %v8256_v49  ;;  %v8332_v52 = vpop.permute.xlu1 %1215  ;;  %v13103_v21 = vld [vmem:[#allocation6_spill] sm:$0xff]  ;;  %v13106_v16 = vld [vmem:[#allocation81_spill] sm:$0xff]  ;;  %v13127_v12 = vld [vmem:[#allocation67_spill] sm:$0xff] }
 0x144   : > { %v2784_v5 = vadd.f32 %v2672_v9, %v2504_v56  ;;  %v8325_v33 = vmul.f32 %v13097_v59, %v8256_v49  ;;  %v3331_v54 = vmul.f32 0.25, %v3303_v32  ;;  %v8329_v11 = vmul.f32 %v13098_v20, %v8256_v49  ;;  %1231 = vperm.xlu1 %5792, %v8097_v19   ;;  %2083 = vperm.xlu0 %5813, %v13099_v38   ;;  %v5876_v56 = vld [vmem:[%s6372_s13 + $0x150] sm:$0xff]   ;;  %v13111_v20 = vld [vmem:[#allocation28_spill] sm:$0xff] }
 0x145   : > { %v2786_v22 = vadd.f32 %v2674_v39, %v2506_v42  ;;  %v2788_v23 = vadd.f32 %v2676_v18, %v2508_v29  ;;  %v3034_v7 = vadd.f32 %v8241_v41, %v2782_v31  ;;  %v8339_v44 = vmul.f32 %v13100_v47, %v8256_v49  ;;  %v13105_v32 = vld [vmem:[#allocation74_spill] sm:$0xff]  ;;  %v13113_v47 = vld [vmem:[#allocation93_spill] sm:$0xff] }
 0x146   : > { %v3036_v26 = vadd.f32 %v8241_v41, %v2784_v5  ;;  %v8343_v3 = vmul.f32 %v13101_v62, %v8256_v49  ;;  %v13104_v60 = vand.u32 %v13102_v25, %v13103_v21  ;;  %v3359_v42 = vpack.c.bf16 %v3331_v54, %v3331_v54  ;;  %v13107_v31 = vld [vmem:[#allocation82_spill] sm:$0xff]  ;;  %v13114_v62 = vld [vmem:[#allocation41_spill] sm:$0xff] }
 0x147   : > { %v3038_v30 = vadd.f32 %v8241_v41, %v2786_v22  ;;  %v3040_v9 = vadd.f32 %v8241_v41, %v2788_v23  ;;  %v8353_v29 = vmul.f32 %v13105_v32, %v8256_v49  ;;  %v3146_v14 = vmax.f32 %v3034_v7, 0.0  ;;  %v13108_v59 = vld [vmem:[#allocation70_spill] sm:$0xff]  ;;  %v13110_v23 = vld [vmem:[#allocation12_spill] sm:$0xff]  ;;  %v13116_v32 = vld [vmem:[#allocation53_spill] sm:$0xff] }
 0x148   : > { %4126 = vmatpush2.bf16.msra.mxu1 %v13104_v60  ;;  %v3148_v39 = vmax.f32 %v3036_v26, 0.0  ;;  %v8358_v18 = vmul.f32 %v13106_v16, %v8256_v49  ;;  %v8362_v5 = vmul.f32 %v13107_v31, %v8256_v49  ;;  %5526 = vmatprep.mubr.msk.bf16.mxu0 %vm3755_vm2, %v3359_v42  ;;  %v13109_v54 = vld [vmem:[#allocation10_spill] sm:$0xff]  ;;  %v1395_v38 = vadd.f32 %v13111_v20, %v13110_v23  ;;  %v13117_v16 = vld [vmem:[#allocation71_spill] sm:$0xff] }
 0x149   : > { %4127 = vmatprep.subr.bf16.mxu1 %v12850_v15  ;;  %v3150_v41 = vmax.f32 %v3038_v30, 0.0  ;;  %v3152_v37 = vmax.f32 %v3040_v9, 0.0  ;;  %v1117_v22 = vadd.f32 %v13109_v54, %v13108_v59  ;;  %v13112_v7 = vmov 4   ;;  %v13115_v60 = vld [vmem:[#allocation94_spill] sm:$0xff]  ;;  %v13118_v31 = vld [vmem:[#allocation43_spill] sm:$0xff]  ;;  %v5877_v30 = vld [vmem:[%s6372_s13 + $0x148] sm:$0xff]  }
 0x14a   : > { %5794 = vset.pattern.permute.xlu1 %v13112_v7  ;;  %v3246_v26 = vadd.f32 %v3148_v39, %v3146_v14  ;;  %v1671_v25 = vadd.f32 %v13114_v62, %v13113_v47  ;;  %v1673_v49 = vadd.f32 %v13116_v32, %v13115_v60  ;;  %v1843_v42 = vmul.f32 %v13118_v31, %v13117_v16  ;;  %v13119_v9 = vld [vmem:[#allocation92_spill] sm:$0xff]  ;;  %v13120_v54 = vld [vmem:[#allocation31_spill] sm:$0xff]  ;;  %v8385_v39 = vld [vmem:[%s12266_s0 + $0x188] sm:$0xff]  ;;  %v8389_v60 = vpop.permute.xlu1 %1495 }
 0x14b   : > { %1511 = vperm.xlu1 %5794, %v8097_v19   ;;  %v1397_v59 = vadd.f32 %v13119_v9, %v1117_v22  ;;  %v1675_v23 = vadd.f32 %v13120_v54, %v1395_v38  ;;  %v13121_v20 = vld [vmem:[#allocation55_spill] sm:$0xff]  ;;  %13122 = vst [vmem:[#allocation107_spill] sm:$0xff] %v8385_v39  ;;  %v13123_v47 = vld [vmem:[#allocation96_spill] sm:$0xff]  ;;  %v13125_v9 = vld [vmem:[#allocation102_spill] sm:$0xff] }
 0x14c   : > { %4128 = vmatpush2.bf16.msra.mxu1 %v5876_v56  ;;  %v1845_v14 = vmul.f32 %v13121_v20, %v13117_v16  ;;  %v2119_v62 = vmul.f32 %v8385_v39, %v13123_v47  ;;  %v3274_v32 = vadd.f32 %v3246_v26, %v3150_v41  ;;  %v13124_v56 = vld [vmem:[#allocation52_spill] sm:$0xff]  ;;  %v1953_v38 = vadd.f32 %v13125_v9, %v1673_v49  ;;  %v8397_v54 = vld [vmem:[%s12266_s0 + $0x198] sm:$0xff]  ;;  %v8405_v41 = vld [vmem:[%s12266_s0 + $0x1a8] sm:$0xff] }
 0x14d   : > { %4129 = vmatprep.subr.bf16.mxu1 %v12850_v15  ;;  %v1951_v22 = vadd.f32 %v13124_v56, %v1671_v25  ;;  %13126 = vst [vmem:[#allocation109_spill] sm:$0xff] %v8397_v54  ;;  %v2121_v7 = vmul.f32 %v8397_v54, %v13123_v47  ;;  %v1677_v21 = vadd.f32 %v13127_v12, %v1397_v59  ;;  %13128 = vst [vmem:[#allocation111_spill] sm:$0xff] %v8405_v41  ;;  %v8412_v25 = vld [vmem:[%s12266_s0 + $0x1b8] sm:$0xff]  ;;  %v8416_v56 = vpop.permute.xlu0 %2983  ;;  %v13131_v12 = vmov 8   ;;  %v13132_v9 = vld [vmem:[#allocation62_spill] sm:$0xff] }
 0x14e   : > { %v1955_v2 = vadd.f32 %v1843_v42, %v1675_v23  ;;  %v2123_v26 = vmul.f32 %v8405_v41, %v13123_v47  ;;  %13129 = vst [vmem:[#allocation15_spill] sm:$0xff] %v8412_v25  ;;  %v2125_v49 = vmul.f32 %v8412_v25, %v13123_v47  ;;  %13130 = vst [vmem:[#allocation35_spill] sm:$0xff] %v8416_v56  ;;  %5815 = vset.pattern.permute.xlu0 %v13131_v12  ;;  %v13133_v25 = vld [vmem:[#allocation49_spill] sm:$0xff] }
 0x14f   : > { %v3302_v42 = vadd.f32 %v3274_v32, %v3152_v37  ;;  %v2231_v59 = vadd.f32 %v2119_v62, %v1951_v22  ;;  %v2233_v23 = vadd.f32 %v2121_v7, %v1953_v38  ;;  %v2403_v54 = vmul.f32 %v8189_v0, %v13132_v9  ;;  %1515 = vperm.xlu1 %5794, %v8253_v55   ;;  %v13134_v31 = vld [vmem:[#allocation65_spill] sm:$0xff]  ;;  %v13135_v62 = vld [vmem:[#allocation46_spill] sm:$0xff] }
 0x150   : > { %4130 = vmatpush2.bf16.msra.mxu1 %v5877_v30  ;;  %v1957_v41 = vadd.f32 %v1845_v14, %v1677_v21  ;;  %v2235_v39 = vadd.f32 %v2123_v26, %v1955_v2  ;;  %v2405_v43 = vmul.f32 %v8196_v13, %v13132_v9  ;;  %v2679_v56 = vmul.f32 %v8205_v45, %v13133_v25  ;;  %v8436_v30 = vpop.permute.xlu1 %1499  ;;  %v13136_v38 = vld [vmem:[#allocation21_spill] sm:$0xff] }
 0x151   : > { %v3330_v20 = vmul.f32 0.25, %v3302_v42  ;;  %v2511_v37 = vadd.f32 %v13134_v31, %v2231_v59  ;;  %v2513_v7 = vadd.f32 %v13135_v62, %v2233_v23  ;;  %v2681_v0 = vmul.f32 %v8212_v4, %v13133_v25  ;;  %4321 = vmatprep.subr.bf16.mxu1 %v12850_v15  ;;  %2639 = vperm.xlu0 %5815, %v7742_v53   ;;  %v5879_v31 = vld [vmem:[%s6372_s13 + $0x198] sm:$0xff]   ;;  %v13137_v4 = vld [vmem:[#allocation8_spill] sm:$0xff]  ;;  %v13141_v42 = vld [vmem:[#allocation61_spill] sm:$0xff]  ;;  %v8446_v59 = vpop.permute.xlu0 %1219 }
 0x152   : > { %v2237_v21 = vadd.f32 %v2125_v49, %v1957_v41  ;;  %v2515_v2 = vadd.f32 %v2403_v54, %v2235_v39  ;;  %v2683_v13 = vmul.f32 %v8221_v48, %v13133_v25  ;;  %v2685_v45 = vmul.f32 %v8228_v63, %v13133_v25  ;;  %v13138_v39 = vld [vmem:[#allocation11_spill] sm:$0xff]  ;;  %v13139_v54 = vld [vmem:[#allocation26_spill] sm:$0xff]  ;;  %v13140_v49 = vld [vmem:[#allocation84_spill] sm:$0xff] }
 0x153   : > { %v3358_v14 = vpack.c.bf16 %v3330_v20, %v3330_v20  ;;  %v2791_v32 = vadd.f32 %v2679_v56, %v2511_v37  ;;  %v2793_v22 = vadd.f32 %v2681_v0, %v2513_v7  ;;  %v1116_v26 = vadd.f32 %v13137_v4, %v13136_v38  ;;  %5796 = vset.pattern.permute.xlu1 %v12979_v6  ;;  %v13142_v20 = vld [vmem:[#allocation42_spill] sm:$0xff]  ;;  %v13145_v7 = vld [vmem:[#allocation47_spill] sm:$0xff]  ;;  %v8459_v4 = vld [vmem:[%s12266_s0 + $0x160] sm:$0xff] }
 0x154   : > { %v2517_v53 = vadd.f32 %v2405_v43, %v2237_v21  ;;  %v2795_v41 = vadd.f32 %v2683_v13, %v2515_v2  ;;  %v1394_v48 = vadd.f32 %v13139_v54, %v13138_v39  ;;  %v1670_v63 = vadd.f32 %v13141_v42, %v13140_v49  ;;  %1795 = vperm.xlu1 %5796, %v8253_v55   ;;  %v13143_v37 = vld [vmem:[#allocation30_spill] sm:$0xff]  ;;  %v13144_v43 = vld [vmem:[#allocation85_spill] sm:$0xff]  ;;  %v13148_v39 = vld [vmem:[#allocation32_spill] sm:$0xff] }
 0x155   : > { %4021 = vmatmul.mubr.bf16.vlgmr.msra.gmra.mxu0 %v3358_v14  ;;  %v3043_v56 = vadd.f32 %v13142_v20, %v2791_v32  ;;  %v3045_v23 = vadd.f32 %v13142_v20, %v2793_v22  ;;  %v1396_v62 = vadd.f32 %v13143_v37, %v1116_v26  ;;  %v1672_v0 = vadd.f32 %v13145_v7, %v13144_v43  ;;  %v13146_v13 = vld [vmem:[#allocation54_spill] sm:$0xff]  ;;  %v13151_v42 = vld [vmem:[#allocation80_spill] sm:$0xff]  ;;  %v8479_v37 = vpop.permute.xlu1 %1779 }
 0x156   : > { %v2797_v21 = vadd.f32 %v2685_v45, %v2517_v53  ;;  %v3047_v2 = vadd.f32 %v13142_v20, %v2795_v41  ;;  %v1674_v38 = vadd.f32 %v13146_v13, %v1394_v48  ;;  %13147 = vst [vmem:[#allocation58_spill] sm:$0xff] %v8459_v4  ;;  %v1842_v14 = vmul.f32 %v8459_v4, %v13117_v16  ;;  %v5881_v32 = vld [vmem:[%s6372_s13 + $0x190] sm:$0xff]   ;;  %v13150_v48 = vld [vmem:[#allocation51_spill] sm:$0xff]  ;;  %v8485_v7 = vld [vmem:[%s12266_s0 + $0x180] sm:$0xff] }
 0x157   : > { %4211 = vmatpush1.bf16.msra.mxu0 %v5879_v31  ;;  %v3155_v22 = vmax.f32 %v3043_v56, 0.0  ;;  %v3157_v26 = vmax.f32 %v3045_v23, 0.0  ;;  %v1676_v54 = vadd.f32 %v13148_v39, %v1396_v62  ;;  %v8468_v45 = vld [vmem:[%s12266_s0 + $0x170] sm:$0xff]  ;;  %5818 = vset.pattern.permute.xlu0 %v12850_v15  ;;  %v1950_v49 = vadd.f32 %v13150_v48, %v1670_v63  ;;  %v8477_v23 = vpop.permute.xlu0 %1227  ;;  %13152 = vst [vmem:[#allocation105_spill] sm:$0xff] %v8485_v7  ;;  %v8500_v13 = vld [vmem:[%s12266_s0 + $0x1a0] sm:$0xff] }
 0x158   : > { %13149 = vst [vmem:[#allocation103_spill] sm:$0xff] %v8468_v45  ;;  %v1844_v53 = vmul.f32 %v8468_v45, %v13117_v16  ;;  %4212 = vmatprep.subr.bf16.mxu0 %v12850_v15  ;;  %v3049_v41 = vadd.f32 %v13142_v20, %v2797_v21  ;;  %v3159_v31 = vmax.f32 %v3047_v2, 0.0  ;;  %v1952_v56 = vadd.f32 %v13151_v42, %v1672_v0  ;;  %v8493_v21 = vld [vmem:[%s12266_s0 + $0x190] sm:$0xff]  ;;  %v8520_v6 = vld [vmem:[%s12266_s0 + $0x200] sm:$0xff] }
 0x159   : > { %5797 = vset.pattern.permute.xlu1 %v13091_v51  ;;  %v3249_v62 = vadd.f32 %v3157_v26, %v3155_v22  ;;  %v1954_v16 = vadd.f32 %v1842_v14, %v1674_v38  ;;  %v2118_v63 = vmul.f32 %v8485_v7, %v13123_v47  ;;  %13153 = vst [vmem:[#allocation63_spill] sm:$0xff] %v8493_v21  ;;  %13154 = vst [vmem:[#allocation68_spill] sm:$0xff] %v8500_v13  ;;  %v8507_v14 = vld [vmem:[%s12266_s0 + $0x1b0] sm:$0xff]  ;;  %v5883_v26 = vld [vmem:[%s6372_s13 + $0x188] sm:$0xff]  }
 0x15a   : > { %v1956_v43 = vadd.f32 %v1844_v53, %v1676_v54  ;;  %2071 = vperm.xlu1 %5797, %v8097_v19   ;;  %v3161_v0 = vmax.f32 %v3049_v41, 0.0  ;;  %v2120_v2 = vmul.f32 %v8493_v21, %v13123_v47  ;;  %v2122_v38 = vmul.f32 %v8500_v13, %v13123_v47  ;;  %13155 = vst [vmem:[#allocation106_spill] sm:$0xff] %v8507_v14 }
 0x15b   : > { %v2124_v22 = vmul.f32 %v8507_v14, %v13123_v47  ;;  %4213 = vmatpush1.bf16.msra.mxu0 %v5881_v32  ;;  %v3277_v39 = vadd.f32 %v3249_v62, %v3159_v31  ;;  %v2230_v54 = vadd.f32 %v2118_v63, %v1950_v49  ;;  %v2402_v53 = vmul.f32 %v8297_v27, %v13132_v9  ;;  %v13157_v31 = vld [vmem:[#allocation64_spill] sm:$0xff] }
 0x15c   : > { %v2404_v41 = vmul.f32 %v8304_v34, %v13132_v9  ;;  %4214 = vmatprep.subr.bf16.mxu0 %v12850_v15  ;;  %v2232_v48 = vadd.f32 %v2120_v2, %v1952_v56  ;;  %v2234_v42 = vadd.f32 %v2122_v38, %v1954_v16  ;;  %13156 = vst [vmem:[#allocation108_spill] sm:$0xff] %v8520_v6  ;;  %v8528_v34 = vld [vmem:[%s12266_s0 + $0x210] sm:$0xff]  ;;  %v8535_v49 = vld [vmem:[%s12266_s0 + $0x220] sm:$0xff]  ;;  %v13160_v62 = vmov 7   ;;  %v13161_v16 = vld [vmem:[#allocation45_spill] sm:$0xff] }
 0x15d   : > { %v2236_v51 = vadd.f32 %v2124_v22, %v1956_v43  ;;  %v2678_v47 = vmul.f32 %v8520_v6, %v13133_v25  ;;  %v3305_v32 = vadd.f32 %v3277_v39, %v3161_v0  ;;  %v2510_v27 = vadd.f32 %v13157_v31, %v2230_v54  ;;  %13158 = vst [vmem:[#allocation110_spill] sm:$0xff] %v8528_v34  ;;  %v8544_v2 = vld [vmem:[%s12266_s0 + $0x230] sm:$0xff]  ;;  %v8548_v22 = vpop.permute.xlu0 %1775  ;;  %v8550_v39 = vpop.permute.xlu1 %2055  ;;  %v5885_v54 = vld [vmem:[%s6372_s13 + $0x180] sm:$0xff]  }
 0x15e   : > { %v2680_v9 = vmul.f32 %v8528_v34, %v13133_v25  ;;  %13159 = vst [vmem:[#allocation14_spill] sm:$0xff] %v8535_v49  ;;  %v2682_v56 = vmul.f32 %v8535_v49, %v13133_v25  ;;  %5799 = vset.pattern.permute.xlu1 %v13160_v62  ;;  %v2512_v43 = vadd.f32 %v13161_v16, %v2232_v48  ;;  %13162 = vst [vmem:[#allocation17_spill] sm:$0xff] %v8544_v2  ;;  %v5488_v34 = vld [vmem:[%s6367_s9 + $0xb] ss:$0 sm:$0xff] }
 0x15f   : > { %v2514_v63 = vadd.f32 %v2402_v53, %v2234_v42  ;;  %v2516_v0 = vadd.f32 %v2404_v41, %v2236_v51  ;;  %v2684_v38 = vmul.f32 %v8544_v2, %v13133_v25  ;;  %4215 = vmatpush1.bf16.msra.mxu0 %v5883_v26  ;;  %v3333_v31 = vmul.f32 0.25, %v3305_v32  ;;  %v13163_v53 = vld [vmem:[#allocation73_spill] sm:$0xff]  ;;  %2351 = vperm.xlu1 %5799, %v8097_v19   ;;  %v13165_v26 = vld [vmem:[#allocation98_spill] sm:$0xff]  ;;  %v13166_v32 = vld [vmem:[#allocation99_spill] sm:$0xff] }
 0x160   : > { %v2790_v62 = vadd.f32 %v2678_v47, %v2510_v27  ;;  %v1014_v51 = vmul.f32 %v13163_v53, %v8282_v8  ;;  %v13164_v41 = vld [vmem:[#allocation97_spill] sm:$0xff]  ;;  %4216 = vmatprep.subr.bf16.mxu0 %v12850_v15  ;;  %v2792_v25 = vadd.f32 %v2680_v9, %v2512_v43  ;;  %v1016_v2 = vmul.f32 %v13165_v26, %v8282_v8  ;;  %v13167_v53 = vld [vmem:[#allocation100_spill] sm:$0xff] }
 0x161   : > { %v1015_v48 = vmul.f32 %v13164_v41, %v8282_v8  ;;  %v2794_v42 = vadd.f32 %v2682_v56, %v2514_v63  ;;  %v2796_v16 = vadd.f32 %v2684_v38, %v2516_v0  ;;  %v3361_v49 = vpack.c.bf16 %v3333_v31, %v3333_v31  ;;  %v13168_v56 = vld [vmem:[#allocation101_spill] sm:$0xff]  ;;  %v5887_v63 = vld [vmem:[%s6372_s13 + $0x178] sm:$0xff]   ;;  %3007 = vperm.xlu0 %5818, %v5488_v34  }
 0x162   : > { %v3042_v47 = vadd.f32 %v13142_v20, %v2790_v62  ;;  %v1017_v27 = vmul.f32 %v13166_v32, %v8282_v8  ;;  %v1018_v41 = vmul.f32 %v13167_v53, %v8282_v8  ;;  %v3044_v6 = vadd.f32 %v13142_v20, %v2792_v25  ;;  %v13169_v0 = vld [vmem:[#allocation7_spill] sm:$0xff]  ;;  %v13170_v31 = vld [vmem:[#allocation9_spill] sm:$0xff]  ;;  %v5889_v53 = vld [vmem:[%s6372_s13 + $0x170] sm:$0xff]  }
 0x163   : > { %v3046_v19 = vadd.f32 %v13142_v20, %v2794_v42  ;;  %v3048_v9 = vadd.f32 %v13142_v20, %v2796_v16  ;;  %v1019_v43 = vmul.f32 %v13168_v56, %v8282_v8  ;;  %4217 = vmatpush1.bf16.msra.mxu0 %v5885_v54  ;;  %5538 = vmatprep.mubr.msk.bf16.mxu1 %vm3755_vm2, %v3361_v49  ;;  %v8583_v49 = vpop.permute.xlu0 %1783 }
 0x164   : > { %v3154_v62 = vmax.f32 %v3042_v47, 0.0  ;;  %v1020_v38 = vmul.f32 %v13169_v0, %v8282_v8  ;;  %v1021_v26 = vmul.f32 %v13170_v31, %v8282_v8  ;;  %v846_v25 = vadd.f32 %v8321_v58, %v8151_v28  ;;  %4218 = vmatprep.subr.bf16.mxu0 %v12850_v15  ;;  %v8585_v47 = vpop.permute.xlu1 %2335  ;;  %2355 = vperm.xlu1 %5799, %v8253_v55  }
 0x165   : > { %v3156_v20 = vmax.f32 %v3044_v6, 0.0  ;;  %v3158_v42 = vmax.f32 %v3046_v19, 0.0  ;;  %v3160_v16 = vmax.f32 %v3048_v9, 0.0  ;;  %v847_v54 = vadd.f32 %v8325_v33, %v8154_v61  ;;  %13171 = vst [vmem:[#allocation18_spill] sm:$0xff] %v8585_v47  ;;  %v13177_v9 = vld [vmem:[#allocation25_spill] sm:$0xff] }
 0x166   : > { %v848_v8 = vadd.f32 %v8329_v11, %v8157_v36  ;;  %v849_v28 = vadd.f32 %v8339_v44, %v8160_v57  ;;  %v850_v6 = vadd.f32 %v8343_v3, %v8168_v10  ;;  %v851_v58 = vadd.f32 %v8353_v29, %v8171_v50  ;;  %v5897_v47 = vld [vmem:[%s6372_s13 + $0x1a8] sm:$0xff]  }
 0x167   : > { %v3248_v61 = vadd.f32 %v3156_v20, %v3154_v62  ;;  %v852_v33 = vadd.f32 %v8358_v18, %v8174_v17  ;;  %v853_v32 = vadd.f32 %v8362_v5, %v8179_v24  ;;  %v1126_v34 = vadd.f32 %v1014_v51, %v846_v25  ;;  %4219 = vmatpush1.bf16.msra.mxu0 %v5887_v63  ;;  %v13172_v17 = vld [vmem:[#allocation13_spill] sm:$0xff]  ;;  %v13173_v18 = vld [vmem:[#allocation22_spill] sm:$0xff]  ;;  %v13174_v51 = vld [vmem:[#allocation23_spill] sm:$0xff] }
 0x168   : > { %v1127_v36 = vadd.f32 %v1015_v48, %v847_v54  ;;  %v1128_v11 = vadd.f32 %v1016_v2, %v848_v8  ;;  %v1129_v57 = vadd.f32 %v1017_v27, %v849_v28  ;;  %v1130_v44 = vadd.f32 %v1018_v41, %v850_v6  ;;  %4220 = vmatprep.subr.bf16.mxu0 %v12850_v15  ;;  %v13175_v48 = vld [vmem:[#allocation24_spill] sm:$0xff]  ;;  %v8613_v41 = vld [vmem:[%s6362_s29 + $0xd] ss:$0 sm:$0xff]  ;;  %v8623_v31 = vpop.permute.xlu1 %2339 }
 0x169   : > { %v3276_v10 = vadd.f32 %v3248_v61, %v3158_v42  ;;  %v1131_v3 = vadd.f32 %v1019_v43, %v851_v58  ;;  %v1132_v50 = vadd.f32 %v1020_v38, %v852_v33  ;;  %v1133_v29 = vadd.f32 %v1021_v26, %v853_v32  ;;  %5802 = vset.pattern.permute.xlu1 %v13131_v12  ;;  %v13178_v43 = vld [vmem:[#allocation27_spill] sm:$0xff]  ;;  %v13179_v62 = vld [vmem:[#allocation29_spill] sm:$0xff]  ;;  %v8621_v38 = vpop.permute.xlu0 %2059 }
 0x16a   : > { %v1294_v24 = vmul.f32 %v13172_v17, %v8446_v59  ;;  %v1295_v5 = vmul.f32 %v13173_v18, %v8446_v59  ;;  %v1296_v2 = vmul.f32 %v13174_v51, %v8446_v59  ;;  %v1297_v27 = vmul.f32 %v13175_v48, %v8446_v59  ;;  %2635 = vperm.xlu1 %5802, %v8253_v55   ;;  %v5891_v26 = vld [vmem:[%s6372_s13 + $0x168] sm:$0xff]   ;;  %v13180_v55 = vld [vmem:[#allocation83_spill] sm:$0xff] }
 0x16b   : > { %13176 = vst [vmem:[#allocation19_spill] sm:$0xff] %v8613_v41  ;;  %v3304_v19 = vadd.f32 %v3276_v10, %v3160_v16  ;;  %v1298_v56 = vmul.f32 %v13177_v9, %v8446_v59  ;;  %v1299_v63 = vmul.f32 %v13178_v43, %v8446_v59  ;;  %v1300_v0 = vmul.f32 %v13179_v62, %v8446_v59  ;;  %v5485_v58 = vld [vmem:[%s6367_s9 + $0x8] ss:$0 sm:$0xff] }
 0x16c   : > { %4221 = vmatpush1.bf16.msra.mxu0 %v5889_v53  ;;  %v1301_v25 = vmul.f32 %v13180_v55, %v8446_v59  ;;  %v8628_v20 = vadd.f32 %v1294_v24, %v1126_v34  ;;  %v8630_v42 = vadd.f32 %v1295_v5, %v1127_v36  ;;  %v8632_v16 = vadd.f32 %v1296_v2, %v1128_v11  ;;  %v5878_v34 = vld [vmem:[%s6372_s13 + $0x1f0] sm:$0xff]  }
 0x16d   : > { %4222 = vmatprep.subr.bf16.mxu0 %v12850_v15  ;;  %v3332_v54 = vmul.f32 0.25, %v3304_v19  ;;  %v8635_v8 = vadd.f32 %v1297_v27, %v1129_v57  ;;  %v8637_v28 = vadd.f32 %v1298_v56, %v1130_v44  ;;  %v8639_v6 = vadd.f32 %v1299_v63, %v1131_v3  ;;  %523 = vperm.xlu0 %5818, %v8613_v41   ;;  %v8661_v44 = vpop.permute.xlu0 %2067  ;;  %v5893_v27 = vld [vmem:[%s6372_s13 + $0x160] sm:$0xff]   ;;  %v5880_v56 = vld [vmem:[%s6372_s13 + $0x1e8] sm:$0xff]  }
 0x16e   : > { %13181 = vst [vmem:[#allocation48_spill] sm:$0xff] %v8628_v20  ;;  %13182 = vst [vmem:[#allocation90_spill] sm:$0xff] %v8632_v16  ;;  %v8643_v61 = vadd.f32 %v1300_v0, %v1132_v50  ;;  %v8645_v59 = vadd.f32 %v1301_v25, %v1133_v29  ;;  %v1286_v33 = vmul.f32 %v13172_v17, %v8332_v52  ;;  %5803 = vset.pattern.permute.xlu1 %v12850_v15  ;;  %v8735_v0 = vld [vmem:[%s12266_s0 + $0x118] sm:$0xff] }
 0x16f   : > { %13183 = vst [vmem:[#allocation33_spill] sm:$0xff] %v8637_v28  ;;  %v1287_v32 = vmul.f32 %v13173_v18, %v8332_v52  ;;  %v3360_v53 = vpack.c.bf16 %v3332_v54, %v3332_v54  ;;  %v1288_v36 = vmul.f32 %v13174_v51, %v8332_v52  ;;  %v1289_v11 = vmul.f32 %v13175_v48, %v8332_v52  ;;  %v8752_v54 = vld [vmem:[%s12266_s0 + $0x128] sm:$0xff]  ;;  %v9056_v20 = vld [vmem:[%s12266_s0 + $0x78] sm:$0xff] }
 0x170   : > { %13184 = vst [vmem:[#allocation72_spill] sm:$0xff] %v8643_v61  ;;  %v8659_v57 = vmul.f32 %v13177_v9, %v8332_v52  ;;  %13186 = vst [vmem:[#allocation37_spill] sm:$0xff] %v8661_v44  ;;  %4223 = vmatpush1.bf16.msra.mxu0 %v5891_v26  ;;  %v8665_v10 = vmul.f32 %v13178_v43, %v8332_v52  ;;  %v8669_v3 = vmul.f32 %v13179_v62, %v8332_v52  ;;  %v13215_v61 = vld [vmem:[#allocation43_spill] sm:$0xff] }
 0x171   : > { %v8673_v50 = vmul.f32 %v13180_v55, %v8332_v52  ;;  %v8677_v29 = vmul.f32 %v13172_v17, %v8477_v23  ;;  %2995 = vperm.xlu1 %5803, %v5485_v58   ;;  %4132 = vmatmul.mubr.bf16.vlgmr.msra.gmra.mxu1 %v3360_v53  ;;  %v8681_v24 = vmul.f32 %v13173_v18, %v8477_v23  ;;  %v8695_v17 = vpop.permute.xlu1 %2619 }
 0x172   : > { %13185 = vst [vmem:[#allocation44_spill] sm:$0xff] %v8659_v57  ;;  %13187 = vst [vmem:[#allocation69_spill] sm:$0xff] %v8669_v3  ;;  %v8685_v5 = vmul.f32 %v13174_v51, %v8477_v23  ;;  %v8689_v2 = vmul.f32 %v13175_v48, %v8477_v23  ;;  %v8693_v52 = vmul.f32 %v13177_v9, %v8477_v23  ;;  %v8713_v48 = vld [vmem:[%s12266_s0 + $0x100] sm:$0xff]  ;;  %4322 = vmatpush1.bf16.msra.mxu1 %v5878_v34  ;;  %v13205_v34 = vld [vmem:[#allocation38_spill] sm:$0xff] }
 0x173   : > { %13188 = vst [vmem:[#allocation74_spill] sm:$0xff] %v8673_v50  ;;  %13189 = vst [vmem:[#allocation81_spill] sm:$0xff] %v8677_v29  ;;  %v8700_v19 = vmul.f32 %v13178_v43, %v8477_v23  ;;  %v8704_v18 = vmul.f32 %v13179_v62, %v8477_v23  ;;  %v8708_v51 = vmul.f32 %v13180_v55, %v8477_v23  ;;  %v8721_v43 = vld [vmem:[%s12266_s0 + $0x108] sm:$0xff]  ;;  %v8728_v23 = vld [vmem:[%s12266_s0 + $0x110] sm:$0xff]  ;;  %4323 = vmatprep.subr.bf16.mxu1 %v12850_v15 }
 0x174   : > { %13190 = vst [vmem:[#allocation82_spill] sm:$0xff] %v8681_v24  ;;  %13191 = vst [vmem:[#allocation70_spill] sm:$0xff] %v8685_v5  ;;  %v1566_v9 = vmul.f32 %v8713_v48, %v8389_v60  ;;  %v1567_v63 = vmul.f32 %v8721_v43, %v8389_v60  ;;  %v1568_v62 = vmul.f32 %v8728_v23, %v8389_v60  ;;  %v8742_v55 = vld [vmem:[%s12266_s0 + $0x120] sm:$0xff]  ;;  %4224 = vmatprep.subr.bf16.mxu0 %v12850_v15 }
 0x175   : > { %13192 = vst [vmem:[#allocation10_spill] sm:$0xff] %v8689_v2  ;;  %13193 = vst [vmem:[#allocation12_spill] sm:$0xff] %v8693_v52  ;;  %v1569_v26 = vmul.f32 %v8735_v0, %v8389_v60  ;;  %v8746_v25 = vmul.f32 %v8742_v55, %v8389_v60  ;;  %v8756_v58 = vmul.f32 %v8752_v54, %v8389_v60  ;;  %v13208_v2 = vld [vmem:[#allocation39_spill] sm:$0xff]  ;;  %v13209_v24 = vld [vmem:[#allocation88_spill] sm:$0xff]  ;;  %4225 = vmatpush1.bf16.msra.mxu0 %v5893_v27 }
 0x176   : > { %13194 = vst [vmem:[#allocation28_spill] sm:$0xff] %v8700_v19  ;;  %13195 = vst [vmem:[#allocation93_spill] sm:$0xff] %v8704_v18  ;;  %v1118_v53 = vadd.f32 %v13205_v34, %v8126_v35  ;;  %v13206_v18 = vld [vmem:[#allocation75_spill] sm:$0xff]  ;;  %v13207_v19 = vld [vmem:[#allocation86_spill] sm:$0xff]  ;;  %v1121_v5 = vadd.f32 %v13208_v2, %v8135_v46  ;;  %v1846_v29 = vmul.f32 %v13209_v24, %v8548_v22  ;;  %v8773_v34 = vpop.permute.xlu0 %2623  ;;  %4324 = vmatpush1.bf16.msra.mxu1 %v5880_v56 }
 0x177   : > { %13196 = vst [vmem:[#allocation41_spill] sm:$0xff] %v8708_v51  ;;  %13197 = vst [vmem:[#allocation94_spill] sm:$0xff] %v8713_v48  ;;  %v1119_v51 = vadd.f32 %v13206_v18, %v8129_v1  ;;  %v1120_v52 = vadd.f32 %v13207_v19, %v8132_v40  ;;  %v13211_v57 = vld [vmem:[#allocation60_spill] sm:$0xff]  ;;  %v13213_v18 = vld [vmem:[#allocation50_spill] sm:$0xff]  ;;  %v8780_v14 = vmul.f32 %v8459_v4, %v8548_v22  ;;  %4325 = vmatprep.subr.bf16.mxu1 %v12850_v15 }
 0x178   : > { %13198 = vst [vmem:[#allocation53_spill] sm:$0xff] %v8721_v43  ;;  %13199 = vst [vmem:[#allocation71_spill] sm:$0xff] %v8728_v23  ;;  %v1848_v35 = vmul.f32 %v13211_v57, %v8548_v22  ;;  %v1398_v1 = vadd.f32 %v1286_v33, %v1118_v53  ;;  %v1849_v12 = vmul.f32 %v13213_v18, %v8548_v22  ;;  %v5882_v46 = vld [vmem:[%s6372_s13 + $0x1e0] sm:$0xff]   ;;  %4236 = vmatprep.subr.bf16.mxu0 %v12850_v15 }
 0x179   : > { %13200 = vst [vmem:[#allocation92_spill] sm:$0xff] %v8735_v0  ;;  %13201 = vst [vmem:[#allocation31_spill] sm:$0xff] %v8742_v55  ;;  %v1399_v40 = vadd.f32 %v1287_v32, %v1119_v51  ;;  %v1400_v19 = vadd.f32 %v1288_v36, %v1120_v52  ;;  %v1401_v2 = vadd.f32 %v1289_v11, %v1121_v5  ;;  %v8791_v32 = vpop.permute.xlu1 %2979  ;;  %v13219_v5 = vld [vmem:[#allocation55_spill] sm:$0xff]  ;;  %v8798_v51 = vld [vmem:[%s6362_s29 + $0xa] ss:$0 sm:$0xff] }
 0x17a   : > { %13202 = vst [vmem:[#allocation96_spill] sm:$0xff] %v8746_v25  ;;  %13203 = vst [vmem:[#allocation52_spill] sm:$0xff] %v8752_v54  ;;  %v13210_v25 = vld [vmem:[#allocation95_spill] sm:$0xff]  ;;  %v8784_v28 = vmul.f32 %v13215_v61, %v8548_v22  ;;  %v8788_v33 = vmul.f32 %v8468_v45, %v8548_v22  ;;  %v1678_v36 = vadd.f32 %v1566_v9, %v1398_v1  ;;  %511 = vperm.xlu1 %5803, %v8798_v51   ;;  %v9065_v50 = vld [vmem:[%s12266_s0 + $0x80] sm:$0xff] }
 0x17b   : > { %13204 = vst [vmem:[#allocation102_spill] sm:$0xff] %v8756_v58  ;;  %v1847_v3 = vmul.f32 %v13210_v25, %v8548_v22  ;;  %13212 = vst [vmem:[#allocation67_spill] sm:$0xff] %v8773_v34  ;;  %v1679_v52 = vadd.f32 %v1567_v63, %v1399_v40  ;;  %v1680_v11 = vadd.f32 %v1568_v62, %v1400_v19  ;;  %4326 = vmatpush1.bf16.msra.mxu1 %v5882_v46  ;;  %v5884_v1 = vld [vmem:[%s6372_s13 + $0x1d8] sm:$0xff]  }
 0x17c   : > { %13214 = vst [vmem:[#allocation62_spill] sm:$0xff] %v8780_v14  ;;  %13216 = vst [vmem:[#allocation49_spill] sm:$0xff] %v8784_v28  ;;  %v8795_v27 = vmul.f32 %v13219_v5, %v8548_v22  ;;  %v1681_v56 = vadd.f32 %v1569_v26, %v1401_v2  ;;  %v8803_v53 = vmul.f32 %v8713_v48, %v8436_v30  ;;  %4327 = vmatprep.subr.bf16.mxu1 %v12850_v15 }
 0x17d   : > { %13217 = vst [vmem:[#allocation65_spill] sm:$0xff] %v8788_v33  ;;  %13218 = vst [vmem:[#allocation46_spill] sm:$0xff] %v8791_v32  ;;  %v8807_v34 = vmul.f32 %v8721_v43, %v8436_v30  ;;  %v8811_v9 = vmul.f32 %v8728_v23, %v8436_v30  ;;  %v8814_v22 = vadd.f32 %v1846_v29, %v1678_v36  ;;  %v13252_v23 = vmov 2   ;;  %v13259_v33 = vld [vmem:[#allocation59_spill] sm:$0xff] }
 0x17e   : > { %13220 = vst [vmem:[#allocation21_spill] sm:$0xff] %v8795_v27  ;;  %13221 = vst [vmem:[#allocation8_spill] sm:$0xff] %v8803_v53  ;;  %v8816_v63 = vadd.f32 %v1847_v3, %v1679_v52  ;;  %v8818_v62 = vadd.f32 %v1848_v35, %v1680_v11  ;;  %v8822_v26 = vmul.f32 %v8735_v0, %v8436_v30  ;;  %v500_v35 = vpop.permute.xlu0 %499  ;;  %5820 = vset.pattern.permute.xlu0 %v13252_v23 }
 0x17f   : > { %13222 = vst [vmem:[#allocation11_spill] sm:$0xff] %v8811_v9  ;;  %13223 = vst [vmem:[#allocation26_spill] sm:$0xff] %v8814_v22  ;;  %v8825_v40 = vadd.f32 %v1849_v12, %v1681_v56  ;;  %v8829_v19 = vmul.f32 %v8742_v55, %v8436_v30  ;;  %v8833_v29 = vmul.f32 %v8752_v54, %v8436_v30  ;;  %v496_v56 = vpop.permute.xlu1 %495  ;;  %4328 = vmatpush1.bf16.msra.mxu1 %v5884_v1  ;;  %v13248_v1 = vld [vmem:[#allocation111_spill] sm:$0xff]  ;;  %v8966_v22 = vld [vmem:[%s6362_s29 + $0xb] ss:$0 sm:$0xff] }
 0x180   : > { %13224 = vst [vmem:[#allocation84_spill] sm:$0xff] %v8816_v63  ;;  %13225 = vst [vmem:[#allocation61_spill] sm:$0xff] %v8818_v62  ;;  %v8837_v3 = vmul.f32 %v13209_v24, %v8583_v49  ;;  %v8842_v46 = vmul.f32 %v13210_v25, %v8583_v49  ;;  %v8846_v12 = vmul.f32 %v13211_v57, %v8583_v49  ;;  %v13233_v24 = vmov 1   ;;  %4329 = vmatprep.subr.bf16.mxu1 %v12850_v15  ;;  %v8961_v62 = vld [vmem:[%s6372_s13 + $0x208] sm:$0x1f]   ;;  %v9050_v9 = vld [vmem:[%s12266_s0 + $0x70] sm:$0xff] }
 0x181   : > { %13226 = vst [vmem:[#allocation42_spill] sm:$0xff] %v8825_v40  ;;  %13227 = vst [vmem:[#allocation30_spill] sm:$0xff] %v8829_v19  ;;  %v8850_v2 = vmul.f32 %v13213_v18, %v8583_v49  ;;  %v8854_v36 = vmul.f32 %v8459_v4, %v8583_v49  ;;  %5804 = vset.pattern.permute.xlu1 %v13233_v24  ;;  %v8859_v52 = vmul.f32 %v13215_v61, %v8583_v49  ;;  %v8872_v18 = vld [vmem:[%s12266_s0 + $0x140] sm:$0xff]  ;;  %v8882_v61 = vld [vmem:[%s12266_s0 + $0x148] sm:$0xff] }
 0x182   : > { %13228 = vst [vmem:[#allocation85_spill] sm:$0xff] %v8837_v3  ;;  %13229 = vst [vmem:[#allocation47_spill] sm:$0xff] %v8842_v46  ;;  %v8863_v25 = vmul.f32 %v8468_v45, %v8583_v49  ;;  %v8867_v57 = vmul.f32 %v13219_v5, %v8583_v49  ;;  %v8876_v11 = vmul.f32 %v8872_v18, %v8479_v37  ;;  %679 = vperm.xlu1 %5804, %v8798_v51   ;;  %v8891_v5 = vld [vmem:[%s12266_s0 + $0x150] sm:$0xff]  ;;  %v9038_v4 = vld [vmem:[%s12266_s0 + $0x60] sm:$0xff] }
 0x183   : > { %13230 = vst [vmem:[#allocation54_spill] sm:$0xff] %v8846_v12  ;;  %13231 = vst [vmem:[#allocation32_spill] sm:$0xff] %v8850_v2  ;;  %v8886_v49 = vmul.f32 %v8882_v61, %v8479_v37  ;;  %v8908_v3 = vmul.f32 %v8485_v7, %v8621_v38  ;;  %v8917_v46 = vmul.f32 %v8493_v21, %v8621_v38  ;;  %v9044_v19 = vld [vmem:[%s12266_s0 + $0x68] sm:$0xff] }
 0x184   : > { %13232 = vst [vmem:[#allocation51_spill] sm:$0xff] %v8854_v36  ;;  %13234 = vst [vmem:[#allocation80_spill] sm:$0xff] %v8859_v52  ;;  %v8900_v36 = vld [vmem:[%s12266_s0 + $0x158] sm:$0xff]  ;;  %v8934_v54 = vmul.f32 %v8485_v7, %v8661_v44  ;;  %v8942_v0 = vmul.f32 %v8493_v21, %v8661_v44  ;;  %v8951_v48 = vmul.f32 %v8500_v13, %v8661_v44  ;;  %v13267_v7 = vld [vmem:[#allocation77_spill] sm:$0xff] }
 0x185   : > { %13235 = vst [vmem:[#allocation64_spill] sm:$0xff] %v8863_v25  ;;  %13236 = vst [vmem:[#allocation45_spill] sm:$0xff] %v8867_v57  ;;  %v8895_v25 = vmul.f32 %v8891_v5, %v8479_v37  ;;  %v8904_v12 = vmul.f32 %v8900_v36, %v8479_v37  ;;  %v5886_v57 = vld [vmem:[%s6372_s13 + $0x1d0] sm:$0xff]   ;;  %v13244_v52 = vld [vmem:[#allocation107_spill] sm:$0xff] }
 0x186   : > { %13237 = vst [vmem:[#allocation73_spill] sm:$0xff] %v8872_v18  ;;  %13238 = vst [vmem:[#allocation97_spill] sm:$0xff] %v8876_v11  ;;  %v8913_v2 = vmul.f32 %v13244_v52, %v8621_v38  ;;  %v8930_v18 = vmul.f32 %v13248_v1, %v8621_v38  ;;  %v8938_v55 = vmul.f32 %v13244_v52, %v8661_v44  ;;  %683 = vperm.xlu1 %5804, %v8966_v22  }
 0x187   : > { %13239 = vst [vmem:[#allocation98_spill] sm:$0xff] %v8882_v61  ;;  %13240 = vst [vmem:[#allocation99_spill] sm:$0xff] %v8891_v5  ;;  %v13246_v5 = vld [vmem:[#allocation109_spill] sm:$0xff]  ;;  %v8925_v61 = vmul.f32 %v8500_v13, %v8621_v38  ;;  %4330 = vmatpush1.bf16.msra.mxu1 %v5886_v57  ;;  %v13261_v13 = vld [vmem:[#allocation66_spill] sm:$0xff] }
 0x188   : > { %13241 = vst [vmem:[#allocation100_spill] sm:$0xff] %v8895_v25  ;;  %13242 = vst [vmem:[#allocation101_spill] sm:$0xff] %v8900_v36  ;;  %v8921_v36 = vmul.f32 %v13246_v5, %v8621_v38  ;;  %v8947_v43 = vmul.f32 %v13246_v5, %v8661_v44  ;;  %4331 = vmatprep.subr.bf16.mxu1 %v12850_v15  ;;  %v13269_v57 = vld [vmem:[#allocation78_spill] sm:$0xff]  ;;  %v664_v25 = vpop.permute.xlu1 %663  ;;  %v576_v11 = vmul.f32 %v13261_v13, %v496_v56  ;;  %v5892_v5 = vld [vmem:[%s6372_s13 + $0x1b8] sm:$0xff]  }
 0x189   : > { %13243 = vst [vmem:[#allocation7_spill] sm:$0xff] %v8908_v3  ;;  %13245 = vst [vmem:[#allocation9_spill] sm:$0xff] %v8917_v46  ;;  %v8988_v46 = vmul.f32 %v13269_v57, %v500_v35  ;;  %v13271_v3 = vld [vmem:[#allocation79_spill] sm:$0xff]  ;;  %v747_v32 = vmul.f32 %v9044_v19, %v664_v25  ;;  %v748_v16 = vmul.f32 %v9050_v9, %v664_v25 }
 0x18a   : > { %13247 = vst [vmem:[#allocation13_spill] sm:$0xff] %v8925_v61  ;;  %13249 = vst [vmem:[#allocation22_spill] sm:$0xff] %v8934_v54  ;;  %v8955_v54 = vmul.f32 %v13248_v1, %v8661_v44  ;;  %v8974_v44 = vmul.f32 %v13261_v13, %v500_v35  ;;  %v8985_v61 = vmul.f32 %v13267_v7, %v500_v35  ;;  %5806 = vset.pattern.permute.xlu1 %v13252_v23 }
 0x18b   : > { %13250 = vst [vmem:[#allocation23_spill] sm:$0xff] %v8938_v55  ;;  %13251 = vst [vmem:[#allocation24_spill] sm:$0xff] %v8942_v0  ;;  %v13256_v55 = vld [vmem:[#allocation56_spill] sm:$0xff]  ;;  %v8963_v0 = vpop.permute.xlu0 %2991  ;;  %v746_v23 = vmul.f32 %v9038_v4, %v664_v25  ;;  %963 = vperm.xlu1 %5806, %v8966_v22  }
 0x18c   : > { %13253 = vst [vmem:[#allocation25_spill] sm:$0xff] %v8947_v43  ;;  %13254 = vst [vmem:[#allocation27_spill] sm:$0xff] %v8951_v48  ;;  %v8958_v24 = vmul.f32 %v13256_v55, %v500_v35  ;;  %v5888_v43 = vld [vmem:[%s6372_s13 + $0x1c8] sm:$0xff]   ;;  %v8971_v48 = vmul.f32 %v13259_v33, %v500_v35 }
 0x18d   : > { %13255 = vst [vmem:[#allocation29_spill] sm:$0xff] %v8955_v54  ;;  %13258 = vst [vmem:[#allocation38_spill] sm:$0xff] %v8963_v0  ;;  %v13263_v54 = vld [vmem:[#allocation76_spill] sm:$0xff]  ;;  %v5895_v0 = vld [vmem:[%s6372_s13 + $0x1b0] sm:$0x1f]   ;;  %4332 = vmatpush1.bf16.msra.mxu1 %v5888_v43 }
 0x18e   : > { %13257 = vst [vmem:[#allocation83_spill] sm:$0xff] %v8958_v24  ;;  %13260 = vst [vmem:[#allocation75_spill] sm:$0xff] %v8971_v48  ;;  %v8977_v14 = vmul.f32 %v13263_v54, %v500_v35  ;;  %v13265_v24 = vld [vmem:[#allocation20_spill] sm:$0xff]  ;;  %v8991_v48 = vmul.f32 %v13271_v3, %v500_v35  ;;  %v577_v45 = vmul.f32 %v13263_v54, %v496_v56  ;;  %v9025_v43 = vld [vmem:[%s12266_s0 + $0x50] sm:$0xff]  ;;  %4333 = vmatprep.subr.bf16.mxu1 %v12850_v15 }
 0x18f   : > { %13262 = vst [vmem:[#allocation86_spill] sm:$0xff] %v8974_v44  ;;  %v8980_v21 = vmul.f32 %v13265_v24, %v500_v35  ;;  %13268 = vst [vmem:[#allocation95_spill] sm:$0xff] %v8985_v61  ;;  %v574_v44 = vmul.f32 %v13256_v55, %v496_v56  ;;  %v578_v61 = vmul.f32 %v13265_v24, %v496_v56  ;;  %v13274_v55 = vld [vmem:[#allocation6_spill] sm:$0xff]  ;;  %v9013_v54 = vld [vmem:[%s12266_s0 + $0x40] sm:$0xff]  ;;  %v944_v53 = vpop.permute.xlu0 %943 }
 0x190   : > { %13264 = vst [vmem:[#allocation39_spill] sm:$0xff] %v8977_v14  ;;  %13270 = vst [vmem:[#allocation60_spill] sm:$0xff] %v8988_v46  ;;  %v8995_v14 = vld [vmem:[%s6362_s29 + $0xc] ss:$0 sm:$0xff]  ;;  %v579_v46 = vmul.f32 %v13267_v7, %v496_v56  ;;  %v580_v35 = vmul.f32 %v13269_v57, %v496_v56  ;;  %v4208_v13 = vand.u32 %v5895_v0, %v13274_v55 }
 0x191   : > { %13266 = vst [vmem:[#allocation88_spill] sm:$0xff] %v8980_v21  ;;  %13272 = vst [vmem:[#allocation50_spill] sm:$0xff] %v8991_v48  ;;  %v575_v21 = vmul.f32 %v13259_v33, %v496_v56  ;;  %967 = vperm.xlu0 %5820, %v8995_v14   ;;  %v581_v48 = vmul.f32 %v13271_v3, %v496_v56  ;;  %v5890_v33 = vld [vmem:[%s6372_s13 + $0x1c0] sm:$0xff]   ;;  %v742_v7 = vmul.f32 %v9013_v54, %v664_v25  ;;  %v9019_v3 = vld [vmem:[%s12266_s0 + $0x48] sm:$0xff] }
 0x192   : > { %13273 = vst [vmem:[#allocation43_spill] sm:$0xff] %v8995_v14  ;;  %13275 = vst [vmem:[#allocation55_spill] sm:$0xff] %v9013_v54  ;;  %v743_v24 = vmul.f32 %v9019_v3, %v664_v25  ;;  %v744_v0 = vmul.f32 %v9025_v43, %v664_v25  ;;  %v9032_v56 = vld [vmem:[%s12266_s0 + $0x58] sm:$0xff]  ;;  %4237 = vmatpush2.bf16.msra.mxu0 %v4208_v13  ;;  %v749_v14 = vmul.f32 %v9056_v20, %v664_v25 }
 0x193   : > { %13276 = vst [vmem:[#allocation107_spill] sm:$0xff] %v9019_v3  ;;  %13277 = vst [vmem:[#allocation56_spill] sm:$0xff] %v9025_v43  ;;  %v745_v57 = vmul.f32 %v9032_v56, %v664_v25  ;;  %v854_v40 = vadd.f32 %v742_v7, %v574_v44  ;;  %4238 = vmatprep.subr.bf16.mxu0 %v12850_v15  ;;  %v858_v63 = vadd.f32 %v746_v23, %v578_v61  ;;  %v9084_v44 = vld [vmem:[%s12266_s0 + $0x98] sm:$0xff]  ;;  %v9090_v23 = vld [vmem:[%s12266_s0 + $0xa0] sm:$0xff] }
 0x194   : > { %13278 = vst [vmem:[#allocation59_spill] sm:$0xff] %v9032_v56  ;;  %13279 = vst [vmem:[#allocation66_spill] sm:$0xff] %v9038_v4  ;;  %v855_v27 = vadd.f32 %v743_v24, %v575_v21  ;;  %v856_v41 = vadd.f32 %v744_v0, %v576_v11  ;;  %v859_v58 = vadd.f32 %v747_v32, %v579_v46  ;;  %4334 = vmatpush1.bf16.msra.mxu1 %v5890_v33  ;;  %v9071_v21 = vld [vmem:[%s12266_s0 + $0x88] sm:$0xff]  ;;  %v9102_v61 = vld [vmem:[%s12266_s0 + $0xb0] sm:$0xff]  ;;  %v668_v33 = vpop.permute.xlu1 %667 }
 0x195   : > { %13280 = vst [vmem:[#allocation76_spill] sm:$0xff] %v9044_v19  ;;  %13281 = vst [vmem:[#allocation20_spill] sm:$0xff] %v9050_v9  ;;  %v857_v28 = vadd.f32 %v745_v57, %v577_v45  ;;  %v860_v1 = vadd.f32 %v748_v16, %v580_v35  ;;  %v861_v13 = vadd.f32 %v749_v14, %v581_v48  ;;  %v9077_v16 = vld [vmem:[%s12266_s0 + $0x90] sm:$0xff]  ;;  %4335 = vmatprep.subr.bf16.mxu1 %v12850_v15  ;;  %v9096_v46 = vld [vmem:[%s12266_s0 + $0xa8] sm:$0xff] }
 0x196   : > { %13282 = vst [vmem:[#allocation77_spill] sm:$0xff] %v9056_v20  ;;  %v1022_v25 = vmul.f32 %v9065_v50, %v944_v53  ;;  %13283 = vst [vmem:[#allocation78_spill] sm:$0xff] %v9071_v21  ;;  %v1023_v45 = vmul.f32 %v9071_v21, %v944_v53  ;;  %v1024_v14 = vmul.f32 %v9077_v16, %v944_v53  ;;  %4239 = vmatpush2.bf16.msra.mxu0 %v5897_v47  ;;  %v9108_v7 = vld [vmem:[%s12266_s0 + $0xb8] sm:$0xff] }
 0x197   : > { %13284 = vst [vmem:[#allocation79_spill] sm:$0xff] %v9077_v16  ;;  %13285 = vst [vmem:[#allocation112_spill] sm:$0xff] %v9084_v44  ;;  %v1025_v48 = vmul.f32 %v9084_v44, %v944_v53  ;;  %v1026_v32 = vmul.f32 %v9090_v23, %v944_v53  ;;  %v1027_v11 = vmul.f32 %v9096_v46, %v944_v53  ;;  %4240 = vmatprep.subr.bf16.mxu0 %v12850_v15 }
 0x198   : > { %13286 = vst [vmem:[#allocation113_spill] sm:$0xff] %v9090_v23  ;;  %13287 = vst [vmem:[#allocation114_spill] sm:$0xff] %v9096_v46  ;;  %v1028_v35 = vmul.f32 %v9102_v61, %v944_v53  ;;  %v1029_v24 = vmul.f32 %v9108_v7, %v944_v53  ;;  %v9111_v0 = vadd.f32 %v1022_v25, %v854_v40  ;;  %v5899_v23 = vld [vmem:[%s6372_s13 + $0x1a0] sm:$0xff]   ;;  %4336 = vmatpush1.bf16.msra.mxu1 %v5892_v5 }
 0x199   : > { %13288 = vst [vmem:[#allocation115_spill] sm:$0xff] %v9102_v61  ;;  %v9113_v57 = vadd.f32 %v1023_v45, %v855_v27  ;;  %v9115_v46 = vadd.f32 %v1024_v14, %v856_v41  ;;  %v9118_v44 = vadd.f32 %v1025_v48, %v857_v28  ;;  %v9120_v16 = vadd.f32 %v1026_v32, %v858_v63  ;;  %v9170_v48 = vld [vmem:[%s12266_s0 + $0x168] sm:$0xff]  ;;  %v9177_v32 = vld [vmem:[%s12266_s0 + $0x178] sm:$0xff] }
 0x19a   : > { %v9122_v61 = vadd.f32 %v1027_v11, %v859_v58  ;;  %v9124_v47 = vadd.f32 %v1028_v35, %v860_v1  ;;  %v9127_v21 = vadd.f32 %v1029_v24, %v861_v13  ;;  %v9130_v53 = vmul.f32 %v9013_v54, %v668_v33  ;;  %4347 = vmatprep.subr.bf16.mxu1 %v12850_v15  ;;  %v9157_v1 = vld [vmem:[%s12266_s0 + $0x138] sm:$0xff] }
 0x19b   : > { %13289 = vst [vmem:[#allocation116_spill] sm:$0xff] %v9118_v44  ;;  %13290 = vst [vmem:[#allocation117_spill] sm:$0xff] %v9120_v16  ;;  %v9133_v41 = vmul.f32 %v9019_v3, %v668_v33  ;;  %v9136_v28 = vmul.f32 %v9025_v43, %v668_v33  ;;  %v9140_v58 = vmul.f32 %v9032_v56, %v668_v33  ;;  %4241 = vmatpush2.bf16.msra.mxu0 %v5899_v23  ;;  %v13307_v3 = vld [vmem:[#allocation57_spill] sm:$0xff]  ;;  %v13308_v54 = vld [vmem:[#allocation87_spill] sm:$0xff] }
 0x19c   : > { %13291 = vst [vmem:[#allocation118_spill] sm:$0xff] %v9122_v61  ;;  %13292 = vst [vmem:[#allocation119_spill] sm:$0xff] %v9124_v47  ;;  %v9143_v27 = vmul.f32 %v9038_v4, %v668_v33  ;;  %v9146_v63 = vmul.f32 %v9044_v19, %v668_v33  ;;  %v9149_v40 = vmul.f32 %v9050_v9, %v668_v33  ;;  %4432 = vmatprep.subr.bf16.mxu0 %v12850_v15 }
 0x19d   : > { %13293 = vst [vmem:[#allocation120_spill] sm:$0xff] %v9127_v21  ;;  %v9152_v5 = vmul.f32 %v9056_v20, %v668_v33  ;;  %v1581_v13 = vmul.f32 %v9157_v1, %v8436_v30  ;;  %v1687_v25 = vadd.f32 %v8807_v34, %v8630_v42  ;;  %v1689_v45 = vadd.f32 %v8822_v26, %v8635_v8  ;;  %v13296_v8 = vld [vmem:[#allocation15_spill] sm:$0xff]  ;;  %v5896_v26 = vld [vmem:[%s6372_s13 + $0x200] sm:$0xff]   ;;  %v9194_v33 = vld [vmem:[%s12266_s0 + $0x1c8] sm:$0xff] }
 0x19e   : > { %v1691_v14 = vadd.f32 %v8833_v29, %v8639_v6  ;;  %13294 = vst [vmem:[#allocation121_spill] sm:$0xff] %v9170_v48  ;;  %v1859_v23 = vmul.f32 %v9170_v48, %v8479_v37  ;;  %13295 = vst [vmem:[#allocation122_spill] sm:$0xff] %v9177_v32  ;;  %v1861_v42 = vmul.f32 %v9177_v32, %v8479_v37  ;;  %v13309_v48 = vld [vmem:[#allocation104_spill] sm:$0xff]  ;;  %v13310_v21 = vld [vmem:[#allocation34_spill] sm:$0xff] }
 0x19f   : > { %v2141_v34 = vmul.f32 %v13296_v8, %v8621_v38  ;;  %v13297_v6 = vand.u32 %v8961_v62, %v13274_v55  ;;  %v1693_v29 = vadd.f32 %v1581_v13, %v8645_v59  ;;  %v1967_v11 = vadd.f32 %v8886_v49, %v1687_v25  ;;  %13298 = vst [vmem:[#allocation15_spill] sm:$0xff] %v9194_v33  ;;  %v9202_v62 = vld [vmem:[%s12266_s0 + $0x1d8] sm:$0xff] }
 0x1a0   : > { %v1969_v35 = vadd.f32 %v8904_v12, %v1689_v45  ;;  %v2415_v24 = vmul.f32 %v9194_v33, %v8623_v31  ;;  %v1971_v20 = vadd.f32 %v1859_v23, %v1691_v14  ;;  %13299 = vst [vmem:[#allocation123_spill] sm:$0xff] %v9202_v62  ;;  %v2417_v59 = vmul.f32 %v9202_v62, %v8623_v31  ;;  %v9209_v12 = vld [vmem:[%s12266_s0 + $0x1e8] sm:$0xff]  ;;  %v9216_v13 = vld [vmem:[%s12266_s0 + $0x1f8] sm:$0xff] }
 0x1a1   : > { %4348 = vmatpush2.bf16.msra.mxu1 %v13297_v6  ;;  %13300 = vst [vmem:[#allocation124_spill] sm:$0xff] %v9209_v12  ;;  %v2419_v49 = vmul.f32 %v9209_v12, %v8623_v31  ;;  %13301 = vst [vmem:[#allocation125_spill] sm:$0xff] %v9216_v13  ;;  %v2421_v25 = vmul.f32 %v9216_v13, %v8623_v31  ;;  %v1973_v45 = vadd.f32 %v1861_v42, %v1693_v29  ;;  %v9225_v6 = vld [vmem:[%s12266_s0 + $0x208] sm:$0xff]  ;;  %v9234_v42 = vld [vmem:[%s12266_s0 + $0x218] sm:$0xff] }
 0x1a2   : > { %4349 = vmatprep.subr.bf16.mxu1 %v12850_v15  ;;  %v2247_v14 = vadd.f32 %v8913_v2, %v1967_v11  ;;  %v2249_v23 = vadd.f32 %v8921_v36, %v1969_v35  ;;  %13302 = vst [vmem:[#allocation126_spill] sm:$0xff] %v9225_v6  ;;  %v2695_v9 = vmul.f32 %v9225_v6, %v8695_v17  ;;  %13303 = vst [vmem:[#allocation127_spill] sm:$0xff] %v9234_v42  ;;  %v9241_v36 = vld [vmem:[%s12266_s0 + $0x228] sm:$0xff]  ;;  %v13306_v11 = vmov 3   ;;  %v5898_v35 = vld [vmem:[%s6372_s13 + $0x1f8] sm:$0xff]  }
 0x1a3   : > { %v2251_v19 = vadd.f32 %v8930_v18, %v1971_v20  ;;  %v2697_v2 = vmul.f32 %v9234_v42, %v8695_v17  ;;  %13304 = vst [vmem:[#allocation128_spill] sm:$0xff] %v9241_v36  ;;  %v2699_v29 = vmul.f32 %v9241_v36, %v8695_v17  ;;  %v9248_v20 = vld [vmem:[%s12266_s0 + $0x238] sm:$0xff]  ;;  %5807 = vset.pattern.permute.xlu1 %v13306_v11 }
 0x1a4   : > { %13305 = vst [vmem:[#allocation129_spill] sm:$0xff] %v9248_v20  ;;  %v2701_v18 = vmul.f32 %v9248_v20, %v8695_v17  ;;  %v2253_v4 = vadd.f32 %v2141_v34, %v1973_v45  ;;  %v2527_v56 = vadd.f32 %v2415_v24, %v2247_v14  ;;  %v2529_v43 = vadd.f32 %v2417_v59, %v2249_v23  ;;  %v13316_v45 = vld [vmem:[#allocation84_spill] sm:$0xff] }
 0x1a5   : > { %4350 = vmatpush2.bf16.msra.mxu1 %v5896_v26  ;;  %v1123_v55 = vadd.f32 %v13308_v54, %v13307_v3  ;;  %v2531_v32 = vadd.f32 %v2419_v49, %v2251_v19  ;;  %v1125_v47 = vadd.f32 %v13310_v21, %v13309_v48  ;;  %v1573_v61 = vmul.f32 %v9157_v1, %v8389_v60  ;;  %v13311_v3 = vld [vmem:[#allocation74_spill] sm:$0xff]  ;;  %v13312_v19 = vld [vmem:[#allocation109_spill] sm:$0xff]  ;;  %v13313_v21 = vld [vmem:[#allocation111_spill] sm:$0xff] }
 0x1a6   : > { %4351 = vmatprep.subr.bf16.mxu1 %v12850_v15  ;;  %v2127_v16 = vmul.f32 %v13244_v52, %v8550_v39  ;;  %v2533_v26 = vadd.f32 %v2421_v25, %v2253_v4  ;;  %v2807_v44 = vadd.f32 %v2695_v9, %v2527_v56  ;;  %v2809_v34 = vadd.f32 %v2697_v2, %v2529_v43  ;;  %v13314_v4 = vld [vmem:[#allocation35_spill] sm:$0xff]  ;;  %v9274_v56 = vpop.permute.xlu1 %947 }
 0x1a7   : > { %v1403_v24 = vadd.f32 %v8665_v10, %v1123_v55  ;;  %1239 = vperm.xlu1 %5807, %v8798_v51   ;;  %v2811_v54 = vadd.f32 %v2699_v29, %v2531_v32  ;;  %v1405_v59 = vadd.f32 %v13311_v3, %v1125_v47  ;;  %v2129_v49 = vmul.f32 %v13312_v19, %v8550_v39  ;;  %v13315_v10 = vld [vmem:[#allocation102_spill] sm:$0xff]  ;;  %v13317_v29 = vld [vmem:[#allocation49_spill] sm:$0xff] }
 0x1a8   : > { %v2131_v48 = vmul.f32 %v13313_v21, %v8550_v39  ;;  %5823 = vset.pattern.permute.xlu0 %v13306_v11  ;;  %v2813_v52 = vadd.f32 %v2701_v18, %v2533_v26  ;;  %v3059_v9 = vadd.f32 %v13314_v4, %v2807_v44  ;;  %v3061_v43 = vadd.f32 %v13314_v4, %v2809_v34  ;;  %v13319_v26 = vld [vmem:[#allocation19_spill] sm:$0xff] }
 0x1a9   : > { %4352 = vmatpush2.bf16.msra.mxu1 %v5898_v35  ;;  %v1683_v55 = vadd.f32 %v13315_v10, %v1403_v24  ;;  %v3063_v47 = vadd.f32 %v13314_v4, %v2811_v54  ;;  %v1685_v32 = vadd.f32 %v1573_v61, %v1405_v59  ;;  %v2133_v25 = vmul.f32 %v13296_v8, %v8550_v39  ;;  %v13320_v24 = vld [vmem:[#allocation21_spill] sm:$0xff]  ;;  %v13321_v54 = vld [vmem:[#allocation42_spill] sm:$0xff] }
 0x1aa   : > { %v2239_v14 = vadd.f32 %v2127_v16, %v13316_v45  ;;  %4543 = vmatprep.subr.bf16.mxu1 %v12850_v15  ;;  %v3065_v23 = vadd.f32 %v13314_v4, %v2813_v52  ;;  %v3171_v2 = vmax.f32 %v3059_v9, 0.0  ;;  %v3173_v44 = vmax.f32 %v3061_v43, 0.0  ;;  %1251 = vperm.xlu0 %5823, %v13319_v26   ;;  %v13322_v8 = vld [vmem:[#allocation18_spill] sm:$0xff] }
 0x1ab   : > { %v1963_v18 = vadd.f32 %v13317_v29, %v1683_v55  ;;  %v13318_v35 = vmov 4   ;;  %v3175_v34 = vmax.f32 %v3063_v47, 0.0  ;;  %v1965_v61 = vadd.f32 %v13320_v24, %v1685_v32  ;;  %v13323_v32 = vld [vmem:[#allocation40_spill] sm:$0xff] }
 0x1ac   : > { %5809 = vset.pattern.permute.xlu1 %v13318_v35  ;;  %v2241_v3 = vadd.f32 %v2129_v49, %v13321_v54  ;;  %v2407_v16 = vmul.f32 %v9194_v33, %v13322_v8  ;;  %v3177_v59 = vmax.f32 %v3065_v23, 0.0  ;;  %v3253_v19 = vadd.f32 %v3173_v44, %v3171_v2  ;;  %v13332_v35 = vld [vmem:[#allocation30_spill] sm:$0xff]  ;;  %v13354_v33 = vld [vmem:[#allocation44_spill] sm:$0xff] }
 0x1ad   : > { %1519 = vperm.xlu1 %5809, %v8798_v51   ;;  %v2243_v21 = vadd.f32 %v2131_v48, %v1963_v18  ;;  %v2409_v52 = vmul.f32 %v9202_v62, %v13322_v8  ;;  %v2245_v9 = vadd.f32 %v2133_v25, %v1965_v61  ;;  %v2411_v43 = vmul.f32 %v9209_v12, %v13322_v8  ;;  %v9300_v48 = vpop.permute.xlu1 %1223  ;;  %v9311_v61 = vld [vmem:[%s12266_s0 + $0x130] sm:$0xff] }
 0x1ae   : > { %v2413_v10 = vmul.f32 %v9216_v13, %v13322_v8  ;;  %v2519_v55 = vadd.f32 %v2407_v16, %v2239_v14  ;;  %v3281_v49 = vadd.f32 %v3253_v19, %v3175_v34  ;;  %v2687_v45 = vmul.f32 %v9225_v6, %v13323_v32  ;;  %v13353_v6 = vld [vmem:[#allocation89_spill] sm:$0xff] }
 0x1af   : > { %v2521_v47 = vadd.f32 %v2409_v52, %v2241_v3  ;;  %v2689_v23 = vmul.f32 %v9234_v42, %v13323_v32  ;;  %v13324_v2 = vmov 5   ;;  %v2523_v25 = vadd.f32 %v2411_v43, %v2243_v21  ;;  %v13325_v3 = vld [vmem:[#allocation43_spill] sm:$0xff]  ;;  %v13326_v21 = vld [vmem:[#allocation48_spill] sm:$0xff]  ;;  %v13328_v43 = vld [vmem:[#allocation90_spill] sm:$0xff] }
 0x1b0   : > { %5825 = vset.pattern.permute.xlu0 %v13324_v2  ;;  %v2525_v44 = vadd.f32 %v2413_v10, %v2245_v9  ;;  %v2691_v29 = vmul.f32 %v9241_v36, %v13323_v32  ;;  %v2693_v14 = vmul.f32 %v9248_v20, %v13323_v32  ;;  %v3309_v18 = vadd.f32 %v3281_v49, %v3177_v59  ;;  %v13327_v52 = vld [vmem:[#allocation8_spill] sm:$0xff]  ;;  %v13329_v10 = vld [vmem:[#allocation11_spill] sm:$0xff]  ;;  %v13330_v49 = vld [vmem:[#allocation46_spill] sm:$0xff] }
 0x1b1   : > { %1523 = vperm.xlu1 %5809, %v8966_v22   ;;  %v2799_v34 = vadd.f32 %v2687_v45, %v2519_v55  ;;  %v2801_v24 = vadd.f32 %v2689_v23, %v2521_v47  ;;  %v1580_v54 = vmul.f32 %v9311_v61, %v8436_v30  ;;  %1807 = vperm.xlu0 %5825, %v13325_v3   ;;  %v13331_v23 = vld [vmem:[#allocation33_spill] sm:$0xff] }
 0x1b2   : > { %v2803_v16 = vadd.f32 %v2691_v29, %v2523_v25  ;;  %v2805_v19 = vadd.f32 %v2693_v14, %v2525_v44  ;;  %v1686_v9 = vadd.f32 %v13327_v52, %v13326_v21  ;;  %v1688_v59 = vadd.f32 %v13329_v10, %v13328_v43  ;;  %v13333_v25 = vld [vmem:[#allocation72_spill] sm:$0xff]  ;;  %v13334_v29 = vld [vmem:[#allocation58_spill] sm:$0xff]  ;;  %v9332_v43 = vpop.permute.xlu1 %1503  ;;  %v13341_v36 = vld [vmem:[#allocation9_spill] sm:$0xff] }
 0x1b3   : > { %v3337_v55 = vmul.f32 0.25, %v3309_v18  ;;  %v3051_v47 = vadd.f32 %v13330_v49, %v2799_v34  ;;  %v3053_v45 = vadd.f32 %v13330_v49, %v2801_v24  ;;  %v1690_v11 = vadd.f32 %v13332_v35, %v13331_v23  ;;  %v13335_v34 = vld [vmem:[#allocation103_spill] sm:$0xff]  ;;  %v13338_v23 = vld [vmem:[#allocation100_spill] sm:$0xff] }
 0x1b4   : > { %v3055_v30 = vadd.f32 %v13330_v49, %v2803_v16  ;;  %v3057_v20 = vadd.f32 %v13330_v49, %v2805_v19  ;;  %v1692_v44 = vadd.f32 %v1580_v54, %v13333_v25  ;;  %v1858_v14 = vmul.f32 %v13334_v29, %v8479_v37  ;;  %v13337_v54 = vld [vmem:[#allocation97_spill] sm:$0xff] }
 0x1b5   : > { %5811 = vset.pattern.permute.xlu1 %v13324_v2  ;;  %v3365_v21 = vpack.c.bf16 %v3337_v55, %v3337_v55  ;;  %v3163_v18 = vmax.f32 %v3051_v47, 0.0  ;;  %v3165_v52 = vmax.f32 %v3053_v45, 0.0  ;;  %v1860_v24 = vmul.f32 %v13335_v34, %v8479_v37  ;;  %v13339_v37 = vld [vmem:[#allocation106_spill] sm:$0xff]  ;;  %v13340_v34 = vld [vmem:[#allocation7_spill] sm:$0xff] }
 0x1b6   : > { %1803 = vperm.xlu1 %5811, %v8966_v22   ;;  %v13336_v35 = vmov 6   ;;  %v3167_v16 = vmax.f32 %v3055_v30, 0.0  ;;  %v3169_v19 = vmax.f32 %v3057_v20, 0.0  ;;  %v1966_v10 = vadd.f32 %v13337_v54, %v1686_v9  ;;  %v9347_v20 = vld [vmem:[%s12266_s0 + $0x1c0] sm:$0xff] }
 0x1b7   : > { %5828 = vset.pattern.permute.xlu0 %v13336_v35  ;;  %v1968_v25 = vadd.f32 %v13338_v23, %v1688_v59  ;;  %5562 = vmatprep.mubr.msk.bf16.mxu1 %vm3755_vm2, %v3365_v21  ;;  %v3251_v55 = vadd.f32 %v3165_v52, %v3163_v18  ;;  %v1970_v47 = vadd.f32 %v1858_v14, %v1690_v11  ;;  %v9354_v11 = vld [vmem:[%s12266_s0 + $0x1d0] sm:$0xff]  ;;  %v13342_v59 = vld [vmem:[#allocation13_spill] sm:$0xff] }
 0x1b8   : > { %2091 = vperm.xlu0 %5828, %v13319_v26   ;;  %v1972_v45 = vadd.f32 %v1860_v24, %v1692_v44  ;;  %v2140_v29 = vmul.f32 %v13339_v37, %v8621_v38  ;;  %v2246_v2 = vadd.f32 %v13340_v34, %v1966_v10  ;;  %v2414_v26 = vmul.f32 %v9347_v20, %v8623_v31  ;;  %v9362_v44 = vld [vmem:[%s12266_s0 + $0x1e0] sm:$0xff]  ;;  %v9370_v21 = vld [vmem:[%s12266_s0 + $0x1f0] sm:$0xff] }
 0x1b9   : > { %v2248_v42 = vadd.f32 %v13341_v36, %v1968_v25  ;;  %v2416_v38 = vmul.f32 %v9354_v11, %v8623_v31  ;;  %v3279_v9 = vadd.f32 %v3251_v55, %v3167_v16  ;;  %v2250_v30 = vadd.f32 %v13342_v59, %v1970_v47  ;;  %13343 = vst [vmem:[#allocation57_spill] sm:$0xff] %v9362_v44  ;;  %v13345_v16 = vld [vmem:[#allocation108_spill] sm:$0xff]  ;;  %v13346_v25 = vld [vmem:[#allocation110_spill] sm:$0xff]  ;;  %v13351_v59 = vld [vmem:[#allocation91_spill] sm:$0xff] }
 0x1ba   : > { %v2252_v36 = vadd.f32 %v2140_v29, %v1972_v45  ;;  %v2418_v14 = vmul.f32 %v9362_v44, %v8623_v31  ;;  %5812 = vset.pattern.permute.xlu1 %v13336_v35  ;;  %13344 = vst [vmem:[#allocation87_spill] sm:$0xff] %v9370_v21  ;;  %v2420_v18 = vmul.f32 %v9370_v21, %v8623_v31  ;;  %v13347_v47 = vld [vmem:[#allocation14_spill] sm:$0xff]  ;;  %v9381_v29 = vpop.permute.xlu1 %1507  ;;  %v13348_v34 = vmov 8  }
 0x1bb   : > { %v2526_v52 = vadd.f32 %v2414_v26, %v2246_v2  ;;  %v2528_v24 = vadd.f32 %v2416_v38, %v2248_v42  ;;  %v2694_v54 = vmul.f32 %v13345_v16, %v8695_v17  ;;  %2079 = vperm.xlu1 %5812, %v8798_v51   ;;  %v3307_v10 = vadd.f32 %v3279_v9, %v3169_v19  ;;  %v13349_v42 = vld [vmem:[#allocation17_spill] sm:$0xff]  ;;  %v13350_v38 = vld [vmem:[#allocation16_spill] sm:$0xff] }
 0x1bc   : > { %v2530_v23 = vadd.f32 %v2418_v14, %v2250_v30  ;;  %v2696_v55 = vmul.f32 %v13346_v25, %v8695_v17  ;;  %v2698_v45 = vmul.f32 %v13347_v47, %v8695_v17  ;;  %5830 = vset.pattern.permute.xlu0 %v13348_v34  ;;  %v2532_v31 = vadd.f32 %v2420_v18, %v2252_v36  ;;  %v13352_v14 = vld [vmem:[#allocation36_spill] sm:$0xff] }
 0x1bd   : > { %v2700_v2 = vmul.f32 %v13349_v42, %v8695_v17  ;;  %v2806_v26 = vadd.f32 %v2694_v54, %v2526_v52  ;;  %v1122_v35 = vadd.f32 %v13351_v59, %v13350_v38  ;;  %2647 = vperm.xlu0 %5830, %v13325_v3   ;;  %v3335_v19 = vmul.f32 0.25, %v3307_v10  ;;  %v13361_v59 = vld [vmem:[#allocation68_spill] sm:$0xff] }
 0x1be   : > { %v2808_v9 = vadd.f32 %v2696_v55, %v2528_v24  ;;  %v2810_v30 = vadd.f32 %v2698_v45, %v2530_v23  ;;  %v1124_v13 = vadd.f32 %v13353_v6, %v13352_v14  ;;  %v1572_v17 = vmul.f32 %v9311_v61, %v8389_v60  ;;  %v13356_v24 = vld [vmem:[#allocation69_spill] sm:$0xff]  ;;  %v13357_v45 = vld [vmem:[#allocation96_spill] sm:$0xff] }
 0x1bf   : > { %v2812_v12 = vadd.f32 %v2700_v2, %v2532_v31  ;;  %v3058_v62 = vadd.f32 %v13314_v4, %v2806_v26  ;;  %v1402_v36 = vadd.f32 %v13354_v33, %v1122_v35  ;;  %v13355_v18 = vmov 7   ;;  %v13358_v33 = vld [vmem:[#allocation105_spill] sm:$0xff] }
 0x1c0   : > { %5814 = vset.pattern.permute.xlu1 %v13355_v18  ;;  %v3363_v52 = vpack.c.bf16 %v3335_v19, %v3335_v19  ;;  %v3060_v54 = vadd.f32 %v13314_v4, %v2808_v9  ;;  %v3062_v10 = vadd.f32 %v13314_v4, %v2810_v30  ;;  %v1404_v23 = vadd.f32 %v13356_v24, %v1124_v13  ;;  %v13359_v13 = vld [vmem:[#allocation63_spill] sm:$0xff]  ;;  %v13362_v14 = vld [vmem:[#allocation65_spill] sm:$0xff] }
 0x1c1   : > { %2359 = vperm.xlu1 %5814, %v8798_v51   ;;  %v3064_v6 = vadd.f32 %v13314_v4, %v2812_v12  ;;  %v3170_v55 = vmax.f32 %v3058_v62, 0.0  ;;  %v1682_v31 = vadd.f32 %v13357_v45, %v1402_v36  ;;  %v2126_v35 = vmul.f32 %v13358_v33, %v8550_v39  ;;  %5833 = vset.pattern.permute.xlu0 %v12850_v15  ;;  %v9408_v51 = vpop.permute.xlu1 %1787  ;;  %v13360_v62 = vld [vmem:[#allocation62_spill] sm:$0xff]  ;;  %v5490_v24 = vld [vmem:[%s6367_s9 + $0xd] ss:$0 sm:$0xff] }
 0x1c2   : > { %5550 = vmatprep.mubr.msk.bf16.mxu0 %vm3755_vm2, %v3363_v52  ;;  %v3172_v60 = vmax.f32 %v3060_v54, 0.0  ;;  %v3174_v2 = vmax.f32 %v3062_v10, 0.0  ;;  %v1684_v26 = vadd.f32 %v1572_v17, %v1404_v23  ;;  %v2128_v38 = vmul.f32 %v13359_v13, %v8550_v39  ;;  %v13363_v52 = vld [vmem:[#allocation26_spill] sm:$0xff]  ;;  %v13364_v17 = vld [vmem:[#allocation61_spill] sm:$0xff]  ;;  %3015 = vperm.xlu0 %5833, %v5490_v24   ;;  %v5900_v24 = vld [vmem:[%s6372_s13 + $0x2a0] sm:$0xff]  }
 0x1c3   : > { %v3176_v12 = vmax.f32 %v3064_v6, 0.0  ;;  %v1962_v4 = vadd.f32 %v13360_v62, %v1682_v31  ;;  %v2130_v19 = vmul.f32 %v13361_v59, %v8550_v39  ;;  %v2132_v9 = vmul.f32 %v13339_v37, %v8550_v39 }
 0x1c4   : > { %v3252_v30 = vadd.f32 %v3172_v60, %v3170_v55  ;;  %v1964_v36 = vadd.f32 %v13362_v14, %v1684_v26  ;;  %v2238_v54 = vadd.f32 %v2126_v35, %v13363_v52  ;;  %v2240_v10 = vadd.f32 %v2128_v38, %v13364_v17 }
 0x1c5   : > { %2363 = vperm.xlu1 %5814, %v8966_v22   ;;  %v2242_v23 = vadd.f32 %v2130_v19, %v1962_v4  ;;  %v2406_v6 = vmul.f32 %v9347_v20, %v13322_v8  ;;  %v2408_v45 = vmul.f32 %v9354_v11, %v13322_v8  ;;  %v2410_v39 = vmul.f32 %v9362_v44, %v13322_v8  ;;  %v9436_v59 = vpop.permute.xlu1 %2063  ;;  %v13365_v19 = vld [vmem:[#allocation83_spill] sm:$0xff] }
 0x1c6   : > { %v3280_v37 = vadd.f32 %v3252_v30, %v3174_v2  ;;  %v2244_v55 = vadd.f32 %v2132_v9, %v1964_v36  ;;  %v2412_v31 = vmul.f32 %v9370_v21, %v13322_v8  ;;  %v2686_v33 = vmul.f32 %v13345_v16, %v13323_v32 }
 0x1c7   : > { %v2518_v35 = vadd.f32 %v2406_v6, %v2238_v54  ;;  %v2520_v60 = vadd.f32 %v2408_v45, %v2240_v10  ;;  %v2522_v26 = vadd.f32 %v2410_v39, %v2242_v23  ;;  %v2688_v13 = vmul.f32 %v13346_v25, %v13323_v32  ;;  %v13366_v25 = vld [vmem:[#allocation75_spill] sm:$0xff]  ;;  %v13369_v10 = vld [vmem:[#allocation88_spill] sm:$0xff] }
 0x1c8   : > { %v3308_v38 = vadd.f32 %v3280_v37, %v3176_v12  ;;  %v2524_v62 = vadd.f32 %v2412_v31, %v2244_v55  ;;  %v2690_v4 = vmul.f32 %v13347_v47, %v13323_v32  ;;  %v2692_v2 = vmul.f32 %v13349_v42, %v13323_v32  ;;  %v13367_v32 = vld [vmem:[#allocation86_spill] sm:$0xff]  ;;  %v13368_v54 = vld [vmem:[#allocation39_spill] sm:$0xff]  ;;  %v13371_v55 = vld [vmem:[#allocation60_spill] sm:$0xff] }
 0x1c9   : > { %5816 = vset.pattern.permute.xlu1 %v13348_v34  ;;  %v2798_v8 = vadd.f32 %v2686_v33, %v2518_v35  ;;  %v2800_v16 = vadd.f32 %v2688_v13, %v2520_v60  ;;  %v862_v9 = vadd.f32 %v9130_v53, %v13365_v19  ;;  %v863_v12 = vadd.f32 %v9133_v41, %v13366_v25  ;;  %v5487_v41 = vld [vmem:[%s6367_s9 + $0xa] ss:$0 sm:$0xff]  ;;  %v13370_v45 = vld [vmem:[#allocation95_spill] sm:$0xff]  ;;  %v13373_v60 = vld [vmem:[#allocation78_spill] sm:$0xff]  ;;  %v9567_v34 = vpop.permute.xlu0 %951 }
 0x1ca   : > { %2643 = vperm.xlu1 %5816, %v8966_v22   ;;  %v3336_v47 = vmul.f32 0.25, %v3308_v38  ;;  %v2802_v30 = vadd.f32 %v2690_v4, %v2522_v26  ;;  %v2804_v14 = vadd.f32 %v2692_v2, %v2524_v62  ;;  %v864_v42 = vadd.f32 %v9136_v28, %v13367_v32  ;;  %v9467_v26 = vpop.permute.xlu1 %2343  ;;  %v13376_v4 = vld [vmem:[#allocation113_spill] sm:$0xff]  ;;  %v13378_v25 = vld [vmem:[#allocation115_spill] sm:$0xff] }
 0x1cb   : > { %v3050_v36 = vadd.f32 %v13330_v49, %v2798_v8  ;;  %v3052_v52 = vadd.f32 %v13330_v49, %v2800_v16  ;;  %v865_v17 = vadd.f32 %v9140_v58, %v13368_v54  ;;  %v866_v53 = vadd.f32 %v9143_v27, %v13369_v10  ;;  %v13372_v58 = vld [vmem:[#allocation50_spill] sm:$0xff]  ;;  %v5902_v8 = vld [vmem:[%s6372_s13 + $0x298] sm:$0xff]  }
 0x1cc   : > { %v3364_v23 = vpack.c.bf16 %v3336_v47, %v3336_v47  ;;  %v3054_v22 = vadd.f32 %v13330_v49, %v2802_v30  ;;  %v3056_v6 = vadd.f32 %v13330_v49, %v2804_v14  ;;  %v867_v28 = vadd.f32 %v9146_v63, %v13370_v45  ;;  %v13377_v16 = vld [vmem:[#allocation114_spill] sm:$0xff]  ;;  %v9525_v45 = vld [vmem:[%s12266_s0 + $0xd8] sm:$0xff] }
 0x1cd   : > { %v3162_v39 = vmax.f32 %v3050_v36, 0.0  ;;  %v3164_v37 = vmax.f32 %v3052_v52, 0.0  ;;  %v868_v31 = vadd.f32 %v9149_v40, %v13371_v55  ;;  %v869_v33 = vadd.f32 %v9152_v5, %v13372_v58  ;;  %v13374_v40 = vld [vmem:[#allocation79_spill] sm:$0xff]  ;;  %v13375_v5 = vld [vmem:[#allocation112_spill] sm:$0xff]  ;;  %13384 = vst [vmem:[#allocation35_spill] sm:$0xff] %v9525_v45  ;;  %v9539_v55 = vld [vmem:[%s12266_s0 + $0xe8] sm:$0xff] }
 0x1ce   : > { %5817 = vset.pattern.permute.xlu1 %v12850_v15  ;;  %4354 = vmatmul.mubr.bf16.vlgmr.msra.gmra.mxu1 %v3364_v23  ;;  %v3166_v27 = vmax.f32 %v3054_v22, 0.0  ;;  %v3168_v35 = vmax.f32 %v3056_v6, 0.0  ;;  %v1030_v49 = vmul.f32 %v9065_v50, %v9274_v56  ;;  %v1031_v63 = vmul.f32 %v13373_v60, %v9274_v56  ;;  %v5904_v6 = vld [vmem:[%s6372_s13 + $0x290] sm:$0xff]   ;;  %13386 = vst [vmem:[#allocation84_spill] sm:$0xff] %v9539_v55 }
 0x1cf   : > { %3003 = vperm.xlu1 %5817, %v5487_v41   ;;  %v3250_v13 = vadd.f32 %v3164_v37, %v3162_v39  ;;  %v1032_v38 = vmul.f32 %v13374_v40, %v9274_v56  ;;  %v1033_v62 = vmul.f32 %v13375_v5, %v9274_v56  ;;  %v1034_v2 = vmul.f32 %v13376_v4, %v9274_v56  ;;  %v9532_v39 = vld [vmem:[%s12266_s0 + $0xe0] sm:$0xff]  ;;  %v9546_v58 = vld [vmem:[%s12266_s0 + $0xf0] sm:$0xff] }
 0x1d0   : > { %4544 = vmatpush1.bf16.msra.mxu1 %v5900_v24  ;;  %v1035_v19 = vmul.f32 %v13377_v16, %v9274_v56  ;;  %v1036_v47 = vmul.f32 %v13378_v25, %v9274_v56  ;;  %v1037_v30 = vmul.f32 %v9108_v7, %v9274_v56  ;;  %v9482_v14 = vadd.f32 %v1030_v49, %v862_v9  ;;  %v9503_v9 = vld [vmem:[%s12266_s0 + $0xc0] sm:$0xff]  ;;  %v9556_v49 = vld [vmem:[%s12266_s0 + $0xf8] sm:$0xff] }
 0x1d1   : > { %4545 = vmatprep.subr.bf16.mxu1 %v12850_v15  ;;  %v3278_v32 = vadd.f32 %v3250_v13, %v3166_v27  ;;  %v9485_v36 = vadd.f32 %v1031_v63, %v863_v12  ;;  %v9487_v52 = vadd.f32 %v1032_v38, %v864_v42  ;;  %v9489_v54 = vadd.f32 %v1033_v62, %v865_v17  ;;  %v9510_v42 = vld [vmem:[%s12266_s0 + $0xc8] sm:$0xff]  ;;  %v9551_v27 = vpop.permute.xlu1 %2347 }
 0x1d2   : > { %v9491_v10 = vadd.f32 %v1034_v2, %v866_v53  ;;  %v9493_v24 = vadd.f32 %v1035_v19, %v867_v28  ;;  %v9495_v41 = vadd.f32 %v1036_v47, %v868_v31  ;;  %v9497_v23 = vadd.f32 %v1037_v30, %v869_v33  ;;  %13381 = vst [vmem:[#allocation74_spill] sm:$0xff] %v9503_v9  ;;  %v9517_v53 = vld [vmem:[%s12266_s0 + $0xd0] sm:$0xff]  ;;  %v13389_v2 = vld [vmem:[#allocation116_spill] sm:$0xff]  ;;  %v13390_v19 = vld [vmem:[#allocation117_spill] sm:$0xff] }
 0x1d3   : > { %519 = vperm.xlu1 %5817, %v13325_v3   ;;  %v3306_v56 = vadd.f32 %v3278_v32, %v3168_v35  ;;  %v1302_v12 = vmul.f32 %v9503_v9, %v9300_v48  ;;  %13382 = vst [vmem:[#allocation109_spill] sm:$0xff] %v9510_v42  ;;  %v1303_v17 = vmul.f32 %v9510_v42, %v9300_v48  ;;  %13383 = vst [vmem:[#allocation111_spill] sm:$0xff] %v9517_v53  ;;  %v13391_v30 = vld [vmem:[#allocation118_spill] sm:$0xff]  ;;  %v13392_v18 = vmov 1  }
 0x1d4   : > { %13379 = vst [vmem:[#allocation104_spill] sm:$0xff] %v9495_v41  ;;  %13380 = vst [vmem:[#allocation34_spill] sm:$0xff] %v9497_v23  ;;  %v1304_v22 = vmul.f32 %v9517_v53, %v9300_v48  ;;  %4546 = vmatpush1.bf16.msra.mxu1 %v5902_v8  ;;  %v1305_v28 = vmul.f32 %v9525_v45, %v9300_v48  ;;  %v1306_v37 = vmul.f32 %v9532_v39, %v9300_v48 }
 0x1d5   : > { %13385 = vst [vmem:[#allocation102_spill] sm:$0xff] %v9532_v39  ;;  %v1307_v31 = vmul.f32 %v9539_v55, %v9300_v48  ;;  %13387 = vst [vmem:[#allocation49_spill] sm:$0xff] %v9546_v58  ;;  %v1308_v33 = vmul.f32 %v9546_v58, %v9300_v48  ;;  %4547 = vmatprep.subr.bf16.mxu1 %v12850_v15  ;;  %v3334_v35 = vmul.f32 0.25, %v3306_v56  ;;  %v5901_v56 = vld [vmem:[%s6372_s13 + $0x248] sm:$0xff]   ;;  %v9609_v23 = vpop.permute.xlu1 %2627 }
 0x1d6   : > { %13388 = vst [vmem:[#allocation19_spill] sm:$0xff] %v9556_v49  ;;  %v1309_v63 = vmul.f32 %v9556_v49, %v9300_v48  ;;  %v1414_v13 = vadd.f32 %v1302_v12, %v9111_v0  ;;  %v1415_v38 = vadd.f32 %v1303_v17, %v9113_v57  ;;  %v1416_v62 = vadd.f32 %v1304_v22, %v9115_v46  ;;  %v13393_v48 = vld [vmem:[#allocation119_spill] sm:$0xff]  ;;  %v13395_v0 = vld [vmem:[#allocation120_spill] sm:$0xff]  ;;  %v13397_v46 = vld [vmem:[#allocation94_spill] sm:$0xff] }
 0x1d7   : > { %v1417_v8 = vadd.f32 %v1305_v28, %v13389_v2  ;;  %v1418_v47 = vadd.f32 %v1306_v37, %v13390_v19  ;;  %v1419_v32 = vadd.f32 %v1307_v31, %v13391_v30  ;;  %5819 = vset.pattern.permute.xlu1 %v13392_v18  ;;  %v3362_v21 = vpack.c.bf16 %v3334_v35, %v3334_v35  ;;  %v13398_v17 = vld [vmem:[#allocation53_spill] sm:$0xff]  ;;  %v13399_v28 = vld [vmem:[#allocation71_spill] sm:$0xff]  ;;  %v13400_v18 = vld [vmem:[#allocation92_spill] sm:$0xff] }
 0x1d8   : > { %v9571_v44 = vadd.f32 %v1308_v33, %v13393_v48  ;;  %v9574_v57 = vadd.f32 %v1309_v63, %v13395_v0  ;;  %v1582_v12 = vmul.f32 %v13397_v46, %v9332_v43  ;;  %4548 = vmatpush1.bf16.msra.mxu1 %v5904_v6  ;;  %v1583_v22 = vmul.f32 %v13398_v17, %v9332_v43  ;;  %v13401_v33 = vld [vmem:[#allocation31_spill] sm:$0xff]  ;;  %v5906_v63 = vld [vmem:[%s6372_s13 + $0x288] sm:$0xff]   ;;  %v13402_v2 = vld [vmem:[#allocation52_spill] sm:$0xff] }
 0x1d9   : > { %v1584_v37 = vmul.f32 %v13399_v28, %v9332_v43  ;;  %v1585_v31 = vmul.f32 %v13400_v18, %v9332_v43  ;;  %v1586_v35 = vmul.f32 %v13401_v33, %v9332_v43  ;;  %4549 = vmatprep.subr.bf16.mxu1 %v12850_v15  ;;  %4243 = vmatmul.mubr.bf16.vlgmr.msra.gmra.mxu0 %v3362_v21 }
 0x1da   : > { %13394 = vst [vmem:[#allocation21_spill] sm:$0xff] %v9571_v44  ;;  %13396 = vst [vmem:[#allocation42_spill] sm:$0xff] %v9574_v57  ;;  %v1587_v6 = vmul.f32 %v13402_v2, %v9332_v43  ;;  %v9592_v19 = vmul.f32 %v9311_v61, %v9332_v43  ;;  %v9596_v30 = vmul.f32 %v9157_v1, %v9332_v43  ;;  %4433 = vmatpush1.bf16.msra.mxu0 %v5901_v56  ;;  %v5903_v57 = vld [vmem:[%s6372_s13 + $0x240] sm:$0xff]   ;;  %v13408_v43 = vld [vmem:[#allocation81_spill] sm:$0xff] }
 0x1db   : > { %v9598_v48 = vadd.f32 %v1582_v12, %v1414_v13  ;;  %v9600_v0 = vadd.f32 %v1583_v22, %v1415_v38  ;;  %v9602_v44 = vadd.f32 %v1584_v37, %v1416_v62  ;;  %v9604_v41 = vadd.f32 %v1585_v31, %v1417_v8  ;;  %v13409_v13 = vld [vmem:[#allocation82_spill] sm:$0xff]  ;;  %4434 = vmatprep.subr.bf16.mxu0 %v12850_v15  ;;  %v9620_v8 = vpop.f32.mrf.mxu0  ;;  %v13413_v22 = vld [vmem:[#allocation12_spill] sm:$0xff] }
 0x1dc   : > { %13403 = vst [vmem:[#allocation18_spill] sm:$0xff] %v9592_v19  ;;  %13404 = vst [vmem:[#allocation40_spill] sm:$0xff] %v9596_v30  ;;  %v9606_v21 = vadd.f32 %v1586_v35, %v1418_v47  ;;  %v9611_v19 = vadd.f32 %v1587_v6, %v1419_v32  ;;  %v1422_v30 = vadd.f32 %v13408_v43, %v9482_v14  ;;  %v13410_v62 = vld [vmem:[#allocation70_spill] sm:$0xff]  ;;  %v13414_v37 = vld [vmem:[#allocation28_spill] sm:$0xff]  ;;  %4550 = vmatpush1.bf16.msra.mxu1 %v5906_v63 }
 0x1dd   : > { %13405 = vst [vmem:[#allocation43_spill] sm:$0xff] %v9598_v48  ;;  %13406 = vst [vmem:[#allocation48_spill] sm:$0xff] %v9602_v44  ;;  %v1423_v38 = vadd.f32 %v13409_v13, %v9485_v36  ;;  %v1424_v12 = vadd.f32 %v13410_v62, %v9487_v52  ;;  %v13412_v47 = vld [vmem:[#allocation10_spill] sm:$0xff]  ;;  %v1426_v32 = vadd.f32 %v13413_v22, %v9491_v10  ;;  %v5908_v36 = vld [vmem:[%s6372_s13 + $0x280] sm:$0xff]   ;;  %v9631_v52 = vpop.permute.xlu0 %1235  ;;  %4551 = vmatprep.subr.bf16.mxu1 %v12850_v15  ;;  %v3802_v6 = vpop.f32.mrf.mxu0 }
 0x1de   : > { %13407 = vst [vmem:[#allocation8_spill] sm:$0xff] %v9606_v21  ;;  %13411 = vst [vmem:[#allocation90_spill] sm:$0xff] %v9620_v8  ;;  %v1425_v56 = vadd.f32 %v13412_v47, %v9489_v54  ;;  %v1427_v31 = vadd.f32 %v13414_v37, %v9493_v24  ;;  %v1590_v14 = vmul.f32 %v13397_v46, %v9381_v29  ;;  %4435 = vmatpush1.bf16.msra.mxu0 %v5903_v57  ;;  %v13418_v37 = vld [vmem:[#allocation98_spill] sm:$0xff] }
 0x1df   : > { %v1591_v35 = vmul.f32 %v13398_v17, %v9381_v29  ;;  %v1592_v54 = vmul.f32 %v13399_v28, %v9381_v29  ;;  %v1593_v10 = vmul.f32 %v13400_v18, %v9381_v29  ;;  %v1594_v24 = vmul.f32 %v13401_v33, %v9381_v29  ;;  %v5905_v18 = vld [vmem:[%s6372_s13 + $0x238] sm:$0xff]   ;;  %4436 = vmatprep.subr.bf16.mxu0 %v12850_v15  ;;  %v5907_v21 = vld [vmem:[%s6372_s13 + $0x230] sm:$0xff]  }
 0x1e0   : > { %v1595_v46 = vmul.f32 %v13402_v2, %v9381_v29  ;;  %v9646_v63 = vmul.f32 %v9311_v61, %v9381_v29  ;;  %v9650_v17 = vmul.f32 %v9157_v1, %v9381_v29  ;;  %v1702_v28 = vadd.f32 %v1590_v14, %v1422_v30  ;;  %v3803_v2 = vpop.f32.mrf.mxu0  ;;  %v13417_v61 = vld [vmem:[#allocation73_spill] sm:$0xff]  ;;  %v13419_v29 = vld [vmem:[#allocation99_spill] sm:$0xff]  ;;  %4552 = vmatpush1.bf16.msra.mxu1 %v5908_v36  ;;  %v9685_v36 = vld [vmem:[%s12266_s0 + $0x170] sm:$0xff] }
 0x1e1   : > { %v1703_v43 = vadd.f32 %v1591_v35, %v1423_v38  ;;  %v1704_v33 = vadd.f32 %v1592_v54, %v1424_v12  ;;  %v1705_v13 = vadd.f32 %v1593_v10, %v1425_v56  ;;  %v9653_v62 = vadd.f32 %v1594_v24, %v1426_v32  ;;  %v5910_v30 = vld [vmem:[%s6372_s13 + $0x278] sm:$0xff]   ;;  %v9665_v38 = vpop.permute.xlu1 %2987  ;;  %v13421_v12 = vld [vmem:[#allocation101_spill] sm:$0xff]  ;;  %v9672_v32 = vld [vmem:[%s12266_s0 + $0x160] sm:$0xff]  ;;  %13425 = vst [vmem:[#allocation58_spill] sm:$0xff] %v9685_v36  ;;  %v1792_v44 = vpop.permute.xlu0 %1791 }
 0x1e2   : > { %13415 = vst [vmem:[#allocation11_spill] sm:$0xff] %v9646_v63  ;;  %v9656_v47 = vadd.f32 %v1595_v46, %v1427_v31  ;;  %v1870_v22 = vmul.f32 %v13417_v61, %v9408_v51  ;;  %v1871_v1 = vmul.f32 %v13418_v37, %v9408_v51  ;;  %v1872_v57 = vmul.f32 %v13419_v29, %v9408_v51  ;;  %v13424_v14 = vld [vmem:[#allocation121_spill] sm:$0xff]  ;;  %v3804_v10 = vpop.f32.mrf.mxu0  ;;  %v13427_v24 = vld [vmem:[#allocation122_spill] sm:$0xff]  ;;  %v13442_v63 = vld [vmem:[#allocation123_spill] sm:$0xff] }
 0x1e3   : > { %13416 = vst [vmem:[#allocation46_spill] sm:$0xff] %v9653_v62  ;;  %13420 = vst [vmem:[#allocation33_spill] sm:$0xff] %v9665_v38  ;;  %v1873_v56 = vmul.f32 %v13421_v12, %v9408_v51  ;;  %v9676_v31 = vmul.f32 %v9672_v32, %v9408_v51  ;;  %v9680_v35 = vmul.f32 %v13424_v14, %v9408_v51  ;;  %4553 = vmatprep.subr.bf16.mxu1 %v12850_v15  ;;  %v9708_v10 = vld [vmem:[%s12266_s0 + $0x180] sm:$0xff] }
 0x1e4   : > { %13422 = vst [vmem:[#allocation30_spill] sm:$0xff] %v9672_v32  ;;  %v9689_v54 = vmul.f32 %v9685_v36, %v9408_v51  ;;  %v9694_v6 = vmul.f32 %v13427_v24, %v9408_v51  ;;  %v9696_v46 = vadd.f32 %v1870_v22, %v1702_v28  ;;  %v9698_v2 = vadd.f32 %v1871_v1, %v1703_v43  ;;  %v9717_v28 = vld [vmem:[%s12266_s0 + $0x188] sm:$0xff]  ;;  %v9726_v43 = vld [vmem:[%s12266_s0 + $0x190] sm:$0xff]  ;;  %v9745_v1 = vld [vmem:[%s12266_s0 + $0x1a0] sm:$0xff] }
 0x1e5   : > { %13423 = vst [vmem:[#allocation72_spill] sm:$0xff] %v9676_v31  ;;  %v9700_v8 = vadd.f32 %v1872_v57, %v1704_v33  ;;  %4437 = vmatpush1.bf16.msra.mxu0 %v5905_v18  ;;  %v9703_v48 = vadd.f32 %v1873_v56, %v1705_v13  ;;  %13430 = vst [vmem:[#allocation106_spill] sm:$0xff] %v9708_v10  ;;  %v9712_v51 = vmul.f32 %v9708_v10, %v9436_v59  ;;  %v9736_v13 = vld [vmem:[%s12266_s0 + $0x198] sm:$0xff]  ;;  %v9754_v56 = vld [vmem:[%s12266_s0 + $0x1a8] sm:$0xff] }
 0x1e6   : > { %13426 = vst [vmem:[#allocation103_spill] sm:$0xff] %v9689_v54  ;;  %13428 = vst [vmem:[#allocation97_spill] sm:$0xff] %v9696_v46  ;;  %v9721_v18 = vmul.f32 %v9717_v28, %v9436_v59  ;;  %v9730_v33 = vmul.f32 %v9726_v43, %v9436_v59  ;;  %4438 = vmatprep.subr.bf16.mxu0 %v12850_v15  ;;  %v9740_v22 = vmul.f32 %v9736_v13, %v9436_v59  ;;  %v13440_v54 = vld [vmem:[#allocation15_spill] sm:$0xff] }
 0x1e7   : > { %13429 = vst [vmem:[#allocation100_spill] sm:$0xff] %v9700_v8  ;;  %13431 = vst [vmem:[#allocation7_spill] sm:$0xff] %v9712_v51  ;;  %v9749_v57 = vmul.f32 %v9745_v1, %v9436_v59  ;;  %v9762_v51 = vmul.f32 %v9347_v20, %v9467_v26  ;;  %4554 = vmatpush1.bf16.msra.mxu1 %v5910_v30  ;;  %v5912_v8 = vld [vmem:[%s6372_s13 + $0x270] sm:$0xff]   ;;  %v9767_v46 = vmul.f32 %v13440_v54, %v9467_v26  ;;  %v5909_v30 = vld [vmem:[%s6372_s13 + $0x228] sm:$0xff]  }
 0x1e8   : > { %13432 = vst [vmem:[#allocation9_spill] sm:$0xff] %v9717_v28  ;;  %13433 = vst [vmem:[#allocation13_spill] sm:$0xff] %v9726_v43  ;;  %v9775_v38 = vmul.f32 %v13442_v63, %v9467_v26  ;;  %v9779_v31 = vmul.f32 %v9347_v20, %v9551_v27  ;;  %4555 = vmatprep.subr.bf16.mxu1 %v12850_v15  ;;  %v9793_v62 = vmul.f32 %v13442_v63, %v9551_v27 }
 0x1e9   : > { %13434 = vst [vmem:[#allocation108_spill] sm:$0xff] %v9730_v33  ;;  %13435 = vst [vmem:[#allocation110_spill] sm:$0xff] %v9736_v13  ;;  %v9758_v33 = vmul.f32 %v9754_v56, %v9436_v59  ;;  %4439 = vmatpush1.bf16.msra.mxu0 %v5907_v21  ;;  %v9797_v20 = vmul.f32 %v9065_v50, %v9567_v34  ;;  %v9802_v21 = vmul.f32 %v13373_v60, %v9567_v34 }
 0x1ea   : > { %13436 = vst [vmem:[#allocation14_spill] sm:$0xff] %v9745_v1  ;;  %13437 = vst [vmem:[#allocation17_spill] sm:$0xff] %v9749_v57  ;;  %v9771_v57 = vmul.f32 %v9354_v11, %v9467_v26  ;;  %4440 = vmatprep.subr.bf16.mxu0 %v12850_v15  ;;  %v9814_v50 = vmul.f32 %v13376_v4, %v9567_v34  ;;  %v9818_v63 = vmul.f32 %v13377_v16, %v9567_v34  ;;  %v5914_v4 = vld [vmem:[%s6372_s13 + $0x268] sm:$0xff]  }
 0x1eb   : > { %13438 = vst [vmem:[#allocation16_spill] sm:$0xff] %v9754_v56  ;;  %13439 = vst [vmem:[#allocation91_spill] sm:$0xff] %v9762_v51  ;;  %v9785_v51 = vmul.f32 %v13440_v54, %v9551_v27  ;;  %v9806_v54 = vmul.f32 %v13374_v40, %v9567_v34  ;;  %v9822_v60 = vmul.f32 %v13378_v25, %v9567_v34  ;;  %4556 = vmatpush1.bf16.msra.mxu1 %v5912_v8  ;;  %v5911_v8 = vld [vmem:[%s6372_s13 + $0x220] sm:$0xff]  }
 0x1ec   : > { %13441 = vst [vmem:[#allocation36_spill] sm:$0xff] %v9771_v57  ;;  %13443 = vst [vmem:[#allocation89_spill] sm:$0xff] %v9779_v31  ;;  %v9789_v57 = vmul.f32 %v9354_v11, %v9551_v27  ;;  %v504_v31 = vpop.permute.xlu1 %503  ;;  %v9810_v11 = vmul.f32 %v13375_v5, %v9567_v34  ;;  %v9826_v40 = vmul.f32 %v9108_v7, %v9567_v34  ;;  %4557 = vmatprep.subr.bf16.mxu1 %v12850_v15 }
 0x1ed   : > { %13444 = vst [vmem:[#allocation44_spill] sm:$0xff] %v9814_v50  ;;  %13445 = vst [vmem:[#allocation69_spill] sm:$0xff] %v9818_v63  ;;  %v9830_v5 = vmul.f32 %v9503_v9, %v9631_v52  ;;  %v9833_v50 = vpop.permute.xlu0 %2075  ;;  %v9837_v16 = vmul.f32 %v9510_v42, %v9631_v52  ;;  %v9841_v25 = vmul.f32 %v9517_v53, %v9631_v52  ;;  %4441 = vmatpush1.bf16.msra.mxu0 %v5909_v30 }
 0x1ee   : > { %13446 = vst [vmem:[#allocation96_spill] sm:$0xff] %v9822_v60  ;;  %13447 = vst [vmem:[#allocation105_spill] sm:$0xff] %v9826_v40  ;;  %v9845_v7 = vmul.f32 %v9525_v45, %v9631_v52  ;;  %v9849_v34 = vmul.f32 %v9532_v39, %v9631_v52  ;;  %4442 = vmatprep.subr.bf16.mxu0 %v12850_v15  ;;  %v9871_v30 = vmul.f32 %v13418_v37, %v1792_v44  ;;  %v13488_v40 = vld [vmem:[#allocation77_spill] sm:$0xff] }
 0x1ef   : > { %13448 = vst [vmem:[#allocation63_spill] sm:$0xff] %v9830_v5  ;;  %13449 = vst [vmem:[#allocation62_spill] sm:$0xff] %v9833_v50  ;;  %v9855_v5 = vmul.f32 %v9539_v55, %v9631_v52  ;;  %v9877_v55 = vmul.f32 %v13421_v12, %v1792_v44  ;;  %4558 = vmatpush1.bf16.msra.mxu1 %v5914_v4  ;;  %v9889_v37 = vmul.f32 %v13427_v24, %v1792_v44  ;;  %v9910_v24 = vld [vmem:[%s12266_s0 + $0x10] sm:$0xff] }
 0x1f0   : > { %13450 = vst [vmem:[#allocation68_spill] sm:$0xff] %v9837_v16  ;;  %13451 = vst [vmem:[#allocation65_spill] sm:$0xff] %v9841_v25  ;;  %v9859_v25 = vmul.f32 %v9546_v58, %v9631_v52  ;;  %v9866_v16 = vmul.f32 %v13417_v61, %v1792_v44  ;;  %v9886_v61 = vmul.f32 %v9685_v36, %v1792_v44  ;;  %v672_v4 = vpop.permute.xlu1 %671  ;;  %4569 = vmatprep.subr.bf16.mxu1 %v12850_v15  ;;  %v9935_v36 = vld [vmem:[%s12266_s0 + $0x30] sm:$0xff] }
 0x1f1   : > { %13452 = vst [vmem:[#allocation26_spill] sm:$0xff] %v9845_v7  ;;  %13453 = vst [vmem:[#allocation61_spill] sm:$0xff] %v9849_v34  ;;  %v9863_v7 = vmul.f32 %v9556_v49, %v9631_v52  ;;  %v5916_v34 = vld [vmem:[%s6372_s13 + $0x2b8] sm:$0x1f]   ;;  %v9883_v52 = vmul.f32 %v13424_v14, %v1792_v44  ;;  %v9904_v14 = vld [vmem:[%s12266_s0 + $0x8] sm:$0xff]  ;;  %4443 = vmatpush1.bf16.msra.mxu0 %v5911_v8  ;;  %v9945_v45 = vpop.permute.xlu0 %2631  ;;  %v9950_v53 = vmul.f32 %v9708_v10, %v9833_v50 }
 0x1f2   : > { %13454 = vst [vmem:[#allocation83_spill] sm:$0xff] %v9855_v5  ;;  %13455 = vst [vmem:[#allocation75_spill] sm:$0xff] %v9859_v25  ;;  %v9874_v5 = vmul.f32 %v13419_v29, %v1792_v44  ;;  %v9880_v25 = vmul.f32 %v9672_v32, %v1792_v44  ;;  %v9894_v29 = vld [vmem:[%s12266_s0] sm:$0xff]  ;;  %v591_v44 = vmul.f32 %v9904_v14, %v504_v31  ;;  %v9941_v8 = vld [vmem:[%s12266_s0 + $0x38] sm:$0xff]  ;;  %4444 = vmatprep.subr.bf16.mxu0 %v12850_v15 }
 0x1f3   : > { %13456 = vst [vmem:[#allocation86_spill] sm:$0xff] %v9863_v7  ;;  %13457 = vst [vmem:[#allocation39_spill] sm:$0xff] %v9866_v16  ;;  %v590_v12 = vmul.f32 %v9894_v29, %v504_v31  ;;  %v596_v32 = vmul.f32 %v9935_v36, %v504_v31  ;;  %v597_v49 = vmul.f32 %v9941_v8, %v504_v31  ;;  %v13473_v58 = vld [vmem:[#allocation6_spill] sm:$0xff]  ;;  %687 = vperm.xlu1 %5819, %v13325_v3  }
 0x1f4   : > { %13458 = vst [vmem:[#allocation88_spill] sm:$0xff] %v9871_v30  ;;  %13459 = vst [vmem:[#allocation95_spill] sm:$0xff] %v9874_v5  ;;  %v9898_v5 = vld [vmem:[%s6372_s13 + $0x260] sm:$0x1f]   ;;  %v9929_v30 = vld [vmem:[%s12266_s0 + $0x28] sm:$0xff]  ;;  %v4541_v39 = vand.u32 %v5916_v34, %v13473_v58  ;;  %v9954_v42 = vmul.f32 %v9717_v28, %v9833_v50  ;;  %v9958_v9 = vmul.f32 %v9726_v43, %v9833_v50  ;;  %v676_v63 = vpop.permute.xlu1 %675 }
 0x1f5   : > { %13460 = vst [vmem:[#allocation60_spill] sm:$0xff] %v9877_v55  ;;  %13461 = vst [vmem:[#allocation50_spill] sm:$0xff] %v9880_v25  ;;  %v9916_v25 = vld [vmem:[%s12266_s0 + $0x18] sm:$0xff]  ;;  %v595_v7 = vmul.f32 %v9929_v30, %v504_v31  ;;  %v9966_v34 = vmul.f32 %v9745_v1, %v9833_v50  ;;  %v13483_v43 = vld [vmem:[#allocation56_spill] sm:$0xff]  ;;  %v765_v60 = vmul.f32 %v13488_v40, %v672_v4 }
 0x1f6   : > { %13462 = vst [vmem:[#allocation78_spill] sm:$0xff] %v9883_v52  ;;  %13463 = vst [vmem:[#allocation79_spill] sm:$0xff] %v9886_v61  ;;  %v592_v61 = vmul.f32 %v9910_v24, %v504_v31  ;;  %v593_v16 = vmul.f32 %v9916_v25, %v504_v31  ;;  %v5913_v55 = vld [vmem:[%s6372_s13 + $0x218] sm:$0xff]   ;;  %4570 = vmatpush2.bf16.msra.mxu1 %v4541_v39  ;;  %v760_v28 = vmul.f32 %v13483_v43, %v672_v4  ;;  %v5915_v10 = vld [vmem:[%s6372_s13 + $0x210] sm:$0xff]  }
 0x1f7   : > { %13464 = vst [vmem:[#allocation112_spill] sm:$0xff] %v9889_v37  ;;  %13465 = vst [vmem:[#allocation113_spill] sm:$0xff] %v9894_v29  ;;  %v9922_v37 = vld [vmem:[%s12266_s0 + $0x20] sm:$0xff]  ;;  %4571 = vmatprep.subr.bf16.mxu1 %v12850_v15  ;;  %v13484_v1 = vld [vmem:[#allocation59_spill] sm:$0xff]  ;;  %4445 = vmatpush1.bf16.msra.mxu0 %v5913_v55 }
 0x1f8   : > { %13466 = vst [vmem:[#allocation114_spill] sm:$0xff] %v9904_v14  ;;  %13467 = vst [vmem:[#allocation115_spill] sm:$0xff] %v9910_v24  ;;  %v594_v52 = vmul.f32 %v9922_v37, %v504_v31  ;;  %v9962_v31 = vmul.f32 %v9736_v13, %v9833_v50  ;;  %4446 = vmatprep.subr.bf16.mxu0 %v12850_v15  ;;  %v5920_v40 = vld [vmem:[%s6372_s13 + $0x2a8] sm:$0xff]  }
 0x1f9   : > { %13468 = vst [vmem:[#allocation116_spill] sm:$0xff] %v9916_v25  ;;  %13469 = vst [vmem:[#allocation117_spill] sm:$0xff] %v9922_v37 }
 0x1fa   : > { %13470 = vst [vmem:[#allocation118_spill] sm:$0xff] %v9929_v30  ;;  %13471 = vst [vmem:[#allocation119_spill] sm:$0xff] %v9935_v36 }
 0x1fb   : > { %13472 = vst [vmem:[#allocation120_spill] sm:$0xff] %v9941_v8  ;;  %13474 = vst [vmem:[#allocation94_spill] sm:$0xff] %v9945_v45  ;;  %v4430_v45 = vand.u32 %v9898_v5, %v13473_v58  ;;  %v13487_v58 = vld [vmem:[#allocation20_spill] sm:$0xff]  ;;  %4447 = vmatpush1.bf16.msra.mxu0 %v5915_v10 }
 0x1fc   : > { %13475 = vst [vmem:[#allocation53_spill] sm:$0xff] %v9950_v53  ;;  %13476 = vst [vmem:[#allocation71_spill] sm:$0xff] %v9954_v42  ;;  %v9970_v53 = vmul.f32 %v9754_v56, %v9833_v50  ;;  %v5918_v42 = vld [vmem:[%s6372_s13 + $0x2b0] sm:$0xff]   ;;  %v13486_v56 = vld [vmem:[#allocation76_spill] sm:$0xff]  ;;  %v764_v3 = vmul.f32 %v13487_v58, %v672_v4  ;;  %4458 = vmatprep.subr.bf16.mxu0 %v12850_v15 }
 0x1fd   : > { %13477 = vst [vmem:[#allocation92_spill] sm:$0xff] %v9958_v9  ;;  %13478 = vst [vmem:[#allocation31_spill] sm:$0xff] %v9962_v31  ;;  %v13481_v9 = vld [vmem:[#allocation55_spill] sm:$0xff]  ;;  %v13485_v50 = vld [vmem:[#allocation66_spill] sm:$0xff]  ;;  %v763_v5 = vmul.f32 %v13486_v56, %v672_v4  ;;  %4572 = vmatpush2.bf16.msra.mxu1 %v5918_v42 }
 0x1fe   : > { %13479 = vst [vmem:[#allocation52_spill] sm:$0xff] %v9966_v34  ;;  %13480 = vst [vmem:[#allocation81_spill] sm:$0xff] %v9970_v53  ;;  %v758_v13 = vmul.f32 %v13481_v9, %v672_v4  ;;  %v13482_v31 = vld [vmem:[#allocation107_spill] sm:$0xff]  ;;  %v761_v34 = vmul.f32 %v13484_v1, %v672_v4  ;;  %v762_v53 = vmul.f32 %v13485_v50, %v672_v4  ;;  %4573 = vmatprep.subr.bf16.mxu1 %v12850_v15  ;;  %v10012_v42 = vld [vmem:[%s12266_s0 + $0x40] sm:$0xff] }
 0x1ff   : > { %v759_v39 = vmul.f32 %v13482_v31, %v672_v4  ;;  %v9991_v1 = vadd.f32 %v760_v28, %v592_v61  ;;  %v9997_v56 = vadd.f32 %v763_v5, %v595_v7  ;;  %v9999_v58 = vadd.f32 %v764_v3, %v596_v32  ;;  %v508_v4 = vpop.permute.xlu0 %507  ;;  %13492 = vst [vmem:[#allocation12_spill] sm:$0xff] %v10012_v42  ;;  %v10024_v28 = vld [vmem:[%s12266_s0 + $0x50] sm:$0xff] }
 0x200   : > { %v9987_v9 = vadd.f32 %v758_v13, %v590_v12  ;;  %v9993_v55 = vadd.f32 %v761_v34, %v593_v16  ;;  %v9995_v50 = vadd.f32 %v762_v53, %v594_v52  ;;  %v10001_v31 = vadd.f32 %v765_v60, %v597_v49  ;;  %v10006_v13 = vld [vmem:[%s6362_s29 + $0xd] ss:$0 sm:$0xff]  ;;  %13494 = vst [vmem:[#allocation73_spill] sm:$0xff] %v10024_v28  ;;  %v10030_v16 = vld [vmem:[%s12266_s0 + $0x58] sm:$0xff]  ;;  %v10036_v52 = vld [vmem:[%s12266_s0 + $0x60] sm:$0xff] }
 0x201   : > { %v9989_v43 = vadd.f32 %v759_v39, %v591_v44  ;;  %13489 = vst [vmem:[#allocation82_spill] sm:$0xff] %v9997_v56  ;;  %13490 = vst [vmem:[#allocation70_spill] sm:$0xff] %v9999_v58  ;;  %691 = vperm.xlu1 %5819, %v10006_v13   ;;  %v766_v53 = vmul.f32 %v10012_v42, %v676_v63  ;;  %v10018_v49 = vld [vmem:[%s12266_s0 + $0x48] sm:$0xff]  ;;  %v768_v60 = vmul.f32 %v10024_v28, %v676_v63  ;;  %v10048_v44 = vld [vmem:[%s12266_s0 + $0x70] sm:$0xff]  ;;  %v10065_v42 = vpop.permute.xlu1 %955 }
 0x202   : > { %13491 = vst [vmem:[#allocation10_spill] sm:$0xff] %v10001_v31  ;;  %13493 = vst [vmem:[#allocation28_spill] sm:$0xff] %v10018_v49  ;;  %v767_v32 = vmul.f32 %v10018_v49, %v676_v63  ;;  %v769_v7 = vmul.f32 %v10030_v16, %v676_v63  ;;  %v770_v61 = vmul.f32 %v10036_v52, %v676_v63  ;;  %v10042_v12 = vld [vmem:[%s12266_s0 + $0x68] sm:$0xff]  ;;  %v10055_v39 = vld [vmem:[%s12266_s0 + $0x78] sm:$0xff]  ;;  %4574 = vmatpush2.bf16.msra.mxu1 %v5920_v40  ;;  %v10067_v31 = vpop.f32.mrf.mxu1  ;;  %v13501_v40 = vmov 2  }
 0x203   : > { %13495 = vst [vmem:[#allocation98_spill] sm:$0xff] %v10030_v16  ;;  %13496 = vst [vmem:[#allocation99_spill] sm:$0xff] %v10036_v52  ;;  %v771_v10 = vmul.f32 %v10042_v12, %v676_v63  ;;  %v772_v34 = vmul.f32 %v10048_v44, %v676_v63  ;;  %v773_v5 = vmul.f32 %v10055_v39, %v676_v63  ;;  %4459 = vmatpush2.bf16.msra.mxu0 %v4430_v45 }
 0x204   : > { %13497 = vst [vmem:[#allocation101_spill] sm:$0xff] %v10042_v12  ;;  %13498 = vst [vmem:[#allocation121_spill] sm:$0xff] %v10048_v44  ;;  %v598_v3 = vmul.f32 %v9894_v29, %v508_v4  ;;  %v599_v12 = vmul.f32 %v9904_v14, %v508_v4  ;;  %v600_v52 = vmul.f32 %v9910_v24, %v508_v4  ;;  %4460 = vmatprep.subr.bf16.mxu0 %v12850_v15 }
 0x205   : > { %13499 = vst [vmem:[#allocation122_spill] sm:$0xff] %v10055_v39  ;;  %v601_v16 = vmul.f32 %v9916_v25, %v508_v4  ;;  %v602_v44 = vmul.f32 %v9922_v37, %v508_v4  ;;  %v603_v28 = vmul.f32 %v9929_v30, %v508_v4  ;;  %v604_v49 = vmul.f32 %v9935_v36, %v508_v4  ;;  %v5919_v37 = vld [vmem:[%s6372_s13 + $0x258] sm:$0xff]  }
 0x206   : > { %13500 = vst [vmem:[#allocation15_spill] sm:$0xff] %v10067_v31  ;;  %v605_v63 = vmul.f32 %v9941_v8, %v508_v4  ;;  %v10070_v39 = vadd.f32 %v766_v53, %v598_v3  ;;  %v10072_v14 = vadd.f32 %v767_v32, %v599_v12  ;;  %v10074_v24 = vadd.f32 %v768_v60, %v600_v52  ;;  %v3913_v31 = vpop.f32.mrf.mxu1  ;;  %v13502_v53 = vld [vmem:[#allocation34_spill] sm:$0xff]  ;;  %v13503_v32 = vld [vmem:[#allocation41_spill] sm:$0xff]  ;;  %v13508_v12 = vld [vmem:[#allocation124_spill] sm:$0xff] }
 0x207   : > { %5821 = vset.pattern.permute.xlu1 %v13501_v40  ;;  %v10078_v25 = vadd.f32 %v769_v7, %v601_v16  ;;  %v10080_v30 = vadd.f32 %v770_v61, %v602_v44  ;;  %v10082_v36 = vadd.f32 %v771_v10, %v603_v28  ;;  %v10084_v29 = vadd.f32 %v772_v34, %v604_v49  ;;  %v10096_v16 = vld [vmem:[%s12266_s0 + $0x1b8] sm:$0xff]  ;;  %v13505_v28 = vld [vmem:[#allocation37_spill] sm:$0xff]  ;;  %v13520_v8 = vld [vmem:[#allocation80_spill] sm:$0xff] }
 0x208   : > { %v10087_v4 = vadd.f32 %v773_v5, %v605_v63  ;;  %v1429_v60 = vadd.f32 %v13503_v32, %v13502_v53  ;;  %v1987_v45 = vadd.f32 %v9680_v35, %v9656_v47  ;;  %13504 = vst [vmem:[#allocation123_spill] sm:$0xff] %v10096_v16  ;;  %v2157_v49 = vmul.f32 %v10096_v16, %v13505_v28  ;;  %v13506_v31 = vld [vmem:[#allocation23_spill] sm:$0xff]  ;;  %v13507_v52 = vld [vmem:[#allocation25_spill] sm:$0xff]  ;;  %v3914_v35 = vpop.f32.mrf.mxu1  ;;  %v13511_v63 = vld [vmem:[#allocation126_spill] sm:$0xff] }
 0x209   : > { %v2263_v7 = vadd.f32 %v13506_v31, %v9698_v2  ;;  %v2265_v61 = vadd.f32 %v13507_v52, %v9703_v48  ;;  %v2435_v10 = vmul.f32 %v13508_v12, %v9551_v27  ;;  %v13509_v44 = vld [vmem:[#allocation125_spill] sm:$0xff]  ;;  %971 = vperm.xlu1 %5821, %v10006_v13   ;;  %v2711_v40 = vmul.f32 %v13511_v63, %v9609_v23  ;;  %v13512_v2 = vld [vmem:[#allocation127_spill] sm:$0xff]  ;;  %v5921_v48 = vld [vmem:[%s6372_s13 + $0x250] sm:$0xff]  }
 0x20a   : > { %v2437_v47 = vmul.f32 %v13509_v44, %v9551_v27  ;;  %v1709_v34 = vadd.f32 %v9650_v17, %v1429_v60  ;;  %v13510_v5 = vld [vmem:[#allocation29_spill] sm:$0xff]  ;;  %v2713_v53 = vmul.f32 %v13512_v2, %v9609_v23  ;;  %4765 = vmatprep.subr.bf16.mxu1 %v12850_v15  ;;  %4461 = vmatpush2.bf16.msra.mxu0 %v5919_v37  ;;  %v13513_v52 = vld [vmem:[#allocation128_spill] sm:$0xff]  ;;  %v3915_v44 = vpop.f32.mrf.mxu1 }
 0x20b   : > { %v2267_v3 = vadd.f32 %v13510_v5, %v1987_v45  ;;  %v2543_v32 = vadd.f32 %v9785_v51, %v2263_v7  ;;  %v2545_v31 = vadd.f32 %v9793_v62, %v2265_v61  ;;  %v2715_v12 = vmul.f32 %v13513_v52, %v9609_v23  ;;  %v13514_v17 = vld [vmem:[#allocation129_spill] sm:$0xff]  ;;  %v10123_v45 = vpop.permute.xlu1 %1231  ;;  %4462 = vmatprep.subr.bf16.mxu0 %v12850_v15  ;;  %v13516_v5 = vld [vmem:[#allocation42_spill] sm:$0xff]  ;;  %v13517_v63 = vld [vmem:[#allocation40_spill] sm:$0xff] }
 0x20c   : > { %v2717_v60 = vmul.f32 %v13514_v17, %v9609_v23  ;;  %13515 = vst [vmem:[#allocation55_spill] sm:$0xff] %v10123_v45  ;;  %v1989_v35 = vadd.f32 %v9694_v6, %v1709_v34  ;;  %v1701_v51 = vadd.f32 %v13517_v63, %v13516_v5  ;;  %v13518_v62 = vld [vmem:[#allocation47_spill] sm:$0xff]  ;;  %v13519_v52 = vld [vmem:[#allocation32_spill] sm:$0xff]  ;;  %v1979_v45 = vadd.f32 %v13520_v8, %v9611_v19  ;;  %v13522_v6 = vld [vmem:[#allocation45_spill] sm:$0xff] }
 0x20d   : > { %v2547_v37 = vadd.f32 %v2435_v10, %v2267_v3  ;;  %v1975_v7 = vadd.f32 %v13518_v62, %v9600_v0  ;;  %v2823_v61 = vadd.f32 %v2711_v40, %v2543_v32  ;;  %v2825_v2 = vadd.f32 %v2713_v53, %v2545_v31  ;;  %v10140_v3 = vld [vmem:[%s6362_s29 + $0xc] ss:$0 sm:$0xff]  ;;  %v13523_v0 = vld [vmem:[#allocation38_spill] sm:$0xff] }
 0x20e   : > { %v1977_v17 = vadd.f32 %v13519_v52, %v9604_v41  ;;  %v13521_v44 = vmov 3   ;;  %v2269_v58 = vadd.f32 %v2157_v49, %v1989_v35  ;;  %v1981_v10 = vadd.f32 %v13522_v6, %v1701_v51  ;;  %4463 = vmatpush2.bf16.msra.mxu0 %v5921_v48  ;;  %v10153_v48 = vld [vmem:[%s12266_s0 + $0x1e8] sm:$0xff] }
 0x20f   : > { %5822 = vset.pattern.permute.xlu1 %v13521_v44  ;;  %v2827_v56 = vadd.f32 %v2715_v12, %v2547_v37  ;;  %v2149_v34 = vmul.f32 %v10096_v16, %v9436_v59  ;;  %v3075_v40 = vadd.f32 %v13523_v0, %v2823_v61  ;;  %v3077_v41 = vadd.f32 %v13523_v0, %v2825_v2  ;;  %v13528_v61 = vld [vmem:[#allocation67_spill] sm:$0xff]  ;;  %v10188_v52 = vld [vmem:[%s12266_s0 + $0x228] sm:$0xff] }
 0x210   : > { %1247 = vperm.xlu1 %5822, %v10140_v3   ;;  %v2255_v19 = vadd.f32 %v9721_v18, %v1975_v7  ;;  %v2257_v8 = vadd.f32 %v9740_v22, %v1977_v17  ;;  %v2549_v49 = vadd.f32 %v2437_v47, %v2269_v58  ;;  %v2259_v32 = vadd.f32 %v9758_v33, %v1979_v45  ;;  %v10160_v22 = vld [vmem:[%s12266_s0 + $0x1f8] sm:$0xff]  ;;  %v10172_v7 = vld [vmem:[%s12266_s0 + $0x208] sm:$0xff] }
 0x211   : > { %v3079_v53 = vadd.f32 %v13523_v0, %v2827_v56  ;;  %v2261_v31 = vadd.f32 %v2149_v34, %v1981_v10  ;;  %4654 = vmatprep.subr.bf16.mxu0 %v12850_v15  ;;  %v3187_v12 = vmax.f32 %v3075_v40, 0.0  ;;  %v3189_v35 = vmax.f32 %v3077_v41, 0.0  ;;  %13524 = vst [vmem:[#allocation107_spill] sm:$0xff] %v10153_v48  ;;  %13525 = vst [vmem:[#allocation56_spill] sm:$0xff] %v10160_v22  ;;  %v10164_v56 = vpop.permute.xlu1 %1511  ;;  %v10195_v44 = vld [vmem:[%s12266_s0 + $0x238] sm:$0xff]  ;;  %v13532_v40 = vld [vmem:[#allocation104_spill] sm:$0xff] }
 0x212   : > { %v2427_v18 = vmul.f32 %v10153_v48, %v9467_v26  ;;  %v2429_v33 = vmul.f32 %v10160_v22, %v9467_v26  ;;  %v2829_v58 = vadd.f32 %v2717_v60, %v2549_v49  ;;  %v2535_v45 = vadd.f32 %v9767_v46, %v2255_v19  ;;  %13527 = vst [vmem:[#allocation59_spill] sm:$0xff] %v10172_v7  ;;  %v13533_v41 = vld [vmem:[#allocation93_spill] sm:$0xff]  ;;  %v13535_v49 = vld [vmem:[#allocation72_spill] sm:$0xff]  ;;  %v13561_v16 = vld [vmem:[#allocation51_spill] sm:$0xff] }
 0x213   : > { %v3191_v47 = vmax.f32 %v3079_v53, 0.0  ;;  %v2537_v37 = vadd.f32 %v9775_v38, %v2257_v8  ;;  %v13526_v5 = vmov 4   ;;  %v3257_v63 = vadd.f32 %v3189_v35, %v3187_v12  ;;  %v10181_v38 = vld [vmem:[%s12266_s0 + $0x218] sm:$0xff]  ;;  %13530 = vst [vmem:[#allocation76_spill] sm:$0xff] %v10188_v52  ;;  %13531 = vst [vmem:[#allocation20_spill] sm:$0xff] %v10195_v44  ;;  %v13534_v8 = vld [vmem:[#allocation46_spill] sm:$0xff] }
 0x214   : > { %5824 = vset.pattern.permute.xlu1 %v13526_v5  ;;  %v2539_v51 = vadd.f32 %v2427_v18, %v2259_v32  ;;  %v2541_v62 = vadd.f32 %v2429_v33, %v2261_v31  ;;  %v2703_v2 = vmul.f32 %v10172_v7, %v13528_v61  ;;  %v3081_v60 = vadd.f32 %v13523_v0, %v2829_v58  ;;  %v13536_v18 = vld [vmem:[#allocation33_spill] sm:$0xff]  ;;  %v13537_v58 = vld [vmem:[#allocation11_spill] sm:$0xff]  ;;  %v13560_v48 = vld [vmem:[#allocation8_spill] sm:$0xff] }
 0x215   : > { %1527 = vperm.xlu1 %5824, %v10140_v3   ;;  %13529 = vst [vmem:[#allocation66_spill] sm:$0xff] %v10181_v38  ;;  %v2705_v46 = vmul.f32 %v10181_v38, %v13528_v61  ;;  %v2707_v17 = vmul.f32 %v10188_v52, %v13528_v61  ;;  %v2709_v6 = vmul.f32 %v10195_v44, %v13528_v61  ;;  %v10208_v44 = vld [vmem:[%s12266_s0 + $0x1b0] sm:$0xff]  ;;  %v13548_v38 = vmov 5  }
 0x216   : > { %v3285_v10 = vadd.f32 %v3257_v63, %v3191_v47  ;;  %v2815_v34 = vadd.f32 %v2703_v2, %v2535_v45  ;;  %v1428_v19 = vadd.f32 %v13533_v41, %v13532_v40  ;;  %v1986_v53 = vadd.f32 %v13535_v49, %v13534_v8  ;;  %13538 = vst [vmem:[#allocation77_spill] sm:$0xff] %v10208_v44  ;;  %v13539_v45 = vld [vmem:[#allocation97_spill] sm:$0xff]  ;;  %v13540_v63 = vld [vmem:[#allocation22_spill] sm:$0xff]  ;;  %v13542_v40 = vld [vmem:[#allocation100_spill] sm:$0xff] }
 0x217   : > { %v3193_v32 = vmax.f32 %v3081_v60, 0.0  ;;  %v2817_v31 = vadd.f32 %v2705_v46, %v2537_v37  ;;  %v2819_v12 = vadd.f32 %v2707_v17, %v2539_v51  ;;  %v2821_v35 = vadd.f32 %v2709_v6, %v2541_v62  ;;  %v10215_v37 = vpop.permute.xlu1 %1515  ;;  %v13541_v6 = vld [vmem:[#allocation103_spill] sm:$0xff]  ;;  %v13543_v41 = vld [vmem:[#allocation24_spill] sm:$0xff] }
 0x218   : > { %v3067_v33 = vadd.f32 %v13536_v18, %v2815_v34  ;;  %v1708_v5 = vadd.f32 %v13537_v58, %v1428_v19  ;;  %v2156_v47 = vmul.f32 %v10208_v44, %v13505_v28  ;;  %v2262_v2 = vadd.f32 %v13540_v63, %v13539_v45  ;;  %v13544_v19 = vld [vmem:[#allocation27_spill] sm:$0xff] }
 0x219   : > { %1531 = vperm.xlu1 %5824, %v10006_v13   ;;  %v3313_v51 = vadd.f32 %v3285_v10, %v3193_v32  ;;  %v3069_v62 = vadd.f32 %v13536_v18, %v2817_v31  ;;  %v3071_v60 = vadd.f32 %v13536_v18, %v2819_v12  ;;  %v3073_v46 = vadd.f32 %v13536_v18, %v2821_v35  ;;  %v13545_v10 = vld [vmem:[#allocation57_spill] sm:$0xff]  ;;  %v13546_v31 = vld [vmem:[#allocation87_spill] sm:$0xff] }
 0x21a   : > { %v3179_v17 = vmax.f32 %v3067_v33, 0.0  ;;  %v1988_v34 = vadd.f32 %v13541_v6, %v1708_v5  ;;  %v2264_v28 = vadd.f32 %v13543_v41, %v13542_v40  ;;  %v2266_v8 = vadd.f32 %v13544_v19, %v1986_v53  ;;  %v13547_v35 = vld [vmem:[#allocation89_spill] sm:$0xff]  ;;  %v10234_v53 = vld [vmem:[%s12266_s0 + $0x200] sm:$0xff] }
 0x21b   : > { %v3341_v49 = vmul.f32 0.25, %v3313_v51  ;;  %v3181_v58 = vmax.f32 %v3069_v62, 0.0  ;;  %v3183_v45 = vmax.f32 %v3071_v60, 0.0  ;;  %v3185_v63 = vmax.f32 %v3073_v46, 0.0  ;;  %13549 = vst [vmem:[#allocation34_spill] sm:$0xff] %v10234_v53  ;;  %v10253_v60 = vpop.permute.xlu1 %1795  ;;  %v10259_v46 = vld [vmem:[%s12266_s0 + $0x230] sm:$0xff] }
 0x21c   : > { %v2268_v52 = vadd.f32 %v2156_v47, %v1988_v34  ;;  %v2434_v32 = vmul.f32 %v13545_v10, %v9551_v27  ;;  %v2436_v12 = vmul.f32 %v13546_v31, %v9551_v27  ;;  %v2542_v33 = vadd.f32 %v13547_v35, %v2262_v2  ;;  %v10249_v2 = vld [vmem:[%s12266_s0 + $0x220] sm:$0xff]  ;;  %13552 = vst [vmem:[#allocation23_spill] sm:$0xff] %v10253_v60  ;;  %v13554_v41 = vld [vmem:[#allocation21_spill] sm:$0xff] }
 0x21d   : > { %5826 = vset.pattern.permute.xlu1 %v13548_v38  ;;  %v3369_v5 = vpack.c.bf16 %v3341_v49, %v3341_v49  ;;  %v3255_v6 = vadd.f32 %v3181_v58, %v3179_v17  ;;  %v2544_v40 = vadd.f32 %v9789_v57, %v2264_v28  ;;  %v2710_v47 = vmul.f32 %v10234_v53, %v9609_v23  ;;  %v10242_v38 = vld [vmem:[%s12266_s0 + $0x210] sm:$0xff]  ;;  %v13556_v58 = vld [vmem:[#allocation43_spill] sm:$0xff]  ;;  %v13558_v35 = vld [vmem:[#allocation48_spill] sm:$0xff] }
 0x21e   : > { %1811 = vperm.xlu1 %5826, %v10006_v13   ;;  %v2546_v51 = vadd.f32 %v2434_v32, %v2266_v8  ;;  %v2548_v27 = vadd.f32 %v2436_v12, %v2268_v52  ;;  %13550 = vst [vmem:[#allocation41_spill] sm:$0xff] %v10242_v38  ;;  %v2712_v57 = vmul.f32 %v10242_v38, %v9609_v23  ;;  %13551 = vst [vmem:[#allocation37_spill] sm:$0xff] %v10249_v2  ;;  %v13555_v28 = vld [vmem:[#allocation18_spill] sm:$0xff]  ;;  %v13557_v32 = vld [vmem:[#allocation85_spill] sm:$0xff] }
 0x21f   : > { %v2714_v62 = vmul.f32 %v10249_v2, %v9609_v23  ;;  %5586 = vmatprep.mubr.msk.bf16.mxu1 %vm3755_vm2, %v3369_v5  ;;  %v3283_v52 = vadd.f32 %v3255_v6, %v3183_v45  ;;  %13553 = vst [vmem:[#allocation25_spill] sm:$0xff] %v10259_v46  ;;  %v2716_v17 = vmul.f32 %v10259_v46, %v9609_v23  ;;  %v13559_v5 = vld [vmem:[#allocation54_spill] sm:$0xff]  ;;  %v13562_v23 = vmov 6  }
 0x220   : > { %v2822_v34 = vadd.f32 %v2710_v47, %v2542_v33  ;;  %v1700_v19 = vadd.f32 %v13555_v28, %v13554_v41  ;;  %v2824_v8 = vadd.f32 %v2712_v57, %v2544_v40  ;;  %v1974_v12 = vadd.f32 %v13557_v32, %v13556_v58  ;;  %v13563_v47 = vld [vmem:[#allocation64_spill] sm:$0xff]  ;;  %v13566_v28 = vld [vmem:[#allocation17_spill] sm:$0xff] }
 0x221   : > { %v2826_v49 = vadd.f32 %v2714_v62, %v2546_v51  ;;  %v1976_v45 = vadd.f32 %v13559_v5, %v13558_v35  ;;  %v3311_v6 = vadd.f32 %v3283_v52, %v3185_v63  ;;  %v2828_v7 = vadd.f32 %v2716_v17, %v2548_v27  ;;  %v13564_v52 = vld [vmem:[#allocation7_spill] sm:$0xff] }
 0x222   : > { %v3074_v22 = vadd.f32 %v13523_v0, %v2822_v34  ;;  %v1978_v60 = vadd.f32 %v13561_v16, %v13560_v48  ;;  %5827 = vset.pattern.permute.xlu1 %v13562_v23  ;;  %v3076_v33 = vadd.f32 %v13523_v0, %v2824_v8  ;;  %v1980_v51 = vadd.f32 %v13563_v47, %v1700_v19  ;;  %v13565_v34 = vld [vmem:[#allocation108_spill] sm:$0xff] }
 0x223   : > { %v3078_v40 = vadd.f32 %v13523_v0, %v2826_v49  ;;  %v2148_v57 = vmul.f32 %v10208_v44, %v9436_v59  ;;  %2087 = vperm.xlu1 %5827, %v10140_v3   ;;  %v3339_v63 = vmul.f32 0.25, %v3311_v6  ;;  %v3080_v27 = vadd.f32 %v13523_v0, %v2828_v7  ;;  %v10283_v49 = vpop.permute.xlu1 %2071 }
 0x224   : > { %v3186_v62 = vmax.f32 %v3074_v22, 0.0  ;;  %v2254_v17 = vadd.f32 %v13564_v52, %v1974_v12  ;;  %v3188_v16 = vmax.f32 %v3076_v33, 0.0  ;;  %v2256_v41 = vadd.f32 %v13565_v34, %v1976_v45  ;;  %13567 = vst [vmem:[#allocation124_spill] sm:$0xff] %v10283_v49  ;;  %v13568_v22 = vld [vmem:[#allocation91_spill] sm:$0xff]  ;;  %v13569_v12 = vld [vmem:[#allocation36_spill] sm:$0xff] }
 0x225   : > { %v3190_v48 = vmax.f32 %v3078_v40, 0.0  ;;  %v2258_v8 = vadd.f32 %v13566_v28, %v1978_v60  ;;  %v3367_v19 = vpack.c.bf16 %v3339_v63, %v3339_v63  ;;  %v3192_v58 = vmax.f32 %v3080_v27, 0.0  ;;  %v10304_v40 = vld [vmem:[%s12266_s0 + $0x80] sm:$0xff]  ;;  %v10312_v27 = vld [vmem:[%s12266_s0 + $0x88] sm:$0xff] }
 0x226   : > { %v2260_v32 = vadd.f32 %v2148_v57, %v1980_v51  ;;  %v2426_v59 = vmul.f32 %v13545_v10, %v9467_v26  ;;  %v3256_v35 = vadd.f32 %v3188_v16, %v3186_v62  ;;  %v2428_v0 = vmul.f32 %v13546_v31, %v9467_v26  ;;  %v10326_v16 = vld [vmem:[%s12266_s0 + $0x98] sm:$0xff] }
 0x227   : > { %v2534_v7 = vadd.f32 %v13568_v22, %v2254_v17  ;;  %v2536_v5 = vadd.f32 %v13569_v12, %v2256_v41  ;;  %v13570_v6 = vmov 7   ;;  %5574 = vmatprep.mubr.msk.bf16.mxu0 %vm3755_vm2, %v3367_v19  ;;  %v2702_v45 = vmul.f32 %v10234_v53, %v13528_v61  ;;  %v10319_v17 = vld [vmem:[%s12266_s0 + $0x90] sm:$0xff]  ;;  %v10330_v34 = vpop.permute.xlu1 %2351  ;;  %v10338_v19 = vld [vmem:[%s12266_s0 + $0xa0] sm:$0xff] }
 0x228   : > { %5829 = vset.pattern.permute.xlu1 %v13570_v6  ;;  %v2538_v60 = vadd.f32 %v2426_v59, %v2258_v8  ;;  %v2704_v23 = vmul.f32 %v10242_v38, %v13528_v61  ;;  %v2706_v10 = vmul.f32 %v10249_v2, %v13528_v61  ;;  %v3284_v33 = vadd.f32 %v3256_v35, %v3190_v48  ;;  %v10346_v35 = vld [vmem:[%s12266_s0 + $0xa8] sm:$0xff]  ;;  %v10353_v22 = vld [vmem:[%s12266_s0 + $0xb0] sm:$0xff]  ;;  %v10361_v6 = vld [vmem:[%s12266_s0 + $0xb8] sm:$0xff] }
 0x229   : > { %v2540_v26 = vadd.f32 %v2428_v0, %v2260_v32  ;;  %v2708_v31 = vmul.f32 %v10259_v46, %v13528_v61  ;;  %v1046_v47 = vmul.f32 %v10304_v40, %v10065_v42  ;;  %2367 = vperm.xlu1 %5829, %v10140_v3   ;;  %v2814_v51 = vadd.f32 %v2702_v45, %v2534_v7  ;;  %v5922_v45 = vld [vmem:[%s6372_s13 + $0x350] sm:$0xff]   ;;  %v13665_v46 = vld [vmem:[#allocation116_spill] sm:$0xff]  ;;  %v13666_v2 = vld [vmem:[#allocation117_spill] sm:$0xff] }
 0x22a   : > { %v2816_v57 = vadd.f32 %v2704_v23, %v2536_v5  ;;  %v2818_v63 = vadd.f32 %v2706_v10, %v2538_v60  ;;  %v1047_v61 = vmul.f32 %v10312_v27, %v10065_v42  ;;  %v3312_v62 = vadd.f32 %v3284_v33, %v3192_v58  ;;  %13571 = vst [vmem:[#allocation125_spill] sm:$0xff] %v10330_v34  ;;  %v13667_v53 = vld [vmem:[#allocation118_spill] sm:$0xff] }
 0x22b   : > { %v2820_v52 = vadd.f32 %v2708_v31, %v2540_v26  ;;  %v1048_v3 = vmul.f32 %v10319_v17, %v10065_v42  ;;  %v1049_v48 = vmul.f32 %v10326_v16, %v10065_v42  ;;  %v3066_v41 = vadd.f32 %v13536_v18, %v2814_v51 }
 0x22c   : > { %v3068_v28 = vadd.f32 %v13536_v18, %v2816_v57  ;;  %v3070_v8 = vadd.f32 %v13536_v18, %v2818_v63  ;;  %v1050_v58 = vmul.f32 %v10338_v19, %v10065_v42  ;;  %v3340_v32 = vmul.f32 0.25, %v3312_v62 }
 0x22d   : > { %v3072_v59 = vadd.f32 %v13536_v18, %v2820_v52  ;;  %v1051_v0 = vmul.f32 %v10346_v35, %v10065_v42  ;;  %v1052_v7 = vmul.f32 %v10353_v22, %v10065_v42  ;;  %2371 = vperm.xlu1 %5829, %v10006_v13   ;;  %v3178_v12 = vmax.f32 %v3066_v41, 0.0  ;;  %v13574_v52 = vld [vmem:[#allocation82_spill] sm:$0xff] }
 0x22e   : > { %v3180_v18 = vmax.f32 %v3068_v28, 0.0  ;;  %v3182_v5 = vmax.f32 %v3070_v8, 0.0  ;;  %v1053_v60 = vmul.f32 %v10361_v6, %v10065_v42  ;;  %v3368_v23 = vpack.c.bf16 %v3340_v32, %v3340_v32  ;;  %v13578_v28 = vld [vmem:[#allocation10_spill] sm:$0xff]  ;;  %v13579_v8 = vld [vmem:[#allocation105_spill] sm:$0xff] }
 0x22f   : > { %v3184_v10 = vmax.f32 %v3072_v59, 0.0  ;;  %v10367_v33 = vadd.f32 %v1046_v47, %v10070_v39  ;;  %v10370_v26 = vadd.f32 %v1047_v61, %v10072_v14  ;;  %v10373_v51 = vadd.f32 %v1048_v3, %v10074_v24  ;;  %v10392_v47 = vpop.permute.xlu1 %2355  ;;  %v13575_v3 = vld [vmem:[#allocation69_spill] sm:$0xff] }
 0x230   : > { %v3254_v31 = vadd.f32 %v3180_v18, %v3178_v12  ;;  %v10376_v57 = vadd.f32 %v1049_v48, %v10078_v25  ;;  %v10379_v63 = vadd.f32 %v1050_v58, %v10080_v30  ;;  %4576 = vmatmul.mubr.bf16.vlgmr.msra.gmra.mxu1 %v3368_v23  ;;  %v10382_v42 = vadd.f32 %v1051_v0, %v10082_v36  ;;  %v13577_v48 = vld [vmem:[#allocation96_spill] sm:$0xff]  ;;  %v13585_v0 = vld [vmem:[#allocation35_spill] sm:$0xff]  ;;  %v13586_v12 = vld [vmem:[#allocation102_spill] sm:$0xff] }
 0x231   : > { %v10385_v39 = vadd.f32 %v1052_v7, %v10084_v29  ;;  %v10388_v14 = vadd.f32 %v1053_v60, %v10087_v4  ;;  %v1150_v24 = vadd.f32 %v9797_v20, %v9987_v9  ;;  %v1151_v30 = vadd.f32 %v9802_v21, %v9989_v43  ;;  %4766 = vmatpush1.bf16.msra.mxu1 %v5922_v45  ;;  %v5924_v29 = vld [vmem:[%s6372_s13 + $0x348] sm:$0xff]   ;;  %v13573_v4 = vld [vmem:[#allocation44_spill] sm:$0xff]  ;;  %v13576_v9 = vld [vmem:[#allocation70_spill] sm:$0xff] }
 0x232   : > { %v3282_v25 = vadd.f32 %v3254_v31, %v3182_v5  ;;  %v1152_v61 = vadd.f32 %v9806_v54, %v9991_v1  ;;  %v1153_v36 = vadd.f32 %v9810_v11, %v9993_v55  ;;  %v1154_v62 = vadd.f32 %v13573_v4, %v9995_v50  ;;  %4767 = vmatprep.subr.bf16.mxu1 %v12850_v15  ;;  %v13580_v43 = vld [vmem:[#allocation55_spill] sm:$0xff]  ;;  %v13581_v1 = vld [vmem:[#allocation74_spill] sm:$0xff]  ;;  %v13582_v55 = vld [vmem:[#allocation109_spill] sm:$0xff] }
 0x233   : > { %13572 = vst [vmem:[#allocation29_spill] sm:$0xff] %v10385_v39  ;;  %v1155_v20 = vadd.f32 %v13575_v3, %v13574_v52  ;;  %v1156_v41 = vadd.f32 %v13577_v48, %v13576_v9  ;;  %v1157_v21 = vadd.f32 %v13579_v8, %v13578_v28  ;;  %v1318_v11 = vmul.f32 %v13581_v1, %v13580_v43  ;;  %v13583_v50 = vld [vmem:[#allocation111_spill] sm:$0xff]  ;;  %v13587_v5 = vld [vmem:[#allocation84_spill] sm:$0xff]  ;;  %v13588_v45 = vld [vmem:[#allocation49_spill] sm:$0xff] }
 0x234   : > { %v3310_v54 = vadd.f32 %v3282_v25, %v3184_v10  ;;  %v1319_v58 = vmul.f32 %v13582_v55, %v13580_v43  ;;  %v1320_v32 = vmul.f32 %v13583_v50, %v13580_v43  ;;  %v13584_v59 = vmov 8   ;;  %v10426_v10 = vpop.f32.mrf.mxu0  ;;  %v13590_v25 = vld [vmem:[#allocation19_spill] sm:$0xff]  ;;  %v10432_v55 = vpop.permute.xlu1 %2635 }
 0x235   : > { %5831 = vset.pattern.permute.xlu1 %v13584_v59  ;;  %v1321_v7 = vmul.f32 %v13585_v0, %v13580_v43  ;;  %v1322_v18 = vmul.f32 %v13586_v12, %v13580_v43  ;;  %v1323_v60 = vmul.f32 %v13587_v5, %v13580_v43  ;;  %v1324_v23 = vmul.f32 %v13588_v45, %v13580_v43  ;;  %v5923_v1 = vld [vmem:[%s6372_s13 + $0x2f8] sm:$0xff]   ;;  %v10475_v0 = vld [vmem:[%s12266_s0 + $0x120] sm:$0xff]  ;;  %v10482_v12 = vld [vmem:[%s12266_s0 + $0x128] sm:$0xff] }
 0x236   : > { %2651 = vperm.xlu1 %5831, %v10006_v13   ;;  %13589 = vst [vmem:[#allocation126_spill] sm:$0xff] %v10426_v10  ;;  %v3338_v31 = vmul.f32 0.25, %v3310_v54  ;;  %v1325_v4 = vmul.f32 %v13590_v25, %v13580_v43  ;;  %v1430_v52 = vadd.f32 %v1318_v11, %v1150_v24  ;;  %v1431_v3 = vadd.f32 %v1319_v58, %v1151_v30  ;;  %v4024_v13 = vpop.f32.mrf.mxu0  ;;  %v13594_v43 = vld [vmem:[#allocation90_spill] sm:$0xff]  ;;  %v13595_v24 = vld [vmem:[#allocation15_spill] sm:$0xff]  ;;  %v5926_v58 = vld [vmem:[%s6372_s13 + $0x340] sm:$0xff]  }
 0x237   : > { %4768 = vmatpush1.bf16.msra.mxu1 %v5924_v29  ;;  %v1432_v9 = vadd.f32 %v1320_v32, %v1152_v61  ;;  %v1433_v48 = vadd.f32 %v1321_v7, %v1153_v36  ;;  %v1434_v28 = vadd.f32 %v1322_v18, %v1154_v62  ;;  %v1435_v8 = vadd.f32 %v1323_v60, %v1155_v20  ;;  %v10445_v61 = vld [vmem:[%s12266_s0 + $0x100] sm:$0xff]  ;;  %v10452_v29 = vld [vmem:[%s12266_s0 + $0x108] sm:$0xff]  ;;  %v10459_v20 = vld [vmem:[%s12266_s0 + $0x110] sm:$0xff] }
 0x238   : > { %4769 = vmatprep.subr.bf16.mxu1 %v12850_v15  ;;  %13591 = vst [vmem:[#allocation127_spill] sm:$0xff] %v10432_v55  ;;  %v3366_v50 = vpack.c.bf16 %v3338_v31, %v3338_v31  ;;  %v10434_v59 = vadd.f32 %v1324_v23, %v1156_v41  ;;  %v10436_v54 = vadd.f32 %v1325_v4, %v1157_v21  ;;  %13597 = vst [vmem:[#allocation40_spill] sm:$0xff] %v10445_v61  ;;  %v10466_v21 = vld [vmem:[%s12266_s0 + $0x118] sm:$0xff]  ;;  %v4025_v32 = vpop.f32.mrf.mxu0  ;;  %v10489_v5 = vld [vmem:[%s12266_s0 + $0x130] sm:$0xff]  ;;  %v10768_v55 = vpop.f32.mrf.mxu1 }
 0x239   : > { %v10440_v30 = vadd.f32 %v13595_v24, %v13594_v43  ;;  %v1598_v36 = vmul.f32 %v10445_v61, %v10164_v56  ;;  %13598 = vst [vmem:[#allocation47_spill] sm:$0xff] %v10452_v29  ;;  %v1599_v62 = vmul.f32 %v10452_v29, %v10164_v56  ;;  %13599 = vst [vmem:[#allocation32_spill] sm:$0xff] %v10459_v20  ;;  %v10498_v45 = vld [vmem:[%s12266_s0 + $0x138] sm:$0xff]  ;;  %v10695_v10 = vld [vmem:[%s6372_s13 + $0x310] sm:$0x1f]  }
 0x23a   : > { %13592 = vst [vmem:[#allocation128_spill] sm:$0xff] %v10434_v59  ;;  %13593 = vst [vmem:[#allocation129_spill] sm:$0xff] %v10436_v54  ;;  %v1600_v41 = vmul.f32 %v10459_v20, %v10164_v56  ;;  %v1601_v11 = vmul.f32 %v10466_v21, %v10164_v56  ;;  %5832 = vset.pattern.permute.xlu1 %v12850_v15  ;;  %4465 = vmatmul.mubr.bf16.vlgmr.msra.gmra.mxu0 %v3366_v50  ;;  %v5925_v50 = vld [vmem:[%s6372_s13 + $0x2f0] sm:$0xff]   ;;  %v4026_v43 = vpop.f32.mrf.mxu0  ;;  %v5934_v59 = vld [vmem:[%s6372_s13 + $0x320] sm:$0xff]  }
 0x23b   : > { %13596 = vst [vmem:[#allocation42_spill] sm:$0xff] %v10440_v30  ;;  %13600 = vst [vmem:[#allocation80_spill] sm:$0xff] %v10466_v21  ;;  %v1602_v7 = vmul.f32 %v10475_v0, %v10164_v56  ;;  %v1603_v18 = vmul.f32 %v10482_v12, %v10164_v56  ;;  %v10493_v60 = vmul.f32 %v10489_v5, %v10164_v56  ;;  %4655 = vmatpush1.bf16.msra.mxu0 %v5923_v1  ;;  %v13613_v30 = vld [vmem:[#allocation63_spill] sm:$0xff] }
 0x23c   : > { %13601 = vst [vmem:[#allocation45_spill] sm:$0xff] %v10475_v0  ;;  %13602 = vst [vmem:[#allocation38_spill] sm:$0xff] %v10482_v12  ;;  %v10502_v23 = vmul.f32 %v10498_v45, %v10164_v56  ;;  %v10504_v31 = vadd.f32 %v1598_v36, %v1430_v52  ;;  %v10506_v25 = vadd.f32 %v1599_v62, %v1431_v3  ;;  %v13614_v52 = vld [vmem:[#allocation68_spill] sm:$0xff]  ;;  %4656 = vmatprep.subr.bf16.mxu0 %v12850_v15  ;;  %v13615_v3 = vld [vmem:[#allocation65_spill] sm:$0xff] }
 0x23d   : > { %13603 = vst [vmem:[#allocation67_spill] sm:$0xff] %v10489_v5  ;;  %13604 = vst [vmem:[#allocation104_spill] sm:$0xff] %v10493_v60  ;;  %v10508_v4 = vadd.f32 %v1600_v41, %v1432_v9  ;;  %v10510_v13 = vadd.f32 %v1601_v11, %v1433_v48  ;;  %v10513_v24 = vadd.f32 %v1602_v7, %v1434_v28  ;;  %v13616_v48 = vld [vmem:[#allocation26_spill] sm:$0xff]  ;;  %v13617_v62 = vld [vmem:[#allocation61_spill] sm:$0xff]  ;;  %4770 = vmatpush1.bf16.msra.mxu1 %v5926_v58 }
 0x23e   : > { %13605 = vst [vmem:[#allocation93_spill] sm:$0xff] %v10498_v45  ;;  %13606 = vst [vmem:[#allocation46_spill] sm:$0xff] %v10502_v23  ;;  %v10515_v32 = vadd.f32 %v1603_v18, %v1435_v8  ;;  %v1438_v56 = vadd.f32 %v13613_v30, %v10367_v33  ;;  %v1439_v36 = vadd.f32 %v13614_v52, %v10370_v26  ;;  %v13618_v8 = vld [vmem:[#allocation83_spill] sm:$0xff]  ;;  %v10531_v30 = vpop.permute.xlu1 %2995  ;;  %4771 = vmatprep.subr.bf16.mxu1 %v12850_v15  ;;  %v5927_v18 = vld [vmem:[%s6372_s13 + $0x2e8] sm:$0xff]  }
 0x23f   : > { %13607 = vst [vmem:[#allocation72_spill] sm:$0xff] %v10504_v31  ;;  %13608 = vst [vmem:[#allocation33_spill] sm:$0xff] %v10506_v25  ;;  %v1440_v9 = vadd.f32 %v13615_v3, %v10373_v51  ;;  %v1441_v1 = vadd.f32 %v13616_v48, %v10376_v57  ;;  %v1442_v28 = vadd.f32 %v13617_v62, %v10379_v63  ;;  %v5928_v33 = vld [vmem:[%s6372_s13 + $0x338] sm:$0xff]   ;;  %4657 = vmatpush1.bf16.msra.mxu0 %v5925_v50  ;;  %v10570_v50 = vld [vmem:[%s12266_s0 + $0x148] sm:$0xff] }
 0x240   : > { %13609 = vst [vmem:[#allocation11_spill] sm:$0xff] %v10508_v4  ;;  %13610 = vst [vmem:[#allocation97_spill] sm:$0xff] %v10510_v13  ;;  %v1443_v41 = vadd.f32 %v13618_v8, %v10382_v42  ;;  %v1606_v26 = vmul.f32 %v10445_v61, %v10215_v37  ;;  %v1607_v51 = vmul.f32 %v10452_v29, %v10215_v37  ;;  %4658 = vmatprep.subr.bf16.mxu0 %v12850_v15  ;;  %v10692_v61 = vld [vmem:[%s6372_s13 + $0x368] sm:$0x1f]   ;;  %v13664_v60 = vld [vmem:[#allocation115_spill] sm:$0xff] }
 0x241   : > { %13611 = vst [vmem:[#allocation22_spill] sm:$0xff] %v10513_v24  ;;  %13612 = vst [vmem:[#allocation103_spill] sm:$0xff] %v10515_v32  ;;  %v1608_v57 = vmul.f32 %v10459_v20, %v10215_v37  ;;  %v1609_v11 = vmul.f32 %v10466_v21, %v10215_v37  ;;  %v1610_v63 = vmul.f32 %v10475_v0, %v10215_v37  ;;  %4772 = vmatpush1.bf16.msra.mxu1 %v5928_v33  ;;  %v13627_v33 = vld [vmem:[#allocation30_spill] sm:$0xff]  ;;  %v10684_v20 = vld [vmem:[%s12266_s0 + $0x1d8] sm:$0xff] }
 0x242   : > { %13619 = vst [vmem:[#allocation100_spill] sm:$0xff] %v10531_v30  ;;  %v1611_v42 = vmul.f32 %v10482_v12, %v10215_v37  ;;  %v10548_v58 = vmul.f32 %v10489_v5, %v10215_v37  ;;  %v10552_v7 = vmul.f32 %v10498_v45, %v10215_v37  ;;  %v1718_v43 = vadd.f32 %v1606_v26, %v1438_v56  ;;  %v10563_v5 = vld [vmem:[%s12266_s0 + $0x140] sm:$0xff]  ;;  %v13623_v12 = vld [vmem:[#allocation23_spill] sm:$0xff]  ;;  %v13637_v0 = vld [vmem:[#allocation106_spill] sm:$0xff] }
 0x243   : > { %v1719_v52 = vadd.f32 %v1607_v51, %v1439_v36  ;;  %v1720_v3 = vadd.f32 %v1608_v57, %v1440_v9  ;;  %v1721_v48 = vadd.f32 %v1609_v11, %v1441_v1  ;;  %v10556_v62 = vadd.f32 %v1610_v63, %v1442_v28  ;;  %13622 = vst [vmem:[#allocation57_spill] sm:$0xff] %v10563_v5  ;;  %v5930_v36 = vld [vmem:[%s6372_s13 + $0x330] sm:$0xff]   ;;  %v10585_v28 = vld [vmem:[%s12266_s0 + $0x158] sm:$0xff]  ;;  %v10596_v51 = vld [vmem:[%s12266_s0 + $0x168] sm:$0xff] }
 0x244   : > { %13620 = vst [vmem:[#allocation24_spill] sm:$0xff] %v10548_v58  ;;  %v10558_v8 = vadd.f32 %v1611_v42, %v1443_v41  ;;  %v1886_v37 = vmul.f32 %v10563_v5, %v13623_v12  ;;  %13624 = vst [vmem:[#allocation87_spill] sm:$0xff] %v10570_v50  ;;  %v1887_v56 = vmul.f32 %v10570_v50, %v13623_v12  ;;  %v10578_v9 = vld [vmem:[%s12266_s0 + $0x150] sm:$0xff]  ;;  %4773 = vmatprep.subr.bf16.mxu1 %v12850_v15  ;;  %v10610_v42 = vld [vmem:[%s12266_s0 + $0x178] sm:$0xff]  ;;  %v10621_v50 = vpop.permute.xlu0 %2999 }
 0x245   : > { %13621 = vst [vmem:[#allocation27_spill] sm:$0xff] %v10556_v62  ;;  %13625 = vst [vmem:[#allocation89_spill] sm:$0xff] %v10578_v9  ;;  %v1888_v1 = vmul.f32 %v10578_v9, %v13623_v12  ;;  %v1889_v41 = vmul.f32 %v10585_v28, %v13623_v12  ;;  %v10591_v26 = vmul.f32 %v13627_v33, %v13623_v12  ;;  %v13630_v11 = vld [vmem:[#allocation58_spill] sm:$0xff]  ;;  %4659 = vmatpush1.bf16.msra.mxu0 %v5927_v18  ;;  %v5929_v9 = vld [vmem:[%s6372_s13 + $0x2e0] sm:$0xff]  }
 0x246   : > { %13626 = vst [vmem:[#allocation21_spill] sm:$0xff] %v10585_v28  ;;  %13629 = vst [vmem:[#allocation43_spill] sm:$0xff] %v10596_v51  ;;  %v10600_v57 = vmul.f32 %v10596_v51, %v13623_v12  ;;  %v10605_v63 = vmul.f32 %v13630_v11, %v13623_v12  ;;  %v10614_v33 = vmul.f32 %v10610_v42, %v13623_v12  ;;  %v512_v11 = vpop.permute.xlu1 %511  ;;  %v13639_v12 = vld [vmem:[#allocation9_spill] sm:$0xff]  ;;  %4660 = vmatprep.subr.bf16.mxu0 %v12850_v15  ;;  %v5933_v30 = vld [vmem:[%s6372_s13 + $0x2d0] sm:$0xff]  }
 0x247   : > { %13628 = vst [vmem:[#allocation18_spill] sm:$0xff] %v10591_v26  ;;  %13632 = vst [vmem:[#allocation48_spill] sm:$0xff] %v10610_v42  ;;  %v10616_v28 = vadd.f32 %v1886_v37, %v1718_v43  ;;  %v10618_v51 = vadd.f32 %v1887_v56, %v1719_v52  ;;  %v10623_v5 = vadd.f32 %v1888_v1, %v1720_v3  ;;  %v13641_v18 = vld [vmem:[#allocation13_spill] sm:$0xff]  ;;  %v13643_v37 = vld [vmem:[#allocation110_spill] sm:$0xff]  ;;  %4774 = vmatpush1.bf16.msra.mxu1 %v5930_v36 }
 0x248   : > { %13631 = vst [vmem:[#allocation85_spill] sm:$0xff] %v10605_v63  ;;  %13633 = vst [vmem:[#allocation54_spill] sm:$0xff] %v10614_v33  ;;  %v10625_v45 = vadd.f32 %v1889_v41, %v1721_v48  ;;  %v10629_v21 = vmul.f32 %v13637_v0, %v10283_v49  ;;  %v10633_v43 = vmul.f32 %v13639_v12, %v10283_v49  ;;  %v13645_v48 = vld [vmem:[#allocation14_spill] sm:$0xff]  ;;  %v13647_v56 = vld [vmem:[#allocation16_spill] sm:$0xff]  ;;  %4775 = vmatprep.subr.bf16.mxu1 %v12850_v15  ;;  %v516_v24 = vpop.permute.xlu0 %515 }
 0x249   : > { %13634 = vst [vmem:[#allocation8_spill] sm:$0xff] %v10616_v28  ;;  %13635 = vst [vmem:[#allocation51_spill] sm:$0xff] %v10621_v50  ;;  %v10638_v52 = vmul.f32 %v13641_v18, %v10283_v49  ;;  %v10642_v3 = vmul.f32 %v13643_v37, %v10283_v49  ;;  %v10646_v0 = vmul.f32 %v13645_v48, %v10283_v49  ;;  %v5932_v41 = vld [vmem:[%s6372_s13 + $0x328] sm:$0xff]   ;;  %v10657_v18 = vld [vmem:[%s12266_s0 + $0x1c0] sm:$0xff]  ;;  %4661 = vmatpush1.bf16.msra.mxu0 %v5929_v9 }
 0x24a   : > { %13636 = vst [vmem:[#allocation64_spill] sm:$0xff] %v10623_v5  ;;  %13638 = vst [vmem:[#allocation7_spill] sm:$0xff] %v10629_v21  ;;  %v10650_v1 = vmul.f32 %v13647_v56, %v10283_v49  ;;  %v5489_v12 = vld [vmem:[%s6367_s9 + $0xc] ss:$0 sm:$0xff]  ;;  %v10661_v37 = vmul.f32 %v10657_v18, %v10330_v34  ;;  %v10675_v36 = vld [vmem:[%s12266_s0 + $0x1d0] sm:$0xff]  ;;  %v10688_v29 = vmul.f32 %v10684_v20, %v10330_v34  ;;  %4662 = vmatprep.subr.bf16.mxu0 %v12850_v15  ;;  %v680_v63 = vpop.permute.xlu1 %679 }
 0x24b   : > { %13640 = vst [vmem:[#allocation108_spill] sm:$0xff] %v10633_v43  ;;  %13642 = vst [vmem:[#allocation17_spill] sm:$0xff] %v10638_v52  ;;  %v10666_v48 = vld [vmem:[%s12266_s0 + $0x1c8] sm:$0xff]  ;;  %v10679_v42 = vmul.f32 %v10675_v36, %v10330_v34  ;;  %v10708_v52 = vmul.f32 %v10675_v36, %v10392_v47  ;;  %v10712_v21 = vmul.f32 %v10684_v20, %v10392_v47  ;;  %3011 = vperm.xlu1 %5832, %v5489_v12   ;;  %v13669_v12 = vld [vmem:[#allocation120_spill] sm:$0xff] }
 0x24c   : > { %13644 = vst [vmem:[#allocation91_spill] sm:$0xff] %v10642_v3  ;;  %13646 = vst [vmem:[#allocation36_spill] sm:$0xff] %v10646_v0  ;;  %v10670_v56 = vmul.f32 %v10666_v48, %v10330_v34  ;;  %v10704_v0 = vmul.f32 %v10666_v48, %v10392_v47  ;;  %v13662_v9 = vld [vmem:[#allocation113_spill] sm:$0xff]  ;;  %4776 = vmatpush1.bf16.msra.mxu1 %v5932_v41  ;;  %v610_v38 = vmul.f32 %v13666_v2, %v512_v11  ;;  %v13670_v28 = vld [vmem:[#allocation6_spill] sm:$0xff]  ;;  %v960_v43 = vpop.permute.xlu0 %959 }
 0x24d   : > { %13648 = vst [vmem:[#allocation44_spill] sm:$0xff] %v10650_v1  ;;  %13649 = vst [vmem:[#allocation82_spill] sm:$0xff] %v10657_v18  ;;  %v606_v4 = vmul.f32 %v13662_v9, %v512_v11  ;;  %4777 = vmatprep.subr.bf16.mxu1 %v12850_v15  ;;  %v613_v5 = vmul.f32 %v13669_v12, %v512_v11  ;;  %v4763_v58 = vand.u32 %v10692_v61, %v13670_v28  ;;  %v13672_v41 = vld [vmem:[#allocation28_spill] sm:$0xff]  ;;  %v13674_v34 = vld [vmem:[#allocation98_spill] sm:$0xff] }
 0x24e   : > { %13650 = vst [vmem:[#allocation69_spill] sm:$0xff] %v10661_v37  ;;  %13651 = vst [vmem:[#allocation70_spill] sm:$0xff] %v10666_v48  ;;  %v5931_v37 = vld [vmem:[%s6372_s13 + $0x2d8] sm:$0xff]   ;;  %v608_v48 = vmul.f32 %v13664_v60, %v512_v11  ;;  %v10730_v44 = vmul.f32 %v13662_v9, %v516_v24  ;;  %v10737_v62 = vmul.f32 %v13664_v60, %v516_v24  ;;  %v13671_v60 = vld [vmem:[#allocation12_spill] sm:$0xff] }
 0x24f   : > { %13652 = vst [vmem:[#allocation96_spill] sm:$0xff] %v10670_v56  ;;  %13653 = vst [vmem:[#allocation10_spill] sm:$0xff] %v10675_v36  ;;  %v609_v36 = vmul.f32 %v13665_v46, %v512_v11  ;;  %4663 = vmatpush1.bf16.msra.mxu0 %v5931_v37  ;;  %v10743_v39 = vmul.f32 %v13666_v2, %v516_v24  ;;  %v10747_v61 = vmul.f32 %v13667_v53, %v516_v24  ;;  %v13673_v2 = vld [vmem:[#allocation73_spill] sm:$0xff]  ;;  %v13675_v3 = vld [vmem:[#allocation99_spill] sm:$0xff] }
 0x250   : > { %13654 = vst [vmem:[#allocation105_spill] sm:$0xff] %v10679_v42  ;;  %13655 = vst [vmem:[#allocation55_spill] sm:$0xff] %v10684_v20  ;;  %v10700_v42 = vmul.f32 %v10657_v18, %v10392_v47  ;;  %v13663_v18 = vld [vmem:[#allocation114_spill] sm:$0xff]  ;;  %v611_v20 = vmul.f32 %v13667_v53, %v512_v11  ;;  %4664 = vmatprep.subr.bf16.mxu0 %v12850_v15  ;;  %v774_v9 = vmul.f32 %v13671_v60, %v680_v63  ;;  %v13677_v50 = vld [vmem:[#allocation121_spill] sm:$0xff] }
 0x251   : > { %13656 = vst [vmem:[#allocation74_spill] sm:$0xff] %v10688_v29  ;;  %13657 = vst [vmem:[#allocation109_spill] sm:$0xff] %v10695_v10  ;;  %v607_v31 = vmul.f32 %v13663_v18, %v512_v11  ;;  %v10734_v26 = vmul.f32 %v13663_v18, %v516_v24  ;;  %v10753_v18 = vmul.f32 %v13669_v12, %v516_v24  ;;  %4778 = vmatpush1.bf16.msra.mxu1 %v5934_v59  ;;  %v13678_v12 = vld [vmem:[#allocation122_spill] sm:$0xff]  ;;  %v5935_v59 = vld [vmem:[%s6372_s13 + $0x2c8] sm:$0xff]  }
 0x252   : > { %13658 = vst [vmem:[#allocation111_spill] sm:$0xff] %v10700_v42  ;;  %13659 = vst [vmem:[#allocation35_spill] sm:$0xff] %v10704_v0  ;;  %v775_v29 = vmul.f32 %v13672_v41, %v680_v63  ;;  %v776_v56 = vmul.f32 %v13673_v2, %v680_v63  ;;  %v777_v1 = vmul.f32 %v13674_v34, %v680_v63  ;;  %4779 = vmatprep.subr.bf16.mxu1 %v12850_v15 }
 0x253   : > { %13660 = vst [vmem:[#allocation102_spill] sm:$0xff] %v10708_v52  ;;  %13661 = vst [vmem:[#allocation84_spill] sm:$0xff] %v10712_v21  ;;  %v13668_v52 = vld [vmem:[#allocation119_spill] sm:$0xff]  ;;  %v778_v53 = vmul.f32 %v13675_v3, %v680_v63  ;;  %v781_v32 = vmul.f32 %v13678_v12, %v680_v63  ;;  %v886_v13 = vadd.f32 %v774_v9, %v606_v4  ;;  %4665 = vmatpush1.bf16.msra.mxu0 %v5933_v30  ;;  %v4135_v30 = vpop.f32.mrf.mxu1 }
 0x254   : > { %v612_v42 = vmul.f32 %v13668_v52, %v512_v11  ;;  %v10740_v11 = vmul.f32 %v13665_v46, %v516_v24  ;;  %v10750_v37 = vmul.f32 %v13668_v52, %v516_v24  ;;  %v5936_v46 = vld [vmem:[%s6372_s13 + $0x318] sm:$0xff]   ;;  %v13676_v52 = vld [vmem:[#allocation101_spill] sm:$0xff]  ;;  %v780_v24 = vmul.f32 %v13677_v50, %v680_v63  ;;  %4666 = vmatprep.subr.bf16.mxu0 %v12850_v15 }
 0x255   : > { %v779_v49 = vmul.f32 %v13676_v52, %v680_v63  ;;  %v887_v25 = vadd.f32 %v775_v29, %v607_v31  ;;  %v888_v23 = vadd.f32 %v776_v56, %v608_v48  ;;  %v889_v54 = vadd.f32 %v777_v1, %v609_v36  ;;  %13679 = vst [vmem:[#allocation49_spill] sm:$0xff] %v10768_v55  ;;  %v13709_v55 = vld [vmem:[#allocation78_spill] sm:$0xff] }
 0x256   : > { %v890_v33 = vadd.f32 %v778_v53, %v610_v38  ;;  %v892_v0 = vadd.f32 %v780_v24, %v612_v42  ;;  %v893_v28 = vadd.f32 %v781_v32, %v613_v5  ;;  %v1054_v10 = vmul.f32 %v10304_v40, %v960_v43  ;;  %4780 = vmatpush1.bf16.msra.mxu1 %v5936_v46  ;;  %v684_v38 = vpop.permute.xlu1 %683  ;;  %v5937_v42 = vld [vmem:[%s6372_s13 + $0x2c0] sm:$0xff]   ;;  %v13684_v24 = vld [vmem:[#allocation62_spill] sm:$0xff] }
 0x257   : > { %v891_v21 = vadd.f32 %v779_v49, %v611_v20  ;;  %v1055_v63 = vmul.f32 %v10312_v27, %v960_v43  ;;  %v1056_v4 = vmul.f32 %v10319_v17, %v960_v43  ;;  %v1057_v29 = vmul.f32 %v10326_v16, %v960_v43  ;;  %4791 = vmatprep.subr.bf16.mxu1 %v12850_v15 }
 0x258   : > { %v1058_v31 = vmul.f32 %v10338_v19, %v960_v43  ;;  %v1059_v49 = vmul.f32 %v10346_v35, %v960_v43  ;;  %v1060_v20 = vmul.f32 %v10353_v22, %v960_v43  ;;  %v1061_v5 = vmul.f32 %v10361_v6, %v960_v43  ;;  %4667 = vmatpush1.bf16.msra.mxu0 %v5935_v59 }
 0x259   : > { %v10778_v32 = vadd.f32 %v1054_v10, %v886_v13  ;;  %v10781_v1 = vadd.f32 %v1055_v63, %v887_v25  ;;  %v10783_v48 = vadd.f32 %v1056_v4, %v888_v23  ;;  %v10785_v56 = vadd.f32 %v1057_v29, %v889_v54  ;;  %4668 = vmatprep.subr.bf16.mxu0 %v12850_v15  ;;  %v4136_v13 = vpop.f32.mrf.mxu1  ;;  %v5940_v25 = vld [vmem:[%s6372_s13 + $0x360] sm:$0xff]  }
 0x25a   : > { %v10787_v36 = vadd.f32 %v1058_v31, %v890_v33  ;;  %v10790_v9 = vadd.f32 %v1059_v49, %v891_v21  ;;  %v10792_v46 = vadd.f32 %v1060_v20, %v892_v0  ;;  %v10794_v43 = vadd.f32 %v1061_v5, %v893_v28  ;;  %4792 = vmatpush2.bf16.msra.mxu1 %v4763_v58  ;;  %v13689_v31 = vld [vmem:[#allocation56_spill] sm:$0xff]  ;;  %v13692_v20 = vld [vmem:[#allocation109_spill] sm:$0xff]  ;;  %v13693_v5 = vld [vmem:[#allocation6_spill] sm:$0xff] }
 0x25b   : > { %v782_v10 = vmul.f32 %v13671_v60, %v684_v38  ;;  %v783_v23 = vmul.f32 %v13672_v41, %v684_v38  ;;  %v784_v54 = vmul.f32 %v13673_v2, %v684_v38  ;;  %v785_v33 = vmul.f32 %v13674_v34, %v684_v38  ;;  %4793 = vmatprep.subr.bf16.mxu1 %v12850_v15  ;;  %v4137_v60 = vpop.f32.mrf.mxu1 }
 0x25c   : > { %13680 = vst [vmem:[#allocation19_spill] sm:$0xff] %v10790_v9  ;;  %13681 = vst [vmem:[#allocation90_spill] sm:$0xff] %v10792_v46  ;;  %v786_v53 = vmul.f32 %v13675_v3, %v684_v38  ;;  %v787_v21 = vmul.f32 %v13676_v52, %v684_v38  ;;  %v788_v28 = vmul.f32 %v13677_v50, %v684_v38  ;;  %4669 = vmatpush1.bf16.msra.mxu0 %v5937_v42  ;;  %v13695_v42 = vld [vmem:[#allocation81_spill] sm:$0xff]  ;;  %v13701_v60 = vld [vmem:[#allocation20_spill] sm:$0xff] }
 0x25d   : > { %13682 = vst [vmem:[#allocation15_spill] sm:$0xff] %v10794_v43  ;;  %v789_v0 = vmul.f32 %v13678_v12, %v684_v38  ;;  %v10807_v58 = vadd.f32 %v782_v10, %v10730_v44  ;;  %v10810_v41 = vadd.f32 %v783_v23, %v10734_v26  ;;  %v10813_v34 = vadd.f32 %v784_v54, %v10737_v62  ;;  %v13683_v62 = vld [vmem:[#allocation86_spill] sm:$0xff]  ;;  %v13685_v12 = vld [vmem:[#allocation123_spill] sm:$0xff]  ;;  %v13710_v46 = vld [vmem:[#allocation112_spill] sm:$0xff] }
 0x25e   : > { %v10816_v3 = vadd.f32 %v785_v33, %v10740_v11  ;;  %v10819_v2 = vadd.f32 %v786_v53, %v10743_v39  ;;  %4680 = vmatprep.subr.bf16.mxu0 %v12850_v15  ;;  %v10823_v50 = vadd.f32 %v787_v21, %v10747_v61  ;;  %v10826_v44 = vadd.f32 %v788_v28, %v10750_v37  ;;  %v5942_v11 = vld [vmem:[%s6372_s13 + $0x358] sm:$0xff]   ;;  %v13698_v23 = vld [vmem:[#allocation66_spill] sm:$0xff]  ;;  %v10859_v33 = vpop.permute.xlu1 %963  ;;  %v13700_v28 = vld [vmem:[#allocation76_spill] sm:$0xff] }
 0x25f   : > { %v10829_v26 = vadd.f32 %v789_v0, %v10753_v18  ;;  %v1445_v52 = vadd.f32 %v13683_v62, %v10388_v14  ;;  %4794 = vmatpush2.bf16.msra.mxu1 %v5940_v25  ;;  %v2003_v39 = vadd.f32 %v10600_v57, %v10558_v8  ;;  %v2173_v59 = vmul.f32 %v13685_v12, %v13684_v24  ;;  %v13686_v61 = vld [vmem:[#allocation71_spill] sm:$0xff]  ;;  %v13697_v25 = vld [vmem:[#allocation84_spill] sm:$0xff]  ;;  %v13699_v53 = vld [vmem:[#allocation54_spill] sm:$0xff] }
 0x260   : > { %v2279_v63 = vadd.f32 %v13686_v61, %v10618_v51  ;;  %v13687_v37 = vld [vmem:[#allocation31_spill] sm:$0xff]  ;;  %4795 = vmatprep.subr.bf16.mxu1 %v12850_v15  ;;  %v2453_v38 = vmul.f32 %v13689_v31, %v10392_v47  ;;  %v13694_v30 = vand.u32 %v13692_v20, %v13693_v5  ;;  %v5941_v51 = vld [vmem:[%s6372_s13 + $0x308] sm:$0xff]   ;;  %v13707_v5 = vld [vmem:[#allocation60_spill] sm:$0xff] }
 0x261   : > { %v2281_v4 = vadd.f32 %v13687_v37, %v10625_v45  ;;  %v1725_v18 = vadd.f32 %v10552_v7, %v1445_v52  ;;  %v13688_v14 = vld [vmem:[#allocation107_spill] sm:$0xff]  ;;  %v2283_v45 = vadd.f32 %v13695_v42, %v2003_v39  ;;  %v13702_v52 = vld [vmem:[#allocation129_spill] sm:$0xff]  ;;  %v13703_v39 = vld [vmem:[#allocation46_spill] sm:$0xff] }
 0x262   : > { %v2451_v29 = vmul.f32 %v13688_v14, %v10392_v47  ;;  %v13690_v8 = vld [vmem:[#allocation127_spill] sm:$0xff]  ;;  %4681 = vmatpush2.bf16.msra.mxu0 %v13694_v30  ;;  %v1717_v61 = vadd.f32 %v13703_v39, %v13702_v52  ;;  %v13704_v20 = vld [vmem:[#allocation33_spill] sm:$0xff]  ;;  %v13705_v30 = vld [vmem:[#allocation88_spill] sm:$0xff] }
 0x263   : > { %v13691_v57 = vld [vmem:[#allocation59_spill] sm:$0xff]  ;;  %v2561_v7 = vadd.f32 %v13697_v25, %v2281_v4  ;;  %v2729_v54 = vmul.f32 %v13698_v23, %v13690_v8  ;;  %4682 = vmatprep.subr.bf16.mxu0 %v12850_v15  ;;  %v2005_v21 = vadd.f32 %v13699_v53, %v1725_v18  ;;  %v2731_v0 = vmul.f32 %v13700_v28, %v13690_v8  ;;  %v13706_v25 = vld [vmem:[#allocation97_spill] sm:$0xff]  ;;  %v5943_v52 = vld [vmem:[%s6372_s13 + $0x300] sm:$0xff]  }
 0x264   : > { %v2727_v49 = vmul.f32 %v13691_v57, %v13690_v8  ;;  %v13696_v10 = vld [vmem:[#allocation35_spill] sm:$0xff]  ;;  %v2733_v62 = vmul.f32 %v13701_v60, %v13690_v8  ;;  %4796 = vmatpush2.bf16.msra.mxu1 %v5942_v11  ;;  %v1991_v42 = vadd.f32 %v13705_v30, %v13704_v20  ;;  %v1993_v18 = vadd.f32 %v13707_v5, %v13706_v25  ;;  %v13716_v20 = vld [vmem:[#allocation125_spill] sm:$0xff]  ;;  %v13717_v30 = vld [vmem:[#allocation96_spill] sm:$0xff] }
 0x265   : > { %v2559_v13 = vadd.f32 %v13696_v10, %v2279_v63  ;;  %v2563_v63 = vadd.f32 %v2451_v29, %v2283_v45  ;;  %v2841_v4 = vadd.f32 %v2729_v54, %v2561_v7  ;;  %v2285_v10 = vadd.f32 %v2173_v59, %v2005_v21  ;;  %v13708_v53 = vld [vmem:[#allocation103_spill] sm:$0xff]  ;;  %4987 = vmatprep.subr.bf16.mxu1 %v12850_v15  ;;  %v13713_v7 = vld [vmem:[#allocation108_spill] sm:$0xff] }
 0x266   : > { %v1995_v43 = vadd.f32 %v13709_v55, %v13708_v53  ;;  %v1997_v9 = vadd.f32 %v13710_v46, %v1717_v61  ;;  %4683 = vmatpush2.bf16.msra.mxu0 %v5941_v51  ;;  %v13711_v29 = vld [vmem:[#allocation51_spill] sm:$0xff]  ;;  %v2271_v54 = vadd.f32 %v13713_v7, %v1991_v42  ;;  %v13715_v46 = vld [vmem:[#allocation44_spill] sm:$0xff]  ;;  %v13719_v53 = vld [vmem:[#allocation94_spill] sm:$0xff] }
 0x267   : > { %v2839_v37 = vadd.f32 %v2727_v49, %v2559_v13  ;;  %v2843_v11 = vadd.f32 %v2731_v0, %v2563_v63  ;;  %v3093_v45 = vadd.f32 %v13711_v29, %v2841_v4  ;;  %v13712_v13 = vld [vmem:[#allocation124_spill] sm:$0xff]  ;;  %4684 = vmatprep.subr.bf16.mxu0 %v12850_v15  ;;  %v2565_v5 = vadd.f32 %v2453_v38, %v2285_v10  ;;  %v13714_v55 = vld [vmem:[#allocation91_spill] sm:$0xff] }
 0x268   : > { %v2165_v59 = vmul.f32 %v13685_v12, %v13712_v13  ;;  %v2273_v21 = vadd.f32 %v13714_v55, %v1993_v18  ;;  %v2275_v39 = vadd.f32 %v13715_v46, %v1995_v43  ;;  %v2443_v12 = vmul.f32 %v13688_v14, %v13716_v20  ;;  %v13718_v43 = vld [vmem:[#allocation74_spill] sm:$0xff] }
 0x269   : > { %v3091_v49 = vadd.f32 %v13711_v29, %v2839_v37  ;;  %v3095_v51 = vadd.f32 %v13711_v29, %v2843_v11  ;;  %v3205_v0 = vmax.f32 %v3093_v45, 0.0  ;;  %v10887_v37 = vpop.permute.xlu1 %1239  ;;  %v2845_v4 = vadd.f32 %v2733_v62, %v2565_v5  ;;  %v13723_v46 = vld [vmem:[#allocation18_spill] sm:$0xff] }
 0x26a   : > { %v2277_v63 = vadd.f32 %v2165_v59, %v1997_v9  ;;  %v2445_v38 = vmul.f32 %v13689_v31, %v13716_v20  ;;  %v2551_v42 = vadd.f32 %v13717_v30, %v2271_v54  ;;  %4685 = vmatpush2.bf16.msra.mxu0 %v5943_v52  ;;  %v2553_v18 = vadd.f32 %v13718_v43, %v2273_v21  ;;  %v13721_v54 = vld [vmem:[#allocation75_spill] sm:$0xff] }
 0x26b   : > { %v3203_v61 = vmax.f32 %v3091_v49, 0.0  ;;  %v3207_v10 = vmax.f32 %v3095_v51, 0.0  ;;  %v2719_v11 = vmul.f32 %v13691_v57, %v13719_v53  ;;  %v3097_v9 = vadd.f32 %v13711_v29, %v2845_v4  ;;  %4876 = vmatprep.subr.bf16.mxu0 %v12850_v15  ;;  %v13720_v57 = vld [vmem:[#allocation29_spill] sm:$0xff]  ;;  %v13722_v21 = vld [vmem:[#allocation27_spill] sm:$0xff] }
 0x26c   : > { %v2555_v49 = vadd.f32 %v2443_v12, %v2275_v39  ;;  %v2557_v62 = vadd.f32 %v2445_v38, %v2277_v63  ;;  %v2721_v14 = vmul.f32 %v13698_v23, %v13719_v53  ;;  %v2723_v52 = vmul.f32 %v13700_v28, %v13719_v53  ;;  %v13725_v63 = vld [vmem:[#allocation77_spill] sm:$0xff]  ;;  %v13727_v38 = vld [vmem:[#allocation24_spill] sm:$0xff] }
 0x26d   : > { %v3261_v25 = vadd.f32 %v3205_v0, %v3203_v61  ;;  %v2725_v45 = vmul.f32 %v13701_v60, %v13719_v53  ;;  %v2831_v59 = vadd.f32 %v2719_v11, %v2551_v42  ;;  %v3209_v5 = vmax.f32 %v3097_v9, 0.0  ;;  %v13724_v61 = vld [vmem:[#allocation100_spill] sm:$0xff]  ;;  %v10912_v28 = vpop.permute.xlu1 %1519 }
 0x26e   : > { %v2833_v7 = vadd.f32 %v2721_v14, %v2553_v18  ;;  %v1444_v55 = vadd.f32 %v13721_v54, %v13720_v57  ;;  %v2002_v39 = vadd.f32 %v13723_v46, %v13722_v21  ;;  %v2835_v51 = vadd.f32 %v2723_v52, %v2555_v49  ;;  %13726 = vst [vmem:[#allocation63_spill] sm:$0xff] %v10912_v28  ;;  %v13728_v42 = vld [vmem:[#allocation8_spill] sm:$0xff]  ;;  %v13732_v52 = vld [vmem:[#allocation85_spill] sm:$0xff]  ;;  %v13749_v28 = vld [vmem:[#allocation22_spill] sm:$0xff] }
 0x26f   : > { %v3289_v31 = vadd.f32 %v3261_v25, %v3207_v10  ;;  %v2837_v23 = vadd.f32 %v2725_v45, %v2557_v62  ;;  %v3083_v0 = vadd.f32 %v13724_v61, %v2831_v59  ;;  %v2172_v4 = vmul.f32 %v13725_v63, %v13684_v24  ;;  %v13729_v10 = vld [vmem:[#allocation53_spill] sm:$0xff]  ;;  %v13730_v9 = vld [vmem:[#allocation64_spill] sm:$0xff] }
 0x270   : > { %v3085_v60 = vadd.f32 %v13724_v61, %v2833_v7  ;;  %v1724_v30 = vadd.f32 %v13727_v38, %v1444_v55  ;;  %v2278_v25 = vadd.f32 %v13729_v10, %v13728_v42  ;;  %v3087_v43 = vadd.f32 %v13724_v61, %v2835_v51  ;;  %v13731_v49 = vld [vmem:[#allocation92_spill] sm:$0xff]  ;;  %v10934_v55 = vld [vmem:[%s12266_s0 + $0x1f0] sm:$0xff]  ;;  %v13739_v10 = vld [vmem:[#allocation41_spill] sm:$0xff] }
 0x271   : > { %v3317_v12 = vadd.f32 %v3289_v31, %v3209_v5  ;;  %v3089_v18 = vadd.f32 %v13724_v61, %v2837_v23  ;;  %v3195_v11 = vmax.f32 %v3083_v0, 0.0  ;;  %v2280_v62 = vadd.f32 %v13731_v49, %v13730_v9  ;;  %v13733_v31 = vld [vmem:[#allocation52_spill] sm:$0xff]  ;;  %13735 = vst [vmem:[#allocation65_spill] sm:$0xff] %v10934_v55  ;;  %v13736_v23 = vld [vmem:[#allocation111_spill] sm:$0xff] }
 0x272   : > { %v3197_v24 = vmax.f32 %v3085_v60, 0.0  ;;  %v2004_v45 = vadd.f32 %v13732_v52, %v1724_v30  ;;  %v2282_v59 = vadd.f32 %v13733_v31, %v2002_v39  ;;  %v3199_v5 = vmax.f32 %v3087_v43, 0.0  ;;  %v10927_v57 = vld [vmem:[%s12266_s0 + $0x1e0] sm:$0xff]  ;;  %v13738_v30 = vld [vmem:[#allocation34_spill] sm:$0xff] }
 0x273   : > { %v3345_v14 = vmul.f32 0.25, %v3317_v12  ;;  %v3201_v7 = vmax.f32 %v3089_v18, 0.0  ;;  %13734 = vst [vmem:[#allocation68_spill] sm:$0xff] %v10927_v57  ;;  %v2450_v54 = vmul.f32 %v10927_v57, %v10392_v47  ;;  %v2452_v21 = vmul.f32 %v10934_v55, %v10392_v47  ;;  %v13737_v12 = vld [vmem:[#allocation102_spill] sm:$0xff]  ;;  %v10944_v18 = vpop.permute.xlu1 %1523  ;;  %v13744_v52 = vld [vmem:[#allocation104_spill] sm:$0xff] }
 0x274   : > { %v3259_v39 = vadd.f32 %v3197_v24, %v3195_v11  ;;  %v2284_v51 = vadd.f32 %v2172_v4, %v2004_v45  ;;  %v2558_v0 = vadd.f32 %v13736_v23, %v2278_v25  ;;  %v2560_v60 = vadd.f32 %v13737_v12, %v2280_v62  ;;  %13740 = vst [vmem:[#allocation26_spill] sm:$0xff] %v10944_v18  ;;  %v13741_v11 = vld [vmem:[#allocation37_spill] sm:$0xff]  ;;  %v13743_v24 = vld [vmem:[#allocation128_spill] sm:$0xff] }
 0x275   : > { %v3373_v46 = vpack.c.bf16 %v3345_v14, %v3345_v14  ;;  %v2562_v38 = vadd.f32 %v2450_v54, %v2282_v59  ;;  %v2726_v42 = vmul.f32 %v13738_v30, %v13690_v8  ;;  %v2728_v43 = vmul.f32 %v13739_v10, %v13690_v8  ;;  %v13742_v25 = vld [vmem:[#allocation25_spill] sm:$0xff]  ;;  %v13745_v31 = vld [vmem:[#allocation72_spill] sm:$0xff]  ;;  %v13746_v59 = vld [vmem:[#allocation39_spill] sm:$0xff] }
 0x276   : > { %v3287_v9 = vadd.f32 %v3259_v39, %v3199_v5  ;;  %v2564_v47 = vadd.f32 %v2452_v21, %v2284_v51  ;;  %v2730_v4 = vmul.f32 %v13741_v11, %v13690_v8  ;;  %v2732_v49 = vmul.f32 %v13742_v25, %v13690_v8  ;;  %v13748_v5 = vld [vmem:[#allocation95_spill] sm:$0xff]  ;;  %v13750_v8 = vld [vmem:[#allocation50_spill] sm:$0xff] }
 0x277   : > { %5610 = vmatprep.mubr.msk.bf16.mxu1 %vm3755_vm2, %v3373_v46  ;;  %v2838_v62 = vadd.f32 %v2726_v42, %v2558_v0  ;;  %v2840_v14 = vadd.f32 %v2728_v43, %v2560_v60  ;;  %v1716_v45 = vadd.f32 %v13744_v52, %v13743_v24  ;;  %v1990_v54 = vadd.f32 %v13746_v59, %v13745_v31  ;;  %v13747_v46 = vld [vmem:[#allocation11_spill] sm:$0xff] }
 0x278   : > { %v3315_v23 = vadd.f32 %v3287_v9, %v3201_v7  ;;  %v2842_v12 = vadd.f32 %v2730_v4, %v2562_v38  ;;  %v2844_v18 = vadd.f32 %v2732_v49, %v2564_v47  ;;  %v1992_v21 = vadd.f32 %v13748_v5, %v13747_v46  ;;  %v13751_v60 = vld [vmem:[#allocation79_spill] sm:$0xff]  ;;  %v13753_v49 = vld [vmem:[#allocation17_spill] sm:$0xff] }
 0x279   : > { %v3090_v39 = vadd.f32 %v13711_v29, %v2838_v62  ;;  %v3092_v51 = vadd.f32 %v13711_v29, %v2840_v14  ;;  %v1994_v0 = vadd.f32 %v13750_v8, %v13749_v28  ;;  %v1996_v42 = vadd.f32 %v13751_v60, %v1716_v45  ;;  %v13752_v47 = vld [vmem:[#allocation7_spill] sm:$0xff]  ;;  %v10968_v14 = vpop.permute.xlu1 %1803  ;;  %v13754_v45 = vld [vmem:[#allocation36_spill] sm:$0xff] }
 0x27a   : > { %v3343_v43 = vmul.f32 0.25, %v3315_v23  ;;  %v3094_v24 = vadd.f32 %v13711_v29, %v2842_v12  ;;  %v3096_v52 = vadd.f32 %v13711_v29, %v2844_v18  ;;  %v2164_v7 = vmul.f32 %v13725_v63, %v13712_v13  ;;  %v13755_v63 = vld [vmem:[#allocation69_spill] sm:$0xff] }
 0x27b   : > { %v3202_v38 = vmax.f32 %v3090_v39, 0.0  ;;  %v3204_v9 = vmax.f32 %v3092_v51, 0.0  ;;  %v2270_v4 = vadd.f32 %v13752_v47, %v1990_v54  ;;  %v2272_v62 = vadd.f32 %v13753_v49, %v1992_v21  ;;  %v13756_v54 = vld [vmem:[#allocation105_spill] sm:$0xff] }
 0x27c   : > { %v3371_v31 = vpack.c.bf16 %v3343_v43, %v3343_v43  ;;  %v3206_v28 = vmax.f32 %v3094_v24, 0.0  ;;  %v3208_v59 = vmax.f32 %v3096_v52, 0.0  ;;  %v2274_v23 = vadd.f32 %v13754_v45, %v1994_v0 }
 0x27d   : > { %v3260_v46 = vadd.f32 %v3204_v9, %v3202_v38  ;;  %v2276_v12 = vadd.f32 %v2164_v7, %v1996_v42  ;;  %v2442_v29 = vmul.f32 %v10927_v57, %v13716_v20  ;;  %v2444_v13 = vmul.f32 %v10934_v55, %v13716_v20  ;;  %v10992_v38 = vpop.permute.xlu1 %2079  ;;  %v6200_v55 = vld [vmem:[%s12266_s0 + $0x30] sm:$0xff] }
 0x27e   : > { %5598 = vmatprep.mubr.msk.bf16.mxu0 %vm3755_vm2, %v3371_v31  ;;  %v2550_v18 = vadd.f32 %v13755_v63, %v2270_v4  ;;  %v2552_v5 = vadd.f32 %v13756_v54, %v2272_v62  ;;  %v2718_v21 = vmul.f32 %v13738_v30, %v13719_v53  ;;  %v2720_v39 = vmul.f32 %v13739_v10, %v13719_v53 }
 0x27f   : > { %v3288_v51 = vadd.f32 %v3260_v46, %v3206_v28  ;;  %v2554_v8 = vadd.f32 %v2442_v29, %v2274_v23  ;;  %v2556_v0 = vadd.f32 %v2444_v13, %v2276_v12  ;;  %v2722_v60 = vmul.f32 %v13741_v11, %v13719_v53  ;;  %13757 = vst [vmem:[#allocation61_spill] sm:$0xff] %v10992_v38  ;;  %v5944_v28 = vld [vmem:[%s6372_s13 + $0x400] sm:$0xff]   ;;  %v1244_v46 = vpop.permute.xlu0 %1243 }
 0x280   : > { %v2724_v20 = vmul.f32 %v13742_v25, %v13719_v53  ;;  %v2830_v42 = vadd.f32 %v2718_v21, %v2550_v18  ;;  %v2832_v43 = vadd.f32 %v2720_v39, %v2552_v5  ;;  %v1062_v24 = vmul.f32 %v10304_v40, %v10859_v33  ;;  %v11041_v18 = vld [vmem:[%s12266_s0 + $0xd8] sm:$0xff]  ;;  %v11047_v5 = vld [vmem:[%s12266_s0 + $0xe0] sm:$0xff]  ;;  %v11053_v39 = vld [vmem:[%s12266_s0 + $0xe8] sm:$0xff] }
 0x281   : > { %v3316_v52 = vadd.f32 %v3288_v51, %v3208_v59  ;;  %v2834_v7 = vadd.f32 %v2722_v60, %v2554_v8  ;;  %v1063_v30 = vmul.f32 %v10312_v27, %v10859_v33  ;;  %v1064_v10 = vmul.f32 %v10319_v17, %v10859_v33  ;;  %13762 = vst [vmem:[#allocation106_spill] sm:$0xff] %v11041_v18 }
 0x282   : > { %v2836_v11 = vadd.f32 %v2724_v20, %v2556_v0  ;;  %v3082_v9 = vadd.f32 %v13724_v61, %v2830_v42  ;;  %v3084_v53 = vadd.f32 %v13724_v61, %v2832_v43  ;;  %v1065_v25 = vmul.f32 %v10326_v16, %v10859_v33  ;;  %13763 = vst [vmem:[#allocation9_spill] sm:$0xff] %v11047_v5  ;;  %v11060_v0 = vld [vmem:[%s12266_s0 + $0xf0] sm:$0xff]  ;;  %v11066_v20 = vld [vmem:[%s12266_s0 + $0xf8] sm:$0xff] }
 0x283   : > { %v3344_v40 = vmul.f32 0.25, %v3316_v52  ;;  %v3086_v47 = vadd.f32 %v13724_v61, %v2834_v7  ;;  %v1066_v4 = vmul.f32 %v10338_v19, %v10859_v33  ;;  %v1067_v27 = vmul.f32 %v10346_v35, %v10859_v33  ;;  %13764 = vst [vmem:[#allocation13_spill] sm:$0xff] %v11053_v39  ;;  %13765 = vst [vmem:[#allocation110_spill] sm:$0xff] %v11060_v0 }
 0x284   : > { %v3088_v17 = vadd.f32 %v13724_v61, %v2836_v11  ;;  %v3194_v49 = vmax.f32 %v3082_v9, 0.0  ;;  %v3196_v62 = vmax.f32 %v3084_v53, 0.0  ;;  %v1068_v31 = vmul.f32 %v10353_v22, %v10859_v33  ;;  %13766 = vst [vmem:[#allocation14_spill] sm:$0xff] %v11066_v20 }
 0x285   : > { %v3372_v59 = vpack.c.bf16 %v3344_v40, %v3344_v40  ;;  %v3198_v45 = vmax.f32 %v3086_v47, 0.0  ;;  %v1069_v16 = vmul.f32 %v10361_v6, %v10859_v33  ;;  %v1174_v23 = vadd.f32 %v1062_v24, %v10807_v58  ;;  %v11016_v6 = vpop.permute.xlu1 %2359  ;;  %v13769_v40 = vld [vmem:[#allocation42_spill] sm:$0xff] }
 0x286   : > { %v3200_v19 = vmax.f32 %v3088_v17, 0.0  ;;  %v3258_v12 = vadd.f32 %v3196_v62, %v3194_v49  ;;  %v1175_v35 = vadd.f32 %v1063_v30, %v10810_v41  ;;  %v1176_v61 = vadd.f32 %v1064_v10, %v10813_v34  ;;  %13758 = vst [vmem:[#allocation83_spill] sm:$0xff] %v11016_v6  ;;  %v11022_v41 = vld [vmem:[%s12266_s0 + $0xc0] sm:$0xff]  ;;  %v5945_v49 = vld [vmem:[%s6372_s13 + $0x3a8] sm:$0xff]  }
 0x287   : > { %4798 = vmatmul.mubr.bf16.vlgmr.msra.gmra.mxu1 %v3372_v59  ;;  %v1177_v29 = vadd.f32 %v1065_v25, %v10816_v3  ;;  %v1178_v22 = vadd.f32 %v1066_v4, %v10819_v2  ;;  %v1179_v13 = vadd.f32 %v1067_v27, %v10823_v50  ;;  %v1180_v63 = vadd.f32 %v1068_v31, %v10826_v44  ;;  %v11028_v3 = vld [vmem:[%s12266_s0 + $0xc8] sm:$0xff]  ;;  %v5946_v50 = vld [vmem:[%s6372_s13 + $0x3f8] sm:$0xff]   ;;  %v11035_v44 = vld [vmem:[%s12266_s0 + $0xd0] sm:$0xff] }
 0x288   : > { %v3286_v58 = vadd.f32 %v3258_v12, %v3198_v45  ;;  %v1181_v33 = vadd.f32 %v1069_v16, %v10829_v26  ;;  %13759 = vst [vmem:[#allocation23_spill] sm:$0xff] %v11022_v41  ;;  %v1342_v34 = vmul.f32 %v11022_v41, %v1244_v46  ;;  %13760 = vst [vmem:[#allocation30_spill] sm:$0xff] %v11028_v3  ;;  %4988 = vmatpush1.bf16.msra.mxu1 %v5944_v28  ;;  %v13768_v25 = vld [vmem:[#allocation126_spill] sm:$0xff] }
 0x289   : > { %v1343_v2 = vmul.f32 %v11028_v3, %v1244_v46  ;;  %13761 = vst [vmem:[#allocation58_spill] sm:$0xff] %v11035_v44  ;;  %v1344_v26 = vmul.f32 %v11035_v44, %v1244_v46  ;;  %v1345_v54 = vmul.f32 %v11041_v18, %v1244_v46  ;;  %v1346_v21 = vmul.f32 %v11047_v5, %v1244_v46  ;;  %v11095_v62 = vpop.permute.xlu1 %2363  ;;  %v5948_v12 = vld [vmem:[%s6372_s13 + $0x3f0] sm:$0xff]  }
 0x28a   : > { %v1347_v51 = vmul.f32 %v11053_v39, %v1244_v46  ;;  %4989 = vmatprep.subr.bf16.mxu1 %v12850_v15  ;;  %v3314_v8 = vadd.f32 %v3286_v58, %v3200_v19  ;;  %v1348_v60 = vmul.f32 %v11060_v0, %v1244_v46  ;;  %v1349_v42 = vmul.f32 %v11066_v20, %v1244_v46 }
 0x28b   : > { %v11069_v43 = vadd.f32 %v1342_v34, %v1174_v23  ;;  %v11071_v24 = vadd.f32 %v1343_v2, %v1175_v35  ;;  %v11073_v52 = vadd.f32 %v1344_v26, %v1176_v61  ;;  %v11075_v7 = vadd.f32 %v1345_v54, %v1177_v29  ;;  %v13778_v2 = vld [vmem:[#allocation40_spill] sm:$0xff] }
 0x28c   : > { %v11077_v30 = vadd.f32 %v1346_v21, %v1178_v22  ;;  %v3342_v10 = vmul.f32 0.25, %v3314_v8  ;;  %v11079_v11 = vadd.f32 %v1347_v51, %v1179_v13  ;;  %v11081_v9 = vadd.f32 %v1348_v60, %v1180_v63  ;;  %4990 = vmatpush1.bf16.msra.mxu1 %v5946_v50  ;;  %v13770_v22 = vld [vmem:[#allocation19_spill] sm:$0xff]  ;;  %v13771_v63 = vld [vmem:[#allocation90_spill] sm:$0xff]  ;;  %v13780_v26 = vld [vmem:[#allocation32_spill] sm:$0xff] }
 0x28d   : > { %v11083_v53 = vadd.f32 %v1349_v42, %v1181_v33  ;;  %v5251_v47 = vadd.f32 %v13769_v40, %v13768_v25  ;;  %v1334_v4 = vmul.f32 %v11022_v41, %v10887_v37  ;;  %v1335_v27 = vmul.f32 %v11028_v3, %v10887_v37  ;;  %4991 = vmatprep.subr.bf16.mxu1 %v12850_v15  ;;  %v13773_v33 = vld [vmem:[#allocation15_spill] sm:$0xff]  ;;  %v13781_v21 = vld [vmem:[#allocation80_spill] sm:$0xff]  ;;  %v13782_v8 = vld [vmem:[#allocation45_spill] sm:$0xff]  ;;  %v1800_v42 = vpop.permute.xlu0 %1799 }
 0x28e   : > { %13767 = vst [vmem:[#allocation16_spill] sm:$0xff] %v11081_v9  ;;  %v1336_v17 = vmul.f32 %v11035_v44, %v10887_v37  ;;  %v3370_v31 = vpack.c.bf16 %v3342_v10, %v3342_v10  ;;  %v1337_v28 = vmul.f32 %v11041_v18, %v10887_v37  ;;  %v1338_v59 = vmul.f32 %v11047_v5, %v10887_v37  ;;  %v13783_v10 = vld [vmem:[#allocation38_spill] sm:$0xff]  ;;  %v13784_v40 = vld [vmem:[#allocation67_spill] sm:$0xff] }
 0x28f   : > { %v1339_v45 = vmul.f32 %v11053_v39, %v10887_v37  ;;  %v1340_v16 = vmul.f32 %v11060_v0, %v10887_v37  ;;  %v1341_v23 = vmul.f32 %v11066_v20, %v10887_v37  ;;  %v1446_v46 = vadd.f32 %v1334_v4, %v10778_v32  ;;  %v13775_v37 = vld [vmem:[#allocation49_spill] sm:$0xff]  ;;  %v5952_v0 = vld [vmem:[%s6372_s13 + $0x3e0] sm:$0xff]   ;;  %v13806_v5 = vld [vmem:[#allocation26_spill] sm:$0xff] }
 0x290   : > { %v1447_v19 = vadd.f32 %v1335_v27, %v10781_v1  ;;  %4687 = vmatmul.mubr.bf16.vlgmr.msra.gmra.mxu0 %v3370_v31  ;;  %v1448_v35 = vadd.f32 %v1336_v17, %v10783_v48  ;;  %v1449_v61 = vadd.f32 %v1337_v28, %v10785_v56  ;;  %v1450_v29 = vadd.f32 %v1338_v59, %v10787_v36  ;;  %v13777_v1 = vld [vmem:[#allocation63_spill] sm:$0xff]  ;;  %v5947_v48 = vld [vmem:[%s6372_s13 + $0x3a0] sm:$0xff]   ;;  %v13786_v4 = vld [vmem:[#allocation93_spill] sm:$0xff]  ;;  %v11146_v31 = vpop.permute.xlu1 %2643 }
 0x291   : > { %v1451_v13 = vadd.f32 %v1339_v45, %v13770_v22  ;;  %v11115_v58 = vadd.f32 %v1340_v16, %v13771_v63  ;;  %v11118_v34 = vadd.f32 %v1341_v23, %v13773_v33  ;;  %v11121_v32 = vadd.f32 %v5251_v47, %v13775_v37  ;;  %4877 = vmatpush1.bf16.msra.mxu0 %v5945_v49  ;;  %v13779_v56 = vld [vmem:[#allocation47_spill] sm:$0xff]  ;;  %v5950_v49 = vld [vmem:[%s6372_s13 + $0x3e8] sm:$0xff]   ;;  %v11187_v20 = vpop.permute.xlu0 %2083 }
 0x292   : > { %v1614_v50 = vmul.f32 %v13778_v2, %v13777_v1  ;;  %v1615_v36 = vmul.f32 %v13779_v56, %v13777_v1  ;;  %v1616_v54 = vmul.f32 %v13780_v26, %v13777_v1  ;;  %v1617_v51 = vmul.f32 %v13781_v21, %v13777_v1  ;;  %4878 = vmatprep.subr.bf16.mxu0 %v12850_v15  ;;  %v13790_v22 = vld [vmem:[#allocation57_spill] sm:$0xff]  ;;  %v13791_v33 = vld [vmem:[#allocation87_spill] sm:$0xff] }
 0x293   : > { %13772 = vst [vmem:[#allocation113_spill] sm:$0xff] %v11115_v58  ;;  %13774 = vst [vmem:[#allocation114_spill] sm:$0xff] %v11118_v34  ;;  %v1618_v60 = vmul.f32 %v13782_v8, %v13777_v1  ;;  %v1619_v25 = vmul.f32 %v13783_v10, %v13777_v1  ;;  %v11139_v47 = vmul.f32 %v13784_v40, %v13777_v1  ;;  %4992 = vmatpush1.bf16.msra.mxu1 %v5948_v12  ;;  %v13793_v12 = vld [vmem:[#allocation21_spill] sm:$0xff]  ;;  %v13837_v41 = vld [vmem:[#allocation55_spill] sm:$0xff] }
 0x294   : > { %13776 = vst [vmem:[#allocation115_spill] sm:$0xff] %v11121_v32  ;;  %v11143_v27 = vmul.f32 %v13786_v4, %v13777_v1  ;;  %v1726_v17 = vadd.f32 %v1614_v50, %v1446_v46  ;;  %v1727_v28 = vadd.f32 %v1615_v36, %v1447_v19  ;;  %v1728_v59 = vadd.f32 %v1616_v54, %v1448_v35  ;;  %v13792_v1 = vld [vmem:[#allocation89_spill] sm:$0xff]  ;;  %v5949_v46 = vld [vmem:[%s6372_s13 + $0x398] sm:$0xff]   ;;  %v11161_v19 = vld [vmem:[%s12266_s0 + $0x160] sm:$0xff] }
 0x295   : > { %13785 = vst [vmem:[#allocation116_spill] sm:$0xff] %v11139_v47  ;;  %v1729_v45 = vadd.f32 %v1617_v51, %v1449_v61  ;;  %v11148_v16 = vadd.f32 %v1618_v60, %v1450_v29  ;;  %4993 = vmatprep.subr.bf16.mxu1 %v12850_v15  ;;  %v11151_v23 = vadd.f32 %v1619_v25, %v1451_v13  ;;  %13794 = vst [vmem:[#allocation120_spill] sm:$0xff] %v11161_v19  ;;  %v13796_v61 = vld [vmem:[#allocation43_spill] sm:$0xff]  ;;  %v11172_v13 = vld [vmem:[%s12266_s0 + $0x170] sm:$0xff] }
 0x296   : > { %13787 = vst [vmem:[#allocation117_spill] sm:$0xff] %v11143_v27  ;;  %v1894_v63 = vmul.f32 %v13790_v22, %v1800_v42  ;;  %v1895_v37 = vmul.f32 %v13791_v33, %v1800_v42  ;;  %v1896_v32 = vmul.f32 %v13792_v1, %v1800_v42  ;;  %4879 = vmatpush1.bf16.msra.mxu0 %v5947_v48  ;;  %13798 = vst [vmem:[#allocation73_spill] sm:$0xff] %v11172_v13  ;;  %v13800_v36 = vld [vmem:[#allocation48_spill] sm:$0xff]  ;;  %v5957_v58 = vld [vmem:[%s6372_s13 + $0x378] sm:$0xff]  }
 0x297   : > { %13788 = vst [vmem:[#allocation118_spill] sm:$0xff] %v11148_v16  ;;  %13789 = vst [vmem:[#allocation119_spill] sm:$0xff] %v11151_v23  ;;  %v1897_v50 = vmul.f32 %v13793_v12, %v1800_v42  ;;  %v11164_v35 = vmul.f32 %v11161_v19, %v1800_v42  ;;  %v11167_v29 = vmul.f32 %v13796_v61, %v1800_v42  ;;  %4880 = vmatprep.subr.bf16.mxu0 %v12850_v15  ;;  %v6198_v16 = vld [vmem:[%s12266_s0 + $0x20] sm:$0xff] }
 0x298   : > { %v11175_v48 = vmul.f32 %v11172_v13, %v1800_v42  ;;  %v11179_v54 = vmul.f32 %v13800_v36, %v1800_v42  ;;  %v11181_v51 = vadd.f32 %v1894_v63, %v1726_v17  ;;  %v11183_v60 = vadd.f32 %v1895_v37, %v1727_v28  ;;  %4994 = vmatpush1.bf16.msra.mxu1 %v5950_v49 }
 0x299   : > { %13795 = vst [vmem:[#allocation12_spill] sm:$0xff] %v11164_v35  ;;  %13797 = vst [vmem:[#allocation28_spill] sm:$0xff] %v11167_v29  ;;  %v11185_v25 = vadd.f32 %v1896_v32, %v1728_v59  ;;  %v11190_v39 = vadd.f32 %v1897_v50, %v1729_v45  ;;  %v1622_v18 = vmul.f32 %v13778_v2, %v13806_v5  ;;  %4995 = vmatprep.subr.bf16.mxu1 %v12850_v15  ;;  %v11210_v59 = vpop.permute.xlu1 %3003  ;;  %v11277_v50 = vld [vmem:[%s12266_s0 + $0x188] sm:$0xff] }
 0x29a   : > { %13799 = vst [vmem:[#allocation98_spill] sm:$0xff] %v11175_v48  ;;  %13801 = vst [vmem:[#allocation99_spill] sm:$0xff] %v11179_v54  ;;  %v1623_v42 = vmul.f32 %v13779_v56, %v13806_v5  ;;  %v1624_v17 = vmul.f32 %v13780_v26, %v13806_v5  ;;  %v1625_v32 = vmul.f32 %v13781_v21, %v13806_v5  ;;  %4881 = vmatpush1.bf16.msra.mxu0 %v5949_v46  ;;  %v5951_v56 = vld [vmem:[%s6372_s13 + $0x390] sm:$0xff]  }
 0x29b   : > { %13802 = vst [vmem:[#allocation101_spill] sm:$0xff] %v11181_v51  ;;  %13803 = vst [vmem:[#allocation121_spill] sm:$0xff] %v11183_v60  ;;  %v1626_v49 = vmul.f32 %v13782_v8, %v13806_v5  ;;  %v1627_v28 = vmul.f32 %v13783_v10, %v13806_v5  ;;  %v11207_v2 = vmul.f32 %v13784_v40, %v13806_v5  ;;  %4882 = vmatprep.subr.bf16.mxu0 %v12850_v15  ;;  %v5962_v60 = vld [vmem:[%s6372_s13 + $0x410] sm:$0xff]  }
 0x29c   : > { %13804 = vst [vmem:[#allocation122_spill] sm:$0xff] %v11185_v25  ;;  %13805 = vst [vmem:[#allocation86_spill] sm:$0xff] %v11190_v39  ;;  %v11214_v26 = vmul.f32 %v13786_v4, %v13806_v5  ;;  %v1734_v21 = vadd.f32 %v1622_v18, %v11069_v43  ;;  %v1735_v8 = vadd.f32 %v1623_v42, %v11071_v24  ;;  %v11229_v4 = vpop.permute.xlu0 %2639  ;;  %4996 = vmatpush1.bf16.msra.mxu1 %v5952_v0  ;;  %v5954_v18 = vld [vmem:[%s6372_s13 + $0x3d8] sm:$0xff]   ;;  %v6194_v25 = vld [vmem:[%s12266_s0] sm:$0xff] }
 0x29d   : > { %13807 = vst [vmem:[#allocation62_spill] sm:$0xff] %v11207_v2  ;;  %13808 = vst [vmem:[#allocation123_spill] sm:$0xff] %v11210_v59  ;;  %v1736_v45 = vadd.f32 %v1624_v17, %v11073_v52  ;;  %v1737_v10 = vadd.f32 %v1625_v32, %v11075_v7  ;;  %v11222_v40 = vadd.f32 %v1626_v49, %v11077_v30  ;;  %4997 = vmatprep.subr.bf16.mxu1 %v12850_v15  ;;  %v11295_v17 = vld [vmem:[%s12266_s0 + $0x198] sm:$0xff]  ;;  %v11304_v49 = vld [vmem:[%s12266_s0 + $0x1a0] sm:$0xff] }
 0x29e   : > { %v11225_v63 = vadd.f32 %v1627_v28, %v11079_v11  ;;  %v1902_v5 = vmul.f32 %v13790_v22, %v10968_v14  ;;  %13810 = vst [vmem:[#allocation31_spill] sm:$0xff] %v11229_v4  ;;  %v1903_v43 = vmul.f32 %v13791_v33, %v10968_v14  ;;  %v1904_v24 = vmul.f32 %v13792_v1, %v10968_v14  ;;  %v5953_v33 = vld [vmem:[%s6372_s13 + $0x388] sm:$0xff]  }
 0x29f   : > { %13809 = vst [vmem:[#allocation71_spill] sm:$0xff] %v11222_v40  ;;  %v1905_v52 = vmul.f32 %v13793_v12, %v10968_v14  ;;  %v11240_v7 = vmul.f32 %v11161_v19, %v10968_v14  ;;  %v11245_v30 = vmul.f32 %v13796_v61, %v10968_v14  ;;  %v11249_v0 = vmul.f32 %v11172_v13, %v10968_v14  ;;  %v11267_v12 = vld [vmem:[%s12266_s0 + $0x180] sm:$0xff]  ;;  %v11353_v19 = vld [vmem:[%s6372_s13 + $0x418] sm:$0x1f]   ;;  %v6207_v4 = vld [vmem:[%s12266_s0 + $0x68] sm:$0xff] }
 0x2a0   : > { %v11253_v11 = vmul.f32 %v13800_v36, %v10968_v14  ;;  %v11255_v22 = vadd.f32 %v1902_v5, %v1734_v21  ;;  %4883 = vmatpush1.bf16.msra.mxu0 %v5951_v56  ;;  %v11258_v37 = vadd.f32 %v1903_v43, %v1735_v8  ;;  %v11260_v1 = vadd.f32 %v1904_v24, %v1736_v45  ;;  %v11286_v36 = vld [vmem:[%s12266_s0 + $0x190] sm:$0xff]  ;;  %v11311_v21 = vpop.permute.xlu0 %3007  ;;  %v520_v8 = vpop.permute.xlu1 %519  ;;  %v11316_v45 = vld [vmem:[%s12266_s0 + $0x1a8] sm:$0xff] }
 0x2a1   : > { %13811 = vst [vmem:[#allocation107_spill] sm:$0xff] %v11240_v7  ;;  %13812 = vst [vmem:[#allocation56_spill] sm:$0xff] %v11249_v0  ;;  %v11262_v46 = vadd.f32 %v1905_v52, %v1737_v10  ;;  %v11271_v14 = vmul.f32 %v11267_v12, %v11187_v20  ;;  %4884 = vmatprep.subr.bf16.mxu0 %v12850_v15  ;;  %v11281_v61 = vmul.f32 %v11277_v50, %v11187_v20  ;;  %v5956_v56 = vld [vmem:[%s6372_s13 + $0x3d0] sm:$0xff]  }
 0x2a2   : > { %13813 = vst [vmem:[#allocation127_spill] sm:$0xff] %v11255_v22  ;;  %13814 = vst [vmem:[#allocation59_spill] sm:$0xff] %v11260_v1  ;;  %v11290_v42 = vmul.f32 %v11286_v36, %v11187_v20  ;;  %v11299_v32 = vmul.f32 %v11295_v17, %v11187_v20  ;;  %v11308_v28 = vmul.f32 %v11304_v49, %v11187_v20  ;;  %4998 = vmatpush1.bf16.msra.mxu1 %v5954_v18  ;;  %v13842_v1 = vld [vmem:[#allocation6_spill] sm:$0xff] }
 0x2a3   : > { %13815 = vst [vmem:[#allocation109_spill] sm:$0xff] %v11267_v12  ;;  %13816 = vst [vmem:[#allocation81_spill] sm:$0xff] %v11271_v14  ;;  %v11320_v10 = vmul.f32 %v11316_v45, %v11187_v20  ;;  %v11324_v5 = vmul.f32 %v11267_v12, %v10992_v38  ;;  %v11328_v18 = vmul.f32 %v11277_v50, %v10992_v38  ;;  %4999 = vmatprep.subr.bf16.mxu1 %v12850_v15  ;;  %v11416_v14 = vpop.f32.mrf.mxu1 }
 0x2a4   : > { %13817 = vst [vmem:[#allocation35_spill] sm:$0xff] %v11277_v50  ;;  %13818 = vst [vmem:[#allocation84_spill] sm:$0xff] %v11286_v36  ;;  %v11332_v43 = vmul.f32 %v11286_v36, %v10992_v38  ;;  %v11337_v24 = vmul.f32 %v11295_v17, %v10992_v38  ;;  %v11341_v52 = vmul.f32 %v11304_v49, %v10992_v38  ;;  %v13831_v50 = vld [vmem:[#allocation82_spill] sm:$0xff]  ;;  %4885 = vmatpush1.bf16.msra.mxu0 %v5953_v33  ;;  %v5955_v36 = vld [vmem:[%s6372_s13 + $0x380] sm:$0xff]   ;;  %v524_v51 = vpop.permute.xlu0 %523 }
 0x2a5   : > { %13819 = vst [vmem:[#allocation66_spill] sm:$0xff] %v11290_v42  ;;  %13820 = vst [vmem:[#allocation54_spill] sm:$0xff] %v11295_v17  ;;  %v11345_v12 = vmul.f32 %v11316_v45, %v10992_v38  ;;  %v11349_v13 = vmul.f32 %v13831_v50, %v11016_v6  ;;  %v13833_v17 = vld [vmem:[#allocation70_spill] sm:$0xff]  ;;  %4886 = vmatprep.subr.bf16.mxu0 %v12850_v15  ;;  %v11373_v33 = vld [vmem:[%s6372_s13 + $0x3c0] sm:$0x1f]   ;;  %v626_v47 = vmul.f32 %v6198_v16, %v520_v8  ;;  %v4357_v9 = vpop.f32.mrf.mxu1 }
 0x2a6   : > { %13821 = vst [vmem:[#allocation76_spill] sm:$0xff] %v11304_v49  ;;  %13822 = vst [vmem:[#allocation20_spill] sm:$0xff] %v11308_v28  ;;  %v11357_v44 = vmul.f32 %v13833_v17, %v11016_v6  ;;  %v13835_v49 = vld [vmem:[#allocation10_spill] sm:$0xff]  ;;  %5000 = vmatpush1.bf16.msra.mxu1 %v5956_v56  ;;  %v6197_v56 = vld [vmem:[%s12266_s0 + $0x18] sm:$0xff]  ;;  %v628_v57 = vmul.f32 %v6200_v55, %v520_v8  ;;  %v4985_v59 = vand.u32 %v11353_v19, %v13842_v1 }
 0x2a7   : > { %13823 = vst [vmem:[#allocation129_spill] sm:$0xff] %v11311_v21  ;;  %13824 = vst [vmem:[#allocation46_spill] sm:$0xff] %v11316_v45  ;;  %v11361_v3 = vmul.f32 %v13835_v49, %v11016_v6  ;;  %v11365_v45 = vmul.f32 %v13837_v41, %v11016_v6  ;;  %5001 = vmatprep.subr.bf16.mxu1 %v12850_v15  ;;  %v625_v35 = vmul.f32 %v6197_v56, %v520_v8  ;;  %v6201_v28 = vld [vmem:[%s12266_s0 + $0x38] sm:$0xff] }
 0x2a8   : > { %13825 = vst [vmem:[#allocation33_spill] sm:$0xff] %v11324_v5  ;;  %13826 = vst [vmem:[#allocation88_spill] sm:$0xff] %v11328_v18  ;;  %v622_v5 = vmul.f32 %v6194_v25, %v520_v8  ;;  %4887 = vmatpush1.bf16.msra.mxu0 %v5955_v36  ;;  %v629_v42 = vmul.f32 %v6201_v28, %v520_v8  ;;  %v688_v36 = vpop.permute.xlu1 %687  ;;  %v11421_v0 = vmul.f32 %v6194_v25, %v524_v51  ;;  %v11441_v25 = vld [vmem:[%s12266_s0 + $0x40] sm:$0xff]  ;;  %v968_v6 = vpop.permute.xlu0 %967  ;;  %v6209_v21 = vld [vmem:[%s12266_s0 + $0x78] sm:$0xff] }
 0x2a9   : > { %13827 = vst [vmem:[#allocation97_spill] sm:$0xff] %v11332_v43  ;;  %13828 = vst [vmem:[#allocation60_spill] sm:$0xff] %v11337_v24  ;;  %v11381_v43 = vmul.f32 %v13835_v49, %v11095_v62  ;;  %4888 = vmatprep.subr.bf16.mxu0 %v12850_v15  ;;  %v11429_v2 = vmul.f32 %v6198_v16, %v524_v51  ;;  %v11436_v22 = vmul.f32 %v6201_v28, %v524_v51  ;;  %v6203_v16 = vld [vmem:[%s12266_s0 + $0x48] sm:$0xff]  ;;  %v6205_v28 = vld [vmem:[%s12266_s0 + $0x58] sm:$0xff] }
 0x2aa   : > { %13829 = vst [vmem:[#allocation103_spill] sm:$0xff] %v11341_v52  ;;  %13830 = vst [vmem:[#allocation78_spill] sm:$0xff] %v11345_v12  ;;  %v11369_v52 = vmul.f32 %v13831_v50, %v11095_v62  ;;  %v5958_v50 = vld [vmem:[%s6372_s13 + $0x3c8] sm:$0xff]   ;;  %v4358_v12 = vpop.f32.mrf.mxu1  ;;  %v797_v24 = vmul.f32 %v6209_v21, %v688_v36 }
 0x2ab   : > { %13832 = vst [vmem:[#allocation112_spill] sm:$0xff] %v11349_v13  ;;  %13834 = vst [vmem:[#allocation51_spill] sm:$0xff] %v11357_v44  ;;  %v11377_v13 = vmul.f32 %v13833_v17, %v11095_v62  ;;  %v6195_v17 = vld [vmem:[%s12266_s0 + $0x8] sm:$0xff]  ;;  %5002 = vmatpush1.bf16.msra.mxu1 %v5958_v50  ;;  %v790_v50 = vmul.f32 %v11441_v25, %v688_v36 }
 0x2ac   : > { %13836 = vst [vmem:[#allocation124_spill] sm:$0xff] %v11361_v3  ;;  %13838 = vst [vmem:[#allocation108_spill] sm:$0xff] %v11365_v45  ;;  %v11385_v3 = vmul.f32 %v13837_v41, %v11095_v62  ;;  %v623_v49 = vmul.f32 %v6195_v17, %v520_v8  ;;  %v6196_v41 = vld [vmem:[%s12266_s0 + $0x10] sm:$0xff]  ;;  %v11423_v7 = vmul.f32 %v6195_v17, %v524_v51  ;;  %5013 = vmatprep.subr.bf16.mxu1 %v12850_v15  ;;  %v4359_v34 = vpop.f32.mrf.mxu1 }
 0x2ad   : > { %13839 = vst [vmem:[#allocation91_spill] sm:$0xff] %v11369_v52  ;;  %13840 = vst [vmem:[#allocation44_spill] sm:$0xff] %v11381_v43  ;;  %v624_v48 = vmul.f32 %v6196_v41, %v520_v8  ;;  %v6199_v43 = vld [vmem:[%s12266_s0 + $0x28] sm:$0xff]  ;;  %v11425_v40 = vmul.f32 %v6196_v41, %v524_v51  ;;  %4889 = vmatpush1.bf16.msra.mxu0 %v5957_v58  ;;  %v793_v17 = vmul.f32 %v6205_v28, %v688_v36  ;;  %v6206_v41 = vld [vmem:[%s12266_s0 + $0x60] sm:$0xff] }
 0x2ae   : > { %13841 = vst [vmem:[#allocation125_spill] sm:$0xff] %v11385_v3  ;;  %v627_v52 = vmul.f32 %v6199_v43, %v520_v8  ;;  %13843 = vst [vmem:[#allocation96_spill] sm:$0xff] %v11416_v14  ;;  %v11427_v8 = vmul.f32 %v6197_v56, %v524_v51  ;;  %v11431_v19 = vmul.f32 %v6199_v43, %v524_v51  ;;  %v6208_v58 = vld [vmem:[%s12266_s0 + $0x70] sm:$0xff]  ;;  %4890 = vmatprep.subr.bf16.mxu0 %v12850_v15  ;;  %v11472_v3 = vld [vmem:[%s12266_s0 + $0x80] sm:$0xff] }
 0x2af   : > { %v11433_v14 = vmul.f32 %v6200_v55, %v524_v51  ;;  %v791_v43 = vmul.f32 %v6203_v16, %v688_v36  ;;  %v6204_v55 = vld [vmem:[%s12266_s0 + $0x50] sm:$0xff]  ;;  %v794_v56 = vmul.f32 %v6206_v41, %v688_v36  ;;  %v795_v45 = vmul.f32 %v6207_v4, %v688_v36  ;;  %5014 = vmatpush2.bf16.msra.mxu1 %v4985_v59  ;;  %v11490_v34 = vld [vmem:[%s12266_s0 + $0x98] sm:$0xff]  ;;  %v11496_v59 = vld [vmem:[%s12266_s0 + $0xa0] sm:$0xff] }
 0x2b0   : > { %v792_v9 = vmul.f32 %v6204_v55, %v688_v36  ;;  %v5959_v51 = vld [vmem:[%s6372_s13 + $0x370] sm:$0xff]   ;;  %v796_v44 = vmul.f32 %v6208_v58, %v688_v36  ;;  %v902_v39 = vadd.f32 %v790_v50, %v622_v5  ;;  %v905_v38 = vadd.f32 %v793_v17, %v625_v35  ;;  %5015 = vmatprep.subr.bf16.mxu1 %v12850_v15  ;;  %v11515_v50 = vld [vmem:[%s12266_s0 + $0xb8] sm:$0xff] }
 0x2b1   : > { %v903_v54 = vadd.f32 %v791_v43, %v623_v49  ;;  %v906_v29 = vadd.f32 %v794_v56, %v626_v47  ;;  %v907_v23 = vadd.f32 %v795_v45, %v627_v52  ;;  %v909_v12 = vadd.f32 %v797_v24, %v629_v42  ;;  %4891 = vmatpush1.bf16.msra.mxu0 %v5959_v51  ;;  %v11502_v45 = vld [vmem:[%s12266_s0 + $0xa8] sm:$0xff]  ;;  %v11508_v24 = vld [vmem:[%s12266_s0 + $0xb0] sm:$0xff]  ;;  %v692_v49 = vpop.permute.xlu1 %691 }
 0x2b2   : > { %v904_v18 = vadd.f32 %v792_v9, %v624_v48  ;;  %v908_v27 = vadd.f32 %v796_v44, %v628_v57  ;;  %v1070_v36 = vmul.f32 %v11472_v3, %v968_v6  ;;  %v11478_v48 = vld [vmem:[%s12266_s0 + $0x88] sm:$0xff]  ;;  %v11484_v57 = vld [vmem:[%s12266_s0 + $0x90] sm:$0xff]  ;;  %13845 = vst [vmem:[#allocation94_spill] sm:$0xff] %v11490_v34  ;;  %v1073_v35 = vmul.f32 %v11490_v34, %v968_v6 }
 0x2b3   : > { %v1071_v47 = vmul.f32 %v11478_v48, %v968_v6  ;;  %13844 = vst [vmem:[#allocation74_spill] sm:$0xff] %v11484_v57  ;;  %v1072_v44 = vmul.f32 %v11484_v57, %v968_v6  ;;  %13846 = vst [vmem:[#allocation29_spill] sm:$0xff] %v11496_v59  ;;  %v1074_v42 = vmul.f32 %v11496_v59, %v968_v6  ;;  %4902 = vmatprep.subr.bf16.mxu0 %v12850_v15  ;;  %v5964_v34 = vld [vmem:[%s6372_s13 + $0x408] sm:$0xff]  }
 0x2b4   : > { %13847 = vst [vmem:[#allocation75_spill] sm:$0xff] %v11502_v45  ;;  %v1075_v5 = vmul.f32 %v11502_v45, %v968_v6  ;;  %13848 = vst [vmem:[#allocation27_spill] sm:$0xff] %v11508_v24  ;;  %v1076_v52 = vmul.f32 %v11508_v24, %v968_v6  ;;  %v1077_v43 = vmul.f32 %v11515_v50, %v968_v6  ;;  %5016 = vmatpush2.bf16.msra.mxu1 %v5962_v60 }
 0x2b5   : > { %v11518_v9 = vadd.f32 %v1070_v36, %v902_v39  ;;  %v11520_v51 = vadd.f32 %v1071_v47, %v903_v54  ;;  %v11522_v17 = vadd.f32 %v1072_v44, %v904_v18  ;;  %v11524_v56 = vadd.f32 %v1073_v35, %v905_v38  ;;  %5017 = vmatprep.subr.bf16.mxu1 %v12850_v15  ;;  %v11537_v18 = vpop.f32.mrf.mxu0 }
 0x2b6   : > { %v11526_v24 = vadd.f32 %v1074_v42, %v906_v29  ;;  %v11528_v45 = vadd.f32 %v1075_v5, %v907_v23  ;;  %v11530_v59 = vadd.f32 %v1076_v52, %v908_v27  ;;  %v11533_v57 = vadd.f32 %v1077_v43, %v909_v12  ;;  %v5963_v29 = vld [vmem:[%s6372_s13 + $0x3b8] sm:$0xff]   ;;  %v11621_v42 = vld [vmem:[%s12266_s0 + $0x228] sm:$0xff] }
 0x2b7   : > { %v798_v6 = vmul.f32 %v11441_v25, %v692_v49  ;;  %v799_v39 = vmul.f32 %v6203_v16, %v692_v49  ;;  %v800_v54 = vmul.f32 %v6204_v55, %v692_v49  ;;  %v13849_v38 = vand.u32 %v11373_v33, %v13842_v1  ;;  %v4246_v33 = vpop.f32.mrf.mxu0  ;;  %13853 = vst [vmem:[#allocation77_spill] sm:$0xff] %v11621_v42  ;;  %v11628_v52 = vld [vmem:[%s12266_s0 + $0x238] sm:$0xff] }
 0x2b8   : > { %v801_v23 = vmul.f32 %v6205_v28, %v692_v49  ;;  %v802_v60 = vmul.f32 %v6206_v41, %v692_v49  ;;  %v803_v27 = vmul.f32 %v6207_v4, %v692_v49  ;;  %v804_v36 = vmul.f32 %v6208_v58, %v692_v49  ;;  %5018 = vmatpush2.bf16.msra.mxu1 %v5964_v34  ;;  %v11612_v58 = vld [vmem:[%s12266_s0 + $0x218] sm:$0xff]  ;;  %v13860_v33 = vld [vmem:[#allocation121_spill] sm:$0xff] }
 0x2b9   : > { %4903 = vmatpush2.bf16.msra.mxu0 %v13849_v38  ;;  %v805_v12 = vmul.f32 %v6209_v21, %v692_v49  ;;  %v11545_v47 = vadd.f32 %v798_v6, %v11421_v0  ;;  %v11548_v25 = vadd.f32 %v799_v39, %v11423_v7  ;;  %v11551_v16 = vadd.f32 %v800_v54, %v11425_v40  ;;  %v13855_v6 = vld [vmem:[#allocation114_spill] sm:$0xff]  ;;  %v13856_v39 = vld [vmem:[#allocation117_spill] sm:$0xff]  ;;  %v13857_v38 = vld [vmem:[#allocation119_spill] sm:$0xff] }
 0x2ba   : > { %4904 = vmatprep.subr.bf16.mxu0 %v12850_v15  ;;  %v11554_v55 = vadd.f32 %v801_v23, %v11427_v8  ;;  %v11557_v4 = vadd.f32 %v802_v60, %v11429_v2  ;;  %v11560_v21 = vadd.f32 %v803_v27, %v11431_v19  ;;  %v11563_v0 = vadd.f32 %v804_v36, %v11433_v14  ;;  %v11575_v2 = vld [vmem:[%s12266_s0 + $0x1b8] sm:$0xff]  ;;  %v4247_v19 = vpop.f32.mrf.mxu0  ;;  %v13859_v36 = vld [vmem:[#allocation61_spill] sm:$0xff] }
 0x2bb   : > { %v11566_v7 = vadd.f32 %v805_v12, %v11436_v22  ;;  %v1741_v40 = vadd.f32 %v11214_v26, %v11083_v53  ;;  %v2019_v28 = vadd.f32 %v11245_v30, %v11225_v63  ;;  %v2189_v8 = vmul.f32 %v11575_v2, %v11187_v20  ;;  %5209 = vmatprep.subr.bf16.mxu1 %v12850_v15  ;;  %v5965_v22 = vld [vmem:[%s6372_s13 + $0x3b0] sm:$0xff]   ;;  %v11588_v26 = vld [vmem:[%s12266_s0 + $0x1e8] sm:$0xff]  ;;  %v11595_v30 = vld [vmem:[%s12266_s0 + $0x1f8] sm:$0xff] }
 0x2bc   : > { %v2295_v14 = vadd.f32 %v11281_v61, %v11258_v37  ;;  %v2297_v53 = vadd.f32 %v11299_v32, %v11262_v46  ;;  %v2467_v63 = vmul.f32 %v11588_v26, %v11095_v62  ;;  %v2469_v41 = vmul.f32 %v11595_v30, %v11095_v62  ;;  %v11605_v61 = vld [vmem:[%s12266_s0 + $0x208] sm:$0xff]  ;;  %13851 = vst [vmem:[#allocation100_spill] sm:$0xff] %v11612_v58  ;;  %v4248_v34 = vpop.f32.mrf.mxu0 }
 0x2bd   : > { %4905 = vmatpush2.bf16.msra.mxu0 %v5963_v29  ;;  %v2021_v37 = vadd.f32 %v11253_v11, %v1741_v40  ;;  %v2299_v46 = vadd.f32 %v11320_v10, %v2019_v28  ;;  %13850 = vst [vmem:[#allocation18_spill] sm:$0xff] %v11605_v61  ;;  %v2743_v32 = vmul.f32 %v11605_v61, %v11146_v31  ;;  %v13852_v10 = vld [vmem:[#allocation125_spill] sm:$0xff]  ;;  %13854 = vst [vmem:[#allocation24_spill] sm:$0xff] %v11628_v52  ;;  %v13858_v29 = vld [vmem:[#allocation28_spill] sm:$0xff] }
 0x2be   : > { %4906 = vmatprep.subr.bf16.mxu0 %v12850_v15  ;;  %v2745_v44 = vmul.f32 %v11612_v58, %v11146_v31  ;;  %v2575_v11 = vadd.f32 %v11377_v13, %v2295_v14  ;;  %v2577_v35 = vadd.f32 %v13852_v10, %v2297_v53  ;;  %v2747_v5 = vmul.f32 %v11621_v42, %v11146_v31  ;;  %v13861_v40 = vld [vmem:[#allocation88_spill] sm:$0xff]  ;;  %v13862_v53 = vld [vmem:[#allocation99_spill] sm:$0xff]  ;;  %v13865_v34 = vld [vmem:[#allocation129_spill] sm:$0xff] }
 0x2bf   : > { %v2749_v49 = vmul.f32 %v11628_v52, %v11146_v31  ;;  %v2301_v43 = vadd.f32 %v2189_v8, %v2021_v37  ;;  %v2579_v13 = vadd.f32 %v2467_v63, %v2299_v46  ;;  %v1733_v54 = vadd.f32 %v13856_v39, %v13855_v6  ;;  %v13863_v63 = vld [vmem:[#allocation86_spill] sm:$0xff]  ;;  %v13864_v37 = vld [vmem:[#allocation60_spill] sm:$0xff] }
 0x2c0   : > { %v2011_v23 = vadd.f32 %v13858_v29, %v13857_v38  ;;  %v2855_v60 = vadd.f32 %v2743_v32, %v2575_v11  ;;  %v2857_v27 = vadd.f32 %v2745_v44, %v2577_v35  ;;  %v2181_v12 = vmul.f32 %v11575_v2, %v13859_v36  ;;  %v13866_v32 = vld [vmem:[#allocation78_spill] sm:$0xff]  ;;  %v13867_v11 = vld [vmem:[#allocation83_spill] sm:$0xff]  ;;  %v13869_v29 = vld [vmem:[#allocation108_spill] sm:$0xff] }
 0x2c1   : > { %4907 = vmatpush2.bf16.msra.mxu0 %v5965_v22  ;;  %v2287_v28 = vadd.f32 %v13861_v40, %v13860_v33  ;;  %v2581_v19 = vadd.f32 %v2469_v41, %v2301_v43  ;;  %v2859_v14 = vadd.f32 %v2747_v5, %v2579_v13  ;;  %v2013_v8 = vadd.f32 %v13862_v53, %v1733_v54  ;;  %v13868_v54 = vld [vmem:[#allocation51_spill] sm:$0xff] }
 0x2c2   : > { %v2289_v46 = vadd.f32 %v13864_v37, %v13863_v63  ;;  %5098 = vmatprep.subr.bf16.mxu0 %v12850_v15  ;;  %v3107_v10 = vadd.f32 %v13865_v34, %v2855_v60  ;;  %v3109_v22 = vadd.f32 %v13865_v34, %v2857_v27  ;;  %v2291_v44 = vadd.f32 %v13866_v32, %v2011_v23  ;;  %v13870_v63 = vld [vmem:[#allocation31_spill] sm:$0xff]  ;;  %v13872_v37 = vld [vmem:[#allocation62_spill] sm:$0xff] }
 0x2c3   : > { %v2459_v35 = vmul.f32 %v11588_v26, %v13867_v11  ;;  %v2861_v6 = vadd.f32 %v2749_v49, %v2581_v19  ;;  %v3111_v41 = vadd.f32 %v13865_v34, %v2859_v14  ;;  %v2293_v5 = vadd.f32 %v2181_v12, %v2013_v8  ;;  %v13871_v8 = vld [vmem:[#allocation16_spill] sm:$0xff] }
 0x2c4   : > { %v2461_v43 = vmul.f32 %v11595_v30, %v13867_v11  ;;  %v3219_v13 = vmax.f32 %v3107_v10, 0.0  ;;  %v3221_v39 = vmax.f32 %v3109_v22, 0.0  ;;  %v2567_v38 = vadd.f32 %v13868_v54, %v2287_v28  ;;  %v13873_v10 = vld [vmem:[#allocation71_spill] sm:$0xff] }
 0x2c5   : > { %v2569_v60 = vadd.f32 %v13869_v29, %v2289_v46  ;;  %v3113_v27 = vadd.f32 %v13865_v34, %v2861_v6  ;;  %v3223_v33 = vmax.f32 %v3111_v41, 0.0  ;;  %v2571_v23 = vadd.f32 %v2459_v35, %v2291_v44  ;;  %v13874_v22 = vld [vmem:[#allocation107_spill] sm:$0xff] }
 0x2c6   : > { %v2573_v40 = vadd.f32 %v2461_v43, %v2293_v5  ;;  %v3265_v53 = vadd.f32 %v3221_v39, %v3219_v13  ;;  %v2735_v49 = vmul.f32 %v11605_v61, %v13870_v63  ;;  %v2737_v12 = vmul.f32 %v11612_v58, %v13870_v63  ;;  %v13875_v43 = vld [vmem:[#allocation56_spill] sm:$0xff]  ;;  %v11671_v39 = vld [vmem:[%s12266_s0 + $0x1b0] sm:$0xff]  ;;  %v13876_v29 = vld [vmem:[#allocation127_spill] sm:$0xff] }
 0x2c7   : > { %v2739_v19 = vmul.f32 %v11621_v42, %v13870_v63  ;;  %v3225_v14 = vmax.f32 %v3113_v27, 0.0  ;;  %v2741_v28 = vmul.f32 %v11628_v52, %v13870_v63  ;;  %v1740_v46 = vadd.f32 %v13872_v37, %v13871_v8  ;;  %v13877_v27 = vld [vmem:[#allocation81_spill] sm:$0xff]  ;;  %v13894_v61 = vld [vmem:[#allocation98_spill] sm:$0xff] }
 0x2c8   : > { %v2018_v32 = vadd.f32 %v13874_v22, %v13873_v10  ;;  %v3293_v44 = vadd.f32 %v3265_v53, %v3223_v33  ;;  %v2847_v35 = vadd.f32 %v2735_v49, %v2567_v38  ;;  %v2849_v6 = vadd.f32 %v2737_v12, %v2569_v60  ;;  %v13878_v10 = vld [vmem:[#allocation123_spill] sm:$0xff]  ;;  %v13880_v53 = vld [vmem:[#allocation66_spill] sm:$0xff]  ;;  %v13881_v12 = vld [vmem:[#allocation20_spill] sm:$0xff] }
 0x2c9   : > { %v2851_v41 = vadd.f32 %v2739_v19, %v2571_v23  ;;  %v2853_v5 = vadd.f32 %v2741_v28, %v2573_v40  ;;  %v2020_v13 = vadd.f32 %v13875_v43, %v1740_v46  ;;  %v2188_v54 = vmul.f32 %v11671_v39, %v11187_v20  ;;  %v13879_v40 = vld [vmem:[#allocation59_spill] sm:$0xff]  ;;  %v11684_v46 = vpop.permute.xlu1 %971 }
 0x2ca   : > { %v2294_v8 = vadd.f32 %v13877_v27, %v13876_v29  ;;  %v3321_v37 = vadd.f32 %v3293_v44, %v3225_v14  ;;  %v3099_v33 = vadd.f32 %v13878_v10, %v2847_v35  ;;  %v3101_v38 = vadd.f32 %v13878_v10, %v2849_v6  ;;  %v13882_v35 = vld [vmem:[#allocation68_spill] sm:$0xff] }
 0x2cb   : > { %v3103_v60 = vadd.f32 %v13878_v10, %v2851_v41  ;;  %v3105_v23 = vadd.f32 %v13878_v10, %v2853_v5  ;;  %v2296_v49 = vadd.f32 %v13880_v53, %v13879_v40  ;;  %v2298_v19 = vadd.f32 %v13881_v12, %v2018_v32  ;;  %v13883_v41 = vld [vmem:[#allocation65_spill] sm:$0xff]  ;;  %v13884_v5 = vld [vmem:[#allocation91_spill] sm:$0xff]  ;;  %v13885_v53 = vld [vmem:[#allocation44_spill] sm:$0xff] }
 0x2cc   : > { %v2300_v28 = vadd.f32 %v2188_v54, %v2020_v13  ;;  %v3349_v20 = vmul.f32 0.25, %v3321_v37  ;;  %v3211_v22 = vmax.f32 %v3099_v33, 0.0  ;;  %v3213_v43 = vmax.f32 %v3101_v38, 0.0  ;;  %v11695_v13 = vld [vmem:[%s12266_s0 + $0x200] sm:$0xff] }
 0x2cd   : > { %v3215_v14 = vmax.f32 %v3103_v60, 0.0  ;;  %v3217_v44 = vmax.f32 %v3105_v23, 0.0  ;;  %v2466_v6 = vmul.f32 %v13882_v35, %v11095_v62  ;;  %v2468_v29 = vmul.f32 %v13883_v41, %v11095_v62  ;;  %13886 = vst [vmem:[#allocation8_spill] sm:$0xff] %v11695_v13  ;;  %v11702_v62 = vld [vmem:[%s12266_s0 + $0x210] sm:$0xff]  ;;  %v11709_v38 = vld [vmem:[%s12266_s0 + $0x220] sm:$0xff] }
 0x2ce   : > { %v2574_v27 = vadd.f32 %v13884_v5, %v2294_v8  ;;  %v3377_v52 = vpack.c.bf16 %v3349_v20, %v3349_v20  ;;  %v3263_v40 = vadd.f32 %v3213_v43, %v3211_v22  ;;  %v2576_v32 = vadd.f32 %v13885_v53, %v2296_v49  ;;  %13887 = vst [vmem:[#allocation53_spill] sm:$0xff] %v11702_v62  ;;  %v11717_v49 = vld [vmem:[%s12266_s0 + $0x230] sm:$0xff]  ;;  %v13891_v20 = vld [vmem:[#allocation116_spill] sm:$0xff] }
 0x2cf   : > { %v2742_v54 = vmul.f32 %v11695_v13, %v11146_v31  ;;  %v2578_v37 = vadd.f32 %v2466_v6, %v2298_v19  ;;  %v2580_v33 = vadd.f32 %v2468_v29, %v2300_v28  ;;  %v2744_v8 = vmul.f32 %v11702_v62, %v11146_v31  ;;  %13888 = vst [vmem:[#allocation64_spill] sm:$0xff] %v11709_v38  ;;  %v13890_v28 = vld [vmem:[#allocation113_spill] sm:$0xff]  ;;  %v13892_v29 = vld [vmem:[#allocation118_spill] sm:$0xff]  ;;  %v13893_v5 = vld [vmem:[#allocation12_spill] sm:$0xff] }
 0x2d0   : > { %v2746_v60 = vmul.f32 %v11709_v38, %v11146_v31  ;;  %5634 = vmatprep.mubr.msk.bf16.mxu1 %vm3755_vm2, %v3377_v52  ;;  %v3291_v23 = vadd.f32 %v3263_v40, %v3215_v14  ;;  %13889 = vst [vmem:[#allocation92_spill] sm:$0xff] %v11717_v49  ;;  %v2748_v12 = vmul.f32 %v11717_v49, %v11146_v31  ;;  %v11727_v14 = vpop.permute.xlu1 %1247 }
 0x2d1   : > { %v2854_v19 = vadd.f32 %v2742_v54, %v2574_v27  ;;  %v1732_v22 = vadd.f32 %v13891_v20, %v13890_v28  ;;  %v2856_v43 = vadd.f32 %v2744_v8, %v2576_v32  ;;  %v2010_v53 = vadd.f32 %v13893_v5, %v13892_v29  ;;  %v13895_v32 = vld [vmem:[#allocation101_spill] sm:$0xff] }
 0x2d2   : > { %v2858_v6 = vadd.f32 %v2746_v60, %v2578_v37  ;;  %v2180_v52 = vmul.f32 %v11671_v39, %v13859_v36  ;;  %v3319_v40 = vadd.f32 %v3291_v23, %v3217_v44  ;;  %v2860_v42 = vadd.f32 %v2748_v12, %v2580_v33  ;;  %v13896_v37 = vld [vmem:[#allocation33_spill] sm:$0xff]  ;;  %v13897_v60 = vld [vmem:[#allocation122_spill] sm:$0xff]  ;;  %v13899_v44 = vld [vmem:[#allocation103_spill] sm:$0xff] }
 0x2d3   : > { %v3106_v58 = vadd.f32 %v13865_v34, %v2854_v19  ;;  %v2012_v31 = vadd.f32 %v13894_v61, %v1732_v22  ;;  %v3108_v27 = vadd.f32 %v13865_v34, %v2856_v43  ;;  %v2286_v8 = vadd.f32 %v13896_v37, %v13895_v32  ;;  %v13898_v28 = vld [vmem:[#allocation97_spill] sm:$0xff]  ;;  %v13900_v32 = vld [vmem:[#allocation112_spill] sm:$0xff] }
 0x2d4   : > { %v3110_v54 = vadd.f32 %v13865_v34, %v2858_v6  ;;  %v2288_v20 = vadd.f32 %v13898_v28, %v13897_v60  ;;  %v3347_v29 = vmul.f32 0.25, %v3319_v40  ;;  %v3112_v36 = vadd.f32 %v13865_v34, %v2860_v42  ;;  %v13901_v40 = vld [vmem:[#allocation124_spill] sm:$0xff]  ;;  %v11747_v34 = vpop.permute.xlu1 %1527 }
 0x2d5   : > { %v3218_v5 = vmax.f32 %v3106_v58, 0.0  ;;  %v2290_v33 = vadd.f32 %v13899_v44, %v2010_v53  ;;  %v3220_v23 = vmax.f32 %v3108_v27, 0.0  ;;  %v2292_v19 = vadd.f32 %v2180_v52, %v2012_v31 }
 0x2d6   : > { %v3222_v12 = vmax.f32 %v3110_v54, 0.0  ;;  %v2458_v61 = vmul.f32 %v13882_v35, %v13867_v11  ;;  %v3375_v22 = vpack.c.bf16 %v3347_v29, %v3347_v29  ;;  %v3224_v43 = vmax.f32 %v3112_v36, 0.0  ;;  %v13902_v36 = vld [vmem:[#allocation74_spill] sm:$0xff] }
 0x2d7   : > { %v2460_v6 = vmul.f32 %v13883_v41, %v13867_v11  ;;  %v2566_v37 = vadd.f32 %v13900_v32, %v2286_v8  ;;  %v3264_v60 = vadd.f32 %v3220_v23, %v3218_v5  ;;  %v2568_v28 = vadd.f32 %v13901_v40, %v2288_v20  ;;  %v13903_v23 = vld [vmem:[#allocation94_spill] sm:$0xff] }
 0x2d8   : > { %v2570_v42 = vadd.f32 %v2458_v61, %v2290_v33  ;;  %v2734_v58 = vmul.f32 %v11695_v13, %v13870_v63  ;;  %5622 = vmatprep.mubr.msk.bf16.mxu0 %vm3755_vm2, %v3375_v22  ;;  %v2736_v35 = vmul.f32 %v11702_v62, %v13870_v63  ;;  %v2738_v11 = vmul.f32 %v11709_v38, %v13870_v63  ;;  %v13905_v22 = vld [vmem:[#allocation75_spill] sm:$0xff]  ;;  %v5979_v38 = vld [vmem:[%s6372_s13 + $0x428] sm:$0xff]   ;;  %v13941_v13 = vld [vmem:[#allocation24_spill] sm:$0xff] }
 0x2d9   : > { %v2572_v53 = vadd.f32 %v2460_v6, %v2292_v19  ;;  %v2740_v41 = vmul.f32 %v11717_v49, %v13870_v63  ;;  %v3292_v52 = vadd.f32 %v3264_v60, %v3222_v12  ;;  %v1078_v27 = vmul.f32 %v11472_v3, %v11684_v46  ;;  %v13904_v12 = vld [vmem:[#allocation29_spill] sm:$0xff] }
 0x2da   : > { %v2846_v31 = vadd.f32 %v2734_v58, %v2566_v37  ;;  %v1079_v54 = vmul.f32 %v11478_v48, %v11684_v46  ;;  %v2848_v8 = vadd.f32 %v2736_v35, %v2568_v28  ;;  %v2850_v20 = vadd.f32 %v2738_v11, %v2570_v42  ;;  %v13906_v37 = vld [vmem:[#allocation27_spill] sm:$0xff]  ;;  %v11776_v28 = vpop.permute.xlu1 %1531  ;;  %v1252_v11 = vpop.permute.xlu0 %1251 }
 0x2db   : > { %v2852_v29 = vadd.f32 %v2740_v41, %v2572_v53  ;;  %v1080_v5 = vmul.f32 %v13902_v36, %v11684_v46  ;;  %v3320_v44 = vadd.f32 %v3292_v52, %v3224_v43  ;;  %v1081_v63 = vmul.f32 %v13903_v23, %v11684_v46 }
 0x2dc   : > { %v3098_v33 = vadd.f32 %v13878_v10, %v2846_v31  ;;  %v1082_v19 = vmul.f32 %v13904_v12, %v11684_v46  ;;  %v3100_v3 = vadd.f32 %v13878_v10, %v2848_v8  ;;  %v3102_v48 = vadd.f32 %v13878_v10, %v2850_v20  ;;  %v13912_v12 = vld [vmem:[#allocation13_spill] sm:$0xff] }
 0x2dd   : > { %v3104_v61 = vadd.f32 %v13878_v10, %v2852_v29  ;;  %v1083_v6 = vmul.f32 %v13905_v22, %v11684_v46  ;;  %v3348_v32 = vmul.f32 0.25, %v3320_v44  ;;  %v1084_v60 = vmul.f32 %v13906_v37, %v11684_v46  ;;  %v5966_v10 = vld [vmem:[%s6372_s13 + $0x4b0] sm:$0xff]  }
 0x2de   : > { %v3210_v43 = vmax.f32 %v3098_v33, 0.0  ;;  %v1085_v40 = vmul.f32 %v11515_v50, %v11684_v46  ;;  %v3212_v42 = vmax.f32 %v3100_v3, 0.0  ;;  %v3214_v58 = vmax.f32 %v3102_v48, 0.0  ;;  %v13908_v44 = vld [vmem:[#allocation30_spill] sm:$0xff]  ;;  %v11801_v22 = vpop.permute.xlu1 %1811 }
 0x2df   : > { %v3216_v53 = vmax.f32 %v3104_v61, 0.0  ;;  %v1190_v35 = vadd.f32 %v1078_v27, %v11545_v47  ;;  %v3376_v41 = vpack.c.bf16 %v3348_v32, %v3348_v32  ;;  %v1191_v52 = vadd.f32 %v1079_v54, %v11548_v25  ;;  %v13907_v27 = vld [vmem:[#allocation23_spill] sm:$0xff]  ;;  %v13909_v25 = vld [vmem:[#allocation58_spill] sm:$0xff] }
 0x2e0   : > { %v1192_v31 = vadd.f32 %v1080_v5, %v11551_v16  ;;  %v1193_v8 = vadd.f32 %v1081_v63, %v11554_v55  ;;  %v3262_v20 = vadd.f32 %v3212_v42, %v3210_v43  ;;  %v1194_v50 = vadd.f32 %v1082_v19, %v11557_v4  ;;  %v13910_v5 = vld [vmem:[#allocation106_spill] sm:$0xff]  ;;  %v13911_v55 = vld [vmem:[#allocation9_spill] sm:$0xff] }
 0x2e1   : > { %v1195_v46 = vadd.f32 %v1083_v6, %v11560_v21  ;;  %v1196_v29 = vadd.f32 %v1084_v60, %v11563_v0  ;;  %5020 = vmatmul.mubr.bf16.vlgmr.msra.gmra.mxu1 %v3376_v41  ;;  %v1197_v47 = vadd.f32 %v1085_v40, %v11566_v7  ;;  %v1358_v36 = vmul.f32 %v13907_v27, %v1252_v11  ;;  %v5968_v21 = vld [vmem:[%s6372_s13 + $0x4a8] sm:$0xff]   ;;  %v13913_v19 = vld [vmem:[#allocation110_spill] sm:$0xff] }
 0x2e2   : > { %v1359_v33 = vmul.f32 %v13908_v44, %v1252_v11  ;;  %v1360_v54 = vmul.f32 %v13909_v25, %v1252_v11  ;;  %v3290_v16 = vadd.f32 %v3262_v20, %v3214_v58  ;;  %v1361_v23 = vmul.f32 %v13910_v5, %v1252_v11  ;;  %5210 = vmatpush1.bf16.msra.mxu1 %v5966_v10  ;;  %v13914_v3 = vld [vmem:[#allocation14_spill] sm:$0xff]  ;;  %v5967_v20 = vld [vmem:[%s6372_s13 + $0x458] sm:$0xff]  }
 0x2e3   : > { %v1362_v63 = vmul.f32 %v13911_v55, %v1252_v11  ;;  %v1363_v4 = vmul.f32 %v13912_v12, %v1252_v11  ;;  %v1364_v0 = vmul.f32 %v13913_v19, %v1252_v11  ;;  %v1365_v48 = vmul.f32 %v13914_v3, %v1252_v11  ;;  %5211 = vmatprep.subr.bf16.mxu1 %v12850_v15 }
 0x2e4   : > { %v11796_v7 = vadd.f32 %v1358_v36, %v1190_v35  ;;  %v11798_v61 = vadd.f32 %v1359_v33, %v1191_v52  ;;  %v3318_v6 = vadd.f32 %v3290_v16, %v3216_v53  ;;  %v11803_v32 = vadd.f32 %v1360_v54, %v1192_v31 }
 0x2e5   : > { %v11805_v43 = vadd.f32 %v1361_v23, %v1193_v8  ;;  %v11807_v37 = vadd.f32 %v1362_v63, %v1194_v50  ;;  %v11809_v60 = vadd.f32 %v1363_v4, %v1195_v46  ;;  %v11811_v40 = vadd.f32 %v1364_v0, %v1196_v29  ;;  %v5969_v4 = vld [vmem:[%s6372_s13 + $0x450] sm:$0xff]   ;;  %v6237_v0 = vld [vmem:[%s12266_s0 + $0x138] sm:$0xff] }
 0x2e6   : > { %v11813_v42 = vadd.f32 %v1365_v48, %v1197_v47  ;;  %v1350_v58 = vmul.f32 %v13907_v27, %v11727_v14  ;;  %v3346_v35 = vmul.f32 0.25, %v3318_v6  ;;  %v1351_v53 = vmul.f32 %v13908_v44, %v11727_v14  ;;  %5212 = vmatpush1.bf16.msra.mxu1 %v5968_v21  ;;  %v6236_v21 = vld [vmem:[%s12266_s0 + $0x130] sm:$0xff] }
 0x2e7   : > { %v1352_v11 = vmul.f32 %v13909_v25, %v11727_v14  ;;  %v1353_v10 = vmul.f32 %v13910_v5, %v11727_v14  ;;  %v1354_v41 = vmul.f32 %v13911_v55, %v11727_v14  ;;  %v1355_v52 = vmul.f32 %v13912_v12, %v11727_v14  ;;  %5213 = vmatprep.subr.bf16.mxu1 %v12850_v15  ;;  %v11843_v25 = vpop.permute.xlu1 %2087  ;;  %v6234_v5 = vld [vmem:[%s12266_s0 + $0x120] sm:$0xff]  ;;  %v6235_v55 = vld [vmem:[%s12266_s0 + $0x128] sm:$0xff]  ;;  %v1808_v12 = vpop.permute.xlu0 %1807 }
 0x2e8   : > { %v1356_v31 = vmul.f32 %v13913_v19, %v11727_v14  ;;  %v1357_v8 = vmul.f32 %v13914_v3, %v11727_v14  ;;  %v3374_v50 = vpack.c.bf16 %v3346_v35, %v3346_v35  ;;  %v1462_v46 = vadd.f32 %v1350_v58, %v11518_v9  ;;  %v5970_v14 = vld [vmem:[%s6372_s13 + $0x4a0] sm:$0xff]   ;;  %v13916_v9 = vld [vmem:[#allocation115_spill] sm:$0xff] }
 0x2e9   : > { %v1463_v29 = vadd.f32 %v1351_v53, %v11520_v51  ;;  %v1464_v47 = vadd.f32 %v1352_v11, %v11522_v17  ;;  %v1465_v27 = vadd.f32 %v1353_v10, %v11524_v56  ;;  %v1466_v36 = vadd.f32 %v1354_v41, %v11526_v24  ;;  %v6230_v24 = vld [vmem:[%s12266_s0 + $0x100] sm:$0xff]  ;;  %v5972_v10 = vld [vmem:[%s6372_s13 + $0x498] sm:$0xff]  }
 0x2ea   : > { %v1467_v44 = vadd.f32 %v1355_v52, %v11528_v45  ;;  %v11840_v33 = vadd.f32 %v1356_v31, %v11530_v59  ;;  %4909 = vmatmul.mubr.bf16.vlgmr.msra.gmra.mxu0 %v3374_v50  ;;  %v11846_v54 = vadd.f32 %v1357_v8, %v11533_v57  ;;  %v11850_v51 = vadd.f32 %v13916_v9, %v11537_v18  ;;  %v6231_v59 = vld [vmem:[%s12266_s0 + $0x108] sm:$0xff]  ;;  %v6232_v57 = vld [vmem:[%s12266_s0 + $0x110] sm:$0xff]  ;;  %v6233_v18 = vld [vmem:[%s12266_s0 + $0x118] sm:$0xff] }
 0x2eb   : > { %v1630_v45 = vmul.f32 %v6230_v24, %v11747_v34  ;;  %v1631_v17 = vmul.f32 %v6231_v59, %v11747_v34  ;;  %v1632_v56 = vmul.f32 %v6232_v57, %v11747_v34  ;;  %v1633_v16 = vmul.f32 %v6233_v18, %v11747_v34  ;;  %5099 = vmatpush1.bf16.msra.mxu0 %v5967_v20  ;;  %v6238_v41 = vld [vmem:[%s12266_s0 + $0x140] sm:$0xff]  ;;  %v6240_v8 = vld [vmem:[%s12266_s0 + $0x150] sm:$0xff]  ;;  %v6241_v50 = vld [vmem:[%s12266_s0 + $0x158] sm:$0xff] }
 0x2ec   : > { %13915 = vst [vmem:[#allocation85_spill] sm:$0xff] %v11840_v33  ;;  %13917 = vst [vmem:[#allocation52_spill] sm:$0xff] %v11850_v51  ;;  %v1634_v23 = vmul.f32 %v6234_v5, %v11747_v34  ;;  %v1635_v63 = vmul.f32 %v6235_v55, %v11747_v34  ;;  %v11881_v19 = vmul.f32 %v6236_v21, %v11747_v34  ;;  %5100 = vmatprep.subr.bf16.mxu0 %v12850_v15  ;;  %v6243_v9 = vld [vmem:[%s12266_s0 + $0x178] sm:$0xff] }
 0x2ed   : > { %v11887_v3 = vmul.f32 %v6237_v0, %v11747_v34  ;;  %v1742_v48 = vadd.f32 %v1630_v45, %v1462_v46  ;;  %v1743_v6 = vadd.f32 %v1631_v17, %v1463_v29  ;;  %v1744_v58 = vadd.f32 %v1632_v56, %v1464_v47  ;;  %5214 = vmatpush1.bf16.msra.mxu1 %v5970_v14  ;;  %v6239_v34 = vld [vmem:[%s12266_s0 + $0x148] sm:$0xff]  ;;  %v13920_v29 = vld [vmem:[#allocation120_spill] sm:$0xff]  ;;  %v11925_v56 = vpop.permute.xlu1 %2367 }
 0x2ee   : > { %13918 = vst [vmem:[#allocation111_spill] sm:$0xff] %v11881_v19  ;;  %v1745_v35 = vadd.f32 %v1633_v16, %v1465_v27  ;;  %v11890_v53 = vadd.f32 %v1634_v23, %v1466_v36  ;;  %v11892_v11 = vadd.f32 %v1635_v63, %v1467_v44  ;;  %v1910_v52 = vmul.f32 %v6238_v41, %v1808_v12  ;;  %v6242_v27 = vld [vmem:[%s12266_s0 + $0x168] sm:$0xff] }
 0x2ef   : > { %v1911_v31 = vmul.f32 %v6239_v34, %v1808_v12  ;;  %v1912_v20 = vmul.f32 %v6240_v8, %v1808_v12  ;;  %v1913_v46 = vmul.f32 %v6241_v50, %v1808_v12  ;;  %5215 = vmatprep.subr.bf16.mxu1 %v12850_v15  ;;  %v11909_v47 = vmul.f32 %v13920_v29, %v1808_v12  ;;  %v13922_v44 = vld [vmem:[#allocation73_spill] sm:$0xff] }
 0x2f0   : > { %13919 = vst [vmem:[#allocation102_spill] sm:$0xff] %v11890_v53  ;;  %v11914_v36 = vmul.f32 %v6242_v27, %v1808_v12  ;;  %v11917_v14 = vmul.f32 %v13922_v44, %v1808_v12  ;;  %v11922_v45 = vmul.f32 %v6243_v9, %v1808_v12  ;;  %5101 = vmatpush1.bf16.msra.mxu0 %v5969_v4  ;;  %v5971_v17 = vld [vmem:[%s6372_s13 + $0x448] sm:$0xff]  }
 0x2f1   : > { %13921 = vst [vmem:[#allocation34_spill] sm:$0xff] %v11909_v47  ;;  %v11927_v16 = vadd.f32 %v1910_v52, %v1742_v48  ;;  %v11929_v23 = vadd.f32 %v1911_v31, %v1743_v6  ;;  %v11931_v63 = vadd.f32 %v1912_v20, %v1744_v58  ;;  %v11933_v51 = vadd.f32 %v1913_v46, %v1745_v35  ;;  %v5974_v48 = vld [vmem:[%s6372_s13 + $0x490] sm:$0xff]   ;;  %v13926_v46 = vld [vmem:[#allocation109_spill] sm:$0xff] }
 0x2f2   : > { %13923 = vst [vmem:[#allocation41_spill] sm:$0xff] %v11917_v14  ;;  %5102 = vmatprep.subr.bf16.mxu0 %v12850_v15  ;;  %v1638_v14 = vmul.f32 %v6230_v24, %v11776_v28  ;;  %v1639_v12 = vmul.f32 %v6231_v59, %v11776_v28  ;;  %v1640_v4 = vmul.f32 %v6232_v57, %v11776_v28 }
 0x2f3   : > { %13924 = vst [vmem:[#allocation37_spill] sm:$0xff] %v11927_v16  ;;  %13925 = vst [vmem:[#allocation25_spill] sm:$0xff] %v11931_v63  ;;  %v1641_v47 = vmul.f32 %v6233_v18, %v11776_v28  ;;  %5216 = vmatpush1.bf16.msra.mxu1 %v5972_v10  ;;  %v1642_v6 = vmul.f32 %v6234_v5, %v11776_v28  ;;  %v1643_v58 = vmul.f32 %v6235_v55, %v11776_v28  ;;  %v5973_v5 = vld [vmem:[%s6372_s13 + $0x440] sm:$0xff]   ;;  %v11961_v10 = vpop.permute.xlu0 %2091 }
 0x2f4   : > { %v11944_v35 = vmul.f32 %v6236_v21, %v11776_v28  ;;  %v11947_v52 = vmul.f32 %v6237_v0, %v11776_v28  ;;  %5217 = vmatprep.subr.bf16.mxu1 %v12850_v15  ;;  %v1750_v24 = vadd.f32 %v1638_v14, %v11796_v7  ;;  %v1751_v59 = vadd.f32 %v1639_v12, %v11798_v61  ;;  %v13930_v12 = vld [vmem:[#allocation76_spill] sm:$0xff] }
 0x2f5   : > { %v1752_v57 = vadd.f32 %v1640_v4, %v11803_v32  ;;  %v1753_v18 = vadd.f32 %v1641_v47, %v11805_v43  ;;  %5103 = vmatpush1.bf16.msra.mxu0 %v5971_v17  ;;  %v11956_v55 = vadd.f32 %v1642_v6, %v11807_v37  ;;  %v1755_v21 = vadd.f32 %v1643_v58, %v11809_v60  ;;  %v11971_v37 = vpop.permute.xlu1 %2371  ;;  %v5976_v60 = vld [vmem:[%s6372_s13 + $0x488] sm:$0xff]   ;;  %v13927_v47 = vld [vmem:[#allocation35_spill] sm:$0xff] }
 0x2f6   : > { %v1918_v28 = vmul.f32 %v6238_v41, %v11801_v22  ;;  %v1919_v0 = vmul.f32 %v6239_v34, %v11801_v22  ;;  %5104 = vmatprep.subr.bf16.mxu0 %v12850_v15  ;;  %v1920_v7 = vmul.f32 %v6240_v8, %v11801_v22  ;;  %v1921_v61 = vmul.f32 %v6241_v50, %v11801_v22  ;;  %v12005_v58 = vld [vmem:[%s6372_s13 + $0x4c8] sm:$0x1f]  }
 0x2f7   : > { %v11968_v32 = vmul.f32 %v13920_v29, %v11801_v22  ;;  %v1923_v43 = vmul.f32 %v6242_v27, %v11801_v22  ;;  %5218 = vmatpush1.bf16.msra.mxu1 %v5974_v48  ;;  %v11976_v41 = vmul.f32 %v13922_v44, %v11801_v22  ;;  %v1925_v34 = vmul.f32 %v6243_v9, %v11801_v22  ;;  %v5975_v44 = vld [vmem:[%s6372_s13 + $0x438] sm:$0xff]   ;;  %v13928_v22 = vld [vmem:[#allocation84_spill] sm:$0xff]  ;;  %v13929_v9 = vld [vmem:[#allocation54_spill] sm:$0xff] }
 0x2f8   : > { %v11979_v31 = vadd.f32 %v1918_v28, %v1750_v24  ;;  %v2031_v8 = vadd.f32 %v1919_v0, %v1751_v59  ;;  %5219 = vmatprep.subr.bf16.mxu1 %v12850_v15  ;;  %v11982_v20 = vadd.f32 %v1920_v7, %v1752_v57  ;;  %v2033_v50 = vadd.f32 %v1921_v61, %v1753_v18  ;;  %v13931_v48 = vld [vmem:[#allocation46_spill] sm:$0xff]  ;;  %v5978_v28 = vld [vmem:[%s6372_s13 + $0x480] sm:$0xff]  }
 0x2f9   : > { %v11986_v29 = vmul.f32 %v13926_v46, %v11961_v10  ;;  %v2199_v27 = vmul.f32 %v13927_v47, %v11961_v10  ;;  %5105 = vmatpush1.bf16.msra.mxu0 %v5973_v5  ;;  %v11993_v14 = vmul.f32 %v13928_v22, %v11961_v10  ;;  %v2201_v17 = vmul.f32 %v13929_v9, %v11961_v10  ;;  %v12008_v24 = vld [vmem:[%s6372_s13 + $0x470] sm:$0x1f]   ;;  %v6244_v61 = vld [vmem:[%s12266_s0 + $0x1c0] sm:$0xff]  ;;  %v12063_v63 = vpop.permute.xlu1 %2651 }
 0x2fa   : > { %v11999_v4 = vmul.f32 %v13930_v12, %v11961_v10  ;;  %v2203_v6 = vmul.f32 %v13931_v48, %v11961_v10  ;;  %5106 = vmatprep.subr.bf16.mxu0 %v12850_v15  ;;  %v12012_v59 = vmul.f32 %v13926_v46, %v11843_v25  ;;  %v2191_v57 = vmul.f32 %v13927_v47, %v11843_v25 }
 0x2fb   : > { %v12018_v18 = vmul.f32 %v13928_v22, %v11843_v25  ;;  %v12022_v5 = vmul.f32 %v13929_v9, %v11843_v25  ;;  %5220 = vmatpush1.bf16.msra.mxu1 %v5976_v60  ;;  %v12027_v0 = vmul.f32 %v13930_v12, %v11843_v25  ;;  %v12031_v7 = vmul.f32 %v13931_v48, %v11843_v25  ;;  %v6245_v60 = vld [vmem:[%s12266_s0 + $0x1c8] sm:$0xff]  ;;  %v6246_v22 = vld [vmem:[%s12266_s0 + $0x1d0] sm:$0xff]  ;;  %v6247_v12 = vld [vmem:[%s12266_s0 + $0x1d8] sm:$0xff] }
 0x2fc   : > { %13932 = vst [vmem:[#allocation128_spill] sm:$0xff] %v12012_v59  ;;  %v12037_v46 = vmul.f32 %v6244_v61, %v11925_v56  ;;  %v12043_v47 = vmul.f32 %v6245_v60, %v11925_v56  ;;  %5221 = vmatprep.subr.bf16.mxu1 %v12850_v15  ;;  %v12050_v9 = vmul.f32 %v6246_v22, %v11925_v56  ;;  %v12065_v59 = vpop.permute.xlu0 %2647 }
 0x2fd   : > { %13933 = vst [vmem:[#allocation104_spill] sm:$0xff] %v12018_v18  ;;  %13934 = vst [vmem:[#allocation72_spill] sm:$0xff] %v12027_v0  ;;  %v12056_v48 = vmul.f32 %v6247_v12, %v11925_v56  ;;  %5107 = vmatpush1.bf16.msra.mxu0 %v5975_v44  ;;  %v2479_v0 = vmul.f32 %v6245_v60, %v11971_v37  ;;  %v5977_v18 = vld [vmem:[%s6372_s13 + $0x430] sm:$0xff]   ;;  %v2481_v16 = vmul.f32 %v6247_v12, %v11971_v37  ;;  %v5980_v60 = vld [vmem:[%s6372_s13 + $0x478] sm:$0xff]  }
 0x2fe   : > { %13935 = vst [vmem:[#allocation39_spill] sm:$0xff] %v12037_v46  ;;  %13936 = vst [vmem:[#allocation11_spill] sm:$0xff] %v12050_v9  ;;  %v12059_v46 = vmul.f32 %v6244_v61, %v11971_v37  ;;  %v12068_v9 = vmul.f32 %v6246_v22, %v11971_v37  ;;  %5108 = vmatprep.subr.bf16.mxu0 %v12850_v15  ;;  %v5207_v44 = vand.u32 %v12005_v58, %v13842_v1 }
 0x2ff   : > { %5222 = vmatpush1.bf16.msra.mxu1 %v5978_v28  ;;  %v1757_v53 = vadd.f32 %v11947_v52, %v11813_v42  ;;  %v2035_v19 = vadd.f32 %v1923_v43, %v1755_v21  ;;  %v2205_v22 = vmul.f32 %v11575_v2, %v11961_v10  ;;  %v2311_v33 = vadd.f32 %v2199_v27, %v2031_v8  ;;  %v13938_v28 = vld [vmem:[#allocation18_spill] sm:$0xff]  ;;  %v13939_v43 = vld [vmem:[#allocation100_spill] sm:$0xff] }
 0x300   : > { %13937 = vst [vmem:[#allocation95_spill] sm:$0xff] %v12068_v9  ;;  %5223 = vmatprep.subr.bf16.mxu1 %v12850_v15  ;;  %v2313_v12 = vadd.f32 %v2201_v17, %v2033_v50  ;;  %v2483_v49 = vmul.f32 %v11588_v26, %v11971_v37  ;;  %v2485_v58 = vmul.f32 %v11595_v30, %v11971_v37  ;;  %v12092_v50 = vpop.permute.xlu0 %3015  ;;  %v13940_v17 = vld [vmem:[#allocation77_spill] sm:$0xff] }
 0x301   : > { %v2759_v61 = vmul.f32 %v13938_v28, %v12063_v63  ;;  %5109 = vmatpush1.bf16.msra.mxu0 %v5977_v18  ;;  %v2037_v42 = vadd.f32 %v1925_v34, %v1757_v53  ;;  %v2315_v52 = vadd.f32 %v2203_v6, %v2035_v19  ;;  %v2591_v21 = vadd.f32 %v2479_v0, %v2311_v33  ;;  %v12100_v19 = vpop.f32.mrf.mxu1 }
 0x302   : > { %v2761_v8 = vmul.f32 %v13939_v43, %v12063_v63  ;;  %5110 = vmatprep.subr.bf16.mxu0 %v12850_v15  ;;  %v2593_v27 = vadd.f32 %v2481_v16, %v2313_v12  ;;  %v2763_v62 = vmul.f32 %v13940_v17, %v12063_v63  ;;  %v2765_v9 = vmul.f32 %v13941_v13, %v12063_v63 }
 0x303   : > { %v1749_v53 = vadd.f32 %v11887_v3, %v11846_v54  ;;  %5224 = vmatpush1.bf16.msra.mxu1 %v5980_v60  ;;  %v2317_v33 = vadd.f32 %v2205_v22, %v2037_v42  ;;  %v2595_v34 = vadd.f32 %v2483_v49, %v2315_v52  ;;  %v2871_v6 = vadd.f32 %v2759_v61, %v2591_v21  ;;  %v4579_v3 = vpop.f32.mrf.mxu1  ;;  %v5981_v60 = vld [vmem:[%s6372_s13 + $0x420] sm:$0xff]  }
 0x304   : > { %v2027_v18 = vadd.f32 %v11914_v36, %v11892_v11  ;;  %5235 = vmatprep.subr.bf16.mxu1 %v12850_v15  ;;  %v2873_v16 = vadd.f32 %v2761_v8, %v2593_v27  ;;  %v2197_v12 = vmul.f32 %v11575_v2, %v11843_v25  ;;  %v2303_v54 = vadd.f32 %v2191_v57, %v11929_v23  ;;  %v5985_v3 = vld [vmem:[%s6372_s13 + $0x468] sm:$0xff]  }
 0x305   : > { %v2029_v0 = vadd.f32 %v11922_v45, %v1749_v53  ;;  %5111 = vmatpush1.bf16.msra.mxu0 %v5979_v38  ;;  %v2597_v22 = vadd.f32 %v2485_v58, %v2317_v33  ;;  %v2875_v49 = vadd.f32 %v2763_v62, %v2595_v34  ;;  %v3123_v61 = vadd.f32 %v12092_v50, %v2871_v6  ;;  %v4580_v57 = vpop.f32.mrf.mxu1  ;;  %v5984_v38 = vld [vmem:[%s6372_s13 + $0x4c0] sm:$0xff]   ;;  %v12128_v53 = vpop.permute.xlu1 %3011  ;;  %v5986_v34 = vld [vmem:[%s6372_s13 + $0x4b8] sm:$0xff]  }
 0x306   : > { %v2305_v11 = vadd.f32 %v12022_v5, %v11933_v51  ;;  %5112 = vmatprep.subr.bf16.mxu0 %v12850_v15  ;;  %v3125_v36 = vadd.f32 %v12092_v50, %v2873_v16  ;;  %v2307_v45 = vadd.f32 %v12031_v7, %v2027_v18  ;;  %v2475_v23 = vmul.f32 %v11588_v26, %v11925_v56  ;;  %v6248_v57 = vld [vmem:[%s12266_s0 + $0x1e0] sm:$0xff] }
 0x307   : > { %v2309_v2 = vadd.f32 %v2197_v12, %v2029_v0  ;;  %5236 = vmatpush2.bf16.msra.mxu1 %v5207_v44  ;;  %v2877_v58 = vadd.f32 %v2765_v9, %v2597_v22  ;;  %v3127_v62 = vadd.f32 %v12092_v50, %v2875_v49  ;;  %v3235_v42 = vmax.f32 %v3123_v61, 0.0  ;;  %v4581_v26 = vpop.f32.mrf.mxu1  ;;  %v12142_v0 = vpop.f32.mrf.mxu0 }
 0x308   : > { %v2477_v51 = vmul.f32 %v11595_v30, %v11925_v56  ;;  %5237 = vmatprep.subr.bf16.mxu1 %v12850_v15  ;;  %v3237_v5 = vmax.f32 %v3125_v36, 0.0  ;;  %v2583_v52 = vadd.f32 %v12043_v47, %v2303_v54  ;;  %v2585_v7 = vadd.f32 %v12056_v48, %v2305_v11 }
 0x309   : > { %v2587_v21 = vadd.f32 %v2475_v23, %v2307_v45  ;;  %5113 = vmatpush1.bf16.msra.mxu0 %v5981_v60  ;;  %v3129_v44 = vadd.f32 %v12092_v50, %v2877_v58  ;;  %v3239_v9 = vmax.f32 %v3127_v62, 0.0  ;;  %v2751_v27 = vmul.f32 %v13938_v28, %v12065_v59  ;;  %v5987_v23 = vld [vmem:[%s6372_s13 + $0x460] sm:$0xff]   ;;  %v13943_v58 = vld [vmem:[#allocation95_spill] sm:$0xff] }
 0x30a   : > { %v2589_v8 = vadd.f32 %v2477_v51, %v2309_v2  ;;  %5124 = vmatprep.subr.bf16.mxu0 %v12850_v15  ;;  %v3269_v30 = vadd.f32 %v3237_v5, %v3235_v42  ;;  %v2753_v47 = vmul.f32 %v13939_v43, %v12065_v59  ;;  %v2755_v48 = vmul.f32 %v13940_v17, %v12065_v59 }
 0x30b   : > { %v2757_v33 = vmul.f32 %v13941_v13, %v12065_v59  ;;  %5238 = vmatpush2.bf16.msra.mxu1 %v5984_v38  ;;  %v3241_v6 = vmax.f32 %v3129_v44, 0.0  ;;  %v2863_v18 = vadd.f32 %v2751_v27, %v2583_v52  ;;  %v1756_v28 = vadd.f32 %v11944_v35, %v11811_v40  ;;  %v13944_v52 = vld [vmem:[#allocation8_spill] sm:$0xff] }
 0x30c   : > { %v2034_v16 = vadd.f32 %v11968_v32, %v11956_v55  ;;  %5239 = vmatprep.subr.bf16.mxu1 %v12850_v15  ;;  %v3297_v43 = vadd.f32 %v3269_v30, %v3239_v9  ;;  %v2865_v12 = vadd.f32 %v2753_v47, %v2585_v7  ;;  %v2867_v17 = vadd.f32 %v2755_v48, %v2587_v21  ;;  %v4468_v32 = vpop.f32.mrf.mxu0  ;;  %v13945_v21 = vld [vmem:[#allocation53_spill] sm:$0xff] }
 0x30d   : > { %v2869_v54 = vadd.f32 %v2757_v33, %v2589_v8  ;;  %v13942_v13 = vand.u32 %v12008_v24, %v13842_v1  ;;  %v3115_v60 = vadd.f32 %v12128_v53, %v2863_v18  ;;  %v2036_v40 = vadd.f32 %v11976_v41, %v1756_v28  ;;  %v13946_v8 = vld [vmem:[#allocation64_spill] sm:$0xff]  ;;  %v13948_v48 = vld [vmem:[#allocation85_spill] sm:$0xff]  ;;  %v13949_v33 = vld [vmem:[#allocation111_spill] sm:$0xff] }
 0x30e   : > { %v2204_v35 = vmul.f32 %v11671_v39, %v11961_v10  ;;  %v2310_v55 = vadd.f32 %v11986_v29, %v11979_v31  ;;  %v3325_v22 = vadd.f32 %v3297_v43, %v3241_v6  ;;  %v3117_v49 = vadd.f32 %v12128_v53, %v2865_v12  ;;  %v4469_v31 = vpop.f32.mrf.mxu0  ;;  %v13950_v28 = vld [vmem:[#allocation102_spill] sm:$0xff] }
 0x30f   : > { %5125 = vmatpush2.bf16.msra.mxu0 %v13942_v13  ;;  %v3119_v1 = vadd.f32 %v12128_v53, %v2867_v17  ;;  %v3121_v24 = vadd.f32 %v12128_v53, %v2869_v54  ;;  %5240 = vmatpush2.bf16.msra.mxu1 %v5986_v34  ;;  %v3227_v61 = vmax.f32 %v3115_v60, 0.0  ;;  %v2312_v41 = vadd.f32 %v11993_v14, %v11982_v20  ;;  %v6249_v20 = vld [vmem:[%s12266_s0 + $0x1f0] sm:$0xff]  ;;  %v13952_v13 = vld [vmem:[#allocation41_spill] sm:$0xff] }
 0x310   : > { %5126 = vmatprep.subr.bf16.mxu0 %v12850_v15  ;;  %v2314_v10 = vadd.f32 %v11999_v4, %v2034_v16  ;;  %v2316_v11 = vadd.f32 %v2204_v35, %v2036_v40  ;;  %v3353_v29 = vmul.f32 0.25, %v3325_v22  ;;  %v3229_v36 = vmax.f32 %v3117_v49, 0.0  ;;  %v4470_v42 = vpop.f32.mrf.mxu0  ;;  %v13951_v16 = vld [vmem:[#allocation34_spill] sm:$0xff]  ;;  %v13953_v35 = vld [vmem:[#allocation37_spill] sm:$0xff]  ;;  %v13956_v49 = vld [vmem:[#allocation104_spill] sm:$0xff] }
 0x311   : > { %v3231_v45 = vmax.f32 %v3119_v1, 0.0  ;;  %v3233_v2 = vmax.f32 %v3121_v24, 0.0  ;;  %v2482_v38 = vmul.f32 %v6248_v57, %v11971_v37  ;;  %v2484_v14 = vmul.f32 %v6249_v20, %v11971_v37  ;;  %v13955_v22 = vld [vmem:[#allocation25_spill] sm:$0xff] }
 0x312   : > { %v2590_v4 = vadd.f32 %v12059_v46, %v2310_v55  ;;  %v2592_v62 = vadd.f32 %v13943_v58, %v2312_v41  ;;  %v3381_v51 = vpack.c.bf16 %v3353_v29, %v3353_v29  ;;  %v3267_v5 = vadd.f32 %v3229_v36, %v3227_v61  ;;  %v13947_v46 = vld [vmem:[#allocation92_spill] sm:$0xff] }
 0x313   : > { %5127 = vmatpush2.bf16.msra.mxu0 %v5985_v3  ;;  %v2758_v7 = vmul.f32 %v13944_v52, %v12063_v63  ;;  %v2760_v26 = vmul.f32 %v13945_v21, %v12063_v63  ;;  %v2594_v44 = vadd.f32 %v2482_v38, %v2314_v10  ;;  %v2596_v9 = vadd.f32 %v2484_v14, %v2316_v11  ;;  %v13954_v55 = vld [vmem:[#allocation128_spill] sm:$0xff]  ;;  %v13959_v38 = vld [vmem:[#allocation11_spill] sm:$0xff] }
 0x314   : > { %5128 = vmatprep.subr.bf16.mxu0 %v12850_v15  ;;  %v2762_v37 = vmul.f32 %v13946_v8, %v12063_v63  ;;  %v2764_v27 = vmul.f32 %v13947_v46, %v12063_v63  ;;  %5658 = vmatprep.mubr.msk.bf16.mxu1 %vm3755_vm2, %v3381_v51  ;;  %v3295_v30 = vadd.f32 %v3267_v5, %v3231_v45 }
 0x315   : > { %v2870_v15 = vadd.f32 %v2758_v7, %v2590_v4  ;;  %v2872_v47 = vadd.f32 %v2760_v26, %v2592_v62  ;;  %v1748_v34 = vadd.f32 %v13949_v33, %v13948_v48  ;;  %v2026_v43 = vadd.f32 %v13951_v16, %v13950_v28  ;;  %v13960_v7 = vld [vmem:[#allocation96_spill] sm:$0xff] }
 0x316   : > { %v2874_v6 = vadd.f32 %v2762_v37, %v2594_v44  ;;  %v2876_v18 = vadd.f32 %v2764_v27, %v2596_v9  ;;  %v2196_v12 = vmul.f32 %v11671_v39, %v11843_v25  ;;  %v3323_v17 = vadd.f32 %v3295_v30, %v3233_v2  ;;  %v13957_v25 = vld [vmem:[#allocation72_spill] sm:$0xff]  ;;  %v13958_v2 = vld [vmem:[#allocation39_spill] sm:$0xff] }
 0x317   : > { %5129 = vmatpush2.bf16.msra.mxu0 %v5987_v23  ;;  %v3122_v63 = vadd.f32 %v12092_v50, %v2870_v15  ;;  %v3124_v54 = vadd.f32 %v12092_v50, %v2872_v47  ;;  %v2028_v3 = vadd.f32 %v13952_v13, %v1748_v34  ;;  %v2302_v32 = vadd.f32 %v13954_v55, %v13953_v35  ;;  %v13961_v26 = vld [vmem:[#allocation52_spill] sm:$0xff] }
 0x318   : > { %v3126_v60 = vadd.f32 %v12092_v50, %v2874_v6  ;;  %v3128_v40 = vadd.f32 %v12092_v50, %v2876_v18  ;;  %v2304_v1 = vadd.f32 %v13956_v49, %v13955_v22  ;;  %v3351_v24 = vmul.f32 0.25, %v3323_v17 }
 0x319   : > { %v3234_v61 = vmax.f32 %v3122_v63, 0.0  ;;  %v3236_v39 = vmax.f32 %v3124_v54, 0.0  ;;  %v2306_v41 = vadd.f32 %v13957_v25, %v2026_v43  ;;  %v2308_v31 = vadd.f32 %v2196_v12, %v2028_v3 }
 0x31a   : > { %v3238_v10 = vmax.f32 %v3126_v60, 0.0  ;;  %v3240_v11 = vmax.f32 %v3128_v40, 0.0  ;;  %v2474_v29 = vmul.f32 %v6248_v57, %v11925_v56  ;;  %v3379_v36 = vpack.c.bf16 %v3351_v24, %v3351_v24 }
 0x31b   : > { %v3268_v45 = vadd.f32 %v3236_v39, %v3234_v61  ;;  %v2476_v50 = vmul.f32 %v6249_v20, %v11925_v56  ;;  %v2582_v23 = vadd.f32 %v13958_v2, %v2302_v32  ;;  %v2584_v14 = vadd.f32 %v13959_v38, %v2304_v1 }
 0x31c   : > { %v2586_v4 = vadd.f32 %v2474_v29, %v2306_v41  ;;  %v2750_v58 = vmul.f32 %v13944_v52, %v12065_v59  ;;  %v2752_v62 = vmul.f32 %v13945_v21, %v12065_v59  ;;  %5646 = vmatprep.mubr.msk.bf16.mxu0 %vm3755_vm2, %v3379_v36  ;;  %v2754_v57 = vmul.f32 %v13946_v8, %v12065_v59 }
 0x31d   : > { %v3296_v42 = vadd.f32 %v3268_v45, %v3238_v10  ;;  %v2588_v51 = vadd.f32 %v2476_v50, %v2308_v31  ;;  %v2756_v56 = vmul.f32 %v13947_v46, %v12065_v59  ;;  %v5254_v44 = vadd.f32 %v13961_v26, %v13960_v7  ;;  %v5249_v45 = vld [vmem:[#allocation2] sm:$0xff] }
 0x31e   : > { %v2862_v20 = vadd.f32 %v2750_v58, %v2582_v23  ;;  %v2864_v5 = vadd.f32 %v2752_v62, %v2584_v14  ;;  %v2866_v52 = vadd.f32 %v2754_v57, %v2586_v4 }
 0x31f   : > { %v3324_v9 = vadd.f32 %v3296_v42, %v3240_v11  ;;  %v2868_v37 = vadd.f32 %v2756_v56, %v2588_v51  ;;  %v5255_v30 = vadd.f32 %v5254_v44, %v12142_v0 }
 0x320   : > { %v3114_v21 = vadd.f32 %v12128_v53, %v2862_v20  ;;  %v3116_v27 = vadd.f32 %v12128_v53, %v2864_v5  ;;  %v3118_v8 = vadd.f32 %v12128_v53, %v2866_v52 }
 0x321   : > { %v3352_v15 = vmul.f32 0.25, %v3324_v9  ;;  %v3120_v47 = vadd.f32 %v12128_v53, %v2868_v37  ;;  %v5256_v48 = vadd.f32 %v5255_v30, %v12100_v19 }
 0x322   : > { %v3226_v59 = vmax.f32 %v3114_v21, 0.0  ;;  %v3228_v46 = vmax.f32 %v3116_v27, 0.0  ;;  %v3230_v34 = vmax.f32 %v3118_v8, 0.0 }
 0x323   : > { %v3380_v33 = vpack.c.bf16 %v3352_v15, %v3352_v15  ;;  %v3232_v18 = vmax.f32 %v3120_v47, 0.0 }
 0x324   : > { %v3266_v6 = vadd.f32 %v3228_v46, %v3226_v59 }
 0x325   : > { %5242 = vmatmul.mubr.bf16.vlgmr.msra.gmra.mxu1 %v3380_v33 }
 0x326   : > { %v3294_v28 = vadd.f32 %v3266_v6, %v3230_v34 }
 0x328   : > { %v3322_v16 = vadd.f32 %v3294_v28, %v3232_v18 }
 0x32a   : > { %v3350_v43 = vmul.f32 0.25, %v3322_v16 }
 0x32c   : > { %v3378_v12 = vpack.c.bf16 %v3350_v43, %v3350_v43 }
 0x32e   : > { %5131 = vmatmul.mubr.bf16.vlgmr.msra.gmra.mxu0 %v3378_v12 }
 0x347   : > { %v4799_v0 = vpop.f32.mrf.mxu1 }
 0x349   : > { %v4801_v17 = vpop.f32.mrf.mxu1 }
 0x34b   : > { %v4802_v63 = vpop.f32.mrf.mxu1 }
 0x34d   : > { %v4803_v54 = vpop.f32.mrf.mxu1 }
 0x350   : > { %v4688_v13 = vpop.f32.mrf.mxu0 }
 0x351   : > { %v5257_v53 = vadd.f32 %v5256_v48, %v4688_v13 }
 0x352   : > { %v4690_v3 = vpop.f32.mrf.mxu0 }
 0x353   : > { %v5258_v60 = vadd.f32 %v5257_v53, %v4799_v0 }
 0x354   : > { %v4691_v40 = vpop.f32.mrf.mxu0 }
 0x356   : > { %v4692_v19 = vpop.f32.mrf.mxu0 }
 0x3a1   : > { %v5021_v35 = vpop.f32.mrf.mxu1 }
 0x3a3   : > { %v5023_v55 = vpop.f32.mrf.mxu1 }
 0x3a5   : > { %v5024_v32 = vpop.f32.mrf.mxu1 }
 0x3a7   : > { %v5025_v22 = vpop.f32.mrf.mxu1 }
 0x3aa   : > { %v4910_v49 = vpop.f32.mrf.mxu0 }
 0x3ab   : > { %v5259_v1 = vadd.f32 %v5258_v60, %v4910_v49 }
 0x3ac   : > { %v4912_v24 = vpop.f32.mrf.mxu0 }
 0x3ad   : > { %v5260_v61 = vadd.f32 %v5259_v1, %v5021_v35 }
 0x3ae   : > { %v4913_v39 = vpop.f32.mrf.mxu0 }
 0x3b0   : > { %v4914_v25 = vpop.f32.mrf.mxu0 }
 0x3e5   : > { %v5243_v41 = vpop.f32.mrf.mxu1 }
 0x3e7   : > { %v5245_v10 = vpop.f32.mrf.mxu1 }
 0x3e9   : > { %v5246_v11 = vpop.f32.mrf.mxu1 }
 0x3eb   : > { %v5247_v31 = vpop.f32.mrf.mxu1 }
 0x3ee   : > { %v5132_v29 = vpop.f32.mrf.mxu0 }
 0x3ef   : > { %v5261_v36 = vadd.f32 %v5260_v61, %v5132_v29 }
 0x3f0   : > { %v5134_v50 = vpop.f32.mrf.mxu0 }
 0x3f1   : > { %v5262_v2 = vadd.f32 %v5261_v36, %v5243_v41  ;;  %5268 = sbr.rel (%p5659_p5) target bundleno = 1246 (0x4de), region = 56 }
 0x3f2   : > { %v5135_v23 = vpop.f32.mrf.mxu0 }
 0x3f3   : > { %v5263_v38 = vadd.f32 %v5262_v2, %v5249_v45 }
 0x3f4   : > { %v5136_v14 = vpop.f32.mrf.mxu0 }
 0x3f5   : > { %5264 = vst [vmem:[#allocation2] sm:$0xff] %v5263_v38 }
 0x3f6   : > { %v6250_v4 = vld [vmem:[%s12271_s5 + $0x38] sm:$0xff]   ;;  %v6305_v58 = vmov 0.0   ;;  %v6251_v62 = vld [vmem:[%s12271_s5 + $0x30] sm:$0xff]   ;;  %vm6306_vm3 = vmmov 0   ;;  %v6252_v42 = vld [vmem:[%s12271_s5 + $0x28] sm:$0xff]   ;;  %vm5391_vm4 = vcmask 80896  }
 0x3f7   : > { %5683 = vmatprep.subr.bf16.mxu0 %v6305_v58  ;;  %5699 = vmatprep.mubr.msk.bf16.mxu0 %vm6306_vm3, %v6305_v58  ;;  %v6253_v51 = vld [vmem:[%s12271_s5 + $0x20] sm:$0xff]   ;;  %v6254_v57 = vld [vmem:[%s12271_s5 + $0x18] sm:$0xff]   ;;  %v6255_v56 = vld [vmem:[%s12271_s5 + $0x10] sm:$0xff]  }
 0x3f8   : > { %5684 = vmatpush3.bf16.msra.mxu0 %v6250_v4  ;;  %v5660_v5 = vld [vmem:[%s12270_s4] ss:$0 sm:$0xff]  ;;  %v6256_v26 = vld [vmem:[%s12271_s5 + $0x8] sm:$0xff]  }
 0x3f9   : > { %5685 = vmatprep.subr.bf16.mxu0 %v6305_v58  ;;  %v6257_v9 = vld [vmem:[%s12271_s5] sm:$0xff]  }
 0x3fa   : > { %v5661_v37 = vld [vmem:[%s12272_s6] ss:$0 sm:$0xff] }
 0x3fc   : > { %5686 = vmatpush3.bf16.msra.mxu0 %v6251_v62  ;;  %v5269_v20 = vld [vmem:[#allocation2] sm:$0xff] }
 0x3fd   : > { %5687 = vmatprep.subr.bf16.mxu0 %v6305_v58  ;;  %v5277_v7 = vadd.f32 %v5660_v5, %v5269_v20 }
 0x3ff   : > { %v5278_v44 = vmax.f32 %v5277_v7, 0.0 }
 0x400   : > { %5688 = vmatpush3.bf16.msra.mxu0 %v6252_v42 }
 0x401   : > { %5689 = vmatprep.subr.bf16.mxu0 %v6305_v58  ;;  %v5279_v52 = vpack.c.bf16 %v5278_v44, %v5278_v44 }
 0x404   : > { %5690 = vmatpush3.bf16.msra.mxu0 %v6253_v51 }
 0x405   : > { %5691 = vmatprep.subr.bf16.mxu0 %v6305_v58 }
 0x408   : > { %5692 = vmatpush3.bf16.msra.mxu0 %v6254_v57 }
 0x409   : > { %5693 = vmatprep.subr.bf16.mxu0 %v6305_v58 }
 0x40c   : > { %5694 = vmatpush3.bf16.msra.mxu0 %v6255_v56 }
 0x40d   : > { %5695 = vmatprep.subr.bf16.mxu0 %v6305_v58 }
 0x410   : > { %5696 = vmatpush3.bf16.msra.mxu0 %v6256_v26 }
 0x411   : > { %5697 = vmatprep.subr.bf16.mxu0 %v6305_v58 }
 0x414   : > { %5698 = vmatpush3.bf16.msra.mxu0 %v6257_v9 }
 0x417   : > { %5700 = vmatmul.mubr.bf16.vlgmr.msra.gmra.mxu0 %v5279_v52 }
 0x4d7   : > { %v5385_v21 = vpop.f32.mrf.mxu0 }
 0x4d8   : > { %v5386_v27 = vadd.f32 %v5661_v37, %v5385_v21 }
 0x4d9   : > { %v5701_v30 = vpop.f32.mrf.mxu0 }
 0x4da   : > { %5392 = vst.msk [vmem:[#allocation3] sm:$0xff] %vm5391_vm4, %v5386_v27 }
 0x4db   : > { %v5388_v15 = vpop.f32.mrf.mxu0 }
 0x4dd   : > { %v5702_v8 = vpop.f32.mrf.mxu0 }
 0x4de PF: > { %p5708_p6 = scmp.eq.s32.totalorder %s6354_s25, 1  ;;  %s6307_s10 = smov [#allocation3]  }
 0x4df   : > { %s5400_s13 = sshll.u32 %s6307_s10, 4  ;;  %s5401_s13 = int_to_ptr.vmem [resolvable:$true] %s5400_s13 }
 0x4e0   : > { %s6258_s11 = scalar_lea.vmem %s5401_s13, 128  ;;  %p6265_p10 = scmp.lt.s32.totalorder %s5401_s13, %s5401_s13 }
 0x4e1   : > { %p6259_p7 = scmp.ne.s32.totalorder %s5401_s13, %s6258_s11  ;;  %p6266_p11 = scmp.lt.s32.totalorder %s6258_s11, %s6258_s11 }
 0x4e3   : > { %p6260_p8 = pnand %p6259_p7, %p5708_p6  ;;  %p6267_p12 = por %p6266_p11, %p6265_p10 }
 0x4e5   : > { %p6261_p9 = pneg %p6260_p8 }
 0x4e7   : > { %p6268_p13 = pnand %p6267_p12, %p6261_p9 }
 0x4e9   : > { %6271 = shalt.err (!%p6268_p13)
}
 0x4ea   : > { %5705 = dma.vmem_to_hbm [thread:$0]  (%p5708_p6), %s5401_s13, 128, %s12273_s7, [#allocation4]  }
 0x4eb   : > { %6287 = dma.done.wait (%p5708_p6), [#allocation4], 128  }
 0x4ec   : > { %6289 = vsyncadd (%p5708_p6), [#allocation4], 4294967168 }
 0x4ed PF: > { %s18_s24 = sadd.s32 1, %s6292_s24  }
 0x4ee   : > { %p15_p0 = scmp.ge.s32.totalorder %s18_s24, 4  }
 0x4f0   :  { %17 = sbr.rel (!%p15_p0) target bundleno = 1 (0x1), region = 89 }
 0x4f5   :  { %5413 = vsyncpa [#allocation4], 1 }
 0x4f6   :  { %5415 = vsyncpa [#allocation4 + $0x1], 1 }

</bundles_post_ra>
